<compile_context>
chip_gen: v5e
topology: v5e:2x2
jax: 0.10.0
libtpu: 0.0.40
codegen_flags: <defaults>
</compile_context>

<pallas_src>
import jax
import jax.numpy as jnp
from jax import lax
from jax.experimental import pallas as pl
from jax.experimental.pallas import tpu as pltpu

DIM = 32             # GIN hidden dim
NUM_FEAT_XD = 78     # atom feature dim
PROT_LEN = 1000      # protein sequence length (conv in_channels)
PROT_PAD = 1024      # padded contraction dim (multiple of 128 lanes)
EMB_DIM = 128        # embedding dim (conv "length")
VOCAB = 26           # num_features_xt + 1
VOCAB_PAD = 32       # padded vocab (extra rows are zero)
CONV_OUT = 32
KSIZE = 8
CONV_LEN = EMB_DIM - KSIZE + 1   # 121 (valid conv length)
BN_EPS = 1e-5


# ---------------------------------------------------------------------------
# Kernels
# ---------------------------------------------------------------------------
def gin_branch_kernel(af_ref, adj_ref, m_ref,
                      w1_0_ref, b1_0_ref, w2_0_ref, b2_0_ref, s_0_ref, t_0_ref,
                      w1s_ref, b1s_ref, w2s_ref, b2s_ref, ss_ref, ts_ref,
                      fcw_ref, fcb_ref, o_ref):
    # One batch element per grid step; all 5 GIN layers fused, activation stays
    # in VMEM/vregs between layers.
    x = af_ref[0]      # (N, 78)
    adj = adj_ref[0]   # (N, N)
    m = m_ref[0]       # (N, 1)

    def gin_layer(h, w1, b1, w2, b2, scale, shift):
        # DenseGINConv (eps=0): nn(adj @ h + h), node mask, outer ReLU,
        # then eval-mode BatchNorm1d folded into affine scale/shift.
        z = jnp.dot(adj, h, preferred_element_type=jnp.float32) + h
        z = jnp.maximum(jnp.dot(z, w1, preferred_element_type=jnp.float32) + b1, 0.0)
        z = jnp.dot(z, w2, preferred_element_type=jnp.float32) + b2
        z = z * m
        z = jnp.maximum(z, 0.0)
        return z * scale + shift

    x = gin_layer(x, w1_0_ref[...], b1_0_ref[...], w2_0_ref[...], b2_0_ref[...],
                  s_0_ref[...], t_0_ref[...])
    for i in range(4):  # layers 2..5 (packed weights, static unrolled loop)
        x = gin_layer(x, w1s_ref[i], b1s_ref[i], w2s_ref[i], b2s_ref[i],
                      ss_ref[i], ts_ref[i])

    # MaskedGlobalPooling(pooling='add') sums over ALL node slots (mask is
    # ignored for 'add' in the reference), then fc1_xd + ReLU.
    # TODO(synk): trailing Dropout(0.2) treated as identity (eval mode).
    s = jnp.sum(x, axis=0, keepdims=True)                                   # (1, 32)
    y = jnp.dot(s, fcw_ref[...], preferred_element_type=jnp.float32) + fcb_ref[...]
    o_ref[0] = jnp.maximum(y, 0.0)                                          # (1, 128)


def prot_conv_kernel(rf_ref, tab_ref, w_ref, b_ref, o_ref):
    # Embedding lookup fused in-kernel (one-hot matmul against the padded
    # 32x128 table), then Conv1d(in=1000->1024 padded, out=32, k=8) as 8
    # full-width matmuls + lane rolls; no unaligned lane slices.
    idx = rf_ref[0]                                                         # (1024, 1) i32
    col = lax.broadcasted_iota(jnp.int32, (PROT_PAD, VOCAB_PAD), 1)
    onehot = (col == idx).astype(jnp.float32)                               # (1024, 32)
    emb = jnp.dot(onehot, tab_ref[...],
                  preferred_element_type=jnp.float32)                       # (1024, 128)
    emb = emb.astype(jnp.bfloat16)

    acc = jnp.zeros((CONV_OUT, EMB_DIM), jnp.float32)
    for k in range(KSIZE):
        p = jnp.dot(w_ref[k], emb, preferred_element_type=jnp.float32)      # (32, 128)
        if k == 0:
            acc = acc + p
        else:
            # out[:, t] += p[:, t + k]  (wrap-around only touches t >= 121,
            # which is zeroed below)
            acc = acc + pltpu.roll(p, shift=EMB_DIM - k, axis=1)
    acc = acc + b_ref[...]                                                  # bias (32, 1)

    lane = lax.broadcasted_iota(jnp.int32, (CONV_OUT, EMB_DIM), 1)
    o_ref[0] = jnp.where(lane < CONV_LEN, acc, 0.0)                         # pad 121 -> 128


def head_kernel(afo_ref, rff_ref, wxt_ref, bxt_ref,
                w1a_ref, w1b_ref, b1_ref, w2_ref, b2_ref, w3_ref, b3_ref, o_ref):
    # fc1_xt (no activation; weight rows padded 3872 -> 4096 so the padded
    # conv columns contribute zero) + BindingAffinityLayer GCN head.
    # w1 (256x1024) is split into two 128-row halves => no concat needed.
    # TODO(synk): Dropout(0.2) layers treated as identity (eval mode).
    rf_out = jnp.dot(rff_ref[...].astype(jnp.bfloat16), wxt_ref[...],
                     preferred_element_type=jnp.float32) + bxt_ref[...]     # (B, 128)
    h = jnp.dot(afo_ref[...].astype(jnp.bfloat16), w1a_ref[...],
                preferred_element_type=jnp.float32)
    h = h + jnp.dot(rf_out.astype(jnp.bfloat16), w1b_ref[...],
                    preferred_element_type=jnp.float32)
    h = jnp.maximum(h + b1_ref[...], 0.0)                                   # (B, 1024)
    h = jnp.maximum(jnp.dot(h.astype(jnp.bfloat16), w2_ref[...],
                            preferred_element_type=jnp.float32) + b2_ref[...], 0.0)
    o_ref[...] = jnp.dot(h, w3_ref[...],
                         preferred_element_type=jnp.float32) + b3_ref[...]  # (B, 1)


# ---------------------------------------------------------------------------
# Wrappers (pallas_call plumbing)
# ---------------------------------------------------------------------------
def _const_spec(shape):
    nd = len(shape)
    return pl.BlockSpec(shape, lambda b, _nd=nd: (0,) * _nd)


def gin_branch(af, aa, mask3, g):
    B, N, Fin = af.shape
    out = pl.pallas_call(
        gin_branch_kernel,
        out_shape=jax.ShapeDtypeStruct((B, 1, 128), jnp.float32),
        grid=(B,),
        in_specs=[
            pl.BlockSpec((1, N, Fin), lambda b: (b, 0, 0)),
            pl.BlockSpec((1, N, N), lambda b: (b, 0, 0)),
            pl.BlockSpec((1, N, 1), lambda b: (b, 0, 0)),
            _const_spec(g["w1_0"].shape), _const_spec(g["b1_0"].shape),
            _const_spec(g["w2_0"].shape), _const_spec(g["b2_0"].shape),
            _const_spec(g["s_0"].shape), _const_spec(g["t_0"].shape),
            _const_spec(g["w1s"].shape), _const_spec(g["b1s"].shape),
            _const_spec(g["w2s"].shape), _const_spec(g["b2s"].shape),
            _const_spec(g["ss"].shape), _const_spec(g["ts"].shape),
            _const_spec(g["fcw"].shape), _const_spec(g["fcb"].shape),
        ],
        out_specs=pl.BlockSpec((1, 1, 128), lambda b: (b, 0, 0)),
        compiler_params=pltpu.CompilerParams(dimension_semantics=("parallel",)),
    )(af, aa, mask3,
      g["w1_0"], g["b1_0"], g["w2_0"], g["b2_0"], g["s_0"], g["t_0"],
      g["w1s"], g["b1s"], g["w2s"], g["b2s"], g["ss"], g["ts"],
      g["fcw"], g["fcb"])
    return out.reshape(B, 128)


def prot_conv(rf_pad, table, conv_w, conv_b):
    B = rf_pad.shape[0]
    return pl.pallas_call(
        prot_conv_kernel,
        out_shape=jax.ShapeDtypeStruct((B, CONV_OUT, EMB_DIM), jnp.float32),
        grid=(B,),
        in_specs=[
            pl.BlockSpec((1, PROT_PAD, 1), lambda b: (b, 0, 0)),
            _const_spec(table.shape),
            _const_spec(conv_w.shape),
            _const_spec(conv_b.shape),
        ],
        out_specs=pl.BlockSpec((1, CONV_OUT, EMB_DIM), lambda b: (b, 0, 0)),
        compiler_params=pltpu.CompilerParams(dimension_semantics=("parallel",)),
    )(rf_pad, table, conv_w, conv_b)


def head(af_out, rf_flat, h):
    B = af_out.shape[0]
    return pl.pallas_call(
        head_kernel,
        out_shape=jax.ShapeDtypeStruct((B, 1), jnp.float32),
    )(af_out, rf_flat, h["wxt"], h["bxt"], h["w1a"], h["w1b"], h["b1"],
      h["w2"], h["b2"], h["w3"], h["b3"])


# ---------------------------------------------------------------------------
# Parameters (deterministic, synthetic)
# ---------------------------------------------------------------------------
def _init_linear(key, fin, fout):
    kw, kb = jax.random.split(key)
    s = 1.0 / jnp.sqrt(jnp.float32(fin))
    w = jax.random.uniform(kw, (fin, fout), jnp.float32, -s, s)
    b = jax.random.uniform(kb, (1, fout), jnp.float32, -s, s)
    return w, b


def make_params(key):
    keys = jax.random.split(key, 16)
    params = {}

    # --- GIN branch: 5 x (Linear->ReLU->Linear) + eval BatchNorm folded ---
    fins = [NUM_FEAT_XD] + [DIM] * 4
    w1l, b1l, w2l, b2l, sl, tl = [], [], [], [], [], []
    for i, fin in enumerate(fins):
        k1, k2 = jax.random.split(keys[i])
        w1, b1 = _init_linear(k1, fin, DIM)
        w2, b2 = _init_linear(k2, DIM, DIM)
        gamma = jnp.ones((1, DIM), jnp.float32)
        beta = jnp.zeros((1, DIM), jnp.float32)
        mu = jnp.zeros((1, DIM), jnp.float32)
        var = jnp.ones((1, DIM), jnp.float32)
        scale = gamma * lax.rsqrt(var + BN_EPS)
        shift = beta - mu * scale
        w1l.append(w1); b1l.append(b1); w2l.append(w2); b2l.append(b2)
        sl.append(scale); tl.append(shift)
    fcw, fcb = _init_linear(keys[5], DIM, 128)   # fc1_xd
    params["gin"] = {
        "w1_0": w1l[0], "b1_0": b1l[0], "w2_0": w2l[0], "b2_0": b2l[0],
        "s_0": sl[0], "t_0": tl[0],
        "w1s": jnp.stack(w1l[1:]), "b1s": jnp.stack(b1l[1:]),
        "w2s": jnp.stack(w2l[1:]), "b2s": jnp.stack(b2l[1:]),
        "ss": jnp.stack(sl[1:]), "ts": jnp.stack(tl[1:]),
        "fcw": fcw, "fcb": fcb,
    }

    # --- Protein branch: Embedding(26,128) padded to 32 rows, Conv1d padded ---
    emb_tab = jax.random.normal(keys[6], (VOCAB, EMB_DIM), jnp.float32)
    params["emb_table"] = jnp.zeros((VOCAB_PAD, EMB_DIM), jnp.float32).at[:VOCAB].set(emb_tab)

    s = 1.0 / jnp.sqrt(jnp.float32(PROT_LEN * KSIZE))
    conv_w = jax.random.uniform(keys[7], (CONV_OUT, PROT_LEN, KSIZE), jnp.float32, -s, s)
    conv_w_t = jnp.transpose(conv_w, (2, 0, 1))                       # (K, out, in)
    conv_w_pad = jnp.zeros((KSIZE, CONV_OUT, PROT_PAD), jnp.float32)
    conv_w_pad = conv_w_pad.at[:, :, :PROT_LEN].set(conv_w_t)
    params["conv_w"] = conv_w_pad.astype(jnp.bfloat16)                # bf16 weight DMA
    params["conv_b"] = jax.random.uniform(keys[8], (CONV_OUT, 1), jnp.float32, -s, s)

    # --- Head: fc1_xt (rows remapped o*121+t -> o*128+t, padded rows zero) ---
    wxt, bxt = _init_linear(keys[9], CONV_OUT * CONV_LEN, 128)        # (3872,128)
    wxt_pad = jnp.zeros((CONV_OUT, EMB_DIM, 128), jnp.float32)
    wxt_pad = wxt_pad.at[:, :CONV_LEN, :].set(wxt.reshape(CONV_OUT, CONV_LEN, 128))
    head_p = {"wxt": wxt_pad.reshape(CONV_OUT * EMB_DIM, 128).astype(jnp.bfloat16),
              "bxt": bxt}
    # BindingAffinityLayer (GCN head): 256 -> 1024 -> 512 -> 1
    w1, b1 = _init_linear(keys[10], 256, 1024)
    w2, b2 = _init_linear(keys[11], 1024, 512)
    w3, b3 = _init_linear(keys[12], 512, 1)
    head_p["w1a"] = w1[:128].astype(jnp.bfloat16)    # multiplies af_out (com)
    head_p["w1b"] = w1[128:].astype(jnp.bfloat16)    # multiplies rf_out (pro)
    head_p["b1"] = b1
    head_p["w2"] = w2.astype(jnp.bfloat16)
    head_p["b2"] = b2
    head_p["w3"] = w3
    head_p["b3"] = b3
    params["head"] = head_p
    return params


# ---------------------------------------------------------------------------
# Forward pass (matches Net.forward(batch, model='GIN'))
# ---------------------------------------------------------------------------
def net_forward(params, af, aa, am, rf, bav):
    B, _, _ = af.shape
    mask3 = am[:, :, None].astype(jnp.float32)

    # GIN branch: 5x(GIN+ReLU+BN) + add-pool + fc1_xd + ReLU, one fused kernel
    af_out = gin_branch(af, aa, mask3, params["gin"])                  # (B, 128)

    # Protein branch: pad indices 1000 -> 1024 (padding index hits a zero
    # table row), embedding + conv fused in one kernel, time axis padded 121->128
    rf_idx = rf[..., 0]                                                # (B, 1000) i32
    rf_pad = jnp.pad(rf_idx, ((0, 0), (0, PROT_PAD - PROT_LEN)),
                     constant_values=VOCAB)[:, :, None]                # (B, 1024, 1)
    conv = prot_conv(rf_pad, params["emb_table"],
                     params["conv_w"], params["conv_b"])               # (B, 32, 128)
    rf_flat = conv.reshape(B, CONV_OUT * EMB_DIM)                      # (B, 4096)

    # fc1_xt + BindingAffinityLayer head, one fused kernel (no concat)
    bap = head(af_out, rf_flat, params["head"])                        # (B, 1)

    return [bap.reshape(-1), bav.reshape(-1), None, None, None]


# ---------------------------------------------------------------------------
if __name__ == "__main__":
    key = jax.random.PRNGKey(0)
    kp, ka, kadj, km, kr, kb = jax.random.split(key, 6)

    B, N = 2, 16
    params = make_params(kp)

    af = jax.random.normal(ka, (B, N, NUM_FEAT_XD), jnp.float32)
    adj_rnd = jax.random.bernoulli(kadj, 0.3, (B, N, N))
    aa = (adj_rnd | jnp.swapaxes(adj_rnd, 1, 2)).astype(jnp.float32)
    am = jnp.ones((B, N), jnp.float32).at[1, 12:].set(0.0)
    rf = jax.random.randint(kr, (B, PROT_LEN, 1), 0, VOCAB, dtype=jnp.int32)
    bav = jax.random.normal(kb, (B, 1), jnp.float32)

    fwd = jax.jit(net_forward)
    out = fwd(params, af, aa, am, rf, bav)
    bap = jax.block_until_ready(out[0])
    assert bap.shape == (B,)
    print("KERNEL_OK")
</pallas_src>

<mosaic_0001>
module attributes {stable_mosaic.version = 11 : i64} {
  func.func @head_kernel(%arg0: memref<2x128xf32, #tpu.memory_space<vmem>>, %arg1: memref<2x4096xf32, #tpu.memory_space<vmem>>, %arg2: memref<4096x128xbf16, #tpu.memory_space<vmem>>, %arg3: memref<1x128xf32, #tpu.memory_space<vmem>>, %arg4: memref<128x1024xbf16, #tpu.memory_space<vmem>>, %arg5: memref<128x1024xbf16, #tpu.memory_space<vmem>>, %arg6: memref<1x1024xf32, #tpu.memory_space<vmem>>, %arg7: memref<1024x512xbf16, #tpu.memory_space<vmem>>, %arg8: memref<1x512xf32, #tpu.memory_space<vmem>>, %arg9: memref<512x1xf32, #tpu.memory_space<vmem>>, %arg10: memref<1x1xf32, #tpu.memory_space<vmem>>, %arg11: memref<2x1xf32, #tpu.memory_space<vmem>>) attributes {dimension_semantics = [], scalar_prefetch = 0 : i64, scratch_operands = 0 : i64, tpu.core_type = #tpu.core_type<tc>} {
    %c0 = arith.constant 0 : index
    %c0_0 = arith.constant 0 : index
    %0 = vector.load %arg1[%c0, %c0_0] : memref<2x4096xf32, #tpu.memory_space<vmem>>, vector<2x4096xf32>
    %1 = arith.truncf %0 : vector<2x4096xf32> to vector<2x4096xbf16>
    %c0_1 = arith.constant 0 : index
    %c0_2 = arith.constant 0 : index
    %2 = vector.load %arg2[%c0_1, %c0_2] : memref<4096x128xbf16, #tpu.memory_space<vmem>>, vector<4096x128xbf16>
    %cst = arith.constant dense<0.000000e+00> : vector<2x128xf32>
    %3 = tpu.matmul %1, %2, %cst {dimension_numbers = #tpu.dot_dimension_numbers<[1], [0], [0], [1], [0, 0, 1, 1], [], []>} : vector<2x4096xbf16>, vector<4096x128xbf16>, vector<2x128xf32> -> vector<2x128xf32>
    %c0_3 = arith.constant 0 : index
    %c0_4 = arith.constant 0 : index
    %4 = vector.load %arg3[%c0_3, %c0_4] : memref<1x128xf32, #tpu.memory_space<vmem>>, vector<1x128xf32>
    %5 = vector.broadcast %4 : vector<1x128xf32> to vector<2x128xf32>
    %6 = arith.addf %3, %5 : vector<2x128xf32>
    %c0_5 = arith.constant 0 : index
    %c0_6 = arith.constant 0 : index
    %7 = vector.load %arg0[%c0_5, %c0_6] : memref<2x128xf32, #tpu.memory_space<vmem>>, vector<2x128xf32>
    %8 = arith.truncf %7 : vector<2x128xf32> to vector<2x128xbf16>
    %c0_7 = arith.constant 0 : index
    %c0_8 = arith.constant 0 : index
    %9 = vector.load %arg4[%c0_7, %c0_8] : memref<128x1024xbf16, #tpu.memory_space<vmem>>, vector<128x1024xbf16>
    %cst_9 = arith.constant dense<0.000000e+00> : vector<2x1024xf32>
    %10 = tpu.matmul %8, %9, %cst_9 {dimension_numbers = #tpu.dot_dimension_numbers<[1], [0], [0], [1], [0, 0, 1, 1], [], []>} : vector<2x128xbf16>, vector<128x1024xbf16>, vector<2x1024xf32> -> vector<2x1024xf32>
    %11 = arith.truncf %6 : vector<2x128xf32> to vector<2x128xbf16>
    %c0_10 = arith.constant 0 : index
    %c0_11 = arith.constant 0 : index
    %12 = vector.load %arg5[%c0_10, %c0_11] : memref<128x1024xbf16, #tpu.memory_space<vmem>>, vector<128x1024xbf16>
    %cst_12 = arith.constant dense<0.000000e+00> : vector<2x1024xf32>
    %13 = tpu.matmul %11, %12, %cst_12 {dimension_numbers = #tpu.dot_dimension_numbers<[1], [0], [0], [1], [0, 0, 1, 1], [], []>} : vector<2x128xbf16>, vector<128x1024xbf16>, vector<2x1024xf32> -> vector<2x1024xf32>
    %14 = arith.addf %10, %13 : vector<2x1024xf32>
    %c0_13 = arith.constant 0 : index
    %c0_14 = arith.constant 0 : index
    %15 = vector.load %arg6[%c0_13, %c0_14] : memref<1x1024xf32, #tpu.memory_space<vmem>>, vector<1x1024xf32>
    %16 = vector.broadcast %15 : vector<1x1024xf32> to vector<2x1024xf32>
    %17 = arith.addf %14, %16 : vector<2x1024xf32>
    %cst_15 = arith.constant 0.000000e+00 : f32
    %18 = vector.broadcast %cst_15 : f32 to vector<2x1024xf32>
    %19 = arith.maximumf %17, %18 : vector<2x1024xf32>
    %20 = arith.truncf %19 : vector<2x1024xf32> to vector<2x1024xbf16>
    %c0_16 = arith.constant 0 : index
    %c0_17 = arith.constant 0 : index
    %21 = vector.load %arg7[%c0_16, %c0_17] : memref<1024x512xbf16, #tpu.memory_space<vmem>>, vector<1024x512xbf16>
    %cst_18 = arith.constant dense<0.000000e+00> : vector<2x512xf32>
    %22 = tpu.matmul %20, %21, %cst_18 {dimension_numbers = #tpu.dot_dimension_numbers<[1], [0], [0], [1], [0, 0, 1, 1], [], []>} : vector<2x1024xbf16>, vector<1024x512xbf16>, vector<2x512xf32> -> vector<2x512xf32>
    %c0_19 = arith.constant 0 : index
    %c0_20 = arith.constant 0 : index
    %23 = vector.load %arg8[%c0_19, %c0_20] : memref<1x512xf32, #tpu.memory_space<vmem>>, vector<1x512xf32>
    %24 = vector.broadcast %23 : vector<1x512xf32> to vector<2x512xf32>
    %25 = arith.addf %22, %24 : vector<2x512xf32>
    %cst_21 = arith.constant 0.000000e+00 : f32
    %26 = vector.broadcast %cst_21 : f32 to vector<2x512xf32>
    %27 = arith.maximumf %25, %26 : vector<2x512xf32>
    %c0_22 = arith.constant 0 : index
    %c0_23 = arith.constant 0 : index
    %28 = vector.load %arg9[%c0_22, %c0_23] : memref<512x1xf32, #tpu.memory_space<vmem>>, vector<512x1xf32>
    %cst_24 = arith.constant dense<0.000000e+00> : vector<2x1xf32>
    %29 = tpu.matmul %27, %28, %cst_24 {dimension_numbers = #tpu.dot_dimension_numbers<[1], [0], [0], [1], [0, 0, 1, 1], [], []>} : vector<2x512xf32>, vector<512x1xf32>, vector<2x1xf32> -> vector<2x1xf32>
    %c0_25 = arith.constant 0 : index
    %c0_26 = arith.constant 0 : index
    %30 = vector.load %arg10[%c0_25, %c0_26] : memref<1x1xf32, #tpu.memory_space<vmem>>, vector<1x1xf32>
    %31 = vector.broadcast %30 : vector<1x1xf32> to vector<2x1xf32>
    %32 = arith.addf %29, %31 : vector<2x1xf32>
    %c0_27 = arith.constant 0 : index
    %c0_28 = arith.constant 0 : index
    %33 = vector.load %arg11[%c0_27, %c0_28] : memref<2x1xf32, #tpu.memory_space<vmem>>, vector<2x1xf32>
    tpu.vector_store %arg11[%c0_27, %c0_28], %32 {strides = array<i32>} : memref<2x1xf32, #tpu.memory_space<vmem>>, vector<2x1xf32>,
    return
  }
}

module attributes {stable_mosaic.version = 11 : i64} {
  func.func @gin_branch_kernel(%arg0: i32, %arg1: memref<1x16x78xf32, #tpu.memory_space<vmem>>, %arg2: memref<1x16x16xf32, #tpu.memory_space<vmem>>, %arg3: memref<1x16x1xf32, #tpu.memory_space<vmem>>, %arg4: memref<78x32xf32, #tpu.memory_space<vmem>>, %arg5: memref<1x32xf32, #tpu.memory_space<vmem>>, %arg6: memref<32x32xf32, #tpu.memory_space<vmem>>, %arg7: memref<1x32xf32, #tpu.memory_space<vmem>>, %arg8: memref<1x32xf32, #tpu.memory_space<vmem>>, %arg9: memref<1x32xf32, #tpu.memory_space<vmem>>, %arg10: memref<4x32x32xf32, #tpu.memory_space<vmem>>, %arg11: memref<4x1x32xf32, #tpu.memory_space<vmem>>, %arg12: memref<4x32x32xf32, #tpu.memory_space<vmem>>, %arg13: memref<4x1x32xf32, #tpu.memory_space<vmem>>, %arg14: memref<4x1x32xf32, #tpu.memory_space<vmem>>, %arg15: memref<4x1x32xf32, #tpu.memory_space<vmem>>, %arg16: memref<32x128xf32, #tpu.memory_space<vmem>>, %arg17: memref<1x128xf32, #tpu.memory_space<vmem>>, %arg18: memref<1x1x128xf32, #tpu.memory_space<vmem>>) attributes {dimension_semantics = [#tpu.dimension_semantics<parallel>], iteration_bounds = array<i64: 2>, scalar_prefetch = 0 : i64, scratch_operands = 0 : i64, tpu.core_type = #tpu.core_type<tc>, window_params = [{transform_indices = @transform_0, window_bounds = array<i64: 1, 16, 78>}, {transform_indices = @transform_1, window_bounds = array<i64: 1, 16, 16>}, {transform_indices = @transform_2, window_bounds = array<i64: 1, 16, 1>}, {pipeline_mode = #tpu.pipeline_mode<synchronous>, transform_indices = @transform_3, window_bounds = array<i64: 78, 32>}, {pipeline_mode = #tpu.pipeline_mode<synchronous>, transform_indices = @transform_4, window_bounds = array<i64: 1, 32>}, {pipeline_mode = #tpu.pipeline_mode<synchronous>, transform_indices = @transform_5, window_bounds = array<i64: 32, 32>}, {pipeline_mode = #tpu.pipeline_mode<synchronous>, transform_indices = @transform_6, window_bounds = array<i64: 1, 32>}, {pipeline_mode = #tpu.pipeline_mode<synchronous>, transform_indices = @transform_7, window_bounds = array<i64: 1, 32>}, {pipeline_mode = #tpu.pipeline_mode<synchronous>, transform_indices = @transform_8, window_bounds = array<i64: 1, 32>}, {pipeline_mode = #tpu.pipeline_mode<synchronous>, transform_indices = @transform_9, window_bounds = array<i64: 4, 32, 32>}, {pipeline_mode = #tpu.pipeline_mode<synchronous>, transform_indices = @transform_10, window_bounds = array<i64: 4, 1, 32>}, {pipeline_mode = #tpu.pipeline_mode<synchronous>, transform_indices = @transform_11, window_bounds = array<i64: 4, 32, 32>}, {pipeline_mode = #tpu.pipeline_mode<synchronous>, transform_indices = @transform_12, window_bounds = array<i64: 4, 1, 32>}, {pipeline_mode = #tpu.pipeline_mode<synchronous>, transform_indices = @transform_13, window_bounds = array<i64: 4, 1, 32>}, {pipeline_mode = #tpu.pipeline_mode<synchronous>, transform_indices = @transform_14, window_bounds = array<i64: 4, 1, 32>}, {pipeline_mode = #tpu.pipeline_mode<synchronous>, transform_indices = @transform_15, window_bounds = array<i64: 32, 128>}, {pipeline_mode = #tpu.pipeline_mode<synchronous>, transform_indices = @transform_16, window_bounds = array<i64: 1, 128>}, {transform_indices = @transform_17, window_bounds = array<i64: 1, 1, 128>}]} {
    %c0 = arith.constant 0 : index
    %c0_0 = arith.constant 0 : index
    %c0_1 = arith.constant 0 : index
    %0 = vector.load %arg1[%c0, %c0_0, %c0_1] : memref<1x16x78xf32, #tpu.memory_space<vmem>>, vector<1x16x78xf32>
    %1 = vector.shape_cast %0 : vector<1x16x78xf32> to vector<16x78xf32>
    %c0_2 = arith.constant 0 : index
    %c0_3 = arith.constant 0 : index
    %c0_4 = arith.constant 0 : index
    %2 = vector.load %arg2[%c0_2, %c0_3, %c0_4] : memref<1x16x16xf32, #tpu.memory_space<vmem>>, vector<1x16x16xf32>
    %3 = vector.shape_cast %2 : vector<1x16x16xf32> to vector<16x16xf32>
    %c0_5 = arith.constant 0 : index
    %c0_6 = arith.constant 0 : index
    %c0_7 = arith.constant 0 : index
    %4 = vector.load %arg3[%c0_5, %c0_6, %c0_7] : memref<1x16x1xf32, #tpu.memory_space<vmem>>, vector<1x16x1xf32>
    %5 = vector.shape_cast %4 : vector<1x16x1xf32> to vector<16x1xf32>
    %c0_8 = arith.constant 0 : index
    %c0_9 = arith.constant 0 : index
    %6 = vector.load %arg4[%c0_8, %c0_9] : memref<78x32xf32, #tpu.memory_space<vmem>>, vector<78x32xf32>
    %c0_10 = arith.constant 0 : index
    %c0_11 = arith.constant 0 : index
    %7 = vector.load %arg5[%c0_10, %c0_11] : memref<1x32xf32, #tpu.memory_space<vmem>>, vector<1x32xf32>
    %c0_12 = arith.constant 0 : index
    %c0_13 = arith.constant 0 : index
    %8 = vector.load %arg6[%c0_12, %c0_13] : memref<32x32xf32, #tpu.memory_space<vmem>>, vector<32x32xf32>
    %c0_14 = arith.constant 0 : index
    %c0_15 = arith.constant 0 : index
    %9 = vector.load %arg7[%c0_14, %c0_15] : memref<1x32xf32, #tpu.memory_space<vmem>>, vector<1x32xf32>
    %c0_16 = arith.constant 0 : index
    %c0_17 = arith.constant 0 : index
    %10 = vector.load %arg8[%c0_16, %c0_17] : memref<1x32xf32, #tpu.memory_space<vmem>>, vector<1x32xf32>
    %c0_18 = arith.constant 0 : index
    %c0_19 = arith.constant 0 : index
    %11 = vector.load %arg9[%c0_18, %c0_19] : memref<1x32xf32, #tpu.memory_space<vmem>>, vector<1x32xf32>
    %cst = arith.constant dense<0.000000e+00> : vector<16x78xf32>
    %12 = tpu.matmul %3, %1, %cst {dimension_numbers = #tpu.dot_dimension_numbers<[1], [0], [0], [1], [0, 0, 1, 1], [], []>} : vector<16x16xf32>, vector<16x78xf32>, vector<16x78xf32> -> vector<16x78xf32>
    %13 = arith.addf %12, %1 : vector<16x78xf32>
    %cst_20 = arith.constant dense<0.000000e+00> : vector<16x32xf32>
    %14 = tpu.matmul %13, %6, %cst_20 {dimension_numbers = #tpu.dot_dimension_numbers<[1], [0], [0], [1], [0, 0, 1, 1], [], []>} : vector<16x78xf32>, vector<78x32xf32>, vector<16x32xf32> -> vector<16x32xf32>
    %15 = vector.broadcast %7 : vector<1x32xf32> to vector<16x32xf32>
    %16 = arith.addf %14, %15 : vector<16x32xf32>
    %cst_21 = arith.constant 0.000000e+00 : f32
    %17 = vector.broadcast %cst_21 : f32 to vector<16x32xf32>
    %18 = arith.maximumf %16, %17 : vector<16x32xf32>
    %cst_22 = arith.constant dense<0.000000e+00> : vector<16x32xf32>
    %19 = tpu.matmul %18, %8, %cst_22 {dimension_numbers = #tpu.dot_dimension_numbers<[1], [0], [0], [1], [0, 0, 1, 1], [], []>} : vector<16x32xf32>, vector<32x32xf32>, vector<16x32xf32> -> vector<16x32xf32>
    %20 = vector.broadcast %9 : vector<1x32xf32> to vector<16x32xf32>
    %21 = arith.addf %19, %20 : vector<16x32xf32>
    %22 = vector.broadcast %5 : vector<16x1xf32> to vector<16x32xf32>
    %23 = arith.mulf %21, %22 : vector<16x32xf32>
    %cst_23 = arith.constant 0.000000e+00 : f32
    %24 = vector.broadcast %cst_23 : f32 to vector<16x32xf32>
    %25 = arith.maximumf %23, %24 : vector<16x32xf32>
    %26 = vector.broadcast %10 : vector<1x32xf32> to vector<16x32xf32>
    %27 = arith.mulf %25, %26 : vector<16x32xf32>
    %28 = vector.broadcast %11 : vector<1x32xf32> to vector<16x32xf32>
    %29 = arith.addf %27, %28 : vector<16x32xf32>
    %c0_24 = arith.constant 0 : index
    %c0_25 = arith.constant 0 : index
    %c0_26 = arith.constant 0 : index
    %30 = vector.load %arg10[%c0_24, %c0_25, %c0_26] : memref<4x32x32xf32, #tpu.memory_space<vmem>>, vector<1x32x32xf32>
    %31 = vector.shape_cast %30 : vector<1x32x32xf32> to vector<32x32xf32>
    %c0_27 = arith.constant 0 : index
    %c0_28 = arith.constant 0 : index
    %c0_29 = arith.constant 0 : index
    %32 = vector.load %arg11[%c0_27, %c0_28, %c0_29] : memref<4x1x32xf32, #tpu.memory_space<vmem>>, vector<1x1x32xf32>
    %33 = vector.shape_cast %32 : vector<1x1x32xf32> to vector<1x32xf32>
    %c0_30 = arith.constant 0 : index
    %c0_31 = arith.constant 0 : index
    %c0_32 = arith.constant 0 : index
    %34 = vector.load %arg12[%c0_30, %c0_31, %c0_32] : memref<4x32x32xf32, #tpu.memory_space<vmem>>, vector<1x32x32xf32>
    %35 = vector.shape_cast %34 : vector<1x32x32xf32> to vector<32x32xf32>
    %c0_33 = arith.constant 0 : index
    %c0_34 = arith.constant 0 : index
    %c0_35 = arith.constant 0 : index
    %36 = vector.load %arg13[%c0_33, %c0_34, %c0_35] : memref<4x1x32xf32, #tpu.memory_space<vmem>>, vector<1x1x32xf32>
    %37 = vector.shape_cast %36 : vector<1x1x32xf32> to vector<1x32xf32>
    %c0_36 = arith.constant 0 : index
    %c0_37 = arith.constant 0 : index
    %c0_38 = arith.constant 0 : index
    %38 = vector.load %arg14[%c0_36, %c0_37, %c0_38] : memref<4x1x32xf32, #tpu.memory_space<vmem>>, vector<1x1x32xf32>
    %39 = vector.shape_cast %38 : vector<1x1x32xf32> to vector<1x32xf32>
    %c0_39 = arith.constant 0 : index
    %c0_40 = arith.constant 0 : index
    %c0_41 = arith.constant 0 : index
    %40 = vector.load %arg15[%c0_39, %c0_40, %c0_41] : memref<4x1x32xf32, #tpu.memory_space<vmem>>, vector<1x1x32xf32>
    %41 = vector.shape_cast %40 : vector<1x1x32xf32> to vector<1x32xf32>
    %cst_42 = arith.constant dense<0.000000e+00> : vector<16x32xf32>
    %42 = tpu.matmul %3, %29, %cst_42 {dimension_numbers = #tpu.dot_dimension_numbers<[1], [0], [0], [1], [0, 0, 1, 1], [], []>} : vector<16x16xf32>, vector<16x32xf32>, vector<16x32xf32> -> vector<16x32xf32>
    %43 = arith.addf %42, %29 : vector<16x32xf32>
    %cst_43 = arith.constant dense<0.000000e+00> : vector<16x32xf32>
    %44 = tpu.matmul %43, %31, %cst_43 {dimension_numbers = #tpu.dot_dimension_numbers<[1], [0], [0], [1], [0, 0, 1, 1], [], []>} : vector<16x32xf32>, vector<32x32xf32>, vector<16x32xf32> -> vector<16x32xf32>
    %45 = vector.broadcast %33 : vector<1x32xf32> to vector<16x32xf32>
    %46 = arith.addf %44, %45 : vector<16x32xf32>
    %cst_44 = arith.constant 0.000000e+00 : f32
    %47 = vector.broadcast %cst_44 : f32 to vector<16x32xf32>
    %48 = arith.maximumf %46, %47 : vector<16x32xf32>
    %cst_45 = arith.constant dense<0.000000e+00> : vector<16x32xf32>
    %49 = tpu.matmul %48, %35, %cst_45 {dimension_numbers = #tpu.dot_dimension_numbers<[1], [0], [0], [1], [0, 0, 1, 1], [], []>} : vector<16x32xf32>, vector<32x32xf32>, vector<16x32xf32> -> vector<16x32xf32>
    %50 = vector.broadcast %37 : vector<1x32xf32> to vector<16x32xf32>
    %51 = arith.addf %49, %50 : vector<16x32xf32>
    %52 = vector.broadcast %5 : vector<16x1xf32> to vector<16x32xf32>
    %53 = arith.mulf %51, %52 : vector<16x32xf32>
    %cst_46 = arith.constant 0.000000e+00 : f32
    %54 = vector.broadcast %cst_46 : f32 to vector<16x32xf32>
    %55 = arith.maximumf %53, %54 : vector<16x32xf32>
    %56 = vector.broadcast %39 : vector<1x32xf32> to vector<16x32xf32>
    %57 = arith.mulf %55, %56 : vector<16x32xf32>
    %58 = vector.broadcast %41 : vector<1x32xf32> to vector<16x32xf32>
    %59 = arith.addf %57, %58 : vector<16x32xf32>
    %c1 = arith.constant 1 : index
    %c0_47 = arith.constant 0 : index
    %c0_48 = arith.constant 0 : index
    %60 = vector.load %arg10[%c1, %c0_47, %c0_48] : memref<4x32x32xf32, #tpu.memory_space<vmem>>, vector<1x32x32xf32>
    %61 = vector.shape_cast %60 : vector<1x32x32xf32> to vector<32x32xf32>
    %c1_49 = arith.constant 1 : index
    %c0_50 = arith.constant 0 : index
    %c0_51 = arith.constant 0 : index
    %62 = vector.load %arg11[%c1_49, %c0_50, %c0_51] : memref<4x1x32xf32, #tpu.memory_space<vmem>>, vector<1x1x32xf32>
    %63 = vector.shape_cast %62 : vector<1x1x32xf32> to vector<1x32xf32>
    %c1_52 = arith.constant 1 : index
    %c0_53 = arith.constant 0 : index
    %c0_54 = arith.constant 0 : index
    %64 = vector.load %arg12[%c1_52, %c0_53, %c0_54] : memref<4x32x32xf32, #tpu.memory_space<vmem>>, vector<1x32x32xf32>
    %65 = vector.shape_cast %64 : vector<1x32x32xf32> to vector<32x32xf32>
    %c1_55 = arith.constant 1 : index
    %c0_56 = arith.constant 0 : index
    %c0_57 = arith.constant 0 : index
    %66 = vector.load %arg13[%c1_55, %c0_56, %c0_57] : memref<4x1x32xf32, #tpu.memory_space<vmem>>, vector<1x1x32xf32>
    %67 = vector.shape_cast %66 : vector<1x1x32xf32> to vector<1x32xf32>
    %c1_58 = arith.constant 1 : index
    %c0_59 = arith.constant 0 : index
    %c0_60 = arith.constant 0 : index
    %68 = vector.load %arg14[%c1_58, %c0_59, %c0_60] : memref<4x1x32xf32, #tpu.memory_space<vmem>>, vector<1x1x32xf32>
    %69 = vector.shape_cast %68 : vector<1x1x32xf32> to vector<1x32xf32>
    %c1_61 = arith.constant 1 : index
    %c0_62 = arith.constant 0 : index
    %c0_63 = arith.constant 0 : index
    %70 = vector.load %arg15[%c1_61, %c0_62, %c0_63] : memref<4x1x32xf32, #tpu.memory_space<vmem>>, vector<1x1x32xf32>
    %71 = vector.shape_cast %70 : vector<1x1x32xf32> to vector<1x32xf32>
    %cst_64 = arith.constant dense<0.000000e+00> : vector<16x32xf32>
    %72 = tpu.matmul %3, %59, %cst_64 {dimension_numbers = #tpu.dot_dimension_numbers<[1], [0], [0], [1], [0, 0, 1, 1], [], []>} : vector<16x16xf32>, vector<16x32xf32>, vector<16x32xf32> -> vector<16x32xf32>
    %73 = arith.addf %72, %59 : vector<16x32xf32>
    %cst_65 = arith.constant dense<0.000000e+00> : vector<16x32xf32>
    %74 = tpu.matmul %73, %61, %cst_65 {dimension_numbers = #tpu.dot_dimension_numbers<[1], [0], [0], [1], [0, 0, 1, 1], [], []>} : vector<16x32xf32>, vector<32x32xf32>, vector<16x32xf32> -> vector<16x32xf32>
    %75 = vector.broadcast %63 : vector<1x32xf32> to vector<16x32xf32>
    %76 = arith.addf %74, %75 : vector<16x32xf32>
    %cst_66 = arith.constant 0.000000e+00 : f32
    %77 = vector.broadcast %cst_66 : f32 to vector<16x32xf32>
    %78 = arith.maximumf %76, %77 : vector<16x32xf32>
    %cst_67 = arith.constant dense<0.000000e+00> : vector<16x32xf32>
    %79 = tpu.matmul %78, %65, %cst_67 {dimension_numbers = #tpu.dot_dimension_numbers<[1], [0], [0], [1], [0, 0, 1, 1], [], []>} : vector<16x32xf32>, vector<32x32xf32>, vector<16x32xf32> -> vector<16x32xf32>
    %80 = vector.broadcast %67 : vector<1x32xf32> to vector<16x32xf32>
    %81 = arith.addf %79, %80 : vector<16x32xf32>
    %82 = vector.broadcast %5 : vector<16x1xf32> to vector<16x32xf32>
    %83 = arith.mulf %81, %82 : vector<16x32xf32>
    %cst_68 = arith.constant 0.000000e+00 : f32
    %84 = vector.broadcast %cst_68 : f32 to vector<16x32xf32>
    %85 = arith.maximumf %83, %84 : vector<16x32xf32>
    %86 = vector.broadcast %69 : vector<1x32xf32> to vector<16x32xf32>
    %87 = arith.mulf %85, %86 : vector<16x32xf32>
    %88 = vector.broadcast %71 : vector<1x32xf32> to vector<16x32xf32>
    %89 = arith.addf %87, %88 : vector<16x32xf32>
    %c2 = arith.constant 2 : index
    %c0_69 = arith.constant 0 : index
    %c0_70 = arith.constant 0 : index
    %90 = vector.load %arg10[%c2, %c0_69, %c0_70] : memref<4x32x32xf32, #tpu.memory_space<vmem>>, vector<1x32x32xf32>
    %91 = vector.shape_cast %90 : vector<1x32x32xf32> to vector<32x32xf32>
    %c2_71 = arith.constant 2 : index
    %c0_72 = arith.constant 0 : index
    %c0_73 = arith.constant 0 : index
    %92 = vector.load %arg11[%c2_71, %c0_72, %c0_73] : memref<4x1x32xf32, #tpu.memory_space<vmem>>, vector<1x1x32xf32>
    %93 = vector.shape_cast %92 : vector<1x1x32xf32> to vector<1x32xf32>
    %c2_74 = arith.constant 2 : index
    %c0_75 = arith.constant 0 : index
    %c0_76 = arith.constant 0 : index
    %94 = vector.load %arg12[%c2_74, %c0_75, %c0_76] : memref<4x32x32xf32, #tpu.memory_space<vmem>>, vector<1x32x32xf32>
    %95 = vector.shape_cast %94 : vector<1x32x32xf32> to vector<32x32xf32>
    %c2_77 = arith.constant 2 : index
    %c0_78 = arith.constant 0 : index
    %c0_79 = arith.constant 0 : index
    %96 = vector.load %arg13[%c2_77, %c0_78, %c0_79] : memref<4x1x32xf32, #tpu.memory_space<vmem>>, vector<1x1x32xf32>
    %97 = vector.shape_cast %96 : vector<1x1x32xf32> to vector<1x32xf32>
    %c2_80 = arith.constant 2 : index
    %c0_81 = arith.constant 0 : index
    %c0_82 = arith.constant 0 : index
    %98 = vector.load %arg14[%c2_80, %c0_81, %c0_82] : memref<4x1x32xf32, #tpu.memory_space<vmem>>, vector<1x1x32xf32>
    %99 = vector.shape_cast %98 : vector<1x1x32xf32> to vector<1x32xf32>
    %c2_83 = arith.constant 2 : index
    %c0_84 = arith.constant 0 : index
    %c0_85 = arith.constant 0 : index
    %100 = vector.load %arg15[%c2_83, %c0_84, %c0_85] : memref<4x1x32xf32, #tpu.memory_space<vmem>>, vector<1x1x32xf32>
    %101 = vector.shape_cast %100 : vector<1x1x32xf32> to vector<1x32xf32>
    %cst_86 = arith.constant dense<0.000000e+00> : vector<16x32xf32>
    %102 = tpu.matmul %3, %89, %cst_86 {dimension_numbers = #tpu.dot_dimension_numbers<[1], [0], [0], [1], [0, 0, 1, 1], [], []>} : vector<16x16xf32>, vector<16x32xf32>, vector<16x32xf32> -> vector<16x32xf32>
    %103 = arith.addf %102, %89 : vector<16x32xf32>
    %cst_87 = arith.constant dense<0.000000e+00> : vector<16x32xf32>
    %104 = tpu.matmul %103, %91, %cst_87 {dimension_numbers = #tpu.dot_dimension_numbers<[1], [0], [0], [1], [0, 0, 1, 1], [], []>} : vector<16x32xf32>, vector<32x32xf32>, vector<16x32xf32> -> vector<16x32xf32>
    %105 = vector.broadcast %93 : vector<1x32xf32> to vector<16x32xf32>
    %106 = arith.addf %104, %105 : vector<16x32xf32>
    %cst_88 = arith.constant 0.000000e+00 : f32
    %107 = vector.broadcast %cst_88 : f32 to vector<16x32xf32>
    %108 = arith.maximumf %106, %107 : vector<16x32xf32>
    %cst_89 = arith.constant dense<0.000000e+00> : vector<16x32xf32>
    %109 = tpu.matmul %108, %95, %cst_89 {dimension_numbers = #tpu.dot_dimension_numbers<[1], [0], [0], [1], [0, 0, 1, 1], [], []>} : vector<16x32xf32>, vector<32x32xf32>, vector<16x32xf32> -> vector<16x32xf32>
    %110 = vector.broadcast %97 : vector<1x32xf32> to vector<16x32xf32>
    %111 = arith.addf %109, %110 : vector<16x32xf32>
    %112 = vector.broadcast %5 : vector<16x1xf32> to vector<16x32xf32>
    %113 = arith.mulf %111, %112 : vector<16x32xf32>
    %cst_90 = arith.constant 0.000000e+00 : f32
    %114 = vector.broadcast %cst_90 : f32 to vector<16x32xf32>
    %115 = arith.maximumf %113, %114 : vector<16x32xf32>
    %116 = vector.broadcast %99 : vector<1x32xf32> to vector<16x32xf32>
    %117 = arith.mulf %115, %116 : vector<16x32xf32>
    %118 = vector.broadcast %101 : vector<1x32xf32> to vector<16x32xf32>
    %119 = arith.addf %117, %118 : vector<16x32xf32>
    %c3 = arith.constant 3 : index
    %c0_91 = arith.constant 0 : index
    %c0_92 = arith.constant 0 : index
    %120 = vector.load %arg10[%c3, %c0_91, %c0_92] : memref<4x32x32xf32, #tpu.memory_space<vmem>>, vector<1x32x32xf32>
    %121 = vector.shape_cast %120 : vector<1x32x32xf32> to vector<32x32xf32>
    %c3_93 = arith.constant 3 : index
    %c0_94 = arith.constant 0 : index
    %c0_95 = arith.constant 0 : index
    %122 = vector.load %arg11[%c3_93, %c0_94, %c0_95] : memref<4x1x32xf32, #tpu.memory_space<vmem>>, vector<1x1x32xf32>
    %123 = vector.shape_cast %122 : vector<1x1x32xf32> to vector<1x32xf32>
    %c3_96 = arith.constant 3 : index
    %c0_97 = arith.constant 0 : index
    %c0_98 = arith.constant 0 : index
    %124 = vector.load %arg12[%c3_96, %c0_97, %c0_98] : memref<4x32x32xf32, #tpu.memory_space<vmem>>, vector<1x32x32xf32>
    %125 = vector.shape_cast %124 : vector<1x32x32xf32> to vector<32x32xf32>
    %c3_99 = arith.constant 3 : index
    %c0_100 = arith.constant 0 : index
    %c0_101 = arith.constant 0 : index
    %126 = vector.load %arg13[%c3_99, %c0_100, %c0_101] : memref<4x1x32xf32, #tpu.memory_space<vmem>>, vector<1x1x32xf32>
    %127 = vector.shape_cast %126 : vector<1x1x32xf32> to vector<1x32xf32>
    %c3_102 = arith.constant 3 : index
    %c0_103 = arith.constant 0 : index
    %c0_104 = arith.constant 0 : index
    %128 = vector.load %arg14[%c3_102, %c0_103, %c0_104] : memref<4x1x32xf32, #tpu.memory_space<vmem>>, vector<1x1x32xf32>
    %129 = vector.shape_cast %128 : vector<1x1x32xf32> to vector<1x32xf32>
    %c3_105 = arith.constant 3 : index
    %c0_106 = arith.constant 0 : index
    %c0_107 = arith.constant 0 : index
    %130 = vector.load %arg15[%c3_105, %c0_106, %c0_107] : memref<4x1x32xf32, #tpu.memory_space<vmem>>, vector<1x1x32xf32>
    %131 = vector.shape_cast %130 : vector<1x1x32xf32> to vector<1x32xf32>
    %cst_108 = arith.constant dense<0.000000e+00> : vector<16x32xf32>
    %132 = tpu.matmul %3, %119, %cst_108 {dimension_numbers = #tpu.dot_dimension_numbers<[1], [0], [0], [1], [0, 0, 1, 1], [], []>} : vector<16x16xf32>, vector<16x32xf32>, vector<16x32xf32> -> vector<16x32xf32>
    %133 = arith.addf %132, %119 : vector<16x32xf32>
    %cst_109 = arith.constant dense<0.000000e+00> : vector<16x32xf32>
    %134 = tpu.matmul %133, %121, %cst_109 {dimension_numbers = #tpu.dot_dimension_numbers<[1], [0], [0], [1], [0, 0, 1, 1], [], []>} : vector<16x32xf32>, vector<32x32xf32>, vector<16x32xf32> -> vector<16x32xf32>
    %135 = vector.broadcast %123 : vector<1x32xf32> to vector<16x32xf32>
    %136 = arith.addf %134, %135 : vector<16x32xf32>
    %cst_110 = arith.constant 0.000000e+00 : f32
    %137 = vector.broadcast %cst_110 : f32 to vector<16x32xf32>
    %138 = arith.maximumf %136, %137 : vector<16x32xf32>
    %cst_111 = arith.constant dense<0.000000e+00> : vector<16x32xf32>
    %139 = tpu.matmul %138, %125, %cst_111 {dimension_numbers = #tpu.dot_dimension_numbers<[1], [0], [0], [1], [0, 0, 1, 1], [], []>} : vector<16x32xf32>, vector<32x32xf32>, vector<16x32xf32> -> vector<16x32xf32>
    %140 = vector.broadcast %127 : vector<1x32xf32> to vector<16x32xf32>
    %141 = arith.addf %139, %140 : vector<16x32xf32>
    %142 = vector.broadcast %5 : vector<16x1xf32> to vector<16x32xf32>
    %143 = arith.mulf %141, %142 : vector<16x32xf32>
    %cst_112 = arith.constant 0.000000e+00 : f32
    %144 = vector.broadcast %cst_112 : f32 to vector<16x32xf32>
    %145 = arith.maximumf %143, %144 : vector<16x32xf32>
    %146 = vector.broadcast %129 : vector<1x32xf32> to vector<16x32xf32>
    %147 = arith.mulf %145, %146 : vector<16x32xf32>
    %148 = vector.broadcast %131 : vector<1x32xf32> to vector<16x32xf32>
    %149 = arith.addf %147, %148 : vector<16x32xf32>
    %cst_113 = arith.constant dense<0.000000e+00> : vector<32xf32>
    %150 = vector.multi_reduction <add>, %149, %cst_113 [0] : vector<16x32xf32> to vector<32xf32>
    %151 = vector.shape_cast %150 : vector<32xf32> to vector<1x32xf32>
    %c0_114 = arith.constant 0 : index
    %c0_115 = arith.constant 0 : index
    %152 = vector.load %arg16[%c0_114, %c0_115] : memref<32x128xf32, #tpu.memory_space<vmem>>, vector<32x128xf32>
    %cst_116 = arith.constant dense<0.000000e+00> : vector<1x128xf32>
    %153 = tpu.matmul %151, %152, %cst_116 {dimension_numbers = #tpu.dot_dimension_numbers<[1], [0], [0], [1], [0, 0, 1, 1], [], []>} : vector<1x32xf32>, vector<32x128xf32>, vector<1x128xf32> -> vector<1x128xf32>
    %c0_117 = arith.constant 0 : index
    %c0_118 = arith.constant 0 : index
    %154 = vector.load %arg17[%c0_117, %c0_118] : memref<1x128xf32, #tpu.memory_space<vmem>>, vector<1x128xf32>
    %155 = arith.addf %153, %154 : vector<1x128xf32>
    %cst_119 = arith.constant 0.000000e+00 : f32
    %156 = vector.broadcast %cst_119 : f32 to vector<1x128xf32>
    %157 = arith.maximumf %155, %156 : vector<1x128xf32>
    %c0_120 = arith.constant 0 : index
    %c0_121 = arith.constant 0 : index
    %c0_122 = arith.constant 0 : index
    %158 = vector.load %arg18[%c0_120, %c0_121, %c0_122] : memref<1x1x128xf32, #tpu.memory_space<vmem>>, vector<1x1x128xf32>
    %159 = vector.shape_cast %158 : vector<1x1x128xf32> to vector<1x128xf32>
    %160 = vector.shape_cast %157 : vector<1x128xf32> to vector<1x1x128xf32>
    tpu.vector_store %arg18[%c0_120, %c0_121, %c0_122], %160 {strides = array<i32>} : memref<1x1x128xf32, #tpu.memory_space<vmem>>, vector<1x1x128xf32>,
    return
  }
  func.func @transform_0(%arg0: i32) -> (i32, i32, i32) {
    %c0_i32 = arith.constant 0 : i32
    %c0_i32_0 = arith.constant 0 : i32
    %c0_i32_1 = arith.constant 0 : i32
    return %arg0, %c0_i32, %c0_i32_0 : i32, i32, i32
  }
  func.func @transform_1(%arg0: i32) -> (i32, i32, i32) {
    %c0_i32 = arith.constant 0 : i32
    %c0_i32_0 = arith.constant 0 : i32
    %c0_i32_1 = arith.constant 0 : i32
    return %arg0, %c0_i32, %c0_i32_0 : i32, i32, i32
  }
  func.func @transform_2(%arg0: i32) -> (i32, i32, i32) {
    %c0_i32 = arith.constant 0 : i32
    %c0_i32_0 = arith.constant 0 : i32
    %c0_i32_1 = arith.constant 0 : i32
    return %arg0, %c0_i32, %c0_i32_0 : i32, i32, i32
  }
  func.func @transform_3(%arg0: i32) -> (i32, i32) {
    %c0_i32 = arith.constant 0 : i32
    %c0_i32_0 = arith.constant 0 : i32
    %c0_i32_1 = arith.constant 0 : i32
    return %c0_i32, %c0_i32_0 : i32, i32
  }
  func.func @transform_4(%arg0: i32) -> (i32, i32) {
    %c0_i32 = arith.constant 0 : i32
    %c0_i32_0 = arith.constant 0 : i32
    %c0_i32_1 = arith.constant 0 : i32
    return %c0_i32, %c0_i32_0 : i32, i32
  }
  func.func @transform_5(%arg0: i32) -> (i32, i32) {
    %c0_i32 = arith.constant 0 : i32
    %c0_i32_0 = arith.constant 0 : i32
    %c0_i32_1 = arith.constant 0 : i32
    return %c0_i32, %c0_i32_0 : i32, i32
  }
  func.func @transform_6(%arg0: i32) -> (i32, i32) {
    %c0_i32 = arith.constant 0 : i32
    %c0_i32_0 = arith.constant 0 : i32
    %c0_i32_1 = arith.constant 0 : i32
    return %c0_i32, %c0_i32_0 : i32, i32
  }
  func.func @transform_7(%arg0: i32) -> (i32, i32) {
    %c0_i32 = arith.constant 0 : i32
    %c0_i32_0 = arith.constant 0 : i32
    %c0_i32_1 = arith.constant 0 : i32
    return %c0_i32, %c0_i32_0 : i32, i32
  }
  func.func @transform_8(%arg0: i32) -> (i32, i32) {
    %c0_i32 = arith.constant 0 : i32
    %c0_i32_0 = arith.constant 0 : i32
    %c0_i32_1 = arith.constant 0 : i32
    return %c0_i32, %c0_i32_0 : i32, i32
  }
  func.func @transform_9(%arg0: i32) -> (i32, i32, i32) {
    %c0_i32 = arith.constant 0 : i32
    %c0_i32_0 = arith.constant 0 : i32
    %c0_i32_1 = arith.constant 0 : i32
    %c0_i32_2 = arith.constant 0 : i32
    return %c0_i32, %c0_i32_0, %c0_i32_1 : i32, i32, i32
  }
  func.func @transform_10(%arg0: i32) -> (i32, i32, i32) {
    %c0_i32 = arith.constant 0 : i32
    %c0_i32_0 = arith.constant 0 : i32
    %c0_i32_1 = arith.constant 0 : i32
    %c0_i32_2 = arith.constant 0 : i32
    return %c0_i32, %c0_i32_0, %c0_i32_1 : i32, i32, i32
  }
  func.func @transform_11(%arg0: i32) -> (i32, i32, i32) {
    %c0_i32 = arith.constant 0 : i32
    %c0_i32_0 = arith.constant 0 : i32
    %c0_i32_1 = arith.constant 0 : i32
    %c0_i32_2 = arith.constant 0 : i32
    return %c0_i32, %c0_i32_0, %c0_i32_1 : i32, i32, i32
  }
  func.func @transform_12(%arg0: i32) -> (i32, i32, i32) {
    %c0_i32 = arith.constant 0 : i32
    %c0_i32_0 = arith.constant 0 : i32
    %c0_i32_1 = arith.constant 0 : i32
    %c0_i32_2 = arith.constant 0 : i32
    return %c0_i32, %c0_i32_0, %c0_i32_1 : i32, i32, i32
  }
  func.func @transform_13(%arg0: i32) -> (i32, i32, i32) {
    %c0_i32 = arith.constant 0 : i32
    %c0_i32_0 = arith.constant 0 : i32
    %c0_i32_1 = arith.constant 0 : i32
    %c0_i32_2 = arith.constant 0 : i32
    return %c0_i32, %c0_i32_0, %c0_i32_1 : i32, i32, i32
  }
  func.func @transform_14(%arg0: i32) -> (i32, i32, i32) {
    %c0_i32 = arith.constant 0 : i32
    %c0_i32_0 = arith.constant 0 : i32
    %c0_i32_1 = arith.constant 0 : i32
    %c0_i32_2 = arith.constant 0 : i32
    return %c0_i32, %c0_i32_0, %c0_i32_1 : i32, i32, i32
  }
  func.func @transform_15(%arg0: i32) -> (i32, i32) {
    %c0_i32 = arith.constant 0 : i32
    %c0_i32_0 = arith.constant 0 : i32
    %c0_i32_1 = arith.constant 0 : i32
    return %c0_i32, %c0_i32_0 : i32, i32
  }
  func.func @transform_16(%arg0: i32) -> (i32, i32) {
    %c0_i32 = arith.constant 0 : i32
    %c0_i32_0 = arith.constant 0 : i32
    %c0_i32_1 = arith.constant 0 : i32
    return %c0_i32, %c0_i32_0 : i32, i32
  }
  func.func @transform_17(%arg0: i32) -> (i32, i32, i32) {
    %c0_i32 = arith.constant 0 : i32
    %c0_i32_0 = arith.constant 0 : i32
    %c0_i32_1 = arith.constant 0 : i32
    return %arg0, %c0_i32, %c0_i32_0 : i32, i32, i32
  }
}

module attributes {stable_mosaic.version = 11 : i64} {
  func.func @prot_conv_kernel(%arg0: i32, %arg1: memref<1x1024x1xi32, #tpu.memory_space<vmem>>, %arg2: memref<32x128xf32, #tpu.memory_space<vmem>>, %arg3: memref<8x32x1024xbf16, #tpu.memory_space<vmem>>, %arg4: memref<32x1xf32, #tpu.memory_space<vmem>>, %arg5: memref<1x32x128xf32, #tpu.memory_space<vmem>>) attributes {dimension_semantics = [#tpu.dimension_semantics<parallel>], iteration_bounds = array<i64: 2>, scalar_prefetch = 0 : i64, scratch_operands = 0 : i64, tpu.core_type = #tpu.core_type<tc>, window_params = [{transform_indices = @transform_0, window_bounds = array<i64: 1, 1024, 1>}, {pipeline_mode = #tpu.pipeline_mode<synchronous>, transform_indices = @transform_1, window_bounds = array<i64: 32, 128>}, {pipeline_mode = #tpu.pipeline_mode<synchronous>, transform_indices = @transform_2, window_bounds = array<i64: 8, 32, 1024>}, {pipeline_mode = #tpu.pipeline_mode<synchronous>, transform_indices = @transform_3, window_bounds = array<i64: 32, 1>}, {transform_indices = @transform_4, window_bounds = array<i64: 1, 32, 128>}]} {
    %c0 = arith.constant 0 : index
    %c0_0 = arith.constant 0 : index
    %c0_1 = arith.constant 0 : index
    %0 = vector.load %arg1[%c0, %c0_0, %c0_1] : memref<1x1024x1xi32, #tpu.memory_space<vmem>>, vector<1x1024x1xi32>
    %1 = vector.shape_cast %0 : vector<1x1024x1xi32> to vector<1024x1xi32>
    %2 = tpu.iota {dimensions = array<i32: 1>} : vector<1024x32xi32>
    %3 = vector.broadcast %1 : vector<1024x1xi32> to vector<1024x32xi32>
    %4 = arith.cmpi eq, %2, %3 : vector<1024x32xi32>
    %5 = arith.extui %4 : vector<1024x32xi1> to vector<1024x32xi32>
    %6 = arith.sitofp %5 : vector<1024x32xi32> to vector<1024x32xf32>
    %c0_2 = arith.constant 0 : index
    %c0_3 = arith.constant 0 : index
    %7 = vector.load %arg2[%c0_2, %c0_3] : memref<32x128xf32, #tpu.memory_space<vmem>>, vector<32x128xf32>
    %cst = arith.constant dense<0.000000e+00> : vector<1024x128xf32>
    %8 = tpu.matmul %6, %7, %cst {dimension_numbers = #tpu.dot_dimension_numbers<[1], [0], [0], [1], [0, 0, 1, 1], [], []>} : vector<1024x32xf32>, vector<32x128xf32>, vector<1024x128xf32> -> vector<1024x128xf32>
    %9 = arith.truncf %8 : vector<1024x128xf32> to vector<1024x128xbf16>
    %cst_4 = arith.constant 0.000000e+00 : f32
    %10 = vector.broadcast %cst_4 : f32 to vector<32x128xf32>
    %c0_5 = arith.constant 0 : index
    %c0_6 = arith.constant 0 : index
    %c0_7 = arith.constant 0 : index
    %11 = vector.load %arg3[%c0_5, %c0_6, %c0_7] : memref<8x32x1024xbf16, #tpu.memory_space<vmem>>, vector<1x32x1024xbf16>
    %12 = vector.shape_cast %11 : vector<1x32x1024xbf16> to vector<32x1024xbf16>
    %cst_8 = arith.constant dense<0.000000e+00> : vector<32x128xf32>
    %13 = tpu.matmul %12, %9, %cst_8 {dimension_numbers = #tpu.dot_dimension_numbers<[1], [0], [0], [1], [0, 0, 1, 1], [], []>} : vector<32x1024xbf16>, vector<1024x128xbf16>, vector<32x128xf32> -> vector<32x128xf32>
    %14 = arith.addf %10, %13 : vector<32x128xf32>
    %c1 = arith.constant 1 : index
    %c0_9 = arith.constant 0 : index
    %c0_10 = arith.constant 0 : index
    %15 = vector.load %arg3[%c1, %c0_9, %c0_10] : memref<8x32x1024xbf16, #tpu.memory_space<vmem>>, vector<1x32x1024xbf16>
    %16 = vector.shape_cast %15 : vector<1x32x1024xbf16> to vector<32x1024xbf16>
    %cst_11 = arith.constant dense<0.000000e+00> : vector<32x128xf32>
    %17 = tpu.matmul %16, %9, %cst_11 {dimension_numbers = #tpu.dot_dimension_numbers<[1], [0], [0], [1], [0, 0, 1, 1], [], []>} : vector<32x1024xbf16>, vector<1024x128xbf16>, vector<32x128xf32> -> vector<32x128xf32>
    %c127_i32 = arith.constant 127 : i32
    %18 = tpu.dynamic_rotate %17 by %c127_i32 dim 1 : vector<32x128xf32>, i32 -> vector<32x128xf32>
    %19 = arith.addf %14, %18 : vector<32x128xf32>
    %c2 = arith.constant 2 : index
    %c0_12 = arith.constant 0 : index
    %c0_13 = arith.constant 0 : index
    %20 = vector.load %arg3[%c2, %c0_12, %c0_13] : memref<8x32x1024xbf16, #tpu.memory_space<vmem>>, vector<1x32x1024xbf16>
    %21 = vector.shape_cast %20 : vector<1x32x1024xbf16> to vector<32x1024xbf16>
    %cst_14 = arith.constant dense<0.000000e+00> : vector<32x128xf32>
    %22 = tpu.matmul %21, %9, %cst_14 {dimension_numbers = #tpu.dot_dimension_numbers<[1], [0], [0], [1], [0, 0, 1, 1], [], []>} : vector<32x1024xbf16>, vector<1024x128xbf16>, vector<32x128xf32> -> vector<32x128xf32>
    %c126_i32 = arith.constant 126 : i32
    %23 = tpu.dynamic_rotate %22 by %c126_i32 dim 1 : vector<32x128xf32>, i32 -> vector<32x128xf32>
    %24 = arith.addf %19, %23 : vector<32x128xf32>
    %c3 = arith.constant 3 : index
    %c0_15 = arith.constant 0 : index
    %c0_16 = arith.constant 0 : index
    %25 = vector.load %arg3[%c3, %c0_15, %c0_16] : memref<8x32x1024xbf16, #tpu.memory_space<vmem>>, vector<1x32x1024xbf16>
    %26 = vector.shape_cast %25 : vector<1x32x1024xbf16> to vector<32x1024xbf16>
    %cst_17 = arith.constant dense<0.000000e+00> : vector<32x128xf32>
    %27 = tpu.matmul %26, %9, %cst_17 {dimension_numbers = #tpu.dot_dimension_numbers<[1], [0], [0], [1], [0, 0, 1, 1], [], []>} : vector<32x1024xbf16>, vector<1024x128xbf16>, vector<32x128xf32> -> vector<32x128xf32>
    %c125_i32 = arith.constant 125 : i32
    %28 = tpu.dynamic_rotate %27 by %c125_i32 dim 1 : vector<32x128xf32>, i32 -> vector<32x128xf32>
    %29 = arith.addf %24, %28 : vector<32x128xf32>
    %c4 = arith.constant 4 : index
    %c0_18 = arith.constant 0 : index
    %c0_19 = arith.constant 0 : index
    %30 = vector.load %arg3[%c4, %c0_18, %c0_19] : memref<8x32x1024xbf16, #tpu.memory_space<vmem>>, vector<1x32x1024xbf16>
    %31 = vector.shape_cast %30 : vector<1x32x1024xbf16> to vector<32x1024xbf16>
    %cst_20 = arith.constant dense<0.000000e+00> : vector<32x128xf32>
    %32 = tpu.matmul %31, %9, %cst_20 {dimension_numbers = #tpu.dot_dimension_numbers<[1], [0], [0], [1], [0, 0, 1, 1], [], []>} : vector<32x1024xbf16>, vector<1024x128xbf16>, vector<32x128xf32> -> vector<32x128xf32>
    %c124_i32 = arith.constant 124 : i32
    %33 = tpu.dynamic_rotate %32 by %c124_i32 dim 1 : vector<32x128xf32>, i32 -> vector<32x128xf32>
    %34 = arith.addf %29, %33 : vector<32x128xf32>
    %c5 = arith.constant 5 : index
    %c0_21 = arith.constant 0 : index
    %c0_22 = arith.constant 0 : index
    %35 = vector.load %arg3[%c5, %c0_21, %c0_22] : memref<8x32x1024xbf16, #tpu.memory_space<vmem>>, vector<1x32x1024xbf16>
    %36 = vector.shape_cast %35 : vector<1x32x1024xbf16> to vector<32x1024xbf16>
    %cst_23 = arith.constant dense<0.000000e+00> : vector<32x128xf32>
    %37 = tpu.matmul %36, %9, %cst_23 {dimension_numbers = #tpu.dot_dimension_numbers<[1], [0], [0], [1], [0, 0, 1, 1], [], []>} : vector<32x1024xbf16>, vector<1024x128xbf16>, vector<32x128xf32> -> vector<32x128xf32>
    %c123_i32 = arith.constant 123 : i32
    %38 = tpu.dynamic_rotate %37 by %c123_i32 dim 1 : vector<32x128xf32>, i32 -> vector<32x128xf32>
    %39 = arith.addf %34, %38 : vector<32x128xf32>
    %c6 = arith.constant 6 : index
    %c0_24 = arith.constant 0 : index
    %c0_25 = arith.constant 0 : index
    %40 = vector.load %arg3[%c6, %c0_24, %c0_25] : memref<8x32x1024xbf16, #tpu.memory_space<vmem>>, vector<1x32x1024xbf16>
    %41 = vector.shape_cast %40 : vector<1x32x1024xbf16> to vector<32x1024xbf16>
    %cst_26 = arith.constant dense<0.000000e+00> : vector<32x128xf32>
    %42 = tpu.matmul %41, %9, %cst_26 {dimension_numbers = #tpu.dot_dimension_numbers<[1], [0], [0], [1], [0, 0, 1, 1], [], []>} : vector<32x1024xbf16>, vector<1024x128xbf16>, vector<32x128xf32> -> vector<32x128xf32>
    %c122_i32 = arith.constant 122 : i32
    %43 = tpu.dynamic_rotate %42 by %c122_i32 dim 1 : vector<32x128xf32>, i32 -> vector<32x128xf32>
    %44 = arith.addf %39, %43 : vector<32x128xf32>
    %c7 = arith.constant 7 : index
    %c0_27 = arith.constant 0 : index
    %c0_28 = arith.constant 0 : index
    %45 = vector.load %arg3[%c7, %c0_27, %c0_28] : memref<8x32x1024xbf16, #tpu.memory_space<vmem>>, vector<1x32x1024xbf16>
    %46 = vector.shape_cast %45 : vector<1x32x1024xbf16> to vector<32x1024xbf16>
    %cst_29 = arith.constant dense<0.000000e+00> : vector<32x128xf32>
    %47 = tpu.matmul %46, %9, %cst_29 {dimension_numbers = #tpu.dot_dimension_numbers<[1], [0], [0], [1], [0, 0, 1, 1], [], []>} : vector<32x1024xbf16>, vector<1024x128xbf16>, vector<32x128xf32> -> vector<32x128xf32>
    %c121_i32 = arith.constant 121 : i32
    %48 = tpu.dynamic_rotate %47 by %c121_i32 dim 1 : vector<32x128xf32>, i32 -> vector<32x128xf32>
    %49 = arith.addf %44, %48 : vector<32x128xf32>
    %c0_30 = arith.constant 0 : index
    %c0_31 = arith.constant 0 : index
    %50 = vector.load %arg4[%c0_30, %c0_31] : memref<32x1xf32, #tpu.memory_space<vmem>>, vector<32x1xf32>
    %51 = vector.broadcast %50 : vector<32x1xf32> to vector<32x128xf32>
    %52 = arith.addf %49, %51 : vector<32x128xf32>
    %53 = tpu.iota {dimensions = array<i32: 1>} : vector<32x128xi32>
    %c121_i32_32 = arith.constant 121 : i32
    %54 = vector.broadcast %c121_i32_32 : i32 to vector<32x128xi32>
    %55 = arith.cmpi slt, %53, %54 : vector<32x128xi32>
    %cst_33 = arith.constant 0.000000e+00 : f32
    %56 = vector.broadcast %cst_33 : f32 to vector<32x128xf32>
    %57 = arith.select %55, %52, %56 : vector<32x128xi1>, vector<32x128xf32>
    %c0_34 = arith.constant 0 : index
    %c0_35 = arith.constant 0 : index
    %c0_36 = arith.constant 0 : index
    %58 = vector.load %arg5[%c0_34, %c0_35, %c0_36] : memref<1x32x128xf32, #tpu.memory_space<vmem>>, vector<1x32x128xf32>
    %59 = vector.shape_cast %58 : vector<1x32x128xf32> to vector<32x128xf32>
    %60 = vector.shape_cast %57 : vector<32x128xf32> to vector<1x32x128xf32>
    tpu.vector_store %arg5[%c0_34, %c0_35, %c0_36], %60 {strides = array<i32>} : memref<1x32x128xf32, #tpu.memory_space<vmem>>, vector<1x32x128xf32>,
    return
  }
  func.func @transform_0(%arg0: i32) -> (i32, i32, i32) {
    %c0_i32 = arith.constant 0 : i32
    %c0_i32_0 = arith.constant 0 : i32
    %c0_i32_1 = arith.constant 0 : i32
    return %arg0, %c0_i32, %c0_i32_0 : i32, i32, i32
  }
  func.func @transform_1(%arg0: i32) -> (i32, i32) {
    %c0_i32 = arith.constant 0 : i32
    %c0_i32_0 = arith.constant 0 : i32
    %c0_i32_1 = arith.constant 0 : i32
    return %c0_i32, %c0_i32_0 : i32, i32
  }
  func.func @transform_2(%arg0: i32) -> (i32, i32, i32) {
    %c0_i32 = arith.constant 0 : i32
    %c0_i32_0 = arith.constant 0 : i32
    %c0_i32_1 = arith.constant 0 : i32
    %c0_i32_2 = arith.constant 0 : i32
    return %c0_i32, %c0_i32_0, %c0_i32_1 : i32, i32, i32
  }
  func.func @transform_3(%arg0: i32) -> (i32, i32) {
    %c0_i32 = arith.constant 0 : i32
    %c0_i32_0 = arith.constant 0 : i32
    %c0_i32_1 = arith.constant 0 : i32
    return %c0_i32, %c0_i32_0 : i32, i32
  }
  func.func @transform_4(%arg0: i32) -> (i32, i32, i32) {
    %c0_i32 = arith.constant 0 : i32
    %c0_i32_0 = arith.constant 0 : i32
    %c0_i32_1 = arith.constant 0 : i32
    return %arg0, %c0_i32, %c0_i32_0 : i32, i32, i32
  }
}

</mosaic_0001>

<bundles_post_ra>
// kernel: net_forward.3
= control target key start
LH: loop header
LB: loop body
LE: loop exit
PB: predicated region body
PF: predicated region fallthrough
CT: control target
= control target key end

     0   :  { %s2184_s0 = inlined_call_operand.vmem [shape: f32[2,16,78], index: 0, kind: input, shape index: {}]   ;;  %s2185_s1 = inlined_call_operand.hbm [shape: f32[2,16,16], index: 1, kind: input, shape index: {}]   ;;  %s2186_s2 = inlined_call_operand.vmem [shape: f32[2,16,1], index: 2, kind: input, shape index: {}]   ;;  %s2187_s3 = inlined_call_operand.vmem [shape: f32[78,32], index: 3, kind: input, shape index: {}]   ;;  %s2188_s4 = inlined_call_operand.vmem [shape: f32[1,32], index: 4, kind: input, shape index: {}]   ;;  %s2189_s5 = inlined_call_operand.hbm [shape: f32[32,32], index: 5, kind: input, shape index: {}]   ;;  %s2190_s6 = inlined_call_operand.vmem [shape: f32[1,32], index: 6, kind: input, shape index: {}]   ;;  %s2191_s7 = inlined_call_operand.vmem [shape: f32[1,32], index: 7, kind: input, shape index: {}]   ;;  %s2192_s8 = inlined_call_operand.vmem [shape: f32[1,32], index: 8, kind: input, shape index: {}]   ;;  %s2193_s9 = inlined_call_operand.vmem [shape: f32[4,32,32], index: 9, kind: input, shape index: {}]   ;;  %s2194_s10 = inlined_call_operand.vmem [shape: f32[4,1,32], index: 10, kind: input, shape index: {}]   ;;  %s2195_s11 = inlined_call_operand.vmem [shape: f32[4,32,32], index: 11, kind: input, shape index: {}]   ;;  %s2196_s12 = inlined_call_operand.vmem [shape: f32[4,1,32], index: 12, kind: input, shape index: {}]   ;;  %s2197_s13 = inlined_call_operand.vmem [shape: f32[4,1,32], index: 13, kind: input, shape index: {}]   ;;  %s2198_s14 = inlined_call_operand.vmem [shape: f32[4,1,32], index: 14, kind: input, shape index: {}]   ;;  %s2199_s15 = inlined_call_operand.hbm [shape: f32[32,128], index: 15, kind: input, shape index: {}]   ;;  %s2200_s16 = inlined_call_operand.vmem [shape: f32[1,128], index: 16, kind: input, shape index: {}]   ;;  %s2201_s17 = inlined_call_operand.vmem [shape: f32[2,1,128], index: 17, kind: output, shape index: {}]  }
   0x1   :  { %2207 = sst [smem:[#allocation10_spill]] %s2184_s0 }
   0x2   :  { %2208 = sst [smem:[#allocation11_spill]] %s2185_s1 }
   0x3   :  { %2209 = sst [smem:[#allocation12_spill]] %s2189_s5 }
   0x4   :  { %2210 = sst [smem:[#allocation13_spill]] %s2197_s13 }
   0x5   :  { %2211 = sst [smem:[#allocation14_spill]] %s2198_s14 }
   0x6   :  { %2212 = sst [smem:[#allocation15_spill]] %s2199_s15 }
   0x7   :  { %2213 = sst [smem:[#allocation16_spill]] %s2200_s16 }
   0x8   :  { %2214 = sst [smem:[#allocation17_spill]] %s2201_s17 }
   0x9   :  { %22 = vsyncpa [#allocation3], 0 }
   0xa   :  { %24 = vsyncpa [#allocation3 + $0x1], 0 }
   0xb   :  { %25 = vsyncpa [#allocation5], 0  ;;  %s1807_s24 = smov 0   ;;  %s1809_s25 = smov 0  }
   0xc   :  { %s1811_s26 = smov 0   ;;  %s1813_s27 = smov 0  }
   0xd LB: > { %s1826_s28 = sadd.s32 4294967295, %s1710_s27   ;;  %p77_p0 = scmp.ne.s32.totalorder %s1702_s25, %s1698_s24  ;;  %s1710_s27 = sphi %s1813_s27, %s2233_s27   ;;  %s1706_s26 = sphi %s1811_s26, %s2232_s26   ;;  %s1702_s25 = sphi %s1809_s25, %s2231_s25   ;;  %s1698_s24 = sphi %s1807_s24, %s2230_s24  }
   0xe   : > { %p78_p1 = scmp.eq.s32.totalorder %s1826_s28, 0  ;;  %p1410_p2 = scmp.ge.s32.totalorder %s1710_s27, 1 }
   0xf   : > { %p434_p3 = scmp.lt.s32.totalorder %s1710_s27, 3  ;;  %s2216_s5 = sld [smem:[#allocation12_spill]] }
  0x10   : > { %p1834_p4 = por %p78_p1, %p77_p0  ;;  %s1712_s1 = smov [#allocation4]  }
  0x11   : > { %p1841_p5 = pnand %p1410_p2, %p434_p3  ;;  %s453_s20 = sshll.u32 %s1712_s1, 4  ;;  %s454_s20 = int_to_ptr.vmem [resolvable:$true] %s453_s20 }
  0x12   : > { %s2218_s15 = sld [smem:[#allocation15_spill]]  ;;  %s2205_s24 = smov 128  }
  0x13   : > { %p1508_p6 = pneg %p1841_p5  ;;  %s2206_s0 = smov 8  }
  0x14   : > { %s1715_s30 = smov [#allocation6]   ;;  %s1859_s21 = sadd.s32 1, %s1710_s27  }
  0x15   : > { %s451_s18 = sshll.u32 %s2216_s5, 4  ;;  %p1509_p7 = pnand %p1508_p6, %p78_p1  ;;  %s452_s18 = int_to_ptr.hbm [resolvable:$true] %s451_s18 }
  0x16   : > { %s494_s1 = sshll.u32 %s1715_s30, 4  ;;  %s64_s22 = sadd.s32 1, %s1706_s26  ;;  %s495_s1 = int_to_ptr.vmem [resolvable:$true] %s494_s1 }
  0x17   : > { %1511 = dma.hbm_to_vmem [thread:$0]  (!%p1509_p7), %s452_s18, 512, %s454_s20, [#allocation5], %s2205_s24, %s2205_s24, %s2206_s0  }
  0x18   : > { %s492_s23 = sshll.u32 %s2218_s15, 4  ;;  %s61_s5 = ssub.s32 %s1710_s27, %s1859_s21  ;;  %s493_s23 = int_to_ptr.hbm [resolvable:$true] %s492_s23 }
  0x19   : > { %1514 = dma.hbm_to_vmem [thread:$0]  (!%p1509_p7), %s493_s23, 512, %s495_s1, [#allocation5], %s2205_s24, %s2205_s24, %s2206_s0  }
  0x1a   : > { %p71_p8 = scmp.ne.s32.totalorder %s1706_s26, %s1702_s25  ;;  %p62_p9 = scmp.eq.s32.totalorder %s61_s5, 0 }
  0x1b   : > { %p72_p10 = scmp.eq.s32.totalorder %s1710_s27, 0  ;;  %s519_s15 = sand.u32 1, %s1706_s26  }
  0x1c   : > { %s1869_s17 = scalar_select %p62_p9, %s1706_s26, %s64_s22  }
  0x1d   : > { %p73_p11 = por %p72_p10, %p71_p8  ;;  %p1521_p12 = scmp.lt.s32.totalorder %s1710_s27, 2 }
  0x1e   : > { %2219 = sst [smem:[#allocation9_spill]] %s1869_s17  ;;  %s1414_s18 = sshll.u32 %s519_s15, 4 }
  0x1f   : > { %s1495_s20 = sshll.u32 %s1710_s27, 4  ;;  %s2220_s14 = sld [smem:[#allocation11_spill]] }
  0x20   : > { %s523_s1 = scalar_lea.vmem [#allocation2], %s1414_s18  ;;  %p1876_p13 = pnand %p1521_p12, %p73_p11 }
  0x21   : > { %s531_s24 = sshll.u32 %s523_s1, 4  ;;  %s520_s5 = scalar_lea.sflag [#allocation3], %s519_s15  ;;  %s532_s24 = int_to_ptr.vmem [resolvable:$true] %s531_s24 }
  0x22   : > { %p1646_p2 = pneg %p1876_p13 }
  0x25   : > { %s528_s13 = scalar_lea.hbm %s2220_s14, %s1495_s20  ;;  %s1649_s27 = scalar_lea.hbm %s2220_s14, 32 }
  0x26   : > { %s529_s23 = sshll.u32 %s528_s13, 4  ;;  %s530_s23 = int_to_ptr.hbm [resolvable:$true] %s529_s23 }
  0x27   : > { %s1642_s22 = sshra.s32 %s530_s23, 4  ;;  %s1643_s22 = int_to_ptr.hbm [resolvable:$true] %s1642_s22 }
  0x28   : > { %s1644_s17 = scalar_lea.hbm %s1643_s22, 16  ;;  %p1650_p7 = scmp.lt.s32.totalorder %s1643_s22, %s2220_s14 }
  0x29   : > { %p1645_p0 = scmp.ne.s32.totalorder %s1643_s22, %s1644_s17  ;;  %p1651_p8 = scmp.lt.s32.totalorder %s1649_s27, %s1644_s17 }
  0x2b   : > { %p1647_p3 = pnand %p1646_p2, %p1645_p0  ;;  %p1652_p9 = por %p1651_p8, %p1650_p7 }
  0x2d   : > { %p1648_p6 = pneg %p1647_p3 }
  0x2f   : > { %p1653_p10 = pnand %p1652_p9, %p1648_p6 }
  0x31   : > { %1656 = shalt.err (!%p1653_p10)
}
  0x32   : > { %s2222_s15 = smov 8   ;;  %s2223_s30 = smov 128  }
  0x33   : > { %1518 = dma.hbm_to_vmem [thread:$0]  (!%p1876_p13), %s530_s23, 256, %s532_s24, %s520_s5, %s2223_s30, %s2223_s30, %s2222_s15  }
  0x34   : > { %551 = sbr.rel (%p1841_p5) target bundleno = 2287 (0x8ef), region = 88  ;;  %s553_s1 = sand.u32 (!%p1841_p5), 1, %s1702_s25  }
  0x35   : > { %s1418_s16 = sshll.u32 (!%p1841_p5), %s553_s1, 4  ;;  %s554_s13 = scalar_lea.sflag (!%p1841_p5), [#allocation3], %s553_s1 }
  0x36   : > { %s557_s18 = scalar_lea.vmem (!%p1841_p5), [#allocation2], %s1418_s16 }
  0x39   : > { %1689 = dma.done.wait (%p1834_p4), %s554_s13, 256  }
  0x3a   : > { %1691 = vsyncadd (%p1834_p4), %s554_s13, 4294967040 }
  0x3b   : > { %1693 = dma.done.wait (%p78_p1), [#allocation5], 1024  }
  0x3c   : > { %1695 = vsyncadd (%p78_p1), [#allocation5], 4294966272  ;;  %p627_p5 = scmp.lt.s32.totalorder %s1826_s28, 1  ;;  %s2224_s0 = sld [smem:[#allocation10_spill]]  ;;  %v1914_v2 = vld [vmem:[%s557_s18] sm:$0xff]  ;;  %vm664_vm0 = vcmask 130048  }
  0x3d   : > { %v655_v3 = vld [vmem:[%s2187_s3 + $0x48] sm:$0x3f]  ;;  %vm704_vm1 = vcmask 1045504   ;;  %v654_v4 = vld [vmem:[%s2187_s3 + $0x40] sm:$0xff]  ;;  %v653_v5 = vld [vmem:[%s2187_s3 + $0x38] sm:$0xff]  ;;  %vm697_vm2 = vcmask 637952  }
  0x3e   : > { %s2235_s28 = smov (!%p627_p5, %s1826_s28), 1  ;;  %v652_v6 = vld [vmem:[%s2187_s3 + $0x30] sm:$0xff]  ;;  %v1930_v7 = vld [vmem:[%s557_s18 + $0x8] sm:$0xff]  ;;  %v650_v9 = vld [vmem:[%s2187_s3 + $0x20] sm:$0xff]  ;;  %v1716_v23 = vmov 0   ;;  %vm736_vm3 = vcmask 261120  }
  0x3f   : > { %s1496_s17 = sshll.u32 %s2235_s28, 4  ;;  %v651_v8 = vld [vmem:[%s2187_s3 + $0x28] sm:$0xff]  ;;  %v649_v10 = vld [vmem:[%s2187_s3 + $0x18] sm:$0xff]  ;;  %v648_v11 = vld [vmem:[%s2187_s3 + $0x10] sm:$0xff]  ;;  %1561 = vset.pattern.permute.xlu0 %v1716_v23  ;;  %s2228_s5 = sld [smem:[#allocation17_spill]] }
  0x40   : > { %v647_v12 = vld [vmem:[%s2187_s3 + $0x8] sm:$0xff]  ;;  %v646_v13 = vld [vmem:[%s2187_s3] sm:$0xff]  ;;  %v660_v14 = vld [vmem:[#allocation4 + $0x18] sm:$0xff]  ;;  %s636_s1 = scalar_lea.vmem %s2186_s2, %s1496_s17 }
  0x41   : > { %755 = vmatpush.msra.mxu2 %v660_v14  ;;  %v659_v19 = vld [vmem:[#allocation4 + $0x10] sm:$0xff]  ;;  %v658_v20 = vld [vmem:[#allocation4 + $0x8] sm:$0xff]  ;;  %v657_v21 = vld [vmem:[#allocation4] sm:$0xff] }
  0x42   : > { %s631_s29 = scalar_lea.vmem %s2224_s0, %s1496_s17  ;;  %v645_v22 = vld [vmem:[%s636_s1 + $0x8] sm:$0xff]  ;;  %v644_v24 = vld [vmem:[%s636_s1] sm:$0xff]  ;;  %v793_v33 = vld [vmem:[%s2193_s9 + $0x18] sm:$0xff]  ;;  %s2225_s17 = sld [smem:[#allocation13_spill]] }
  0x43   : > { %v641_v0 = vld [vmem:[%s631_s29 + $0x8] sm:$0xff]  ;;  %v640_v1 = vld [vmem:[%s631_s29] sm:$0xff]  ;;  %756 = vmatpush.msra.mxu2 %v659_v19  ;;  %773 = vperm.xlu0 %1561, %v645_v22   ;;  %v792_v34 = vld [vmem:[%s2193_s9 + $0x10] sm:$0xff]  ;;  %s2226_s0 = sld [smem:[#allocation14_spill]] }
  0x44   : > { %685 = vmatpush.msra.mxu1 %v641_v0  ;;  %v1562_v25 = vld [vmem:[%s2188_s4] ss:$0 sm:$0xff]  ;;  %846 = vmatpush.msra.mxu0 %v793_v33  ;;  %v791_v51 = vld [vmem:[%s2193_s9 + $0x8] sm:$0xff]  ;;  %v798_v53 = vld [vmem:[%s2195_s11 + $0x18] sm:$0xff]  ;;  %s2227_s29 = sld [smem:[#allocation16_spill]] }
  0x45   : > { %757 = vmatpush.msra.mxu2 %v658_v20  ;;  %v1563_v35 = vld [vmem:[%s2190_s6] ss:$0 sm:$0xff]  ;;  %v797_v58 = vld [vmem:[%s2195_s11 + $0x10] sm:$0xff]  ;;  %v796_v59 = vld [vmem:[%s2195_s11 + $0x8] sm:$0xff]  ;;  %s639_s22 = scalar_lea.vmem %s2228_s5, %s2235_s28 }
  0x46   : > { %686 = vmatpush.msra.mxu1 %v640_v1  ;;  %847 = vmatpush.msra.mxu0 %v792_v34  ;;  %v1564_v43 = vld [vmem:[%s2191_s7] ss:$0 sm:$0xff]  ;;  %v1439_v23 = vld [vmem:[%s2193_s9 + $0x28] sm:$0xff]  ;;  %v1570_v34 = vld [vmem:[%s2194_s10 + $0x1] ss:$0 sm:$0xff] }
  0x47   : > { %1425 = vmatmul.msk.f32.vlgmr.msra.gmra.mxu1 %vm664_vm0, %v1914_v2  ;;  %758 = vmatpush.msra.mxu2 %v657_v21  ;;  %v1565_v47 = vld [vmem:[%s2192_s8] ss:$0 sm:$0xff] }
  0x48   : > { %1427 = vmatpush.msk.msrb.mxu1 %vm704_vm1, %v655_v3  ;;  %848 = vmatpush.msra.mxu0 %v791_v51  ;;  %v790_v52 = vld [vmem:[%s2193_s9] sm:$0xff] }
  0x49   : > { %v795_v60 = vld [vmem:[%s2195_s11] sm:$0xff] }
  0x4a   : > { %715 = vmatpush.msrb.mxu1 %v654_v4  ;;  %849 = vmatpush.msra.mxu0 %v790_v52  ;;  %v1566_v61 = vld [vmem:[%s2194_s10] ss:$0 sm:$0xff]  ;;  %v1572_v51 = vld [vmem:[%s2225_s17 + $0x1] ss:$0 sm:$0xff] }
  0x4b   : > { %768 = vperm.xlu0 %1561, %v644_v24   ;;  %v1569_v19 = vld [vmem:[%s2226_s0] ss:$0 sm:$0xff] }
  0x4c   : > { %716 = vmatpush.msrb.mxu1 %v653_v5  ;;  %v1441_v5 = vld [vmem:[%s2193_s9 + $0x38] sm:$0xff]  ;;  %v1438_v24 = vld [vmem:[%s2193_s9 + $0x20] sm:$0xff] }
  0x4d   : > { %967 = vmatpush.msrb.mxu0 %v1441_v5  ;;  %v1443_v33 = vld [vmem:[%s2195_s11 + $0x20] sm:$0xff] }
  0x4e   : > { %717 = vmatpush.msrb.mxu1 %v652_v6  ;;  %v1440_v6 = vld [vmem:[%s2193_s9 + $0x30] sm:$0xff]  ;;  %v1461_v5 = vld [vmem:[%s2195_s11 + $0x40] sm:$0xff] }
  0x4f   : > { %1426 = vmatmul.msk.f32.gmra.mxu1 %vm664_vm0, %v1930_v7  ;;  %968 = vmatpush.msrb.mxu0 %v1440_v6  ;;  %v1574_v6 = vld [vmem:[%s2194_s10 + $0x2] ss:$0 sm:$0xff] }
  0x50   : > { %718 = vmatpush.msrb.mxu1 %v651_v8  ;;  %v1567_v8 = vld [vmem:[%s2196_s12] ss:$0 sm:$0xff] }
  0x51   : > { %969 = vmatpush.msrb.mxu0 %v1439_v23  ;;  %v1576_v23 = vld [vmem:[%s2225_s17 + $0x2] ss:$0 sm:$0xff] }
  0x52   : > { %719 = vmatpush.msrb.mxu1 %v650_v9 }
  0x53   : > { %970 = vmatpush.msrb.mxu0 %v1438_v24 }
  0x54   : > { %720 = vmatpush.msrb.mxu1 %v649_v10 }
  0x56   : > { %721 = vmatpush.msrb.mxu1 %v648_v11 }
  0x58   : > { %722 = vmatpush.msrb.mxu1 %v647_v12 }
  0x5a   : > { %723 = vmatpush.msrb.mxu1 %v646_v13 }
  0xb5   : > { %v1962_v32 = vpop.permute.xlu0 %773 }
  0xbd   : > { %v1973_v38 = vpop.permute.xlu0 %768 }
  0xc4   : > { %v688_v15 = vpop.f32.mrf.mxu1 }
  0xc5   : > { %v689_v16 = vadd.f32 %v688_v15, %v640_v1 }
  0xc7   : > { %1428 = vmatmul.msk.f32.vlgmr.msrb.gmra.mxu1 %vm697_vm2, %v689_v16  ;;  %v1568_v16 = vld [vmem:[%s2225_s17] ss:$0 sm:$0xff] }
  0xcc   : > { %v691_v17 = vpop.f32.mrf.mxu1 }
  0xcd   : > { %v692_v18 = vadd.f32 %v691_v17, %v641_v0 }
  0xcf   : > { %1429 = vmatmul.msk.f32.gmra.mxu1 %vm697_vm2, %v692_v18 }
 0x144   : > { %v725_v26 = vpop.f32.mrf.mxu1 }
 0x145   : > { %v726_v27 = vadd.f32 %v1562_v25, %v725_v26 }
 0x147   : > { %v731_v28 = vmax.f32 %v726_v27, 0.0 }
 0x149   : > { %1430 = vmatmul.msk.f32.vlgmr.msra.gmra.mxu2 %vm736_vm3, %v731_v28 }
 0x14c   : > { %v728_v29 = vpop.f32.mrf.mxu1 }
 0x14d   : > { %v729_v30 = vadd.f32 %v1562_v25, %v728_v29  ;;  %v1446_v25 = vld [vmem:[%s2195_s11 + $0x38] sm:$0xff] }
 0x14e   : > { %1001 = vmatpush.msra.mxu1 %v1446_v25 }
 0x14f   : > { %v732_v31 = vmax.f32 %v729_v30, 0.0  ;;  %v1445_v30 = vld [vmem:[%s2195_s11 + $0x30] sm:$0xff] }
 0x150   : > { %1002 = vmatpush.msra.mxu1 %v1445_v30 }
 0x151   : > { %1431 = vmatmul.msk.f32.gmra.mxu2 %vm736_vm3, %v732_v31  ;;  %v1444_v31 = vld [vmem:[%s2195_s11 + $0x28] sm:$0xff] }
 0x152   : > { %1003 = vmatpush.msra.mxu1 %v1444_v31  ;;  %v1475_v31 = vld [vmem:[%s2193_s9 + $0x68] sm:$0xff] }
 0x154   : > { %1004 = vmatpush.msra.mxu1 %v1443_v33  ;;  %v1474_v33 = vld [vmem:[%s2193_s9 + $0x60] sm:$0xff] }
 0x1cc   : > { %v760_v36 = vpop.f32.mrf.mxu2 }
 0x1cd   : > { %v761_v37 = vadd.f32 %v1563_v35, %v760_v36 }
 0x1cf   : > { %v776_v39 = vmul.f32 %v1973_v38, %v761_v37 }
 0x1d1   : > { %v778_v44 = vmax.f32 %v776_v39, 0.0 }
 0x1d3   : > { %v783_v48 = vmul.f32 %v1564_v43, %v778_v44  ;;  %v1571_v44 = vld [vmem:[%s2196_s12 + $0x1] ss:$0 sm:$0xff] }
 0x1d4   : > { %v763_v40 = vpop.f32.mrf.mxu2 }
 0x1d5   : > { %v764_v41 = vadd.f32 %v1563_v35, %v763_v40  ;;  %v788_v50 = vadd.f32 %v1565_v47, %v783_v48 }
 0x1d7   : > { %v777_v42 = vmul.f32 %v1962_v32, %v764_v41 }
 0x1d9   : > { %v779_v45 = vmax.f32 %v777_v42, 0.0  ;;  %v1459_v42 = vld [vmem:[%s2193_s9 + $0x58] sm:$0xff] }
 0x1db   : > { %v784_v46 = vmul.f32 %v1564_v43, %v779_v45  ;;  %v1458_v43 = vld [vmem:[%s2193_s9 + $0x50] sm:$0xff] }
 0x1dd   : > { %v789_v49 = vadd.f32 %v1565_v47, %v784_v46 }
 0x1df   : > { %816 = vmatpush.msra.mxu3 %v789_v49 }
 0x1e1   : > { %817 = vmatpush.msra.mxu3 %v788_v50 }
 0x1e2   : > { %1432 = vmatmul.msk.f32.vlgmr.msra.gmra.mxu3 %vm664_vm0, %v1914_v2 }
 0x1e3   : > { %880 = vmatpush.msrb.mxu3 %v798_v53 }
 0x1e5   : > { %881 = vmatpush.msrb.mxu3 %v797_v58 }
 0x1e7   : > { %882 = vmatpush.msrb.mxu3 %v796_v59  ;;  %v1457_v59 = vld [vmem:[%s2193_s9 + $0x48] sm:$0xff] }
 0x1e9   : > { %883 = vmatpush.msrb.mxu3 %v795_v60  ;;  %v1456_v60 = vld [vmem:[%s2193_s9 + $0x40] sm:$0xff] }
 0x1ea   : > { %1433 = vmatmul.msk.f32.gmra.mxu3 %vm664_vm0, %v1930_v7 }
 0x265   : > { %v819_v54 = vpop.f32.mrf.mxu3 }
 0x266   : > { %v820_v55 = vadd.f32 %v819_v54, %v788_v50 }
 0x268   : > { %1434 = vmatmul.msk.f32.vlgmr.msra.gmra.mxu0 %vm736_vm3, %v820_v55 }
 0x26d   : > { %v822_v56 = vpop.f32.mrf.mxu3 }
 0x26e   : > { %v823_v57 = vadd.f32 %v822_v56, %v789_v49  ;;  %v1573_v56 = vld [vmem:[%s2226_s0 + $0x1] ss:$0 sm:$0xff] }
 0x270   : > { %1435 = vmatmul.msk.f32.gmra.mxu0 %vm736_vm3, %v823_v57 }
 0x2e5   : > { %v851_v62 = vpop.f32.mrf.mxu0 }
 0x2e6   : > { %v852_v63 = vadd.f32 %v1566_v61, %v851_v62 }
 0x2e8   : > { %v857_v0 = vmax.f32 %v852_v63, 0.0 }
 0x2ea   : > { %1436 = vmatmul.msk.f32.vlgmr.msrb.gmra.mxu3 %vm736_vm3, %v857_v0 }
 0x2ed   : > { %v854_v1 = vpop.f32.mrf.mxu0 }
 0x2ee   : > { %v855_v3 = vadd.f32 %v1566_v61, %v854_v1  ;;  %v1464_v61 = vld [vmem:[%s2195_s11 + $0x58] sm:$0xff] }
 0x2ef   : > { %1122 = vmatpush.msra.mxu0 %v1464_v61  ;;  %v1581_v61 = vld [vmem:[%s2226_s0 + $0x3] ss:$0 sm:$0xff] }
 0x2f0   : > { %v858_v4 = vmax.f32 %v855_v3, 0.0  ;;  %v1463_v3 = vld [vmem:[%s2195_s11 + $0x50] sm:$0xff] }
 0x2f1   : > { %1123 = vmatpush.msra.mxu0 %v1463_v3 }
 0x2f2   : > { %1437 = vmatmul.msk.f32.gmra.mxu3 %vm736_vm3, %v858_v4  ;;  %v1462_v4 = vld [vmem:[%s2195_s11 + $0x48] sm:$0xff] }
 0x2f3   : > { %1124 = vmatpush.msra.mxu0 %v1462_v4 }
 0x2f5   : > { %1125 = vmatpush.msra.mxu0 %v1461_v5 }
 0x36d   : > { %v885_v9 = vpop.f32.mrf.mxu3 }
 0x36e   : > { %v886_v10 = vadd.f32 %v1567_v8, %v885_v9 }
 0x370   : > { %v891_v11 = vmul.f32 %v886_v10, %v1973_v38 }
 0x372   : > { %v893_v14 = vmax.f32 %v891_v11, 0.0 }
 0x374   : > { %v898_v20 = vmul.f32 %v1568_v16, %v893_v14  ;;  %v1477_v14 = vld [vmem:[%s2193_s9 + $0x78] sm:$0xff] }
 0x375   : > { %v888_v12 = vpop.f32.mrf.mxu3 }
 0x376   : > { %v889_v13 = vadd.f32 %v1567_v8, %v888_v12  ;;  %v903_v22 = vadd.f32 %v1569_v19, %v898_v20 }
 0x378   : > { %v892_v15 = vmul.f32 %v889_v13, %v1962_v32 }
 0x37a   : > { %v894_v17 = vmax.f32 %v892_v15, 0.0  ;;  %v1476_v15 = vld [vmem:[%s2193_s9 + $0x70] sm:$0xff] }
 0x37c   : > { %v899_v18 = vmul.f32 %v1568_v16, %v894_v17  ;;  %v1575_v16 = vld [vmem:[%s2196_s12 + $0x2] ss:$0 sm:$0xff] }
 0x37e   : > { %v904_v21 = vadd.f32 %v1569_v19, %v899_v18 }
 0x380   : > { %937 = vmatpush.msrb.mxu2 %v904_v21 }
 0x382   : > { %938 = vmatpush.msrb.mxu2 %v903_v22 }
 0x383   : > { %1450 = vmatmul.msk.f32.vlgmr.msrb.gmra.mxu2 %vm664_vm0, %v1914_v2 }
 0x384   : > { %1088 = vmatpush.msra.mxu2 %v1459_v42 }
 0x386   : > { %1089 = vmatpush.msra.mxu2 %v1458_v43 }
 0x388   : > { %1090 = vmatpush.msra.mxu2 %v1457_v59 }
 0x38a   : > { %1091 = vmatpush.msra.mxu2 %v1456_v60 }
 0x38b   : > { %1451 = vmatmul.msk.f32.gmra.mxu2 %vm664_vm0, %v1930_v7 }
 0x406   : > { %v940_v26 = vpop.f32.mrf.mxu2 }
 0x407   : > { %v941_v27 = vadd.f32 %v940_v26, %v903_v22 }
 0x409   : > { %1452 = vmatmul.msk.f32.vlgmr.msrb.gmra.mxu0 %vm736_vm3, %v941_v27 }
 0x40e   : > { %v943_v28 = vpop.f32.mrf.mxu2 }
 0x40f   : > { %v944_v29 = vadd.f32 %v943_v28, %v904_v21  ;;  %v1577_v28 = vld [vmem:[%s2226_s0 + $0x2] ss:$0 sm:$0xff] }
 0x411   : > { %1453 = vmatmul.msk.f32.gmra.mxu0 %vm736_vm3, %v944_v29 }
 0x486   : > { %v972_v35 = vpop.f32.mrf.mxu0 }
 0x487   : > { %v973_v36 = vadd.f32 %v1570_v34, %v972_v35 }
 0x489   : > { %v978_v37 = vmax.f32 %v973_v36, 0.0 }
 0x48b   : > { %1454 = vmatmul.msk.f32.vlgmr.msra.gmra.mxu1 %vm736_vm3, %v978_v37  ;;  %v1481_v37 = vld [vmem:[%s2195_s11 + $0x70] sm:$0xff] }
 0x48e   : > { %v975_v39 = vpop.f32.mrf.mxu0 }
 0x48f   : > { %v976_v40 = vadd.f32 %v1570_v34, %v975_v39  ;;  %v1482_v34 = vld [vmem:[%s2195_s11 + $0x78] sm:$0xff]  ;;  %v1480_v39 = vld [vmem:[%s2195_s11 + $0x68] sm:$0xff] }
 0x490   : > { %1243 = vmatpush.msrb.mxu2 %v1482_v34 }
 0x491   : > { %v979_v41 = vmax.f32 %v976_v40, 0.0  ;;  %v1479_v40 = vld [vmem:[%s2195_s11 + $0x60] sm:$0xff] }
 0x492   : > { %1244 = vmatpush.msrb.mxu2 %v1481_v37 }
 0x493   : > { %1455 = vmatmul.msk.f32.gmra.mxu1 %vm736_vm3, %v979_v41  ;;  %v1578_v41 = vld [vmem:[%s2194_s10 + $0x3] ss:$0 sm:$0xff] }
 0x494   : > { %1245 = vmatpush.msrb.mxu2 %v1480_v39 }
 0x496   : > { %1246 = vmatpush.msrb.mxu2 %v1479_v40 }
 0x508   : > { %v1006_v45 = vpop.f32.mrf.mxu1 }
 0x509   : > { %v1007_v46 = vadd.f32 %v1571_v44, %v1006_v45 }
 0x50b   : > { %v1012_v47 = vmul.f32 %v1007_v46, %v1973_v38 }
 0x50d   : > { %v1014_v50 = vmax.f32 %v1012_v47, 0.0 }
 0x50f   : > { %v1019_v54 = vmul.f32 %v1572_v51, %v1014_v50  ;;  %v1278_v50 = vld [vmem:[#allocation6 + $0x8] sm:$0xff] }
 0x510   : > { %v1009_v48 = vpop.f32.mrf.mxu1 }
 0x511   : > { %v1010_v49 = vadd.f32 %v1571_v44, %v1009_v48  ;;  %v1024_v58 = vadd.f32 %v1573_v56, %v1019_v54  ;;  %v1280_v48 = vld [vmem:[#allocation6 + $0x18] sm:$0xff] }
 0x512   : > { %1297 = vmatpush.msrb.mxu0 %v1280_v48 }
 0x513   : > { %v1013_v52 = vmul.f32 %v1010_v49, %v1962_v32  ;;  %v1279_v49 = vld [vmem:[#allocation6 + $0x10] sm:$0xff] }
 0x514   : > { %1298 = vmatpush.msrb.mxu0 %v1279_v49 }
 0x515   : > { %v1015_v53 = vmax.f32 %v1013_v52, 0.0  ;;  %v1277_v52 = vld [vmem:[#allocation6] sm:$0xff] }
 0x516   : > { %1299 = vmatpush.msrb.mxu0 %v1278_v50 }
 0x517   : > { %v1020_v55 = vmul.f32 %v1572_v51, %v1015_v53  ;;  %v1579_v51 = vld [vmem:[%s2196_s12 + $0x3] ss:$0 sm:$0xff] }
 0x518   : > { %1300 = vmatpush.msrb.mxu0 %v1277_v52 }
 0x519   : > { %v1025_v57 = vadd.f32 %v1573_v56, %v1020_v55 }
 0x51b   : > { %1058 = vmatpush.msra.mxu3 %v1025_v57 }
 0x51d   : > { %1059 = vmatpush.msra.mxu3 %v1024_v58 }
 0x51e   : > { %1468 = vmatmul.msk.f32.vlgmr.msra.gmra.mxu3 %vm664_vm0, %v1914_v2 }
 0x51f   : > { %1209 = vmatpush.msrb.mxu3 %v1477_v14 }
 0x521   : > { %1210 = vmatpush.msrb.mxu3 %v1476_v15 }
 0x523   : > { %1211 = vmatpush.msrb.mxu3 %v1475_v31 }
 0x525   : > { %1212 = vmatpush.msrb.mxu3 %v1474_v33 }
 0x526   : > { %1469 = vmatmul.msk.f32.gmra.mxu3 %vm664_vm0, %v1930_v7 }
 0x5a1   : > { %v1061_v62 = vpop.f32.mrf.mxu3 }
 0x5a2   : > { %v1062_v63 = vadd.f32 %v1061_v62, %v1024_v58 }
 0x5a4   : > { %1470 = vmatmul.msk.f32.vlgmr.msra.gmra.mxu2 %vm736_vm3, %v1062_v63 }
 0x5a9   : > { %v1064_v0 = vpop.f32.mrf.mxu3 }
 0x5aa   : > { %v1065_v1 = vadd.f32 %v1064_v0, %v1025_v57  ;;  %v1580_v57 = vld [vmem:[%s2225_s17 + $0x3] ss:$0 sm:$0xff] }
 0x5ac   : > { %1471 = vmatmul.msk.f32.gmra.mxu2 %vm736_vm3, %v1065_v1 }
 0x627   : > { %v1093_v8 = vpop.f32.mrf.mxu2 }
 0x628   : > { %v1094_v9 = vadd.f32 %v1574_v6, %v1093_v8 }
 0x62a   : > { %v1099_v10 = vmax.f32 %v1094_v9, 0.0 }
 0x62c   : > { %1472 = vmatmul.msk.f32.vlgmr.msra.gmra.mxu0 %vm736_vm3, %v1099_v10 }
 0x62f   : > { %v1096_v11 = vpop.f32.mrf.mxu2 }
 0x630   : > { %v1097_v12 = vadd.f32 %v1574_v6, %v1096_v11 }
 0x632   : > { %v1100_v13 = vmax.f32 %v1097_v12, 0.0 }
 0x634   : > { %1473 = vmatmul.msk.f32.gmra.mxu0 %vm736_vm3, %v1100_v13 }
 0x6a9   : > { %v1127_v17 = vpop.f32.mrf.mxu0 }
 0x6aa   : > { %v1128_v18 = vadd.f32 %v1575_v16, %v1127_v17 }
 0x6ac   : > { %v1133_v19 = vmul.f32 %v1128_v18, %v1973_v38 }
 0x6ae   : > { %v1135_v22 = vmax.f32 %v1133_v19, 0.0 }
 0x6b0   : > { %v1140_v26 = vmul.f32 %v1576_v23, %v1135_v22 }
 0x6b1   : > { %v1130_v20 = vpop.f32.mrf.mxu0 }
 0x6b2   : > { %v1131_v21 = vadd.f32 %v1575_v16, %v1130_v20  ;;  %v1145_v30 = vadd.f32 %v1577_v28, %v1140_v26 }
 0x6b4   : > { %v1134_v24 = vmul.f32 %v1131_v21, %v1962_v32 }
 0x6b6   : > { %v1136_v25 = vmax.f32 %v1134_v24, 0.0 }
 0x6b8   : > { %v1141_v27 = vmul.f32 %v1576_v23, %v1136_v25 }
 0x6ba   : > { %v1146_v29 = vadd.f32 %v1577_v28, %v1141_v27 }
 0x6bc   : > { %1179 = vmatpush.msrb.mxu1 %v1146_v29 }
 0x6be   : > { %1180 = vmatpush.msrb.mxu1 %v1145_v30 }
 0x6bf   : > { %1486 = vmatmul.msk.f32.vlgmr.msrb.gmra.mxu1 %vm664_vm0, %v1914_v2 }
 0x6c7   : > { %1487 = vmatmul.msk.f32.gmra.mxu1 %vm664_vm0, %v1930_v7 }
 0x73c   : > { %v1182_v35 = vpop.f32.mrf.mxu1 }
 0x73d   : > { %v1183_v2 = vadd.f32 %v1182_v35, %v1145_v30 }
 0x73f   : > { %1488 = vmatmul.msk.f32.vlgmr.msrb.gmra.mxu3 %vm736_vm3, %v1183_v2 }
 0x744   : > { %v1185_v7 = vpop.f32.mrf.mxu1 }
 0x745   : > { %v1186_v36 = vadd.f32 %v1185_v7, %v1146_v29 }
 0x747   : > { %1489 = vmatmul.msk.f32.gmra.mxu3 %vm736_vm3, %v1186_v36 }
 0x7c2   : > { %v1214_v42 = vpop.f32.mrf.mxu3 }
 0x7c3   : > { %v1215_v43 = vadd.f32 %v1578_v41, %v1214_v42 }
 0x7c5   : > { %v1220_v44 = vmax.f32 %v1215_v43, 0.0 }
 0x7c7   : > { %1490 = vmatmul.msk.f32.vlgmr.msrb.gmra.mxu2 %vm736_vm3, %v1220_v44 }
 0x7ca   : > { %v1217_v45 = vpop.f32.mrf.mxu3 }
 0x7cb   : > { %v1218_v46 = vadd.f32 %v1578_v41, %v1217_v45 }
 0x7cd   : > { %v1221_v47 = vmax.f32 %v1218_v46, 0.0 }
 0x7cf   : > { %1491 = vmatmul.msk.f32.gmra.mxu2 %vm736_vm3, %v1221_v47 }
 0x84a   : > { %v1248_v53 = vpop.f32.mrf.mxu2 }
 0x84b   : > { %v1249_v54 = vadd.f32 %v1579_v51, %v1248_v53 }
 0x84d   : > { %v1254_v55 = vmul.f32 %v1249_v54, %v1973_v38 }
 0x84f   : > { %v1256_v56 = vmax.f32 %v1254_v55, 0.0 }
 0x851   : > { %v1261_v60 = vmul.f32 %v1580_v57, %v1256_v56 }
 0x852   : > { %v1251_v58 = vpop.f32.mrf.mxu2 }
 0x853   : > { %v1252_v59 = vadd.f32 %v1579_v51, %v1251_v58  ;;  %v1266_v0 = vadd.f32 %v1581_v61, %v1261_v60 }
 0x855   : > { %v1255_v62 = vmul.f32 %v1252_v59, %v1962_v32  ;;  %v1268_v38 = vsel %vm736_vm3, %v1266_v0, 0.0  ;;  %v1281_v32 = vld [vmem:[%s2227_s29] sm:$0x1] }
 0x857   : > { %v1257_v63 = vmax.f32 %v1255_v62, 0.0 }
 0x859   : > { %v1262_v1 = vmul.f32 %v1580_v57, %v1257_v63 }
 0x85b   : > { %v1267_v3 = vadd.f32 %v1581_v61, %v1262_v1 }
 0x85d   : > { %v1269_v4 = vsel %vm736_vm3, %v1267_v3, 0.0 }
 0x85e   : > { %v1270_v5 = vadd.f32 %v1269_v4, %v1268_v38 }
 0x860   : > { %v1271_v6 = vrot.slane %v1270_v5, 4 }
 0x862   : > { %v1272_v8 = vadd.f32 %v1271_v6, %v1270_v5 }
 0x864   : > { %v1273_v9 = vrot.slane %v1272_v8, 2 }
 0x866   : > { %v1274_v10 = vadd.f32 %v1273_v9, %v1272_v8 }
 0x868   : > { %v1275_v11 = vrot.slane %v1274_v10, 1 }
 0x86a   : > { %v1276_v12 = vadd.f32 %v1275_v11, %v1274_v10 }
 0x86c   : > { %1492 = vmatmul.msk.f32.vlgmr.msrb.gmra.mxu0 %vm736_vm3, %v1276_v12 }
 0x8e9   : > { %v1302_v13 = vpop.f32.mrf.mxu0 }
 0x8ea   : > { %v1303_v14 = vadd.f32 %v1302_v13, %v1281_v32 }
 0x8ec   : > { %v1305_v15 = vmax.f32 %v1303_v14, 0.0 }
 0x8ee   : > { %1306 = vst [vmem:[%s639_s22] sm:$0x1] %v1305_v15 }
 0x8ef PF: > { %s2229_s27 = sld [smem:[#allocation9_spill]]  ;;  %p28_p1 = scmp.ge.s32.totalorder %s1859_s21, 4  }
 0x8f0   : > { %s2230_s24 = smov %s1702_s25  ;;  %s2231_s25 = smov %s1706_s26 }
 0x8f1   :  { %30 = sbr.rel (!%p28_p1) target bundleno = 13 (0xd), region = 160 }
 0x8f5   : > { %s2232_s26 = smov %s2229_s27  ;;  %s2233_s27 = smov %s1859_s21 }
 0x8f6   :  { %1324 = vsyncpa [#allocation3], 1 }
 0x8f7   :  { %1326 = vsyncpa [#allocation3 + $0x1], 1 }
 0x8f8   :  { %1327 = vsyncpa [#allocation5], 1 }

// kernel: net_forward.4
= control target key start
LH: loop header
LB: loop body
LE: loop exit
PB: predicated region body
PF: predicated region fallthrough
CT: control target
= control target key end

     0   :  { %9 = vsyncpa [#allocation3], 0  ;;  %s5177_s15 = smov 0   ;;  %s7317_s0 = inlined_call_operand.vmem [shape: s32[2,1024,1], index: 0, kind: input, shape index: {}]   ;;  %s7318_s1 = inlined_call_operand.vmem [shape: f32[32,128], index: 1, kind: input, shape index: {}]   ;;  %s7319_s2 = inlined_call_operand.hbm [shape: bf16[8,32,1024], index: 2, kind: input, shape index: {}]   ;;  %s7320_s3 = inlined_call_operand.vmem [shape: f32[32,1], index: 3, kind: input, shape index: {}]   ;;  %s7321_s4 = inlined_call_operand.vmem [shape: f32[2,32,128], index: 4, kind: output, shape index: {}]  }
   0x1 LB: > { %s149_s18 = sshll.u32 %s7319_s2, 4  ;;  %s4142_s19 = sadd.s32 4294967295, %s5138_s15   ;;  %s5138_s15 = sphi %s5177_s15, %s15_s15   ;;  %s150_s18 = int_to_ptr.hbm [resolvable:$true] %s149_s18 }
   0x2   : > { %p4144_p0 = scmp.ge.s32.totalorder %s5138_s15, 1  ;;  %p135_p1 = scmp.lt.s32.totalorder %s5138_s15, 3 }
   0x3   : > { %p5073_p2 = scmp.eq.s32.totalorder %s4142_s19, 0  ;;  %s5140_s20 = smov [#allocation2]  }
   0x4   : > { %p136_p3 = pnand %p4144_p0, %p135_p1  ;;  %s151_s21 = sshll.u32 %s5140_s20, 4  ;;  %s152_s21 = int_to_ptr.vmem [resolvable:$true] %s151_s21 }
   0x5   : > { %s5141_s22 = smov 512   ;;  %s5142_s23 = smov 32  }
   0x6   : > { %p5069_p4 = pneg %p136_p3  ;;  %178 = sbr.rel (%p136_p3) target bundleno = 1969 (0x7b1), region = 36 }
   0x8   : > { %p5070_p5 = pnand %p5073_p2, %p5069_p4 }
   0xa   : > { %5072 = dma.hbm_to_vmem [thread:$0]  (!%p5070_p5), %s150_s18, 16384, %s152_s21, [#allocation3], %s5141_s22, %s5141_s22, %s5142_s23  }
   0xb   : > { %5133 = dma.done.wait (%p5073_p2), [#allocation3], 16384  }
   0xc   : > { %5135 = vsyncadd (%p5073_p2), [#allocation3], 4294950912  ;;  %p205_p6 = scmp.lt.s32.totalorder %s4142_s19, 1  ;;  %v5143_v0 = vmov 0   ;;  %v1116_v31 = vld [vmem:[%s7318_s1 + $0x18] sm:$0xff]  ;;  %v1115_v32 = vld [vmem:[%s7318_s1 + $0x10] sm:$0xff]  ;;  %v343_v50 = vlaneseq }
   0xd   : > { %5097 = vset.pattern.permute.xlu2 %v5143_v0  ;;  %5096 = vset.pattern.permute.xlu1 %v5143_v0  ;;  %v1114_v36 = vld [vmem:[%s7318_s1 + $0x8] sm:$0xff]  ;;  %v1113_v37 = vld [vmem:[%s7318_s1] sm:$0xff]  ;;  %vm1117_vm0 = vcmask 261120   ;;  %v7322_v58 = vmov 0.0   ;;  %s5145_s12 = smov 127   ;;  %s5146_s13 = smov 126  }
   0xe   : > { %5095 = vset.pattern.permute.xlu0 %v5143_v0  ;;  %s7758_s19 = smov (!%p205_p6, %s4142_s19), 1  ;;  %1514 = vmatpush.msra.mxu0 %v1116_v31  ;;  %v5259_v54 = vand.u32 127, %v343_v50  ;;  %s5147_s14 = smov 125  }
   0xf   : > { %s4923_s24 = sshll.u32 %s7758_s19, 10  ;;  %5054 = vmatpush.msra.mxu2 %v1116_v31  ;;  %5055 = vmatpush.msra.mxu3 %v1116_v31  ;;  %s5148_s16 = smov 124  }
  0x10   : > { %s5194_s27 = scalar_lea.vmem %s7317_s0, %s4923_s24  ;;  %5053 = vmatpush.msra.mxu1 %v1116_v31  ;;  %1515 = vmatpush.msra.mxu0 %v1115_v32  ;;  %7490 = vst [vmem:[#allocation5_spill] sm:$0xff] %v5259_v54  ;;  %s5149_s17 = smov 123  }
  0x11   : > { %v219_v1 = vld [vmem:[%s5194_s27 + $0x20] sm:$0xff]  ;;  %v217_v2 = vld [vmem:[%s5194_s27 + $0x10] sm:$0xff]  ;;  %v220_v4 = vld [vmem:[%s5194_s27 + $0x28] sm:$0xff]  ;;  %5057 = vmatpush.msra.mxu2 %v1115_v32  ;;  %5058 = vmatpush.msra.mxu3 %v1115_v32  ;;  %s5150_s18 = smov 122   ;;  %s5151_s20 = smov 121  }
  0x12   : > { %v215_v3 = vld [vmem:[%s5194_s27] sm:$0xff]  ;;  %358 = vperm.xlu2 %5097, %v219_v1   ;;  %352 = vperm.xlu1 %5096, %v217_v2   ;;  %v218_v5 = vld [vmem:[%s5194_s27 + $0x18] sm:$0xff]  ;;  %v216_v6 = vld [vmem:[%s5194_s27 + $0x8] sm:$0xff] }
  0x13   : > { %346 = vperm.xlu0 %5095, %v215_v3   ;;  %v223_v7 = vld [vmem:[%s5194_s27 + $0x40] sm:$0xff]  ;;  %v222_v8 = vld [vmem:[%s5194_s27 + $0x38] sm:$0xff]  ;;  %v221_v9 = vld [vmem:[%s5194_s27 + $0x30] sm:$0xff]  ;;  %5056 = vmatpush.msra.mxu1 %v1115_v32 }
  0x14   : > { %v226_v10 = vld [vmem:[%s5194_s27 + $0x58] sm:$0xff]  ;;  %v225_v11 = vld [vmem:[%s5194_s27 + $0x50] sm:$0xff]  ;;  %v224_v12 = vld [vmem:[%s5194_s27 + $0x48] sm:$0xff]  ;;  %1516 = vmatpush.msra.mxu0 %v1114_v36  ;;  %5060 = vmatpush.msra.mxu2 %v1114_v36 }
  0x15   : > { %v229_v13 = vld [vmem:[%s5194_s27 + $0x70] sm:$0xff]  ;;  %v228_v14 = vld [vmem:[%s5194_s27 + $0x68] sm:$0xff]  ;;  %v227_v15 = vld [vmem:[%s5194_s27 + $0x60] sm:$0xff]  ;;  %5061 = vmatpush.msra.mxu3 %v1114_v36  ;;  %5059 = vmatpush.msra.mxu1 %v1114_v36 }
  0x16   : > { %v232_v16 = vld [vmem:[%s5194_s27 + $0x88] sm:$0xff]  ;;  %v231_v17 = vld [vmem:[%s5194_s27 + $0x80] sm:$0xff]  ;;  %v230_v18 = vld [vmem:[%s5194_s27 + $0x78] sm:$0xff]  ;;  %1517 = vmatpush.msra.mxu0 %v1113_v37  ;;  %5063 = vmatpush.msra.mxu2 %v1113_v37 }
  0x17   : > { %v235_v19 = vld [vmem:[%s5194_s27 + $0xa0] sm:$0xff]  ;;  %v234_v20 = vld [vmem:[%s5194_s27 + $0x98] sm:$0xff]  ;;  %v233_v21 = vld [vmem:[%s5194_s27 + $0x90] sm:$0xff]  ;;  %5064 = vmatpush.msra.mxu3 %v1113_v37  ;;  %5062 = vmatpush.msra.mxu1 %v1113_v37 }
  0x18   : > { %v238_v22 = vld [vmem:[%s5194_s27 + $0xb8] sm:$0xff]  ;;  %v237_v23 = vld [vmem:[%s5194_s27 + $0xb0] sm:$0xff]  ;;  %v236_v24 = vld [vmem:[%s5194_s27 + $0xa8] sm:$0xff] }
  0x19   : > { %v241_v25 = vld [vmem:[%s5194_s27 + $0xd0] sm:$0xff]  ;;  %v240_v26 = vld [vmem:[%s5194_s27 + $0xc8] sm:$0xff]  ;;  %v239_v27 = vld [vmem:[%s5194_s27 + $0xc0] sm:$0xff] }
  0x1a   : > { %361 = vperm.xlu2 %5097, %v220_v4   ;;  %355 = vperm.xlu1 %5096, %v218_v5   ;;  %v244_v28 = vld [vmem:[%s5194_s27 + $0xe8] sm:$0xff]  ;;  %v243_v29 = vld [vmem:[%s5194_s27 + $0xe0] sm:$0xff]  ;;  %v242_v30 = vld [vmem:[%s5194_s27 + $0xd8] sm:$0xff] }
  0x1b   : > { %349 = vperm.xlu0 %5095, %v216_v6   ;;  %v247_v33 = vld [vmem:[%s5194_s27 + $0x100] sm:$0xff]  ;;  %v246_v34 = vld [vmem:[%s5194_s27 + $0xf8] sm:$0xff]  ;;  %v245_v35 = vld [vmem:[%s5194_s27 + $0xf0] sm:$0xff] }
  0x1c   : > { %v250_v38 = vld [vmem:[%s5194_s27 + $0x118] sm:$0xff]  ;;  %v249_v39 = vld [vmem:[%s5194_s27 + $0x110] sm:$0xff]  ;;  %v248_v40 = vld [vmem:[%s5194_s27 + $0x108] sm:$0xff] }
  0x1d   : > { %v253_v42 = vld [vmem:[%s5194_s27 + $0x130] sm:$0xff]  ;;  %v252_v43 = vld [vmem:[%s5194_s27 + $0x128] sm:$0xff]  ;;  %v251_v44 = vld [vmem:[%s5194_s27 + $0x120] sm:$0xff] }
  0x1e   : > { %v256_v46 = vld [vmem:[%s5194_s27 + $0x148] sm:$0xff]  ;;  %v255_v47 = vld [vmem:[%s5194_s27 + $0x140] sm:$0xff]  ;;  %v254_v48 = vld [vmem:[%s5194_s27 + $0x138] sm:$0xff] }
  0x1f   : > { %v259_v51 = vld [vmem:[%s5194_s27 + $0x160] sm:$0xff]  ;;  %v258_v52 = vld [vmem:[%s5194_s27 + $0x158] sm:$0xff]  ;;  %v257_v53 = vld [vmem:[%s5194_s27 + $0x150] sm:$0xff] }
  0x20   : > { %v262_v60 = vld [vmem:[%s5194_s27 + $0x178] sm:$0xff]  ;;  %v261_v61 = vld [vmem:[%s5194_s27 + $0x170] sm:$0xff]  ;;  %v260_v62 = vld [vmem:[%s5194_s27 + $0x168] sm:$0xff] }
  0x21   : > { %v265_v3 = vld [vmem:[%s5194_s27 + $0x190] sm:$0xff]  ;;  %v264_v4 = vld [vmem:[%s5194_s27 + $0x188] sm:$0xff]  ;;  %v263_v5 = vld [vmem:[%s5194_s27 + $0x180] sm:$0xff] }
  0x22   : > { %370 = vperm.xlu2 %5097, %v223_v7   ;;  %367 = vperm.xlu1 %5096, %v222_v8   ;;  %v277_v31 = vld [vmem:[%s5194_s27 + $0x1f0] sm:$0xff]  ;;  %v276_v32 = vld [vmem:[%s5194_s27 + $0x1e8] sm:$0xff] }
  0x23   : > { %364 = vperm.xlu0 %5095, %v221_v9  }
  0x2a   : > { %379 = vperm.xlu2 %5097, %v226_v10   ;;  %376 = vperm.xlu1 %5096, %v225_v11   ;;  %v268_v10 = vld [vmem:[%s5194_s27 + $0x1a8] sm:$0xff]  ;;  %v267_v11 = vld [vmem:[%s5194_s27 + $0x1a0] sm:$0xff] }
  0x2b   : > { %373 = vperm.xlu0 %5095, %v224_v12   ;;  %v266_v12 = vld [vmem:[%s5194_s27 + $0x198] sm:$0xff] }
  0x32   : > { %388 = vperm.xlu2 %5097, %v229_v13   ;;  %385 = vperm.xlu1 %5096, %v228_v14  }
  0x33   : > { %382 = vperm.xlu0 %5095, %v227_v15  }
  0x3a   : > { %397 = vperm.xlu2 %5097, %v232_v16   ;;  %394 = vperm.xlu1 %5096, %v231_v17   ;;  %v271_v17 = vld [vmem:[%s5194_s27 + $0x1c0] sm:$0xff] }
  0x3b   : > { %391 = vperm.xlu0 %5095, %v230_v18   ;;  %v270_v18 = vld [vmem:[%s5194_s27 + $0x1b8] sm:$0xff] }
  0x42   : > { %406 = vperm.xlu2 %5097, %v235_v19   ;;  %403 = vperm.xlu1 %5096, %v234_v20   ;;  %v269_v19 = vld [vmem:[%s5194_s27 + $0x1b0] sm:$0xff] }
  0x43   : > { %400 = vperm.xlu0 %5095, %v233_v21  }
  0x4a   : > { %415 = vperm.xlu2 %5097, %v238_v22   ;;  %412 = vperm.xlu1 %5096, %v237_v23  }
  0x4b   : > { %409 = vperm.xlu0 %5095, %v236_v24   ;;  %v274_v24 = vld [vmem:[%s5194_s27 + $0x1d8] sm:$0xff] }
  0x52   : > { %424 = vperm.xlu2 %5097, %v241_v25   ;;  %421 = vperm.xlu1 %5096, %v240_v26   ;;  %v273_v25 = vld [vmem:[%s5194_s27 + $0x1d0] sm:$0xff]  ;;  %v272_v26 = vld [vmem:[%s5194_s27 + $0x1c8] sm:$0xff] }
  0x53   : > { %418 = vperm.xlu0 %5095, %v239_v27  }
  0x5a   : > { %433 = vperm.xlu2 %5097, %v244_v28   ;;  %430 = vperm.xlu1 %5096, %v243_v29  }
  0x5b   : > { %427 = vperm.xlu0 %5095, %v242_v30  }
  0x62   : > { %442 = vperm.xlu2 %5097, %v247_v33   ;;  %439 = vperm.xlu1 %5096, %v246_v34   ;;  %v275_v33 = vld [vmem:[%s5194_s27 + $0x1e0] sm:$0xff] }
  0x63   : > { %436 = vperm.xlu0 %5095, %v245_v35  }
  0x6a   : > { %451 = vperm.xlu2 %5097, %v250_v38   ;;  %448 = vperm.xlu1 %5096, %v249_v39   ;;  %v280_v38 = vld [vmem:[%s5194_s27 + $0x208] sm:$0xff]  ;;  %v279_v39 = vld [vmem:[%s5194_s27 + $0x200] sm:$0xff] }
  0x6b   : > { %445 = vperm.xlu0 %5095, %v248_v40   ;;  %v278_v40 = vld [vmem:[%s5194_s27 + $0x1f8] sm:$0xff] }
  0x6c   : > { %v5244_v41 = vpop.permute.xlu2 %358 }
  0x6d   : > { %vm733_vm5 = vcmp.eq.s32.totalorder %v5259_v54, %v5244_v41 }
  0x6e   : > { %v4157_v23 = vsel %vm733_vm5, 1.0, %v7322_v58 }
  0x72   : > { %460 = vperm.xlu2 %5097, %v253_v42   ;;  %457 = vperm.xlu1 %5096, %v252_v43  }
  0x73   : > { %454 = vperm.xlu0 %5095, %v251_v44  }
  0x74   : > { %v5249_v45 = vpop.permute.xlu2 %361 }
  0x75   : > { %vm734_vm6 = vcmp.eq.s32.totalorder %v5259_v54, %v5249_v45  ;;  %v283_v45 = vld [vmem:[%s5194_s27 + $0x220] sm:$0xff] }
  0x76   : > { %v4158_v30 = vsel %vm734_vm6, 1.0, %v7322_v58 }
  0x7a   : > { %469 = vperm.xlu2 %5097, %v256_v46   ;;  %466 = vperm.xlu1 %5096, %v255_v47   ;;  %v282_v46 = vld [vmem:[%s5194_s27 + $0x218] sm:$0xff]  ;;  %v281_v47 = vld [vmem:[%s5194_s27 + $0x210] sm:$0xff] }
  0x7b   : > { %463 = vperm.xlu0 %5095, %v254_v48  }
  0x7c   : > { %v5254_v49 = vpop.permute.xlu2 %370 }
  0x7d   : > { %vm737_vm9 = vcmp.eq.s32.totalorder %v5259_v54, %v5254_v49 }
  0x82   : > { %478 = vperm.xlu2 %5097, %v259_v51   ;;  %475 = vperm.xlu1 %5096, %v258_v52   ;;  %v4161_v52 = vsel %vm737_vm9, 1.0, %v7322_v58 }
  0x83   : > { %472 = vperm.xlu0 %5095, %v257_v53   ;;  %v286_v53 = vld [vmem:[%s5194_s27 + $0x238] sm:$0xff] }
  0x84   : > { %v5261_v55 = vpop.permute.xlu2 %379  ;;  %v353_v56 = vpop.permute.xlu1 %352 }
  0x85   : > { %v347_v57 = vpop.permute.xlu0 %346  ;;  %vm731_vm3 = vcmp.eq.s32.totalorder %v5259_v54, %v353_v56  ;;  %v285_v56 = vld [vmem:[%s5194_s27 + $0x230] sm:$0xff]  ;;  %vm740_vm12 = vcmp.eq.s32.totalorder %v5259_v54, %v5261_v55 }
  0x86   : > { %vm729_vm1 = vcmp.eq.s32.totalorder %v5259_v54, %v347_v57  ;;  %v4155_v9 = vsel %vm731_vm3, 1.0, %v7322_v58  ;;  %v284_v57 = vld [vmem:[%s5194_s27 + $0x228] sm:$0xff] }
  0x87   : > { %v4153_v59 = vsel %vm729_vm1, 1.0, %v7322_v58 }
  0x88   : > { %4281 = vmatmul.msk.f32.vlgmr.msra.gmra.mxu0 %vm1117_vm0, %v4153_v59 }
  0x8a   : > { %487 = vperm.xlu2 %5097, %v262_v60   ;;  %484 = vperm.xlu1 %5096, %v261_v61  }
  0x8b   : > { %481 = vperm.xlu0 %5095, %v260_v62   ;;  %v289_v62 = vld [vmem:[%s5194_s27 + $0x250] sm:$0xff] }
  0x8c   : > { %v5269_v63 = vpop.permute.xlu2 %388  ;;  %v356_v0 = vpop.permute.xlu1 %355 }
  0x8d   : > { %v350_v1 = vpop.permute.xlu0 %349  ;;  %vm732_vm4 = vcmp.eq.s32.totalorder %v5259_v54, %v356_v0  ;;  %v288_v0 = vld [vmem:[%s5194_s27 + $0x248] sm:$0xff]  ;;  %vm743_vm15 = vcmp.eq.s32.totalorder %v5259_v54, %v5269_v63 }
  0x8e   : > { %vm730_vm2 = vcmp.eq.s32.totalorder %v5259_v54, %v350_v1  ;;  %v4156_v16 = vsel %vm732_vm4, 1.0, %v7322_v58  ;;  %v287_v1 = vld [vmem:[%s5194_s27 + $0x240] sm:$0xff] }
  0x8f   : > { %v4154_v2 = vsel %vm730_vm2, 1.0, %v7322_v58 }
  0x90   : > { %4282 = vmatmul.msk.f32.gmra.mxu0 %vm1117_vm0, %v4154_v2 }
  0x92   : > { %496 = vperm.xlu2 %5097, %v265_v3   ;;  %493 = vperm.xlu1 %5096, %v264_v4  }
  0x93   : > { %490 = vperm.xlu0 %5095, %v263_v5  }
  0x94   : > { %v5278_v6 = vpop.permute.xlu2 %397  ;;  %v5280_v7 = vpop.permute.xlu1 %367 }
  0x95   : > { %v365_v8 = vpop.permute.xlu0 %364  ;;  %vm736_vm8 = vcmp.eq.s32.totalorder %v5259_v54, %v5280_v7  ;;  %v292_v7 = vld [vmem:[%s5194_s27 + $0x268] sm:$0xff]  ;;  %vm746_vm3 = vcmp.eq.s32.totalorder %v5259_v54, %v5278_v6 }
  0x96   : > { %vm735_vm7 = vcmp.eq.s32.totalorder %v5259_v54, %v365_v8  ;;  %v4160_v44 = vsel %vm736_vm8, 1.0, %v7322_v58  ;;  %v291_v8 = vld [vmem:[%s5194_s27 + $0x260] sm:$0xff] }
  0x97   : > { %v4159_v37 = vsel %vm735_vm7, 1.0, %v7322_v58 }
  0x98   : > { %4283 = vmatmul.msk.f32.gmra.mxu0 %vm1117_vm0, %v4155_v9  ;;  %v290_v9 = vld [vmem:[%s5194_s27 + $0x258] sm:$0xff] }
  0x9a   : > { %505 = vperm.xlu2 %5097, %v268_v10   ;;  %502 = vperm.xlu1 %5096, %v267_v11  }
  0x9b   : > { %499 = vperm.xlu0 %5095, %v266_v12  }
  0x9c   : > { %v5288_v13 = vpop.permute.xlu2 %406  ;;  %v5290_v14 = vpop.permute.xlu1 %376 }
  0x9d   : > { %v5292_v15 = vpop.permute.xlu0 %373  ;;  %vm739_vm11 = vcmp.eq.s32.totalorder %v5259_v54, %v5290_v14  ;;  %v4164_v14 = vsel %vm740_vm12, 1.0, %v7322_v58  ;;  %vm749_vm6 = vcmp.eq.s32.totalorder %v5259_v54, %v5288_v13 }
  0x9e   : > { %vm738_vm10 = vcmp.eq.s32.totalorder %v5259_v54, %v5292_v15  ;;  %v4163_v5 = vsel %vm739_vm11, 1.0, %v7322_v58  ;;  %v295_v15 = vld [vmem:[%s5194_s27 + $0x280] sm:$0xff] }
  0x9f   : > { %v4162_v61 = vsel %vm738_vm10, 1.0, %v7322_v58 }
  0xa0   : > { %4284 = vmatmul.msk.f32.gmra.mxu0 %vm1117_vm0, %v4156_v16  ;;  %v294_v16 = vld [vmem:[%s5194_s27 + $0x278] sm:$0xff] }
  0xa2   : > { %514 = vperm.xlu2 %5097, %v271_v17   ;;  %511 = vperm.xlu1 %5096, %v270_v18   ;;  %v293_v17 = vld [vmem:[%s5194_s27 + $0x270] sm:$0xff] }
  0xa3   : > { %508 = vperm.xlu0 %5095, %v269_v19  }
  0xa4   : > { %v5301_v20 = vpop.permute.xlu2 %415  ;;  %v5303_v21 = vpop.permute.xlu1 %385 }
  0xa5   : > { %v5305_v22 = vpop.permute.xlu0 %382  ;;  %vm742_vm14 = vcmp.eq.s32.totalorder %v5259_v54, %v5303_v21  ;;  %vm752_vm9 = vcmp.eq.s32.totalorder %v5259_v54, %v5301_v20 }
  0xa6   : > { %vm741_vm13 = vcmp.eq.s32.totalorder %v5259_v54, %v5305_v22 }
  0xa8   : > { %4285 = vmatmul.msk.f32.gmra.mxu0 %vm1117_vm0, %v4157_v23  ;;  %v4165_v23 = vsel %vm741_vm13, 1.0, %v7322_v58 }
  0xaa   : > { %523 = vperm.xlu2 %5097, %v274_v24   ;;  %520 = vperm.xlu1 %5096, %v273_v25   ;;  %v298_v24 = vld [vmem:[%s5194_s27 + $0x298] sm:$0xff]  ;;  %v297_v25 = vld [vmem:[%s5194_s27 + $0x290] sm:$0xff] }
  0xab   : > { %517 = vperm.xlu0 %5095, %v272_v26   ;;  %v296_v26 = vld [vmem:[%s5194_s27 + $0x288] sm:$0xff] }
  0xac   : > { %v5314_v27 = vpop.permute.xlu2 %424  ;;  %v5316_v28 = vpop.permute.xlu1 %394 }
  0xad   : > { %v5318_v29 = vpop.permute.xlu0 %391  ;;  %vm745_vm2 = vcmp.eq.s32.totalorder %v5259_v54, %v5316_v28  ;;  %vm755_vm12 = vcmp.eq.s32.totalorder %v5259_v54, %v5314_v27  ;;  %v311_v27 = vld [vmem:[%s5194_s27 + $0x300] sm:$0xff] }
  0xae   : > { %vm744_vm1 = vcmp.eq.s32.totalorder %v5259_v54, %v5318_v29 }
  0xb0   : > { %4286 = vmatmul.msk.f32.gmra.mxu0 %vm1117_vm0, %v4158_v30 }
  0xb2   : > { %532 = vperm.xlu2 %5097, %v277_v31   ;;  %529 = vperm.xlu1 %5096, %v276_v32   ;;  %v4166_v32 = vsel %vm742_vm14, 1.0, %v7322_v58 }
  0xb3   : > { %526 = vperm.xlu0 %5095, %v275_v33   ;;  %v301_v33 = vld [vmem:[%s5194_s27 + $0x2b0] sm:$0xff] }
  0xb4   : > { %v5326_v34 = vpop.permute.xlu2 %433  ;;  %v5328_v35 = vpop.permute.xlu1 %403 }
  0xb5   : > { %v5330_v36 = vpop.permute.xlu0 %400  ;;  %vm748_vm5 = vcmp.eq.s32.totalorder %v5259_v54, %v5328_v35 }
  0xb6   : > { %vm747_vm4 = vcmp.eq.s32.totalorder %v5259_v54, %v5330_v36 }
  0xb8   : > { %4287 = vmatmul.msk.f32.gmra.mxu0 %vm1117_vm0, %v4159_v37  ;;  %v300_v37 = vld [vmem:[%s5194_s27 + $0x2a8] sm:$0xff] }
  0xba   : > { %541 = vperm.xlu2 %5097, %v280_v38   ;;  %538 = vperm.xlu1 %5096, %v279_v39   ;;  %v299_v38 = vld [vmem:[%s5194_s27 + $0x2a0] sm:$0xff] }
  0xbb   : > { %535 = vperm.xlu0 %5095, %v278_v40  }
  0xbc   : > { %v5339_v41 = vpop.permute.xlu2 %442  ;;  %v5341_v42 = vpop.permute.xlu1 %412 }
  0xbd   : > { %v5343_v43 = vpop.permute.xlu0 %409  ;;  %vm751_vm8 = vcmp.eq.s32.totalorder %v5259_v54, %v5341_v42 }
  0xbe   : > { %vm750_vm7 = vcmp.eq.s32.totalorder %v5259_v54, %v5343_v43 }
  0xc0   : > { %4288 = vmatmul.msk.f32.gmra.mxu0 %vm1117_vm0, %v4160_v44  ;;  %v4167_v44 = vsel %vm743_vm15, 1.0, %v7322_v58 }
  0xc2   : > { %550 = vperm.xlu2 %5097, %v283_v45   ;;  %547 = vperm.xlu1 %5096, %v282_v46   ;;  %v318_v45 = vld [vmem:[%s5194_s27 + $0x338] sm:$0xff]  ;;  %v331_v46 = vld [vmem:[%s5194_s27 + $0x3a0] sm:$0xff] }
  0xc3   : > { %544 = vperm.xlu0 %5095, %v281_v47   ;;  %v302_v47 = vld [vmem:[%s5194_s27 + $0x2b8] sm:$0xff] }
  0xc4   : > { %v5352_v48 = vpop.permute.xlu2 %451  ;;  %v5354_v50 = vpop.permute.xlu1 %421 }
  0xc5   : > { %v5356_v51 = vpop.permute.xlu0 %418  ;;  %vm754_vm11 = vcmp.eq.s32.totalorder %v5259_v54, %v5354_v50 }
  0xc6   : > { %vm753_vm10 = vcmp.eq.s32.totalorder %v5259_v54, %v5356_v51 }
  0xc8   : > { %4289 = vmatmul.msk.f32.gmra.mxu0 %vm1117_vm0, %v4161_v52 }
  0xca   : > { %559 = vperm.xlu2 %5097, %v286_v53   ;;  %556 = vperm.xlu1 %5096, %v285_v56   ;;  %v4168_v56 = vsel %vm744_vm1, 1.0, %v7322_v58 }
  0xcb   : > { %553 = vperm.xlu0 %5095, %v284_v57   ;;  %v319_v57 = vld [vmem:[%s5194_s27 + $0x340] sm:$0xff] }
  0xcc   : > { %v5365_v49 = vpop.permute.xlu2 %460  ;;  %v5367_v59 = vpop.permute.xlu1 %430 }
  0xcd   : > { %v5369_v60 = vpop.permute.xlu0 %427  ;;  %vm757_vm1 = vcmp.eq.s32.totalorder %v5259_v54, %v5367_v59  ;;  %v4038_v59 = vld [vmem:[%s7320_s3] sm:$0xff] }
  0xce   : > { %vm756_vm14 = vcmp.eq.s32.totalorder %v5259_v54, %v5369_v60 }
  0xd0   : > { %4290 = vmatmul.msk.f32.gmra.mxu0 %vm1117_vm0, %v4162_v61  ;;  %v332_v61 = vld [vmem:[%s5194_s27 + $0x3a8] sm:$0xff] }
  0xd2   : > { %568 = vperm.xlu2 %5097, %v289_v62   ;;  %565 = vperm.xlu1 %5096, %v288_v0   ;;  %v303_v62 = vld [vmem:[%s5194_s27 + $0x2c0] sm:$0xff] }
  0xd3   : > { %562 = vperm.xlu0 %5095, %v287_v1  }
  0xd4   : > { %v5378_v2 = vpop.permute.xlu2 %469  ;;  %v5380_v3 = vpop.permute.xlu1 %439 }
  0xd5   : > { %v5382_v4 = vpop.permute.xlu0 %436 }
  0xd8   : > { %4291 = vmatmul.msk.f32.gmra.mxu0 %vm1117_vm0, %v4163_v5 }
  0xda   : > { %577 = vperm.xlu2 %5097, %v292_v7   ;;  %574 = vperm.xlu1 %5096, %v291_v8   ;;  %v4169_v7 = vsel %vm745_vm2, 1.0, %v7322_v58  ;;  %v320_v8 = vld [vmem:[%s5194_s27 + $0x348] sm:$0xff] }
  0xdb   : > { %571 = vperm.xlu0 %5095, %v290_v9   ;;  %v333_v9 = vld [vmem:[%s5194_s27 + $0x3b0] sm:$0xff] }
  0xdc   : > { %v5391_v10 = vpop.permute.xlu2 %478  ;;  %v5393_v11 = vpop.permute.xlu1 %448 }
  0xdd   : > { %v5395_v12 = vpop.permute.xlu0 %445 }
  0xe0   : > { %4292 = vmatmul.msk.f32.gmra.mxu0 %vm1117_vm0, %v4164_v14  ;;  %v304_v14 = vld [vmem:[%s5194_s27 + $0x2c8] sm:$0xff] }
  0xe2   : > { %586 = vperm.xlu2 %5097, %v295_v15   ;;  %583 = vperm.xlu1 %5096, %v294_v16  }
  0xe3   : > { %580 = vperm.xlu0 %5095, %v293_v17  }
  0xe4   : > { %v5404_v55 = vpop.permute.xlu2 %487  ;;  %v5406_v18 = vpop.permute.xlu1 %457 }
  0xe5   : > { %v5408_v19 = vpop.permute.xlu0 %454 }
  0xe8   : > { %4293 = vmatmul.msk.f32.gmra.mxu0 %vm1117_vm0, %v4165_v23  ;;  %v4170_v23 = vsel %vm746_vm3, 1.0, %v7322_v58  ;;  %vm758_vm3 = vcmp.eq.s32.totalorder %v5259_v54, %v5326_v34 }
  0xea   : > { %595 = vperm.xlu2 %5097, %v298_v24   ;;  %592 = vperm.xlu1 %5096, %v297_v25   ;;  %v321_v24 = vld [vmem:[%s5194_s27 + $0x350] sm:$0xff]  ;;  %v334_v25 = vld [vmem:[%s5194_s27 + $0x3b8] sm:$0xff] }
  0xeb   : > { %589 = vperm.xlu0 %5095, %v296_v26   ;;  %v305_v26 = vld [vmem:[%s5194_s27 + $0x2d0] sm:$0xff] }
  0xec   : > { %v5417_v22 = vpop.permute.xlu2 %496  ;;  %v5419_v30 = vpop.permute.xlu1 %466 }
  0xed   : > { %v5421_v31 = vpop.permute.xlu0 %463 }
  0xf0   : > { %4294 = vmatmul.msk.f32.gmra.mxu0 %vm1117_vm0, %v4166_v32 }
  0xf2   : > { %604 = vperm.xlu2 %5097, %v301_v33   ;;  %601 = vperm.xlu1 %5096, %v300_v37  }
  0xf3   : > { %598 = vperm.xlu0 %5095, %v299_v38   ;;  %v4171_v38 = vsel %vm747_vm4, 1.0, %v7322_v58 }
  0xf4   : > { %v5430_v21 = vpop.permute.xlu2 %505  ;;  %v5432_v39 = vpop.permute.xlu1 %475 }
  0xf5   : > { %v5434_v40 = vpop.permute.xlu0 %472 }
  0xf8   : > { %4295 = vmatmul.msk.f32.gmra.mxu0 %vm1117_vm0, %v4167_v44  ;;  %v322_v44 = vld [vmem:[%s5194_s27 + $0x358] sm:$0xff] }
  0xfa   : > { %655 = vperm.xlu2 %5097, %v318_v45   ;;  %694 = vperm.xlu1 %5096, %v331_v46   ;;  %v335_v45 = vld [vmem:[%s5194_s27 + $0x3c0] sm:$0xff]  ;;  %v306_v46 = vld [vmem:[%s5194_s27 + $0x2d8] sm:$0xff] }
  0xfb   : > { %607 = vperm.xlu0 %5095, %v302_v47  }
  0xfc   : > { %v5443_v63 = vpop.permute.xlu2 %514  ;;  %v5445_v52 = vpop.permute.xlu1 %484 }
  0xfd   : > { %v5447_v53 = vpop.permute.xlu0 %481 }
 0x100   : > { %4296 = vmatmul.msk.f32.gmra.mxu0 %vm1117_vm0, %v4168_v56 }
 0x102   : > { %658 = vperm.xlu2 %5097, %v319_v57   ;;  %697 = vperm.xlu1 %5096, %v332_v61   ;;  %v4172_v61 = vsel %vm748_vm5, 1.0, %v7322_v58 }
 0x103   : > { %610 = vperm.xlu0 %5095, %v303_v62   ;;  %v323_v62 = vld [vmem:[%s5194_s27 + $0x360] sm:$0xff] }
 0x104   : > { %v5456_v29 = vpop.permute.xlu2 %523  ;;  %v5458_v0 = vpop.permute.xlu1 %493 }
 0x105   : > { %v5460_v1 = vpop.f32.mrf.mxu0  ;;  %v5462_v5 = vpop.permute.xlu0 %490 }
 0x108   : > { %4297 = vmatmul.msk.f32.gmra.mxu0 %vm1117_vm0, %v4169_v7  ;;  %v336_v7 = vld [vmem:[%s5194_s27 + $0x3c8] sm:$0xff] }
 0x10a   : > { %661 = vperm.xlu2 %5097, %v320_v8   ;;  %700 = vperm.xlu1 %5096, %v333_v9   ;;  %v307_v8 = vld [vmem:[%s5194_s27 + $0x2e0] sm:$0xff] }
 0x10b   : > { %613 = vperm.xlu0 %5095, %v304_v14  }
 0x10c   : > { %v5471_v28 = vpop.permute.xlu2 %532  ;;  %v5473_v15 = vpop.permute.xlu1 %502 }
 0x10d   : > { %v5475_v16 = vpop.f32.mrf.mxu0  ;;  %v5477_v17 = vpop.permute.xlu0 %499 }
 0x110   : > { %4298 = vmatmul.msk.f32.gmra.mxu0 %vm1117_vm0, %v4170_v23 }
 0x112   : > { %664 = vperm.xlu2 %5097, %v321_v24   ;;  %703 = vperm.xlu1 %5096, %v334_v25   ;;  %v4173_v24 = vsel %vm749_vm6, 1.0, %v7322_v58  ;;  %v324_v25 = vld [vmem:[%s5194_s27 + $0x368] sm:$0xff]  ;;  %vm759_vm6 = vcmp.eq.s32.totalorder %v5259_v54, %v5382_v4 }
 0x113   : > { %616 = vperm.xlu0 %5095, %v305_v26   ;;  %v337_v26 = vld [vmem:[%s5194_s27 + $0x3d0] sm:$0xff] }
 0x114   : > { %v5486_v6 = vpop.permute.xlu2 %541  ;;  %v5488_v32 = vpop.permute.xlu1 %511 }
 0x115   : > { %v5490_v33 = vpop.f32.mrf.mxu0  ;;  %v5492_v37 = vpop.permute.xlu0 %508 }
 0x118   : > { %4299 = vmatmul.msk.f32.gmra.mxu0 %vm1117_vm0, %v4171_v38  ;;  %v308_v38 = vld [vmem:[%s5194_s27 + $0x2e8] sm:$0xff] }
 0x11a   : > { %667 = vperm.xlu2 %5097, %v322_v44   ;;  %706 = vperm.xlu1 %5096, %v335_v45  }
 0x11b   : > { %619 = vperm.xlu0 %5095, %v306_v46  }
 0x11c   : > { %v5501_v36 = vpop.permute.xlu2 %550  ;;  %v5503_v47 = vpop.permute.xlu1 %520 }
 0x11d   : > { %7491 = vst [vmem:[#allocation6_spill] sm:$0xff] %v5501_v36  ;;  %v5505_v56 = vpop.f32.mrf.mxu0  ;;  %v5507_v57 = vpop.permute.xlu0 %517  ;;  %v342_v36 = vld [vmem:[%s5194_s27 + $0x3f8] sm:$0xff] }
 0x120   : > { %4300 = vmatmul.msk.f32.gmra.mxu0 %vm1117_vm0, %v4172_v61  ;;  %v4174_v61 = vsel %vm750_vm7, 1.0, %v7322_v58 }
 0x122   : > { %670 = vperm.xlu2 %5097, %v323_v62   ;;  %709 = vperm.xlu1 %5096, %v336_v7   ;;  %v338_v62 = vld [vmem:[%s5194_s27 + $0x3d8] sm:$0xff]  ;;  %v313_v7 = vld [vmem:[%s5194_s27 + $0x310] sm:$0xff] }
 0x123   : > { %622 = vperm.xlu0 %5095, %v307_v8   ;;  %v309_v8 = vld [vmem:[%s5194_s27 + $0x2f0] sm:$0xff] }
 0x124   : > { %v5516_v35 = vpop.permute.xlu2 %559  ;;  %v5518_v9 = vpop.permute.xlu1 %529 }
 0x125   : > { %7492 = vst [vmem:[#allocation7_spill] sm:$0xff] %v5516_v35  ;;  %v5520_v14 = vpop.f32.mrf.mxu0  ;;  %v5522_v23 = vpop.permute.xlu0 %526 }
 0x128   : > { %4301 = vmatmul.msk.f32.gmra.mxu0 %vm1117_vm0, %v4173_v24 }
 0x12a   : > { %673 = vperm.xlu2 %5097, %v324_v25   ;;  %712 = vperm.xlu1 %5096, %v337_v26  }
 0x12b   : > { %625 = vperm.xlu0 %5095, %v308_v38   ;;  %v4175_v38 = vsel %vm751_vm8, 1.0, %v7322_v58 }
 0x12c   : > { %v5531_v13 = vpop.permute.xlu2 %568  ;;  %v5533_v44 = vpop.permute.xlu1 %538 }
 0x12d   : > { %7493 = vst [vmem:[#allocation8_spill] sm:$0xff] %v5531_v13  ;;  %v5535_v45 = vpop.f32.mrf.mxu0  ;;  %v5537_v46 = vpop.permute.xlu0 %535  ;;  %v7498_v13 = vmov 0.0  }
 0x12e   : > { %v4176_v35 = vsel %vm752_vm9, 1.0, %v7498_v13  ;;  %vm760_vm9 = vcmp.eq.s32.totalorder %v5259_v54, %v5380_v3 }
 0x130   : > { %4302 = vmatmul.msk.f32.gmra.mxu0 %vm1117_vm0, %v4174_v61  ;;  %v314_v61 = vld [vmem:[%s5194_s27 + $0x318] sm:$0xff] }
 0x132   : > { %715 = vperm.xlu2 %5097, %v338_v62   ;;  %640 = vperm.xlu1 %5096, %v313_v7   ;;  %v310_v62 = vld [vmem:[%s5194_s27 + $0x2f8] sm:$0xff]  ;;  %v325_v7 = vld [vmem:[%s5194_s27 + $0x370] sm:$0xff] }
 0x133   : > { %628 = vperm.xlu0 %5095, %v309_v8  }
 0x134   : > { %v5546_v43 = vpop.permute.xlu2 %577  ;;  %v5548_v24 = vpop.permute.xlu1 %547 }
 0x135   : > { %7494 = vst [vmem:[#allocation9_spill] sm:$0xff] %v5546_v43  ;;  %v5550_v25 = vpop.f32.mrf.mxu0  ;;  %v5552_v26 = vpop.permute.xlu0 %544 }
 0x138   : > { %4303 = vmatmul.msk.f32.gmra.mxu0 %vm1117_vm0, %v4175_v38  ;;  %v315_v38 = vld [vmem:[%s5194_s27 + $0x320] sm:$0xff] }
 0x13a   : > { %643 = vperm.xlu2 %5097, %v314_v61   ;;  %631 = vperm.xlu1 %5096, %v310_v62   ;;  %v326_v61 = vld [vmem:[%s5194_s27 + $0x378] sm:$0xff]  ;;  %v339_v62 = vld [vmem:[%s5194_s27 + $0x3e0] sm:$0xff] }
 0x13b   : > { %676 = vperm.xlu0 %5095, %v325_v7  }
 0x13c   : > { %v5561_v42 = vpop.permute.xlu2 %586  ;;  %v5563_v8 = vpop.permute.xlu1 %556 }
 0x13d   : > { %7495 = vst [vmem:[#allocation10_spill] sm:$0xff] %v5561_v42  ;;  %v5565_v43 = vpop.f32.mrf.mxu0  ;;  %v5567_v58 = vpop.permute.xlu0 %553 }
 0x13e   : > { %7496 = vst [vmem:[#allocation11_spill] sm:$0xff] %v5563_v8 }
 0x13f   : > { %7497 = vst [vmem:[#allocation12_spill] sm:$0xff] %v5567_v58  ;;  %v4177_v58 = vsel %vm753_vm10, 1.0, %v7498_v13 }
 0x140   : > { %4304 = vmatmul.msk.f32.gmra.mxu0 %vm1117_vm0, %v4176_v35  ;;  %v341_v35 = vld [vmem:[%s5194_s27 + $0x3f0] sm:$0xff] }
 0x142   : > { %646 = vperm.xlu2 %5097, %v315_v38   ;;  %679 = vperm.xlu1 %5096, %v326_v61   ;;  %v316_v38 = vld [vmem:[%s5194_s27 + $0x328] sm:$0xff] }
 0x143   : > { %718 = vperm.xlu0 %5095, %v339_v62   ;;  %v340_v61 = vld [vmem:[%s5194_s27 + $0x3e8] sm:$0xff] }
 0x144   : > { %v5576_v20 = vpop.permute.xlu2 %595  ;;  %v5578_v7 = vpop.permute.xlu1 %565 }
 0x145   : > { %7499 = vst [vmem:[#allocation13_spill] sm:$0xff] %v5576_v20  ;;  %v5580_v42 = vpop.f32.mrf.mxu0  ;;  %v5582_v8 = vpop.permute.xlu0 %562 }
 0x146   : > { %7500 = vst [vmem:[#allocation14_spill] sm:$0xff] %v5578_v7 }
 0x147   : > { %7501 = vst [vmem:[#allocation15_spill] sm:$0xff] %v5582_v8  ;;  %v4178_v8 = vsel %vm754_vm11, 1.0, %v7498_v13 }
 0x148   : > { %4305 = vmatmul.msk.f32.gmra.mxu0 %vm1117_vm0, %v4177_v58  ;;  %v327_v58 = vld [vmem:[%s5194_s27 + $0x380] sm:$0xff] }
 0x14a   : > { %724 = vperm.xlu2 %5097, %v341_v35   ;;  %649 = vperm.xlu1 %5096, %v316_v38   ;;  %v317_v35 = vld [vmem:[%s5194_s27 + $0x330] sm:$0xff] }
 0x14b   : > { %721 = vperm.xlu0 %5095, %v340_v61  }
 0x14c   : > { %v5591_v51 = vpop.permute.xlu2 %604  ;;  %v5593_v62 = vpop.permute.xlu1 %574 }
 0x14d   : > { %7502 = vst [vmem:[#allocation16_spill] sm:$0xff] %v5591_v51  ;;  %v5595_v20 = vpop.f32.mrf.mxu0  ;;  %v5597_v7 = vpop.permute.xlu0 %571 }
 0x14e   : > { %7503 = vst [vmem:[#allocation17_spill] sm:$0xff] %v5593_v62 }
 0x150   : > { %4306 = vmatmul.msk.f32.gmra.mxu0 %vm1117_vm0, %v4178_v8  ;;  %v4179_v8 = vsel %vm755_vm12, 1.0, %v7498_v13  ;;  %vm761_vm12 = vcmp.eq.s32.totalorder %v5259_v54, %v5339_v41 }
 0x152   : > { %727 = vperm.xlu2 %5097, %v342_v36   ;;  %682 = vperm.xlu1 %5096, %v327_v58   ;;  %v312_v36 = vld [vmem:[%s5194_s27 + $0x308] sm:$0xff] }
 0x153   : > { %652 = vperm.xlu0 %5095, %v317_v35   ;;  %v328_v58 = vld [vmem:[%s5194_s27 + $0x388] sm:$0xff] }
 0x154   : > { %v656_v50 = vpop.permute.xlu2 %655  ;;  %v5606_v38 = vpop.permute.xlu1 %583 }
 0x155   : > { %7504 = vst [vmem:[#allocation18_spill] sm:$0xff] %v5606_v38  ;;  %vm832_vm13 = vcmp.eq.s32.totalorder %v5259_v54, %v656_v50  ;;  %v5609_v61 = vpop.f32.mrf.mxu0  ;;  %v5611_v51 = vpop.permute.xlu0 %580 }
 0x156   : > { %7505 = vst [vmem:[#allocation19_spill] sm:$0xff] %v5611_v51  ;;  %v4256_v62 = vsel %vm832_vm13, 1.0, %v7498_v13 }
 0x157   : > { %4384 = vmatmul.msk.f32.vlgmr.msra.gmra.mxu2 %vm1117_vm0, %v4256_v62 }
 0x158   : > { %4307 = vmatmul.msk.f32.gmra.mxu0 %vm1117_vm0, %v4179_v8  ;;  %v4180_v8 = vsel %vm756_vm14, 1.0, %v7498_v13 }
 0x15a   : > { %637 = vperm.xlu2 %5097, %v312_v36   ;;  %685 = vperm.xlu1 %5096, %v328_v58   ;;  %v330_v36 = vld [vmem:[%s5194_s27 + $0x398] sm:$0xff]  ;;  %v329_v58 = vld [vmem:[%s5194_s27 + $0x390] sm:$0xff]  ;;  %s4924_s27 = sshll.u32 %s7758_s19, 5 }
 0x15b   : > { %634 = vperm.xlu0 %5095, %v311_v27   ;;  %s7296_s30 = scalar_lea.vmem %s7321_s4, %s4924_s27 }
 0x15c   : > { %v659_v35 = vpop.permute.xlu2 %658  ;;  %v5622_v50 = vpop.permute.xlu1 %592 }
 0x15d   : > { %7506 = vst [vmem:[#allocation20_spill] sm:$0xff] %v5622_v50  ;;  %vm833_vm15 = vcmp.eq.s32.totalorder %v5259_v54, %v659_v35  ;;  %v5625_v38 = vpop.f32.mrf.mxu0  ;;  %v5627_v62 = vpop.permute.xlu0 %589 }
 0x15e   : > { %7507 = vst [vmem:[#allocation21_spill] sm:$0xff] %v5627_v62  ;;  %v4257_v51 = vsel %vm833_vm15, 1.0, %v7498_v13  ;;  %vm762_vm15 = vcmp.eq.s32.totalorder %v5259_v54, %v5395_v12  ;;  %v5733_v12 = vpack.c.bf16 %v5535_v45, %v5520_v14 }
 0x15f   : > { %4385 = vmatmul.msk.f32.gmra.mxu2 %vm1117_vm0, %v4257_v51  ;;  %v4181_v51 = vsel %vm757_vm1, 1.0, %v7498_v13 }
 0x160   : > { %4308 = vmatmul.msk.f32.gmra.mxu0 %vm1117_vm0, %v4180_v8  ;;  %7517 = vst [vmem:[#allocation31_spill] sm:$0xff] %v5733_v12 }
 0x162   : > { %691 = vperm.xlu1 %5096, %v330_v36  }
 0x163   : > { %688 = vperm.xlu0 %5095, %v329_v58  }
 0x164   : > { %v662_v60 = vpop.permute.xlu2 %661  ;;  %v5637_v27 = vpop.permute.xlu1 %601 }
 0x165   : > { %7508 = vst [vmem:[#allocation22_spill] sm:$0xff] %v5637_v27  ;;  %vm834_vm2 = vcmp.eq.s32.totalorder %v5259_v54, %v662_v60  ;;  %v1555_v35 = vpop.f32.mrf.mxu0  ;;  %v5640_v50 = vpop.permute.xlu0 %598  ;;  %v4182_v27 = vsel %vm758_vm3, 1.0, %v7498_v13 }
 0x166   : > { %7509 = vst [vmem:[#allocation23_spill] sm:$0xff] %v5640_v50  ;;  %v4258_v62 = vsel %vm834_vm2, 1.0, %v7498_v13  ;;  %vm763_vm2 = vcmp.eq.s32.totalorder %v5259_v54, %v5393_v11  ;;  %v5754_v11 = vpack.c.bf16 %v5475_v16, %v5460_v1 }
 0x167   : > { %4386 = vmatmul.msk.f32.gmra.mxu2 %vm1117_vm0, %v4258_v62  ;;  %v4187_v14 = vsel %vm763_vm2, 1.0, %v7498_v13 }
 0x168   : > { %4309 = vmatmul.msk.f32.gmra.mxu0 %vm1117_vm0, %v4181_v51  ;;  %7519 = vst [vmem:[#allocation33_spill] sm:$0xff] %v5754_v11 }
 0x16b   : > { %4044 = vperm.xlu0 %5095, %v4038_v59  }
 0x16c   : > { %v665_v8 = vpop.permute.xlu2 %664  ;;  %v695_v36 = vpop.permute.xlu1 %694 }
 0x16d   : > { %vm835_vm4 = vcmp.eq.s32.totalorder %v5259_v54, %v665_v8  ;;  %vm845_vm5 = vcmp.eq.s32.totalorder %v5259_v54, %v695_v36  ;;  %v1558_v58 = vpop.f32.mrf.mxu0  ;;  %v5653_v60 = vpop.permute.xlu0 %607 }
 0x16e   : > { %7510 = vst [vmem:[#allocation24_spill] sm:$0xff] %v5653_v60  ;;  %v4259_v62 = vsel %vm835_vm4, 1.0, %v7498_v13  ;;  %v4269_v51 = vsel %vm845_vm5, 1.0, %v7498_v13  ;;  %v5688_v3 = vpack.c.bf16 %v1558_v58, %v1555_v35  ;;  %v4185_v58 = vsel %vm761_vm12, 1.0, %v7498_v13 }
 0x16f   : > { %4387 = vmatmul.msk.f32.gmra.mxu2 %vm1117_vm0, %v4259_v62  ;;  %4397 = vmatmul.msk.f32.vlgmr.msra.gmra.mxu3 %vm1117_vm0, %v4269_v51  ;;  %v4183_v51 = vsel %vm759_vm6, 1.0, %v7498_v13  ;;  %vm764_vm4 = vcmp.eq.s32.totalorder %v5259_v54, %v5352_v48 }
 0x170   : > { %4310 = vmatmul.msk.f32.gmra.mxu0 %vm1117_vm0, %v4182_v27  ;;  %7513 = vst [vmem:[#allocation27_spill] sm:$0xff] %v5688_v3 }
 0x174   : > { %v668_v34 = vpop.permute.xlu2 %667  ;;  %v698_v59 = vpop.permute.xlu1 %697 }
 0x175   : > { %vm836_vm7 = vcmp.eq.s32.totalorder %v5259_v54, %v668_v34  ;;  %vm846_vm8 = vcmp.eq.s32.totalorder %v5259_v54, %v698_v59  ;;  %v1561_v8 = vpop.f32.mrf.mxu0  ;;  %v5665_v36 = vpop.permute.xlu0 %610 }
 0x176   : > { %7511 = vst [vmem:[#allocation25_spill] sm:$0xff] %v5665_v36  ;;  %v4260_v60 = vsel %vm836_vm7, 1.0, %v7498_v13  ;;  %v4270_v62 = vsel %vm846_vm8, 1.0, %v7498_v13  ;;  %vm765_vm7 = vcmp.eq.s32.totalorder %v5259_v54, %v5408_v19 }
 0x177   : > { %4388 = vmatmul.msk.f32.gmra.mxu2 %vm1117_vm0, %v4260_v60  ;;  %4398 = vmatmul.msk.f32.gmra.mxu3 %vm1117_vm0, %v4270_v62  ;;  %v4184_v62 = vsel %vm760_vm9, 1.0, %v7498_v13 }
 0x178   : > { %4311 = vmatmul.msk.f32.gmra.mxu0 %vm1117_vm0, %v4183_v51 }
 0x17c   : > { %v671_v4 = vpop.permute.xlu2 %670  ;;  %v701_v27 = vpop.permute.xlu1 %700 }
 0x17d   : > { %vm837_vm10 = vcmp.eq.s32.totalorder %v5259_v54, %v671_v4  ;;  %vm847_vm11 = vcmp.eq.s32.totalorder %v5259_v54, %v701_v27  ;;  %v1564_v34 = vpop.f32.mrf.mxu0  ;;  %v5677_v59 = vpop.permute.xlu0 %613  ;;  %v5701_v27 = vpack.c.bf16 %v5625_v38, %v5609_v61 }
 0x17e   : > { %v4261_v36 = vsel %vm837_vm10, 1.0, %v7498_v13  ;;  %v4271_v60 = vsel %vm847_vm11, 1.0, %v7498_v13  ;;  %v5681_v50 = vpack.c.bf16 %v1564_v34, %v1561_v8  ;;  %v5712_v34 = vpack.c.bf16 %v5595_v20, %v5580_v42 }
 0x17f   : > { %4389 = vmatmul.msk.f32.gmra.mxu2 %vm1117_vm0, %v4261_v36  ;;  %4399 = vmatmul.msk.f32.gmra.mxu3 %vm1117_vm0, %v4271_v60  ;;  %7514 = vst [vmem:[#allocation28_spill] sm:$0xff] %v5701_v27  ;;  %v4186_v42 = vsel %vm762_vm15, 1.0, %v7498_v13  ;;  %vm766_vm10 = vcmp.eq.s32.totalorder %v5259_v54, %v5406_v18 }
 0x180   : > { %7512 = vst [vmem:[#allocation26_spill] sm:$0xff] %v5681_v50  ;;  %4312 = vmatmul.msk.f32.gmra.mxu0 %vm1117_vm0, %v4184_v62  ;;  %2080 = vmatpush.bf16.msrb.mxu1 %v5681_v50  ;;  %v5724_v62 = vpack.c.bf16 %v5565_v43, %v5550_v25 }
 0x181   : > { %7515 = vst [vmem:[#allocation29_spill] sm:$0xff] %v5712_v34 }
 0x182   : > { %7516 = vst [vmem:[#allocation30_spill] sm:$0xff] %v5724_v62 }
 0x184   : > { %2081 = vmatpush.bf16.msrb.mxu1 %v5688_v3  ;;  %v674_v51 = vpop.permute.xlu2 %673  ;;  %v704_v8 = vpop.permute.xlu1 %703 }
 0x185   : > { %vm838_vm13 = vcmp.eq.s32.totalorder %v5259_v54, %v674_v51  ;;  %vm848_vm14 = vcmp.eq.s32.totalorder %v5259_v54, %v704_v8  ;;  %v5695_v36 = vpop.f32.mrf.mxu0  ;;  %v5697_v4 = vpop.permute.xlu0 %616  ;;  %v5745_v8 = vpack.c.bf16 %v5505_v56, %v5490_v33 }
 0x186   : > { %v4262_v35 = vsel %vm838_vm13, 1.0, %v7498_v13  ;;  %v4272_v41 = vsel %vm848_vm14, 1.0, %v7498_v13  ;;  %vm767_vm13 = vcmp.eq.s32.totalorder %v5259_v54, %v5365_v49 }
 0x187   : > { %4390 = vmatmul.msk.f32.gmra.mxu2 %vm1117_vm0, %v4262_v35  ;;  %4400 = vmatmul.msk.f32.gmra.mxu3 %vm1117_vm0, %v4272_v41  ;;  %7518 = vst [vmem:[#allocation32_spill] sm:$0xff] %v5745_v8 }
 0x188   : > { %4313 = vmatmul.msk.f32.gmra.mxu0 %vm1117_vm0, %v4185_v58  ;;  %2082 = vmatpush.bf16.msrb.mxu1 %v5701_v27 }
 0x18c   : > { %2083 = vmatpush.bf16.msrb.mxu1 %v5712_v34  ;;  %v707_v38 = vpop.permute.xlu1 %706  ;;  %v716_v45 = vpop.permute.xlu2 %715 }
 0x18d   : > { %vm849_vm1 = vcmp.eq.s32.totalorder %v5259_v54, %v707_v38  ;;  %v5718_v61 = vpop.f32.mrf.mxu0  ;;  %v5720_v60 = vpop.permute.xlu0 %619  ;;  %v4188_v38 = vsel %vm764_vm4, 1.0, %v7498_v13  ;;  %vm852_vm6 = vcmp.eq.s32.totalorder %v5259_v54, %v716_v45  ;;  %vm769_vm4 = vcmp.eq.s32.totalorder %v5259_v54, %v5419_v30 }
 0x18e   : > { %v4273_v51 = vsel %vm849_vm1, 1.0, %v7498_v13  ;;  %vm768_vm1 = vcmp.eq.s32.totalorder %v5259_v54, %v5421_v31 }
 0x18f   : > { %4401 = vmatmul.msk.f32.gmra.mxu3 %vm1117_vm0, %v4273_v51  ;;  %v4276_v51 = vsel %vm852_vm6, 1.0, %v7498_v13 }
 0x190   : > { %4314 = vmatmul.msk.f32.gmra.mxu0 %vm1117_vm0, %v4186_v42  ;;  %2084 = vmatpush.bf16.msrb.mxu1 %v5724_v62 }
 0x194   : > { %2085 = vmatpush.bf16.msrb.mxu1 %v5733_v12  ;;  %v710_v43 = vpop.permute.xlu1 %709  ;;  %v644_v42 = vpop.permute.xlu2 %643 }
 0x195   : > { %vm850_vm3 = vcmp.eq.s32.totalorder %v5259_v54, %v710_v43  ;;  %v5739_v25 = vpop.f32.mrf.mxu0  ;;  %v5741_v20 = vpop.permute.xlu0 %622  ;;  %vm828_vm9 = vcmp.eq.s32.totalorder %v5259_v54, %v644_v42 }
 0x196   : > { %v4274_v35 = vsel %vm850_vm3, 1.0, %v7498_v13 }
 0x197   : > { %4402 = vmatmul.msk.f32.gmra.mxu3 %vm1117_vm0, %v4274_v35  ;;  %v4189_v35 = vsel %vm765_vm7, 1.0, %v7498_v13 }
 0x198   : > { %4315 = vmatmul.msk.f32.gmra.mxu0 %vm1117_vm0, %v4187_v14  ;;  %2086 = vmatpush.bf16.msrb.mxu1 %v5745_v8 }
 0x19c   : > { %2087 = vmatpush.bf16.msrb.mxu1 %v5754_v11  ;;  %v713_v33 = vpop.permute.xlu1 %712 }
 0x19d   : > { %vm851_vm5 = vcmp.eq.s32.totalorder %v5259_v54, %v713_v33  ;;  %v5760_v56 = vpop.f32.mrf.mxu0  ;;  %v5762_v41 = vpop.permute.xlu0 %625  ;;  %v4252_v33 = vsel %vm828_vm9, 1.0, %v7498_v13 }
 0x19e   : > { %v4275_v58 = vsel %vm851_vm5, 1.0, %v7498_v13 }
 0x19f   : > { %4403 = vmatmul.msk.f32.gmra.mxu3 %vm1117_vm0, %v4275_v58  ;;  %v4190_v58 = vsel %vm766_vm10, 1.0, %v7498_v13 }
 0x1a0   : > { %4316 = vmatmul.msk.f32.gmra.mxu0 %vm1117_vm0, %v4188_v38 }
 0x1a4   : > { %v641_v48 = vpop.permute.xlu1 %640 }
 0x1a5   : > { %vm827_vm8 = vcmp.eq.s32.totalorder %v5259_v54, %v641_v48  ;;  %v5772_v1 = vpop.f32.mrf.mxu0  ;;  %v5774_v16 = vpop.permute.xlu0 %628 }
 0x1a6   : > { %v4251_v43 = vsel %vm827_vm8, 1.0, %v7498_v13  ;;  %v647_v48 = vpop.permute.xlu2 %646  ;;  %vm770_vm8 = vcmp.eq.s32.totalorder %v5259_v54, %v5378_v2 }
 0x1a7   : > { %4379 = vmatmul.msk.f32.vlgmr.msra.gmra.mxu1 %vm1117_vm0, %v4251_v43  ;;  %4404 = vmatmul.msk.f32.gmra.mxu3 %vm1117_vm0, %v4276_v51  ;;  %vm829_vm12 = vcmp.eq.s32.totalorder %v5259_v54, %v647_v48 }
 0x1a8   : > { %4317 = vmatmul.msk.f32.gmra.mxu0 %vm1117_vm0, %v4189_v35  ;;  %v4253_v43 = vsel %vm829_vm12, 1.0, %v7498_v13 }
 0x1ac   : > { %v5785_v19 = vpop.permute.xlu1 %631 }
 0x1ad   : > { %v5787_v14 = vpop.f32.mrf.mxu0  ;;  %v677_v45 = vpop.permute.xlu0 %676 }
 0x1ae   : > { %vm839_vm11 = vcmp.eq.s32.totalorder %v5259_v54, %v677_v45  ;;  %v4191_v45 = vsel %vm767_vm13, 1.0, %v7498_v13  ;;  %vm772_vm13 = vcmp.eq.s32.totalorder %v5259_v54, %v5432_v39 }
 0x1af   : > { %v4263_v38 = vsel %vm839_vm11, 1.0, %v7498_v13  ;;  %4380 = vmatmul.msk.f32.gmra.mxu1 %vm1117_vm0, %v4252_v33  ;;  %vm771_vm11 = vcmp.eq.s32.totalorder %v5259_v54, %v5434_v40  ;;  %v4196_v40 = vsel %vm772_vm13, 1.0, %v7498_v13  ;;  %vm786_vm13 = vcmp.eq.s32.totalorder %v5259_v54, %v5507_v57 }
 0x1b0   : > { %4318 = vmatmul.msk.f32.gmra.mxu0 %vm1117_vm0, %v4190_v58  ;;  %4391 = vmatmul.msk.f32.gmra.mxu2 %vm1117_vm0, %v4263_v38 }
 0x1b4   : > { %v680_v18 = vpop.permute.xlu1 %679 }
 0x1b5   : > { %vm840_vm14 = vcmp.eq.s32.totalorder %v5259_v54, %v680_v18  ;;  %v5800_v51 = vpop.f32.mrf.mxu0  ;;  %v719_v42 = vpop.permute.xlu0 %718  ;;  %v4192_v18 = vsel %vm768_vm1, 1.0, %v7498_v13  ;;  %vm774_vm1 = vcmp.eq.s32.totalorder %v5259_v54, %v5447_v53 }
 0x1b6   : > { %v4264_v35 = vsel %vm840_vm14, 1.0, %v7498_v13  ;;  %vm853_vm15 = vcmp.eq.s32.totalorder %v5259_v54, %v719_v42 }
 0x1b7   : > { %v4277_v33 = vsel %vm853_vm15, 1.0, %v7498_v13  ;;  %4381 = vmatmul.msk.f32.gmra.mxu1 %vm1117_vm0, %v4253_v43  ;;  %v725_v43 = vpop.permute.xlu2 %724  ;;  %vm773_vm15 = vcmp.eq.s32.totalorder %v5259_v54, %v5391_v10 }
 0x1b8   : > { %4319 = vmatmul.msk.f32.gmra.mxu0 %vm1117_vm0, %v4191_v45  ;;  %4392 = vmatmul.msk.f32.gmra.mxu2 %vm1117_vm0, %v4264_v35  ;;  %vm855_vm5 = vcmp.eq.s32.totalorder %v5259_v54, %v725_v43 }
 0x1b9   : > { %4405 = vmatmul.msk.f32.gmra.mxu3 %vm1117_vm0, %v4277_v33  ;;  %v4279_v30 = vsel %vm855_vm5, 1.0, %v7498_v13  ;;  %vm778_vm5 = vcmp.eq.s32.totalorder %v5259_v54, %v5458_v0 }
 0x1bc   : > { %v650_v49 = vpop.permute.xlu1 %649 }
 0x1bd   : > { %vm830_vm2 = vcmp.eq.s32.totalorder %v5259_v54, %v650_v49  ;;  %v5814_v58 = vpop.f32.mrf.mxu0  ;;  %v722_v38 = vpop.permute.xlu0 %721  ;;  %v4193_v49 = vsel %vm769_vm4, 1.0, %v7498_v13  ;;  %vm777_vm4 = vcmp.eq.s32.totalorder %v5259_v54, %v5462_v5 }
 0x1be   : > { %v4254_v48 = vsel %vm830_vm2, 1.0, %v7498_v13  ;;  %vm854_vm3 = vcmp.eq.s32.totalorder %v5259_v54, %v722_v38  ;;  %vm775_vm2 = vcmp.eq.s32.totalorder %v5259_v54, %v5445_v52 }
 0x1bf   : > { %v4278_v42 = vsel %vm854_vm3, 1.0, %v7498_v13  ;;  %4382 = vmatmul.msk.f32.gmra.mxu1 %vm1117_vm0, %v4254_v48  ;;  %v728_v48 = vpop.permute.xlu2 %727  ;;  %vm776_vm3 = vcmp.eq.s32.totalorder %v5259_v54, %v5404_v55  ;;  %v4201_v55 = vsel %vm777_vm4, 1.0, %v7498_v13  ;;  %vm792_vm4 = vcmp.eq.s32.totalorder %v5259_v54, %v5537_v46 }
 0x1c0   : > { %4320 = vmatmul.msk.f32.gmra.mxu0 %vm1117_vm0, %v4192_v18  ;;  %vm856_vm9 = vcmp.eq.s32.totalorder %v5259_v54, %v728_v48  ;;  %v4200_v53 = vsel %vm776_vm3, 1.0, %v7498_v13  ;;  %vm791_vm3 = vcmp.eq.s32.totalorder %v5259_v54, %v5471_v28 }
 0x1c1   : > { %4406 = vmatmul.msk.f32.gmra.mxu3 %vm1117_vm0, %v4278_v42 }
 0x1c4   : > { %v683_v31 = vpop.permute.xlu1 %682 }
 0x1c5   : > { %vm841_vm6 = vcmp.eq.s32.totalorder %v5259_v54, %v683_v31  ;;  %v5827_v35 = vpop.f32.mrf.mxu0  ;;  %v653_v45 = vpop.permute.xlu0 %652 }
 0x1c6   : > { %v4265_v33 = vsel %vm841_vm6, 1.0, %v7498_v13  ;;  %vm831_vm7 = vcmp.eq.s32.totalorder %v5259_v54, %v653_v45  ;;  %v4194_v45 = vsel %vm770_vm8, 1.0, %v7498_v13  ;;  %vm779_vm6 = vcmp.eq.s32.totalorder %v5259_v54, %v5417_v22 }
 0x1c7   : > { %v4255_v38 = vsel %vm831_vm7, 1.0, %v7498_v13  ;;  %4393 = vmatmul.msk.f32.gmra.mxu2 %vm1117_vm0, %v4265_v33  ;;  %v4280_v33 = vsel %vm856_vm9, 1.0, %v7498_v13  ;;  %vm780_vm7 = vcmp.eq.s32.totalorder %v5259_v54, %v5477_v17  ;;  %vm781_vm8 = vcmp.eq.s32.totalorder %v5259_v54, %v5473_v15 }
 0x1c8   : > { %4321 = vmatmul.msk.f32.gmra.mxu0 %vm1117_vm0, %v4193_v49  ;;  %4383 = vmatmul.msk.f32.gmra.mxu1 %vm1117_vm0, %v4255_v38  ;;  %v4195_v38 = vsel %vm771_vm11, 1.0, %v7498_v13  ;;  %vm782_vm9 = vcmp.eq.s32.totalorder %v5259_v54, %v5430_v21  ;;  %vm784_vm11 = vcmp.eq.s32.totalorder %v5259_v54, %v5488_v32 }
 0x1c9   : > { %4407 = vmatmul.msk.f32.gmra.mxu3 %vm1117_vm0, %v4279_v30 }
 0x1cc   : > { %v686_v18 = vpop.permute.xlu1 %685 }
 0x1cd   : > { %vm842_vm10 = vcmp.eq.s32.totalorder %v5259_v54, %v686_v18  ;;  %v1594_v42 = vpop.f32.mrf.mxu0  ;;  %v5842_v43 = vpop.permute.xlu0 %634 }
 0x1ce   : > { %v4266_v31 = vsel %vm842_vm10, 1.0, %v7498_v13  ;;  %vm783_vm10 = vcmp.eq.s32.totalorder %v5259_v54, %v5492_v37 }
 0x1cf   : > { %4394 = vmatmul.msk.f32.gmra.mxu2 %vm1117_vm0, %v4266_v31  ;;  %v4207_v15 = vsel %vm783_vm10, 1.0, %v7498_v13 }
 0x1d0   : > { %4322 = vmatmul.msk.f32.gmra.mxu0 %vm1117_vm0, %v4194_v45 }
 0x1d1   : > { %4408 = vmatmul.msk.f32.gmra.mxu3 %vm1117_vm0, %v4280_v33  ;;  %v4197_v33 = vsel %vm773_vm15, 1.0, %v7498_v13  ;;  %vm788_vm15 = vcmp.eq.s32.totalorder %v5259_v54, %v5456_v29 }
 0x1d4   : > { %v692_v48 = vpop.permute.xlu1 %691 }
 0x1d5   : > { %v1597_v2 = vpop.f32.mrf.mxu0  ;;  %v689_v49 = vpop.permute.xlu0 %688  ;;  %vm844_vm14 = vcmp.eq.s32.totalorder %v5259_v54, %v692_v48 }
 0x1d6   : > { %vm843_vm12 = vcmp.eq.s32.totalorder %v5259_v54, %v689_v49  ;;  %v4268_v31 = vsel %vm844_vm14, 1.0, %v7498_v13  ;;  %v4198_v49 = vsel %vm774_vm1, 1.0, %v7498_v13  ;;  %vm787_vm14 = vcmp.eq.s32.totalorder %v5259_v54, %v5503_v47 }
 0x1d7   : > { %v4267_v30 = vsel %vm843_vm12, 1.0, %v7498_v13  ;;  %vm785_vm12 = vcmp.eq.s32.totalorder %v5259_v54, %v5443_v63  ;;  %vm789_vm1 = vcmp.eq.s32.totalorder %v5259_v54, %v5522_v23 }
 0x1d8   : > { %4323 = vmatmul.msk.f32.gmra.mxu0 %vm1117_vm0, %v4195_v38  ;;  %4395 = vmatmul.msk.f32.gmra.mxu2 %vm1117_vm0, %v4267_v30  ;;  %v4199_v30 = vsel %vm775_vm2, 1.0, %v7498_v13  ;;  %vm790_vm2 = vcmp.eq.s32.totalorder %v5259_v54, %v5518_v9  ;;  %v4216_v9 = vsel %vm792_vm4, 1.0, %v7498_v13 }
 0x1dd   : > { %v1600_v18 = vpop.f32.mrf.mxu0 }
 0x1e0   : > { %4324 = vmatmul.msk.f32.gmra.mxu0 %vm1117_vm0, %v4196_v40  ;;  %4396 = vmatmul.msk.f32.gmra.mxu2 %vm1117_vm0, %v4268_v31  ;;  %v5890_v31 = vpack.c.bf16 %v1600_v18, %v1597_v2  ;;  %v5905_v2 = vpack.c.bf16 %v5814_v58, %v5800_v51  ;;  %v4202_v18 = vsel %vm778_vm5, 1.0, %v7498_v13  ;;  %v5921_v51 = vpack.c.bf16 %v5760_v56, %v5739_v25 }
 0x1e1   : > { %v4203_v58 = vsel %vm779_vm6, 1.0, %v7498_v13  ;;  %v4204_v25 = vsel %vm780_vm7, 1.0, %v7498_v13  ;;  %vm793_vm5 = vcmp.eq.s32.totalorder %v5259_v54, %v5533_v44  ;;  %vm794_vm6 = vcmp.eq.s32.totalorder %v5259_v54, %v5486_v6 }
 0x1e2   : > { %7522 = vst [vmem:[#allocation36_spill] sm:$0xff] %v5890_v31  ;;  %v4217_v46 = vsel %vm793_vm5, 1.0, %v7498_v13  ;;  %vm795_vm7 = vcmp.eq.s32.totalorder %v5259_v54, %v5552_v26 }
 0x1e3   : > { %7524 = vst [vmem:[#allocation38_spill] sm:$0xff] %v5905_v2 }
 0x1e4   : > { %7526 = vst [vmem:[#allocation40_spill] sm:$0xff] %v5921_v51 }
 0x1e5   : > { %v1603_v45 = vpop.f32.mrf.mxu0 }
 0x1e8   : > { %4325 = vmatmul.msk.f32.gmra.mxu0 %vm1117_vm0, %v4197_v33  ;;  %v5896_v33 = vpack.c.bf16 %v1594_v42, %v5827_v35  ;;  %v5912_v35 = vpack.c.bf16 %v5787_v14, %v5772_v1  ;;  %v5928_v1 = vpack.c.bf16 %v5718_v61, %v5695_v36  ;;  %v4205_v14 = vsel %vm781_vm8, 1.0, %v7498_v13 }
 0x1e9   : > { %v4206_v36 = vsel %vm782_vm9, 1.0, %v7498_v13  ;;  %vm796_vm8 = vcmp.eq.s32.totalorder %v5259_v54, %v5548_v24 }
 0x1ea   : > { %7523 = vst [vmem:[#allocation37_spill] sm:$0xff] %v5896_v33 }
 0x1eb   : > { %7525 = vst [vmem:[#allocation39_spill] sm:$0xff] %v5912_v35 }
 0x1ec   : > { %7527 = vst [vmem:[#allocation41_spill] sm:$0xff] %v5928_v1 }
 0x1ed   : > { %v1606_v39 = vpop.f32.mrf.mxu0 }
 0x1ee   : > { %v5883_v40 = vpack.c.bf16 %v1606_v39, %v1603_v45  ;;  %v4208_v45 = vsel %vm784_vm11, 1.0, %v7498_v13  ;;  %v4209_v39 = vsel %vm785_vm12, 1.0, %v7498_v13 }
 0x1f0   : > { %4326 = vmatmul.msk.f32.gmra.mxu0 %vm1117_vm0, %v4198_v49  ;;  %7521 = vst [vmem:[#allocation35_spill] sm:$0xff] %v5883_v40  ;;  %v4210_v49 = vsel %vm786_vm13, 1.0, %v7498_v13 }
 0x1f5   : > { %v1609_v38 = vpop.f32.mrf.mxu0 }
 0x1f8   : > { %4327 = vmatmul.msk.f32.gmra.mxu0 %vm1117_vm0, %v4199_v30  ;;  %v4212_v30 = vsel %vm788_vm15, 1.0, %v7498_v13 }
 0x1fd   : > { %v1612_v10 = vpop.f32.mrf.mxu0 }
 0x1fe   : > { %v5878_v48 = vpack.c.bf16 %v1612_v10, %v1609_v38  ;;  %v4211_v38 = vsel %vm787_vm14, 1.0, %v7498_v13  ;;  %v4213_v10 = vsel %vm789_vm1, 1.0, %v7498_v13  ;;  %vm804_vm1 = vcmp.eq.s32.totalorder %v5259_v54, %v5597_v7 }
 0x200   : > { %7520 = vst [vmem:[#allocation34_spill] sm:$0xff] %v5878_v48  ;;  %4328 = vmatmul.msk.f32.gmra.mxu0 %vm1117_vm0, %v4200_v53  ;;  %2099 = vmatpush.bf16.msrb.mxu2 %v5878_v48  ;;  %v4214_v53 = vsel %vm790_vm2, 1.0, %v7498_v13 }
 0x204   : > { %2100 = vmatpush.bf16.msrb.mxu2 %v5883_v40 }
 0x205   : > { %v5888_v52 = vpop.f32.mrf.mxu0 }
 0x208   : > { %4329 = vmatmul.msk.f32.gmra.mxu0 %vm1117_vm0, %v4201_v55  ;;  %2101 = vmatpush.bf16.msrb.mxu2 %v5890_v31  ;;  %v4215_v55 = vsel %vm791_vm3, 1.0, %v7498_v13 }
 0x20c   : > { %2102 = vmatpush.bf16.msrb.mxu2 %v5896_v33 }
 0x20d   : > { %v5901_v5 = vpop.f32.mrf.mxu0 }
 0x210   : > { %4330 = vmatmul.msk.f32.gmra.mxu0 %vm1117_vm0, %v4202_v18  ;;  %2103 = vmatpush.bf16.msrb.mxu2 %v5905_v2 }
 0x214   : > { %2104 = vmatpush.bf16.msrb.mxu2 %v5912_v35 }
 0x215   : > { %v5917_v0 = vpop.f32.mrf.mxu0 }
 0x218   : > { %4331 = vmatmul.msk.f32.gmra.mxu0 %vm1117_vm0, %v4203_v58  ;;  %2105 = vmatpush.bf16.msrb.mxu2 %v5921_v51 }
 0x21c   : > { %2106 = vmatpush.bf16.msrb.mxu2 %v5928_v1 }
 0x21d   : > { %v5933_v22 = vpop.f32.mrf.mxu0 }
 0x220   : > { %4332 = vmatmul.msk.f32.gmra.mxu0 %vm1117_vm0, %v4204_v25 }
 0x224   : > { %v1813_v11 = vpop.f32.mrf.mxu1 }
 0x225   : > { %v5939_v56 = vpop.f32.mrf.mxu0 }
 0x228   : > { %4333 = vmatmul.msk.f32.gmra.mxu0 %vm1117_vm0, %v4205_v14 }
 0x22d   : > { %v1630_v17 = vpop.f32.mrf.mxu0 }
 0x230   : > { %4334 = vmatmul.msk.f32.gmra.mxu0 %vm1117_vm0, %v4206_v36 }
 0x235   : > { %v1633_v61 = vpop.f32.mrf.mxu0 }
 0x238   : > { %4335 = vmatmul.msk.f32.gmra.mxu0 %vm1117_vm0, %v4207_v15  ;;  %v4218_v15 = vsel %vm794_vm6, 1.0, %v7498_v13 }
 0x23d   : > { %v1636_v42 = vpop.f32.mrf.mxu0 }
 0x23e   : > { %v6009_v36 = vpack.c.bf16 %v1636_v42, %v1633_v61  ;;  %v6024_v61 = vpack.c.bf16 %v5933_v22, %v5917_v0  ;;  %v4219_v42 = vsel %vm795_vm7, 1.0, %v7498_v13  ;;  %v4220_v0 = vsel %vm796_vm8, 1.0, %v7498_v13  ;;  %v7536_v22 = vld [vmem:[#allocation6_spill] sm:$0xff] }
 0x23f   : > { %vm797_vm9 = vcmp.eq.s32.totalorder %v5259_v54, %v7536_v22  ;;  %v4228_v22 = vsel %vm804_vm1, 1.0, %v7498_v13  ;;  %vm819_vm1 = vcmp.eq.s32.totalorder %v5259_v54, %v5697_v4 }
 0x240   : > { %4336 = vmatmul.msk.f32.gmra.mxu0 %vm1117_vm0, %v4208_v45  ;;  %7532 = vst [vmem:[#allocation46_spill] sm:$0xff] %v6009_v36  ;;  %v6015_v45 = vpack.c.bf16 %v1630_v17, %v5939_v56  ;;  %v6031_v56 = vpack.c.bf16 %v5901_v5, %v5888_v52  ;;  %v7537_v52 = vld [vmem:[#allocation12_spill] sm:$0xff] }
 0x241   : > { %7534 = vst [vmem:[#allocation48_spill] sm:$0xff] %v6024_v61  ;;  %vm798_vm10 = vcmp.eq.s32.totalorder %v5259_v54, %v7537_v52 }
 0x242   : > { %7533 = vst [vmem:[#allocation47_spill] sm:$0xff] %v6015_v45  ;;  %v4222_v5 = vsel %vm798_vm10, 1.0, %v7498_v13 }
 0x243   : > { %7535 = vst [vmem:[#allocation49_spill] sm:$0xff] %v6031_v56 }
 0x245   : > { %v1639_v21 = vpop.f32.mrf.mxu0 }
 0x248   : > { %4337 = vmatmul.msk.f32.gmra.mxu0 %vm1117_vm0, %v4209_v39  ;;  %v7538_v39 = vld [vmem:[#allocation11_spill] sm:$0xff] }
 0x249   : > { %vm799_vm11 = vcmp.eq.s32.totalorder %v5259_v54, %v7538_v39 }
 0x24d   : > { %v1642_v37 = vpop.f32.mrf.mxu0 }
 0x24e   : > { %v6002_v14 = vpack.c.bf16 %v1642_v37, %v1639_v21  ;;  %v4221_v21 = vsel %vm797_vm9, 1.0, %v7498_v13 }
 0x250   : > { %4338 = vmatmul.msk.f32.gmra.mxu0 %vm1117_vm0, %v4210_v49  ;;  %7531 = vst [vmem:[#allocation45_spill] sm:$0xff] %v6002_v14  ;;  %v4223_v49 = vsel %vm799_vm11, 1.0, %v7498_v13 }
 0x255   : > { %v1645_v32 = vpop.f32.mrf.mxu0 }
 0x258   : > { %4339 = vmatmul.msk.f32.gmra.mxu0 %vm1117_vm0, %v4211_v38 }
 0x25d   : > { %v1648_v63 = vpop.f32.mrf.mxu0 }
 0x25e   : > { %v5997_v25 = vpack.c.bf16 %v1648_v63, %v1645_v32  ;;  %v7539_v32 = vld [vmem:[#allocation7_spill] sm:$0xff] }
 0x25f   : > { %vm800_vm12 = vcmp.eq.s32.totalorder %v5259_v54, %v7539_v32 }
 0x260   : > { %4340 = vmatmul.msk.f32.gmra.mxu0 %vm1117_vm0, %v4212_v30  ;;  %7530 = vst [vmem:[#allocation44_spill] sm:$0xff] %v5997_v25  ;;  %v4224_v63 = vsel %vm800_vm12, 1.0, %v7498_v13  ;;  %v7540_v30 = vld [vmem:[#allocation15_spill] sm:$0xff] }
 0x261   : > { %vm801_vm13 = vcmp.eq.s32.totalorder %v5259_v54, %v7540_v30  ;;  %v7545_v30 = vld [vmem:[#allocation19_spill] sm:$0xff] }
 0x262   : > { %vm807_vm4 = vcmp.eq.s32.totalorder %v5259_v54, %v7545_v30 }
 0x265   : > { %v1651_v57 = vpop.f32.mrf.mxu0 }
 0x268   : > { %4341 = vmatmul.msk.f32.gmra.mxu0 %vm1117_vm0, %v4213_v10  ;;  %v4225_v10 = vsel %vm801_vm13, 1.0, %v7498_v13 }
 0x26d   : > { %v1654_v47 = vpop.f32.mrf.mxu0 }
 0x26e   : > { %v5990_v58 = vpack.c.bf16 %v1654_v47, %v1651_v57  ;;  %v6068_v47 = vpop.f32.mrf.mxu2 }
 0x270   : > { %4342 = vmatmul.msk.f32.gmra.mxu0 %vm1117_vm0, %v4214_v53  ;;  %7529 = vst [vmem:[#allocation43_spill] sm:$0xff] %v5990_v58  ;;  %v7541_v53 = vld [vmem:[#allocation14_spill] sm:$0xff] }
 0x271   : > { %vm802_vm14 = vcmp.eq.s32.totalorder %v5259_v54, %v7541_v53  ;;  %v4231_v53 = vsel %vm807_vm4, 1.0, %v7498_v13  ;;  %vm822_vm4 = vcmp.eq.s32.totalorder %v5259_v54, %v5762_v41 }
 0x275   : > { %v1657_v29 = vpop.f32.mrf.mxu0 }
 0x278   : > { %4343 = vmatmul.msk.f32.gmra.mxu0 %vm1117_vm0, %v4215_v55  ;;  %v4226_v55 = vsel %vm802_vm14, 1.0, %v7498_v13 }
 0x27d   : > { %v1660_v23 = vpop.f32.mrf.mxu0 }
 0x27e   : > { %v5985_v18 = vpack.c.bf16 %v1660_v23, %v1657_v29  ;;  %v7542_v23 = vld [vmem:[#allocation8_spill] sm:$0xff] }
 0x27f   : > { %vm803_vm15 = vcmp.eq.s32.totalorder %v5259_v54, %v7542_v23  ;;  %v4945_v23 = vld [vmem:[#allocation2 + $0x9c] sm:$0xf0] }
 0x280   : > { %7528 = vst [vmem:[#allocation42_spill] sm:$0xff] %v5985_v18  ;;  %4344 = vmatmul.msk.f32.gmra.mxu0 %vm1117_vm0, %v4216_v9  ;;  %2118 = vmatpush.bf16.msrb.mxu3 %v5985_v18  ;;  %v6076_v9 = vpop.f32.mrf.mxu2 }
 0x284   : > { %2119 = vmatpush.bf16.msrb.mxu3 %v5990_v58 }
 0x285   : > { %v5995_v28 = vpop.f32.mrf.mxu0 }
 0x288   : > { %4345 = vmatmul.msk.f32.gmra.mxu0 %vm1117_vm0, %v4217_v46  ;;  %2120 = vmatpush.bf16.msrb.mxu3 %v5997_v25 }
 0x28c   : > { %2121 = vmatpush.bf16.msrb.mxu3 %v6002_v14 }
 0x28d   : > { %v6007_v44 = vpop.f32.mrf.mxu0 }
 0x290   : > { %4346 = vmatmul.msk.f32.gmra.mxu0 %vm1117_vm0, %v4218_v15  ;;  %2122 = vmatpush.bf16.msrb.mxu3 %v6009_v36  ;;  %v4227_v15 = vsel %vm803_vm15, 1.0, %v7498_v13  ;;  %vm818_vm15 = vcmp.eq.s32.totalorder %v5259_v54, %v5677_v59 }
 0x294   : > { %2123 = vmatpush.bf16.msrb.mxu3 %v6015_v45 }
 0x295   : > { %v6020_v6 = vpop.f32.mrf.mxu0 }
 0x298   : > { %4347 = vmatmul.msk.f32.gmra.mxu0 %vm1117_vm0, %v4219_v42  ;;  %2124 = vmatpush.bf16.msrb.mxu3 %v6024_v61 }
 0x29c   : > { %2125 = vmatpush.bf16.msrb.mxu3 %v6031_v56 }
 0x29d   : > { %v6036_v26 = vpop.f32.mrf.mxu0 }
 0x2a0   : > { %4348 = vmatmul.msk.f32.gmra.mxu0 %vm1117_vm0, %v4220_v0  ;;  %v6082_v0 = vpop.f32.mrf.mxu2 }
 0x2a5   : > { %v6042_v17 = vpop.f32.mrf.mxu0 }
 0x2a8   : > { %4349 = vmatmul.msk.f32.gmra.mxu0 %vm1117_vm0, %v4221_v21  ;;  %v7543_v21 = vld [vmem:[#allocation17_spill] sm:$0xff]  ;;  %v6089_v39 = vpop.f32.mrf.mxu2 }
 0x2a9   : > { %vm805_vm2 = vcmp.eq.s32.totalorder %v5259_v54, %v7543_v21 }
 0x2ad   : > { %v6048_v24 = vpop.f32.mrf.mxu0 }
 0x2b0   : > { %4350 = vmatmul.msk.f32.gmra.mxu0 %vm1117_vm0, %v4222_v5  ;;  %v4229_v5 = vsel %vm805_vm2, 1.0, %v7498_v13  ;;  %vm820_vm2 = vcmp.eq.s32.totalorder %v5259_v54, %v5720_v60 }
 0x2b5   : > { %v6054_v37 = vpop.f32.mrf.mxu0 }
 0x2b8   : > { %4351 = vmatmul.msk.f32.gmra.mxu0 %vm1117_vm0, %v4223_v49  ;;  %v7544_v49 = vld [vmem:[#allocation9_spill] sm:$0xff] }
 0x2b9   : > { %vm806_vm3 = vcmp.eq.s32.totalorder %v5259_v54, %v7544_v49 }
 0x2ba   : > { %v4230_v32 = vsel %vm806_vm3, 1.0, %v7498_v13  ;;  %vm821_vm3 = vcmp.eq.s32.totalorder %v5259_v54, %v5741_v20 }
 0x2bd   : > { %v6060_v38 = vpop.f32.mrf.mxu0 }
 0x2c0   : > { %4352 = vmatmul.msk.f32.gmra.mxu0 %vm1117_vm0, %v4224_v63  ;;  %v1840_v63 = vpop.f32.mrf.mxu2 }
 0x2c5   : > { %v1687_v57 = vpop.f32.mrf.mxu0 }
 0x2c8   : > { %4353 = vmatmul.msk.f32.gmra.mxu0 %vm1117_vm0, %v4225_v10 }
 0x2cd   : > { %v1690_v29 = vpop.f32.mrf.mxu0 }
 0x2d0   : > { %4354 = vmatmul.msk.f32.gmra.mxu0 %vm1117_vm0, %v4226_v55  ;;  %v4411_v55 = vld [vmem:[#allocation2 + $0x80] sm:$0xf] }
 0x2d1   : > { %v4412_v21 = vor.u32 %v4945_v23, %v4411_v55 }
 0x2d3   : > { %2088 = vmatmul.bf16.vlgmr.msrb.gmra.mxu1 %v4412_v21  ;;  %v1816_v21 = vpop.f32.mrf.mxu1 }
 0x2d5   : > { %v1693_v46 = vpop.f32.mrf.mxu0 }
 0x2d8   : > { %4355 = vmatmul.msk.f32.gmra.mxu0 %vm1117_vm0, %v4227_v15  ;;  %v7546_v15 = vld [vmem:[#allocation18_spill] sm:$0xff] }
 0x2d9   : > { %vm808_vm5 = vcmp.eq.s32.totalorder %v5259_v54, %v7546_v15 }
 0x2dd   : > { %v1696_v42 = vpop.f32.mrf.mxu0 }
 0x2e0   : > { %4356 = vmatmul.msk.f32.gmra.mxu0 %vm1117_vm0, %v4228_v22  ;;  %v1843_v22 = vpop.f32.mrf.mxu2 }
 0x2e5   : > { %v1699_v52 = vpop.f32.mrf.mxu0 }
 0x2e8   : > { %4357 = vmatmul.msk.f32.gmra.mxu0 %vm1117_vm0, %v4229_v5  ;;  %v1846_v55 = vpop.f32.mrf.mxu2 }
 0x2ed   : > { %v1702_v7 = vpop.f32.mrf.mxu0 }
 0x2ee   : > { %v6107_v30 = vpack.c.bf16 %v1702_v7, %v1699_v52  ;;  %v7552_v52 = vld [vmem:[#allocation21_spill] sm:$0xff] }
 0x2ef   : > { %vm810_vm7 = vcmp.eq.s32.totalorder %v5259_v54, %v7552_v52 }
 0x2f0   : > { %4358 = vmatmul.msk.f32.gmra.mxu0 %vm1117_vm0, %v4230_v32  ;;  %v4232_v32 = vsel %vm808_vm5, 1.0, %v7498_v13  ;;  %7548 = vst [vmem:[#allocation12_spill] sm:$0xff] %v6107_v30  ;;  %vm823_vm5 = vcmp.eq.s32.totalorder %v5259_v54, %v5774_v16 }
 0x2f5   : > { %v1705_v10 = vpop.f32.mrf.mxu0 }
 0x2f8   : > { %4359 = vmatmul.msk.f32.gmra.mxu0 %vm1117_vm0, %v4231_v53  ;;  %v7549_v53 = vld [vmem:[#allocation10_spill] sm:$0xff] }
 0x2f9   : > { %vm809_vm6 = vcmp.eq.s32.totalorder %v5259_v54, %v7549_v53  ;;  %v1819_v53 = vpop.f32.mrf.mxu1 }
 0x2fa   : > { %v4233_v23 = vsel %vm809_vm6, 1.0, %v7498_v13  ;;  %vm824_vm6 = vcmp.eq.s32.totalorder %v5259_v54, %v5785_v19 }
 0x2fd   : > { %v1708_v5 = vpop.f32.mrf.mxu0 }
 0x2fe   : > { %v6102_v49 = vpack.c.bf16 %v1708_v5, %v1705_v10  ;;  %v6114_v10 = vpack.c.bf16 %v1696_v42, %v1693_v46  ;;  %v6119_v5 = vpack.c.bf16 %v1690_v29, %v1687_v57  ;;  %v6128_v46 = vpack.c.bf16 %v6060_v38, %v6054_v37  ;;  %v7555_v29 = vld [vmem:[#allocation20_spill] sm:$0xff] }
 0x2ff   : > { %v4234_v42 = vsel %vm810_vm7, 1.0, %v7498_v13  ;;  %v6135_v57 = vpack.c.bf16 %v6048_v24, %v6042_v17  ;;  %vm811_vm8 = vcmp.eq.s32.totalorder %v5259_v54, %v7555_v29  ;;  %v6144_v37 = vpack.c.bf16 %v6036_v26, %v6020_v6 }
 0x300   : > { %7547 = vst [vmem:[#allocation6_spill] sm:$0xff] %v6102_v49  ;;  %4360 = vmatmul.msk.f32.gmra.mxu0 %vm1117_vm0, %v4232_v32  ;;  %2137 = vmatpush.bf16.msra.mxu1 %v6102_v49  ;;  %v1849_v32 = vpop.f32.mrf.mxu2  ;;  %v4235_v38 = vsel %vm811_vm8, 1.0, %v7498_v13  ;;  %v6151_v17 = vpack.c.bf16 %v6007_v44, %v5995_v28  ;;  %v6167_v28 = vpack.c.bf16 %v1840_v63, %v6089_v39  ;;  %v7562_v44 = vld [vmem:[#allocation23_spill] sm:$0xff]  ;;  %v7565_v63 = vld [vmem:[#allocation22_spill] sm:$0xff] }
 0x301   : > { %7550 = vst [vmem:[#allocation11_spill] sm:$0xff] %v6114_v10  ;;  %v1822_v26 = vpop.f32.mrf.mxu1  ;;  %vm813_vm10 = vcmp.eq.s32.totalorder %v5259_v54, %v7562_v44  ;;  %vm814_vm11 = vcmp.eq.s32.totalorder %v5259_v54, %v7565_v63  ;;  %v6196_v44 = vpack.c.bf16 %v1816_v21, %v1813_v11  ;;  %vm825_vm7 = vcmp.eq.s32.totalorder %v5259_v54, %v5842_v43 }
 0x302   : > { %7551 = vst [vmem:[#allocation7_spill] sm:$0xff] %v6119_v5  ;;  %v4249_v19 = vsel %vm825_vm7, 1.0, %v7498_v13 }
 0x303   : > { %7553 = vst [vmem:[#allocation15_spill] sm:$0xff] %v6128_v46 }
 0x304   : > { %2138 = vmatpush.bf16.msra.mxu1 %v6107_v30  ;;  %7554 = vst [vmem:[#allocation14_spill] sm:$0xff] %v6135_v57 }
 0x305   : > { %v6112_v15 = vpop.f32.mrf.mxu0  ;;  %7556 = vst [vmem:[#allocation8_spill] sm:$0xff] %v6144_v37 }
 0x306   : > { %7557 = vst [vmem:[#allocation17_spill] sm:$0xff] %v6151_v17 }
 0x307   : > { %7561 = vst [vmem:[#allocation18_spill] sm:$0xff] %v6167_v28 }
 0x308   : > { %4361 = vmatmul.msk.f32.gmra.mxu0 %vm1117_vm0, %v4233_v23  ;;  %2139 = vmatpush.bf16.msra.mxu1 %v6114_v10  ;;  %v1852_v52 = vpop.f32.mrf.mxu2 }
 0x309   : > { %v6153_v24 = vpack.c.bf16 %v1852_v52, %v1849_v32  ;;  %v4237_v52 = vsel %vm813_vm10, 1.0, %v7498_v13 }
 0x30b   : > { %7558 = vst [vmem:[#allocation9_spill] sm:$0xff] %v6153_v24 }
 0x30c   : > { %2140 = vmatpush.bf16.msra.mxu1 %v6119_v5 }
 0x30d   : > { %v6124_v7 = vpop.f32.mrf.mxu0 }
 0x310   : > { %4362 = vmatmul.msk.f32.gmra.mxu0 %vm1117_vm0, %v4234_v42  ;;  %2141 = vmatpush.bf16.msra.mxu1 %v6128_v46  ;;  %v7559_v42 = vld [vmem:[#allocation13_spill] sm:$0xff] }
 0x311   : > { %vm812_vm9 = vcmp.eq.s32.totalorder %v5259_v54, %v7559_v42  ;;  %v6186_v42 = vpop.f32.mrf.mxu3  ;;  %7567 = vst [vmem:[#allocation13_spill] sm:$0xff] %v6196_v44 }
 0x312   : > { %v4236_v29 = vsel %vm812_vm9, 1.0, %v7498_v13 }
 0x314   : > { %2142 = vmatpush.bf16.msra.mxu1 %v6135_v57 }
 0x315   : > { %v6140_v23 = vpop.f32.mrf.mxu0 }
 0x318   : > { %4363 = vmatmul.msk.f32.gmra.mxu0 %vm1117_vm0, %v4235_v38  ;;  %2143 = vmatpush.bf16.msra.mxu1 %v6144_v37  ;;  %v6162_v38 = vpack.c.bf16 %v1846_v55, %v1843_v22  ;;  %v6177_v22 = vpack.c.bf16 %v6082_v0, %v6076_v9  ;;  %v1825_v55 = vpop.f32.mrf.mxu1  ;;  %v4238_v9 = vsel %vm814_vm11, 1.0, %v7498_v13  ;;  %v6192_v0 = vpack.c.bf16 %v1822_v26, %v1819_v53  ;;  %v7569_v53 = vld [vmem:[#allocation24_spill] sm:$0xff] }
 0x319   : > { %v6182_v39 = vpack.c.bf16 %v6068_v47, %v1825_v55  ;;  %v7568_v47 = vld [vmem:[#allocation16_spill] sm:$0xff]  ;;  %v6203_v55 = vpop.f32.mrf.mxu3  ;;  %vm816_vm13 = vcmp.eq.s32.totalorder %v5259_v54, %v7569_v53 }
 0x31a   : > { %7560 = vst [vmem:[#allocation19_spill] sm:$0xff] %v6162_v38  ;;  %vm815_vm12 = vcmp.eq.s32.totalorder %v5259_v54, %v7568_v47  ;;  %v4240_v11 = vsel %vm816_vm13, 1.0, %v7498_v13 }
 0x31b   : > { %7563 = vst [vmem:[#allocation10_spill] sm:$0xff] %v6177_v22  ;;  %v4239_v63 = vsel %vm815_vm12, 1.0, %v7498_v13 }
 0x31c   : > { %2144 = vmatpush.bf16.msra.mxu1 %v6151_v17  ;;  %7564 = vst [vmem:[#allocation21_spill] sm:$0xff] %v6182_v39  ;;  %v4413_v17 = vld [vmem:[#allocation2 + $0xa0] sm:$0xf0] }
 0x31d   : > { %v6158_v6 = vpop.f32.mrf.mxu0  ;;  %7566 = vst [vmem:[#allocation20_spill] sm:$0xff] %v6192_v0 }
 0x320   : > { %2194 = vmatpush.bf16.msrb.mxu1 %v6153_v24  ;;  %4364 = vmatmul.msk.f32.gmra.mxu0 %vm1117_vm0, %v4236_v29  ;;  %v4941_v24 = vld [vmem:[#allocation2 + $0x84] sm:$0xf] }
 0x321   : > { %v6212_v21 = vpop.f32.mrf.mxu3 }
 0x324   : > { %2195 = vmatpush.bf16.msrb.mxu1 %v6162_v38 }
 0x325   : > { %v6171_v32 = vpop.f32.mrf.mxu0 }
 0x328   : > { %2196 = vmatpush.bf16.msrb.mxu1 %v6167_v28  ;;  %4365 = vmatmul.msk.f32.gmra.mxu0 %vm1117_vm0, %v4237_v52 }
 0x32c   : > { %2197 = vmatpush.bf16.msrb.mxu1 %v6177_v22  ;;  %v4244_v22 = vsel %vm820_vm2, 1.0, %v7498_v13 }
 0x32d   : > { %v6188_v29 = vpop.f32.mrf.mxu0 }
 0x330   : > { %2198 = vmatpush.bf16.msrb.mxu1 %v6182_v39  ;;  %4366 = vmatmul.msk.f32.gmra.mxu0 %vm1117_vm0, %v4238_v9  ;;  %v7570_v9 = vld [vmem:[#allocation25_spill] sm:$0xff]  ;;  %v4243_v39 = vsel %vm819_vm1, 1.0, %v7498_v13 }
 0x331   : > { %vm817_vm14 = vcmp.eq.s32.totalorder %v5259_v54, %v7570_v9 }
 0x334   : > { %2199 = vmatpush.bf16.msrb.mxu1 %v6192_v0  ;;  %v4242_v0 = vsel %vm818_vm15, 1.0, %v7498_v13 }
 0x335   : > { %v6200_v52 = vpop.f32.mrf.mxu0 }
 0x338   : > { %2200 = vmatpush.bf16.msrb.mxu1 %v6196_v44  ;;  %4367 = vmatmul.msk.f32.gmra.mxu0 %vm1117_vm0, %v4239_v63  ;;  %v4241_v44 = vsel %vm817_vm14, 1.0, %v7498_v13  ;;  %v6219_v63 = vpop.f32.mrf.mxu3 }
 0x33d   : > { %v6209_v26 = vpop.f32.mrf.mxu0 }
 0x340   : > { %4368 = vmatmul.msk.f32.gmra.mxu0 %vm1117_vm0, %v4240_v11  ;;  %v6227_v11 = vpop.f32.mrf.mxu3 }
 0x345   : > { %v1735_v47 = vpop.f32.mrf.mxu0 }
 0x348   : > { %4369 = vmatmul.msk.f32.gmra.mxu0 %vm1117_vm0, %v4241_v44  ;;  %v6233_v59 = vpop.f32.mrf.mxu3 }
 0x34d   : > { %v1738_v53 = vpop.f32.mrf.mxu0 }
 0x350   : > { %4370 = vmatmul.msk.f32.gmra.mxu0 %vm1117_vm0, %v4242_v0  ;;  %v4245_v0 = vsel %vm821_vm3, 1.0, %v7498_v13  ;;  %v6240_v28 = vpop.f32.mrf.mxu3 }
 0x355   : > { %v1741_v9 = vpop.f32.mrf.mxu0 }
 0x358   : > { %4371 = vmatmul.msk.f32.gmra.mxu0 %vm1117_vm0, %v4243_v39  ;;  %v4246_v39 = vsel %vm822_vm4, 1.0, %v7498_v13  ;;  %v1888_v38 = vpop.f32.mrf.mxu3 }
 0x35d   : > { %v1744_v44 = vpop.f32.mrf.mxu0 }
 0x360   : > { %4372 = vmatmul.msk.f32.gmra.mxu0 %vm1117_vm0, %v4244_v22  ;;  %v4247_v22 = vsel %vm823_vm5, 1.0, %v7498_v13  ;;  %v1891_v37 = vpop.f32.mrf.mxu3 }
 0x365   : > { %v1747_v4 = vpop.f32.mrf.mxu0 }
 0x368   : > { %4373 = vmatmul.msk.f32.gmra.mxu0 %vm1117_vm0, %v4245_v0  ;;  %v4416_v0 = vor.u32 %v4941_v24, %v4413_v17  ;;  %v1894_v17 = vpop.f32.mrf.mxu3 }
 0x36a   : > { %2107 = vmatmul.bf16.vlgmr.msrb.gmra.mxu2 %v4416_v0  ;;  %v4445_v0 = vld [vmem:[#allocation2 + $0xe0] sm:$0xf0] }
 0x36d   : > { %v1750_v60 = vpop.f32.mrf.mxu0 }
 0x36e   : > { %v6258_v16 = vpack.c.bf16 %v1750_v60, %v1747_v4  ;;  %v6268_v60 = vpack.c.bf16 %v1738_v53, %v1735_v47  ;;  %v1855_v47 = vpop.f32.mrf.mxu2  ;;  %v6283_v53 = vpack.c.bf16 %v6188_v29, %v6171_v32 }
 0x370   : > { %4374 = vmatmul.msk.f32.gmra.mxu0 %vm1117_vm0, %v4246_v39  ;;  %v4248_v39 = vsel %vm824_vm6, 1.0, %v7498_v13  ;;  %7572 = vst [vmem:[#allocation22_spill] sm:$0xff] %v6258_v16 }
 0x371   : > { %7574 = vst [vmem:[#allocation24_spill] sm:$0xff] %v6268_v60 }
 0x372   : > { %7577 = vst [vmem:[#allocation51_spill] sm:$0xff] %v6283_v53 }
 0x375   : > { %v1753_v20 = vpop.f32.mrf.mxu0 }
 0x376   : > { %v1858_v29 = vpop.f32.mrf.mxu2 }
 0x378   : > { %4375 = vmatmul.msk.f32.gmra.mxu0 %vm1117_vm0, %v4247_v22  ;;  %v6263_v22 = vpack.c.bf16 %v1744_v44, %v1741_v9  ;;  %v1897_v9 = vpop.f32.mrf.mxu3  ;;  %v6274_v44 = vpack.c.bf16 %v6209_v26, %v6200_v52  ;;  %v6288_v52 = vpack.c.bf16 %v6158_v6, %v6140_v23  ;;  %v6301_v6 = vpack.c.bf16 %v1894_v17, %v1891_v37 }
 0x379   : > { %v6315_v37 = vpack.c.bf16 %v6219_v63, %v6212_v21 }
 0x37a   : > { %7573 = vst [vmem:[#allocation16_spill] sm:$0xff] %v6263_v22 }
 0x37b   : > { %7575 = vst [vmem:[#allocation25_spill] sm:$0xff] %v6274_v44 }
 0x37c   : > { %7578 = vst [vmem:[#allocation52_spill] sm:$0xff] %v6288_v52 }
 0x37d   : > { %v1756_v41 = vpop.f32.mrf.mxu0  ;;  %7580 = vst [vmem:[#allocation54_spill] sm:$0xff] %v6301_v6 }
 0x37e   : > { %v6253_v57 = vpack.c.bf16 %v1756_v41, %v1753_v20  ;;  %v4949_v20 = vld [vmem:[#allocation2 + $0xc4] sm:$0xf]  ;;  %v638_v41 = vpop.permute.xlu2 %637  ;;  %7583 = vst [vmem:[#allocation57_spill] sm:$0xff] %v6315_v37 }
 0x37f   : > { %v4448_v4 = vor.u32 %v4949_v20, %v4445_v0  ;;  %vm826_vm8 = vcmp.eq.s32.totalorder %v5259_v54, %v638_v41  ;;  %v6293_v0 = vpack.c.bf16 %v6124_v7, %v6112_v15  ;;  %v1861_v7 = vpop.f32.mrf.mxu2  ;;  %v4515_v54 = vld [vmem:[#allocation2 + $0x48] sm:$0xf] }
 0x380   : > { %7571 = vst [vmem:[#allocation23_spill] sm:$0xff] %v6253_v57  ;;  %4376 = vmatmul.msk.f32.gmra.mxu0 %vm1117_vm0, %v4248_v39  ;;  %2156 = vmatpush.bf16.msra.mxu2 %v6253_v57  ;;  %v1900_v26 = vpop.f32.mrf.mxu3 }
 0x381   : > { %2112 = vmatmul.bf16.gmra.mxu2 %v4448_v4  ;;  %v6295_v41 = vpack.c.bf16 %v1900_v26, %v1897_v9  ;;  %v6310_v9 = vpack.c.bf16 %v6233_v59, %v6227_v11  ;;  %v6322_v26 = vpack.c.bf16 %v6203_v55, %v6186_v42  ;;  %v4443_v59 = vld [vmem:[#allocation2 + $0xc0] sm:$0xf]  ;;  %v4944_v55 = vld [vmem:[#allocation2 + $0x9c] sm:$0xf] }
 0x383   : > { %7582 = vst [vmem:[#allocation56_spill] sm:$0xff] %v6310_v9 }
 0x384   : > { %2157 = vmatpush.bf16.msra.mxu2 %v6258_v16  ;;  %7585 = vst [vmem:[#allocation59_spill] sm:$0xff] %v6322_v26 }
 0x385   : > { %v1759_v24 = vpop.f32.mrf.mxu0 }
 0x387   : > { %v1864_v11 = vpop.f32.mrf.mxu2 }
 0x388   : > { %4377 = vmatmul.msk.f32.gmra.mxu0 %vm1117_vm0, %v4249_v19  ;;  %2158 = vmatpush.bf16.msra.mxu2 %v6263_v22  ;;  %v4250_v19 = vsel %vm826_vm8, 1.0, %v7498_v13  ;;  %v4427_v13 = vld [vmem:[#allocation2 + $0x90] sm:$0xf]  ;;  %v6325_v63 = vpack.c.bf16 %v1864_v11, %v1861_v7  ;;  %v4421_v11 = vld [vmem:[#allocation2 + $0xa8] sm:$0xf0] }
 0x38a   : > { %7586 = vst [vmem:[#allocation60_spill] sm:$0xff] %v6325_v63 }
 0x38c   : > { %2159 = vmatpush.bf16.msra.mxu2 %v6268_v60 }
 0x38d   : > { %v1762_v43 = vpop.f32.mrf.mxu0 }
 0x38e   : > { %v6276_v39 = vpack.c.bf16 %v1762_v43, %v1759_v24  ;;  %v4947_v24 = vld [vmem:[#allocation2 + $0xac] sm:$0xf0]  ;;  %v6305_v43 = vpack.c.bf16 %v1888_v38, %v6240_v28 }
 0x38f   : > { %v4428_v32 = vor.u32 %v4947_v24, %v4427_v13  ;;  %v4955_v38 = vld [vmem:[#allocation2 + $0xec] sm:$0xf0]  ;;  %v4953_v13 = vld [vmem:[#allocation2 + $0xdc] sm:$0xf0] }
 0x390   : > { %7576 = vst [vmem:[#allocation50_spill] sm:$0xff] %v6276_v39  ;;  %4378 = vmatmul.msk.f32.gmra.mxu0 %vm1117_vm0, %v4250_v19  ;;  %2160 = vmatpush.bf16.msra.mxu2 %v6274_v44  ;;  %v4459_v19 = vld [vmem:[#allocation2 + $0xd0] sm:$0xf]  ;;  %v4444_v21 = vor.u32 %v4953_v13, %v4443_v59  ;;  %v4954_v13 = vld [vmem:[#allocation2 + $0xe4] sm:$0xf0] }
 0x391   : > { %7581 = vst [vmem:[#allocation55_spill] sm:$0xff] %v6305_v43 }
 0x392   : > { %2093 = vmatmul.bf16.gmra.mxu1 %v4444_v21 }
 0x394   : > { %2161 = vmatpush.bf16.msra.mxu2 %v6283_v53 }
 0x395   : > { %v1765_v20 = vpop.f32.mrf.mxu0 }
 0x398   : > { %2162 = vmatpush.bf16.msra.mxu2 %v6288_v52 }
 0x39c   : > { %2163 = vmatpush.bf16.msra.mxu2 %v6293_v0 }
 0x39d   : > { %v1768_v4 = vpop.f32.mrf.mxu0 }
 0x39e   : > { %v6299_v23 = vpack.c.bf16 %v1768_v4, %v1765_v20  ;;  %v4460_v20 = vor.u32 %v4955_v38, %v4459_v19  ;;  %v4946_v4 = vld [vmem:[#allocation2 + $0xa4] sm:$0xf0]  ;;  %v4437_v19 = vld [vmem:[#allocation2 + $0xb8] sm:$0xf0] }
 0x39f   : > { %2164 = vmatmul.bf16.vlgmr.msra.gmra.mxu2 %v4428_v32  ;;  %v4419_v32 = vld [vmem:[#allocation2 + $0x88] sm:$0xf]  ;;  %v4440_v7 = vor.u32 %v4944_v55, %v4437_v19  ;;  %v4453_v55 = vld [vmem:[#allocation2 + $0xe8] sm:$0xf0] }
 0x3a0   : > { %2213 = vmatpush.bf16.msrb.mxu2 %v6295_v41  ;;  %7579 = vst [vmem:[#allocation53_spill] sm:$0xff] %v6299_v23 }
 0x3a4   : > { %2214 = vmatpush.bf16.msrb.mxu2 %v6301_v6 }
 0x3a5   : > { %v1771_v15 = vpop.f32.mrf.mxu0 }
 0x3a8   : > { %2215 = vmatpush.bf16.msrb.mxu2 %v6305_v43 }
 0x3ac   : > { %2216 = vmatpush.bf16.msrb.mxu2 %v6310_v9 }
 0x3ad   : > { %v1774_v17 = vpop.f32.mrf.mxu0 }
 0x3ae   : > { %v6318_v28 = vpack.c.bf16 %v1774_v17, %v1771_v15  ;;  %v6328_v15 = vpack.c.bf16 %v1858_v29, %v1855_v47  ;;  %v4420_v17 = vor.u32 %v4946_v4, %v4419_v32  ;;  %v4451_v29 = vld [vmem:[#allocation2 + $0xc8] sm:$0xf]  ;;  %v4952_v32 = vld [vmem:[#allocation2 + $0xdc] sm:$0xf] }
 0x3af   : > { %2169 = vmatmul.bf16.gmra.mxu2 %v4460_v20  ;;  %v4942_v20 = vld [vmem:[#allocation2 + $0x8c] sm:$0xf]  ;;  %v4452_v21 = vor.u32 %v4954_v13, %v4451_v29  ;;  %v4469_v4 = vld [vmem:[#allocation2 + $0xf8] sm:$0xf0] }
 0x3b0   : > { %2217 = vmatpush.bf16.msrb.mxu2 %v6315_v37  ;;  %7584 = vst [vmem:[#allocation58_spill] sm:$0xff] %v6318_v28  ;;  %2126 = vmatmul.bf16.vlgmr.msrb.gmra.mxu3 %v4420_v17  ;;  %v4424_v59 = vor.u32 %v4942_v20, %v4421_v11  ;;  %v4472_v17 = vor.u32 %v4952_v32, %v4469_v4  ;;  %v4483_v11 = vld [vmem:[#allocation2 + $0x8] sm:$0xf] }
 0x3b1   : > { %7587 = vst [vmem:[#allocation61_spill] sm:$0xff] %v6328_v15 }
 0x3b2   : > { %2145 = vmatmul.bf16.vlgmr.msra.gmra.mxu1 %v4424_v59  ;;  %v4930_v59 = vld [vmem:[#allocation2 + $0x24] sm:$0xf0] }
 0x3b3   : > { %v4484_v29 = vor.u32 %v4930_v59, %v4483_v11  ;;  %v4948_v59 = vld [vmem:[#allocation2 + $0xb4] sm:$0xf0] }
 0x3b4   : > { %2218 = vmatpush.bf16.msrb.mxu2 %v6322_v26 }
 0x3b5   : > { %v1777_v24 = vpop.f32.mrf.mxu0 }
 0x3b8   : > { %2219 = vmatpush.bf16.msrb.mxu2 %v6325_v63 }
 0x3bc   : > { %2220 = vmatpush.bf16.msrb.mxu2 %v6328_v15 }
 0x3bd   : > { %v1780_v42 = vpop.f32.mrf.mxu0 }
 0x3be   : > { %v6332_v38 = vpack.c.bf16 %v1780_v42, %v1777_v24  ;;  %v4950_v42 = vld [vmem:[#allocation2 + $0xcc] sm:$0xf] }
 0x3bf   : > { %2221 = vmatmul.bf16.vlgmr.msrb.gmra.mxu2 %v4440_v7  ;;  %v4456_v19 = vor.u32 %v4950_v42, %v4453_v55 }
 0x3c0   : > { %2358 = vmatpush.bf16.msra.mxu2 %v5985_v18  ;;  %7588 = vst [vmem:[#allocation62_spill] sm:$0xff] %v6332_v38  ;;  %2131 = vmatmul.bf16.gmra.mxu3 %v4452_v21 }
 0x3c2   : > { %2150 = vmatmul.bf16.gmra.mxu1 %v4456_v19 }
 0x3c4   : > { %2359 = vmatpush.bf16.msra.mxu2 %v5990_v58 }
 0x3c5   : > { %v1783_v47 = vpop.f32.mrf.mxu0 }
 0x3c8   : > { %2360 = vmatpush.bf16.msra.mxu2 %v5997_v25 }
 0x3cc   : > { %2361 = vmatpush.bf16.msra.mxu2 %v6002_v14 }
 0x3cd   : > { %v1786_v24 = vpop.f32.mrf.mxu0 }
 0x3cf   : > { %2226 = vmatmul.bf16.gmra.mxu2 %v4472_v17 }
 0x3d0   : > { %2362 = vmatpush.bf16.msra.mxu2 %v6009_v36 }
 0x3d4   : > { %2363 = vmatpush.bf16.msra.mxu2 %v6015_v45  ;;  %v4938_v45 = vld [vmem:[#allocation2 + $0x64] sm:$0xf0] }
 0x3d5   : > { %v1789_v7 = vpop.f32.mrf.mxu0  ;;  %v4516_v32 = vor.u32 %v4938_v45, %v4515_v54  ;;  %v6353_v54 = vpack.c.bf16 %v1786_v24, %v1783_v47  ;;  %v4435_v45 = vld [vmem:[#allocation2 + $0x98] sm:$0xf]  ;;  %v4943_v47 = vld [vmem:[#allocation2 + $0x94] sm:$0xf] }
 0x3d6   : > { %v4429_v24 = vld [vmem:[#allocation2 + $0xb0] sm:$0xf0] }
 0x3d7   : > { %7592 = vst [vmem:[#allocation66_spill] sm:$0xff] %v6353_v54 }
 0x3d8   : > { %2364 = vmatpush.bf16.msra.mxu2 %v6024_v61 }
 0x3dc   : > { %2365 = vmatpush.bf16.msra.mxu2 %v6031_v56 }
 0x3dd   : > { %v1792_v20 = vpop.f32.mrf.mxu0 }
 0x3de   : > { %v6349_v11 = vpack.c.bf16 %v1792_v20, %v1789_v7  ;;  %v4927_v7 = vld [vmem:[#allocation2 + $0x14] sm:$0xf] }
 0x3df   : > { %2366 = vmatmul.bf16.vlgmr.msra.gmra.mxu2 %v4484_v29  ;;  %v4493_v20 = vld [vmem:[#allocation2 + $0x30] sm:$0xf0] }
 0x3e0   : > { %7591 = vst [vmem:[#allocation65_spill] sm:$0xff] %v6349_v11 }
 0x3e5   : > { %v1795_v13 = vpop.f32.mrf.mxu0 }
 0x3ed   : > { %v1798_v21 = vpop.f32.mrf.mxu0 }
 0x3ee   : > { %v6345_v55 = vpack.c.bf16 %v1798_v21, %v1795_v13  ;;  %v4436_v21 = vor.u32 %v4948_v59, %v4435_v45  ;;  %v4951_v59 = vld [vmem:[#allocation2 + $0xd4] sm:$0xf] }
 0x3ef   : > { %2371 = vmatmul.bf16.gmra.mxu2 %v4516_v32  ;;  %v4432_v32 = vor.u32 %v4943_v47, %v4429_v24  ;;  %v4525_v47 = vld [vmem:[#allocation2 + $0x70] sm:$0xf0]  ;;  %v6381_v24 = vpop.f32.mrf.mxu2 }
 0x3f0   : > { %7590 = vst [vmem:[#allocation64_spill] sm:$0xff] %v6345_v55 }
 0x3f5   : > { %v1801_v4 = vpop.f32.mrf.mxu0 }
 0x3fd   : > { %v1804_v17 = vpop.f32.mrf.mxu0 }
 0x3fe   : > { %v6341_v42 = vpack.c.bf16 %v1804_v17, %v1801_v4  ;;  %v4496_v4 = vor.u32 %v4927_v7, %v4493_v20  ;;  %v4467_v17 = vld [vmem:[#allocation2 + $0xd8] sm:$0xf] }
 0x400   : > { %7589 = vst [vmem:[#allocation63_spill] sm:$0xff] %v6341_v42  ;;  %2175 = vmatpush.bf16.msra.mxu3 %v6341_v42  ;;  %2415 = vmatpush.bf16.msrb.mxu2 %v6341_v42 }
 0x404   : > { %2176 = vmatpush.bf16.msra.mxu3 %v6345_v55  ;;  %2416 = vmatpush.bf16.msrb.mxu2 %v6345_v55 }
 0x405   : > { %v1807_v19 = vpop.f32.mrf.mxu0 }
 0x408   : > { %2177 = vmatpush.bf16.msra.mxu3 %v6349_v11  ;;  %2417 = vmatpush.bf16.msrb.mxu2 %v6349_v11 }
 0x40c   : > { %2178 = vmatpush.bf16.msra.mxu3 %v6353_v54  ;;  %2418 = vmatpush.bf16.msrb.mxu2 %v6353_v54 }
 0x40d   : > { %v1810_v29 = vpop.f32.mrf.mxu0 }
 0x40e   : > { %v6357_v13 = vpack.c.bf16 %v1810_v29, %v1807_v19  ;;  %v4956_v19 = vld [vmem:[#allocation2 + $0xf4] sm:$0xf0]  ;;  %v4461_v29 = vld [vmem:[#allocation2 + $0xf0] sm:$0xf0] }
 0x40f   : > { %v4468_v45 = vor.u32 %v4956_v19, %v4467_v17  ;;  %v4464_v7 = vor.u32 %v4951_v59, %v4461_v29  ;;  %v6392_v19 = vpop.f32.mrf.mxu2  ;;  %v7594_v59 = vld [vmem:[#allocation33_spill] sm:$0xff] }
 0x410   : > { %7593 = vst [vmem:[#allocation67_spill] sm:$0xff] %v6357_v13  ;;  %2179 = vmatpush.bf16.msra.mxu3 %v6332_v38  ;;  %2201 = vmatpush.bf16.msrb.mxu1 %v6357_v13  ;;  %v4929_v29 = vld [vmem:[#allocation2 + $0x1c] sm:$0xf0] }
 0x411   : > { %2419 = vmatpush.bf16.msrb.mxu2 %v6332_v38 }
 0x413   : > { %2202 = vmatmul.bf16.vlgmr.msrb.gmra.mxu1 %v4436_v21  ;;  %v4935_v21 = vld [vmem:[#allocation2 + $0x54] sm:$0xf] }
 0x414   : > { %2339 = vmatpush.bf16.msra.mxu1 %v5878_v48  ;;  %2180 = vmatpush.bf16.msra.mxu3 %v6318_v28  ;;  %v4528_v20 = vor.u32 %v4935_v21, %v4525_v47  ;;  %v4539_v21 = vld [vmem:[#allocation2 + $0x100] sm:$0xf] }
 0x415   : > { %2420 = vmatpush.bf16.msrb.mxu2 %v6318_v28  ;;  %v4961_v47 = vld [vmem:[#allocation2 + $0x11c] sm:$0xf0] }
 0x418   : > { %2340 = vmatpush.bf16.msra.mxu1 %v5883_v40  ;;  %2181 = vmatpush.bf16.msra.mxu3 %v6299_v23 }
 0x419   : > { %2421 = vmatpush.bf16.msrb.mxu2 %v6299_v23 }
 0x41c   : > { %2341 = vmatpush.bf16.msra.mxu1 %v5890_v31  ;;  %2182 = vmatpush.bf16.msra.mxu3 %v6276_v39 }
 0x41d   : > { %2422 = vmatpush.bf16.msrb.mxu2 %v6276_v39 }
 0x41f   : > { %2183 = vmatmul.bf16.vlgmr.msra.gmra.mxu3 %v4432_v32  ;;  %v4925_v32 = vld [vmem:[#allocation2 + $0x4] sm:$0xf] }
 0x420   : > { %2320 = vmatpush.bf16.msrb.mxu3 %v5681_v50  ;;  %2342 = vmatpush.bf16.msra.mxu1 %v5896_v33 }
 0x421   : > { %2569 = vmatpush.bf16.msra.mxu2 %v5681_v50 }
 0x422   : > { %2423 = vmatmul.bf16.vlgmr.msrb.gmra.mxu2 %v4496_v4  ;;  %v4477_v4 = vld [vmem:[#allocation2 + $0x20] sm:$0xf0] }
 0x423   : > { %2207 = vmatmul.bf16.gmra.mxu1 %v4468_v45  ;;  %v4480_v17 = vor.u32 %v4925_v32, %v4477_v4  ;;  %v4475_v45 = vld [vmem:[#allocation2] sm:$0xf]  ;;  %v4933_v32 = vld [vmem:[#allocation2 + $0x44] sm:$0xf] }
 0x424   : > { %2321 = vmatpush.bf16.msrb.mxu3 %v5688_v3  ;;  %2343 = vmatpush.bf16.msra.mxu1 %v5905_v2  ;;  %v4509_v4 = vld [vmem:[#allocation2 + $0x60] sm:$0xf0] }
 0x425   : > { %2570 = vmatpush.bf16.msra.mxu2 %v5688_v3 }
 0x428   : > { %2322 = vmatpush.bf16.msrb.mxu3 %v5701_v27  ;;  %2344 = vmatpush.bf16.msra.mxu1 %v5912_v35 }
 0x429   : > { %2571 = vmatpush.bf16.msra.mxu2 %v5701_v27 }
 0x42c   : > { %2323 = vmatpush.bf16.msrb.mxu3 %v5712_v34  ;;  %2345 = vmatpush.bf16.msra.mxu1 %v5921_v51 }
 0x42d   : > { %2572 = vmatpush.bf16.msra.mxu2 %v5712_v34 }
 0x42f   : > { %2188 = vmatmul.bf16.gmra.mxu3 %v4464_v7  ;;  %v4476_v7 = vor.u32 %v4929_v29, %v4475_v45  ;;  %v4507_v29 = vld [vmem:[#allocation2 + $0x40] sm:$0xf] }
 0x430   : > { %2324 = vmatpush.bf16.msrb.mxu3 %v5724_v62  ;;  %2346 = vmatpush.bf16.msra.mxu1 %v5928_v1 }
 0x431   : > { %2573 = vmatpush.bf16.msra.mxu2 %v5724_v62  ;;  %v7601_v62 = vld [vmem:[#allocation10_spill] sm:$0xff] }
 0x432   : > { %2428 = vmatmul.bf16.gmra.mxu2 %v4528_v20  ;;  %v4540_v20 = vor.u32 %v4961_v47, %v4539_v21  ;;  %v4937_v21 = vld [vmem:[#allocation2 + $0x5c] sm:$0xf0] }
 0x433   : > { %2347 = vmatmul.bf16.vlgmr.msra.gmra.mxu1 %v4480_v17  ;;  %v6402_v17 = vpop.f32.mrf.mxu2  ;;  %v4571_v47 = vld [vmem:[#allocation2 + $0x140] sm:$0xf] }
 0x434   : > { %2396 = vmatpush.bf16.msrb.mxu1 %v6253_v57  ;;  %2325 = vmatpush.bf16.msrb.mxu3 %v5733_v12 }
 0x435   : > { %2574 = vmatpush.bf16.msra.mxu2 %v5733_v12  ;;  %v4939_v12 = vld [vmem:[#allocation2 + $0x6c] sm:$0xf0] }
 0x438   : > { %2397 = vmatpush.bf16.msrb.mxu1 %v6258_v16  ;;  %2326 = vmatpush.bf16.msrb.mxu3 %v5745_v8 }
 0x439   : > { %2575 = vmatpush.bf16.msra.mxu2 %v5745_v8  ;;  %v6407_v8 = vpop.f32.mrf.mxu1 }
 0x43b   : > { %v6415_v45 = vpop.f32.mrf.mxu2 }
 0x43c   : > { %2398 = vmatpush.bf16.msrb.mxu1 %v6263_v22  ;;  %2327 = vmatpush.bf16.msrb.mxu3 %v7594_v59 }
 0x43d   : > { %2576 = vmatpush.bf16.msra.mxu2 %v7594_v59  ;;  %v4512_v59 = vor.u32 %v4933_v32, %v4509_v4  ;;  %v4491_v4 = vld [vmem:[#allocation2 + $0x10] sm:$0xf] }
 0x43f   : > { %2328 = vmatmul.bf16.vlgmr.msrb.gmra.mxu3 %v4476_v7  ;;  %v4969_v7 = vld [vmem:[#allocation2 + $0x15c] sm:$0xf0] }
 0x440   : > { %2377 = vmatpush.bf16.msra.mxu3 %v6102_v49  ;;  %2399 = vmatpush.bf16.msrb.mxu1 %v6268_v60  ;;  %v4572_v32 = vor.u32 %v4969_v7, %v4571_v47  ;;  %v7598_v47 = vld [vmem:[#allocation9_spill] sm:$0xff]  ;;  %v4485_v7 = vld [vmem:[#allocation2 + $0x28] sm:$0xf0] }
 0x441   : > { %2626 = vmatpush.bf16.msrb.mxu2 %v6102_v49 }
 0x442   : > { %2577 = vmatmul.bf16.vlgmr.msra.gmra.mxu2 %v4540_v20  ;;  %v6420_v20 = vpop.f32.mrf.mxu1 }
 0x443   : > { %2352 = vmatmul.bf16.gmra.mxu1 %v4512_v59  ;;  %v4508_v59 = vor.u32 %v4937_v21, %v4507_v29  ;;  %v6426_v49 = vpop.f32.mrf.mxu2  ;;  %v7597_v21 = vld [vmem:[#allocation17_spill] sm:$0xff] }
 0x444   : > { %2378 = vmatpush.bf16.msra.mxu3 %v6107_v30  ;;  %2400 = vmatpush.bf16.msrb.mxu1 %v6274_v44 }
 0x445   : > { %2627 = vmatpush.bf16.msrb.mxu2 %v6107_v30 }
 0x448   : > { %2379 = vmatpush.bf16.msra.mxu3 %v6114_v10  ;;  %2401 = vmatpush.bf16.msrb.mxu1 %v6283_v53 }
 0x449   : > { %2628 = vmatpush.bf16.msrb.mxu2 %v6114_v10  ;;  %v7595_v10 = vld [vmem:[#allocation14_spill] sm:$0xff] }
 0x44a   : > { %v6431_v29 = vpop.f32.mrf.mxu1 }
 0x44c   : > { %2380 = vmatpush.bf16.msra.mxu3 %v6119_v5  ;;  %2402 = vmatpush.bf16.msrb.mxu1 %v6288_v52 }
 0x44d   : > { %2629 = vmatpush.bf16.msrb.mxu2 %v6119_v5  ;;  %v4931_v5 = vld [vmem:[#allocation2 + $0x2c] sm:$0xf0] }
 0x44e   : > { %v4492_v30 = vor.u32 %v4931_v5, %v4491_v4  ;;  %v4926_v5 = vld [vmem:[#allocation2 + $0xc] sm:$0xf]  ;;  %v7599_v4 = vld [vmem:[#allocation19_spill] sm:$0xff] }
 0x44f   : > { %2333 = vmatmul.bf16.gmra.mxu3 %v4508_v59  ;;  %v4958_v59 = vld [vmem:[#allocation2 + $0x10c] sm:$0xf] }
 0x450   : > { %2381 = vmatpush.bf16.msra.mxu3 %v6128_v46  ;;  %2403 = vmatpush.bf16.msrb.mxu1 %v6293_v0 }
 0x451   : > { %2630 = vmatpush.bf16.msrb.mxu2 %v6128_v46  ;;  %v7596_v46 = vld [vmem:[#allocation8_spill] sm:$0xff] }
 0x452   : > { %2582 = vmatmul.bf16.gmra.mxu2 %v4572_v32  ;;  %v4549_v32 = vld [vmem:[#allocation2 + $0x128] sm:$0xf0] }
 0x453   : > { %2404 = vmatmul.bf16.vlgmr.msrb.gmra.mxu1 %v4492_v30  ;;  %v6439_v30 = vpop.f32.mrf.mxu2 }
 0x454   : > { %2453 = vmatpush.bf16.msra.mxu1 %v6295_v41  ;;  %2382 = vmatpush.bf16.msra.mxu3 %v7595_v10 }
 0x455   : > { %2631 = vmatpush.bf16.msrb.mxu2 %v7595_v10  ;;  %v4523_v10 = vld [vmem:[#allocation2 + $0x50] sm:$0xf] }
 0x458   : > { %2454 = vmatpush.bf16.msra.mxu1 %v6301_v6  ;;  %2383 = vmatpush.bf16.msra.mxu3 %v7596_v46 }
 0x459   : > { %2632 = vmatpush.bf16.msrb.mxu2 %v7596_v46  ;;  %v4488_v46 = vor.u32 %v4926_v5, %v4485_v7  ;;  %v7602_v7 = vld [vmem:[#allocation21_spill] sm:$0xff] }
 0x45b   : > { %v6451_v5 = vpop.f32.mrf.mxu2 }
 0x45c   : > { %2455 = vmatpush.bf16.msra.mxu1 %v6305_v43  ;;  %2384 = vmatpush.bf16.msra.mxu3 %v7597_v21  ;;  %v7600_v43 = vld [vmem:[#allocation18_spill] sm:$0xff] }
 0x45d   : > { %2633 = vmatpush.bf16.msrb.mxu2 %v7597_v21  ;;  %v4552_v21 = vor.u32 %v4958_v59, %v4549_v32  ;;  %v7603_v59 = vld [vmem:[#allocation20_spill] sm:$0xff] }
 0x45f   : > { %2385 = vmatmul.bf16.vlgmr.msra.gmra.mxu3 %v4488_v46  ;;  %v4934_v46 = vld [vmem:[#allocation2 + $0x4c] sm:$0xf] }
 0x460   : > { %2434 = vmatpush.bf16.msrb.mxu3 %v7598_v47  ;;  %2456 = vmatpush.bf16.msra.mxu1 %v6310_v9  ;;  %v4524_v9 = vor.u32 %v4939_v12, %v4523_v10  ;;  %v4517_v12 = vld [vmem:[#allocation2 + $0x68] sm:$0xf0] }
 0x461   : > { %2683 = vmatpush.bf16.msra.mxu2 %v7598_v47  ;;  %v6444_v47 = vpop.f32.mrf.mxu1  ;;  %v4520_v32 = vor.u32 %v4934_v46, %v4517_v12  ;;  %v2127_v12 = vpop.f32.mrf.mxu3 }
 0x462   : > { %2634 = vmatmul.bf16.vlgmr.msrb.gmra.mxu2 %v4552_v21  ;;  %v4966_v21 = vld [vmem:[#allocation2 + $0x14c] sm:$0xf] }
 0x463   : > { %2409 = vmatmul.bf16.gmra.mxu1 %v4524_v9  ;;  %v4581_v9 = vld [vmem:[#allocation2 + $0x168] sm:$0xf0] }
 0x464   : > { %2435 = vmatpush.bf16.msrb.mxu3 %v7599_v4  ;;  %2457 = vmatpush.bf16.msra.mxu1 %v6315_v37 }
 0x465   : > { %2684 = vmatpush.bf16.msra.mxu2 %v7599_v4  ;;  %v4501_v4 = vld [vmem:[#allocation2 + $0x38] sm:$0xf0] }
 0x468   : > { %2436 = vmatpush.bf16.msrb.mxu3 %v7600_v43  ;;  %2458 = vmatpush.bf16.msra.mxu1 %v6322_v26 }
 0x469   : > { %2685 = vmatpush.bf16.msra.mxu2 %v7600_v43  ;;  %v6456_v10 = vpop.f32.mrf.mxu1  ;;  %v4928_v43 = vld [vmem:[#allocation2 + $0x1c] sm:$0xf] }
 0x46c   : > { %2437 = vmatpush.bf16.msrb.mxu3 %v7601_v62  ;;  %2459 = vmatpush.bf16.msra.mxu1 %v6325_v63 }
 0x46d   : > { %2686 = vmatpush.bf16.msra.mxu2 %v7601_v62  ;;  %v4584_v62 = vor.u32 %v4966_v21, %v4581_v9 }
 0x46f   : > { %2390 = vmatmul.bf16.gmra.mxu3 %v4520_v32  ;;  %v4936_v32 = vld [vmem:[#allocation2 + $0x5c] sm:$0xf] }
 0x470   : > { %2438 = vmatpush.bf16.msrb.mxu3 %v7602_v7  ;;  %2460 = vmatpush.bf16.msra.mxu1 %v6328_v15  ;;  %v6463_v15 = vpop.f32.mrf.mxu2 }
 0x471   : > { %2687 = vmatpush.bf16.msra.mxu2 %v7602_v7  ;;  %v7604_v7 = vld [vmem:[#allocation13_spill] sm:$0xff] }
 0x472   : > { %2639 = vmatmul.bf16.gmra.mxu2 %v4584_v62  ;;  %v4499_v62 = vld [vmem:[#allocation2 + $0x18] sm:$0xf] }
 0x474   : > { %2607 = vmatpush.bf16.msrb.mxu1 %v5985_v18  ;;  %2439 = vmatpush.bf16.msrb.mxu3 %v7603_v59  ;;  %v4504_v18 = vor.u32 %v4928_v43, %v4501_v4  ;;  %v4932_v43 = vld [vmem:[#allocation2 + $0x34] sm:$0xf0] }
 0x475   : > { %2688 = vmatpush.bf16.msra.mxu2 %v7603_v59  ;;  %v6468_v59 = vpop.f32.mrf.mxu1  ;;  %v4563_v4 = vld [vmem:[#allocation2 + $0x118] sm:$0xf]  ;;  %v4500_v21 = vor.u32 %v4932_v43, %v4499_v62  ;;  %v2129_v62 = vpop.f32.mrf.mxu3 }
 0x476   : > { %2461 = vmatmul.bf16.vlgmr.msra.gmra.mxu1 %v4504_v18  ;;  %v4964_v18 = vld [vmem:[#allocation2 + $0x134] sm:$0xf0] }
 0x477   : > { %v4564_v9 = vor.u32 %v4964_v18, %v4563_v4  ;;  %v4531_v4 = vld [vmem:[#allocation2 + $0x58] sm:$0xf] }
 0x478   : > { %2608 = vmatpush.bf16.msrb.mxu1 %v5990_v58  ;;  %2440 = vmatpush.bf16.msrb.mxu3 %v7604_v7  ;;  %v6474_v46 = vpop.f32.mrf.mxu2  ;;  %v4940_v18 = vld [vmem:[#allocation2 + $0x74] sm:$0xf0] }
 0x479   : > { %2689 = vmatpush.bf16.msra.mxu2 %v7604_v7  ;;  %v7605_v7 = vld [vmem:[#allocation47_spill] sm:$0xff] }
 0x47c   : > { %2609 = vmatpush.bf16.msrb.mxu1 %v5997_v25  ;;  %2441 = vmatpush.bf16.msrb.mxu3 %v6357_v13 }
 0x47d   : > { %2690 = vmatpush.bf16.msra.mxu2 %v6357_v13  ;;  %v6481_v13 = vpop.f32.mrf.mxu1 }
 0x47f   : > { %2442 = vmatmul.bf16.vlgmr.msrb.gmra.mxu3 %v4500_v21  ;;  %v4972_v21 = vld [vmem:[#allocation2 + $0x174] sm:$0xf0] }
 0x480   : > { %2588 = vmatpush.bf16.msra.mxu3 %v5878_v48  ;;  %2610 = vmatpush.bf16.msrb.mxu1 %v6002_v14 }
 0x481   : > { %2849 = vmatpush.bf16.msrb.mxu2 %v5878_v48  ;;  %v4533_v48 = vld [vmem:[#allocation2 + $0x78] sm:$0xf0] }
 0x482   : > { %v4536_v14 = vor.u32 %v4936_v32, %v4533_v48  ;;  %2691 = vmatmul.bf16.vlgmr.msra.gmra.mxu2 %v4564_v9  ;;  %v4532_v9 = vor.u32 %v4940_v18, %v4531_v4  ;;  %v2109_v4 = vadd.f32 %v6381_v24, %v6407_v8  ;;  %v2111_v24 = vadd.f32 %v6392_v19, %v6420_v20 }
 0x484   : > { %2589 = vmatpush.bf16.msra.mxu3 %v5883_v40  ;;  %2611 = vmatpush.bf16.msrb.mxu1 %v6009_v36  ;;  %v2128_v18 = vadd.f32 %v2127_v12, %v2109_v4  ;;  %v4579_v12 = vld [vmem:[#allocation2 + $0x148] sm:$0xf] }
 0x485   : > { %2850 = vmatpush.bf16.msrb.mxu2 %v5883_v40  ;;  %v6484_v40 = vpop.f32.mrf.mxu2  ;;  %v6493_v43 = vpop.f32.mrf.mxu1  ;;  %v4970_v4 = vld [vmem:[#allocation2 + $0x164] sm:$0xf0] }
 0x486   : > { %2466 = vmatmul.bf16.gmra.mxu1 %v4536_v14  ;;  %v4595_v14 = vld [vmem:[#allocation2 + $0x158] sm:$0xf]  ;;  %v4580_v19 = vor.u32 %v4970_v4, %v4579_v12  ;;  %v2116_v12 = vadd.f32 %v6415_v45, %v6444_v47 }
 0x487   : > { %v4596_v32 = vor.u32 %v4972_v21, %v4595_v14  ;;  %v4957_v14 = vld [vmem:[#allocation2 + $0x104] sm:$0xf] }
 0x488   : > { %2590 = vmatpush.bf16.msra.mxu3 %v5890_v31  ;;  %2612 = vmatpush.bf16.msrb.mxu1 %v7605_v7  ;;  %v4541_v21 = vld [vmem:[#allocation2 + $0x120] sm:$0xf0] }
 0x489   : > { %2851 = vmatpush.bf16.msrb.mxu2 %v5890_v31  ;;  %v2132_v31 = vpop.f32.mrf.mxu3  ;;  %v4544_v8 = vor.u32 %v4957_v14, %v4541_v21  ;;  %v2130_v21 = vadd.f32 %v2129_v62, %v2111_v24  ;;  %v4637_v24 = vld [vmem:[#allocation2 + $0x1e0] sm:$0xf0] }
 0x48c   : > { %2591 = vmatpush.bf16.msra.mxu3 %v5896_v33  ;;  %2613 = vmatpush.bf16.msrb.mxu1 %v6024_v61 }
 0x48d   : > { %2852 = vmatpush.bf16.msrb.mxu2 %v5896_v33  ;;  %v6495_v48 = vpop.f32.mrf.mxu2  ;;  %v4962_v33 = vld [vmem:[#allocation2 + $0x124] sm:$0xf0] }
 0x48f   : > { %2447 = vmatmul.bf16.gmra.mxu3 %v4532_v9 }
 0x490   : > { %2592 = vmatpush.bf16.msra.mxu3 %v5905_v2  ;;  %2614 = vmatpush.bf16.msrb.mxu1 %v6031_v56  ;;  %v2203_v56 = vpop.f32.mrf.mxu1 }
 0x491   : > { %2853 = vmatpush.bf16.msrb.mxu2 %v5905_v2  ;;  %v4547_v2 = vld [vmem:[#allocation2 + $0x108] sm:$0xf]  ;;  %v6517_v9 = vpop.f32.mrf.mxu3 }
 0x492   : > { %2696 = vmatmul.bf16.gmra.mxu2 %v4596_v32  ;;  %v4605_v32 = vld [vmem:[#allocation2 + $0x1a0] sm:$0xf0]  ;;  %v2135_v47 = vadd.f32 %v6517_v9, %v2116_v12  ;;  %v7607_v9 = vld [vmem:[#allocation55_spill] sm:$0xff]  ;;  %v7610_v12 = vld [vmem:[#allocation32_spill] sm:$0xff] }
 0x494   : > { %2664 = vmatpush.bf16.msra.mxu1 %v6341_v42  ;;  %2593 = vmatpush.bf16.msra.mxu3 %v5912_v35  ;;  %v4548_v42 = vor.u32 %v4962_v33, %v4547_v2 }
 0x495   : > { %2854 = vmatpush.bf16.msrb.mxu2 %v5912_v35  ;;  %v6503_v61 = vpop.f32.mrf.mxu2 }
 0x496   : > { %2615 = vmatmul.bf16.vlgmr.msrb.gmra.mxu1 %v4548_v42  ;;  %v4973_v42 = vld [vmem:[#allocation2 + $0x184] sm:$0xf] }
 0x498   : > { %2665 = vmatpush.bf16.msra.mxu1 %v6345_v55  ;;  %2594 = vmatpush.bf16.msra.mxu3 %v5921_v51  ;;  %v2205_v33 = vpop.f32.mrf.mxu1 }
 0x499   : > { %2855 = vmatpush.bf16.msrb.mxu2 %v5921_v51 }
 0x49c   : > { %2666 = vmatpush.bf16.msra.mxu1 %v6349_v11  ;;  %2595 = vmatpush.bf16.msra.mxu3 %v5928_v1 }
 0x49d   : > { %2856 = vmatpush.bf16.msrb.mxu2 %v5928_v1  ;;  %v6515_v2 = vpop.f32.mrf.mxu2 }
 0x49f   : > { %2596 = vmatmul.bf16.vlgmr.msra.gmra.mxu3 %v4544_v8 }
 0x4a0   : > { %2645 = vmatpush.bf16.msrb.mxu3 %v6253_v57  ;;  %2667 = vmatpush.bf16.msra.mxu1 %v6353_v54  ;;  %v2208_v1 = vpop.f32.mrf.mxu1 }
 0x4a1   : > { %2906 = vmatpush.bf16.msra.mxu2 %v6253_v57  ;;  %v4608_v57 = vor.u32 %v4973_v42, %v4605_v32  ;;  %v2149_v42 = vadd.f32 %v6468_v59, %v2130_v21  ;;  %v4981_v59 = vld [vmem:[#allocation2 + $0x1c4] sm:$0xf]  ;;  %v4959_v21 = vld [vmem:[#allocation2 + $0x114] sm:$0xf] }
 0x4a2   : > { %v2184_v20 = vpop.f32.mrf.mxu3 }
 0x4a3   : > { %2857 = vmatmul.bf16.vlgmr.msrb.gmra.mxu2 %v4608_v57  ;;  %v2168_v62 = vadd.f32 %v6439_v30, %v2149_v42 }
 0x4a4   : > { %2646 = vmatpush.bf16.msrb.mxu3 %v6258_v16  ;;  %2668 = vmatpush.bf16.msra.mxu1 %v6332_v38 }
 0x4a5   : > { %2907 = vmatpush.bf16.msra.mxu2 %v6258_v16  ;;  %v2147_v16 = vadd.f32 %v6456_v10, %v2128_v18  ;;  %v6528_v51 = vpop.f32.mrf.mxu2  ;;  %v2114_v18 = vadd.f32 %v6402_v17, %v6431_v29  ;;  %v4965_v17 = vld [vmem:[#allocation2 + $0x144] sm:$0xf] }
 0x4a6   : > { %2620 = vmatmul.bf16.gmra.mxu1 %v4580_v19  ;;  %v4573_v29 = vld [vmem:[#allocation2 + $0x160] sm:$0xf0]  ;;  %v4557_v19 = vld [vmem:[#allocation2 + $0x130] sm:$0xf0] }
 0x4a7   : > { %v2166_v14 = vadd.f32 %v6426_v49, %v2147_v16  ;;  %v2133_v8 = vadd.f32 %v2132_v31, %v2114_v18  ;;  %v4576_v4 = vor.u32 %v4965_v17, %v4573_v29 }
 0x4a8   : > { %2647 = vmatpush.bf16.msrb.mxu3 %v6263_v22  ;;  %2669 = vmatpush.bf16.msra.mxu1 %v6318_v28  ;;  %v2210_v57 = vpop.f32.mrf.mxu1 }
 0x4a9   : > { %2908 = vmatpush.bf16.msra.mxu2 %v6263_v22  ;;  %v2185_v10 = vadd.f32 %v2184_v20, %v2166_v14  ;;  %v2152_v31 = vadd.f32 %v6481_v13, %v2133_v8  ;;  %v4640_v14 = vor.u32 %v4981_v59, %v4637_v24  ;;  %v7609_v24 = vld [vmem:[#allocation56_spill] sm:$0xff] }
 0x4ab   : > { %v2204_v32 = vadd.f32 %v2203_v56, %v2185_v10  ;;  %v2186_v56 = vpop.f32.mrf.mxu3  ;;  %v2171_v13 = vadd.f32 %v6451_v5, %v2152_v31 }
 0x4ac   : > { %2648 = vmatpush.bf16.msrb.mxu3 %v6268_v60  ;;  %2670 = vmatpush.bf16.msra.mxu1 %v6299_v23 }
 0x4ad   : > { %2909 = vmatpush.bf16.msra.mxu2 %v6268_v60  ;;  %v2223_v49 = vadd.f32 %v6474_v46, %v2204_v32  ;;  %v6542_v16 = vpop.f32.mrf.mxu2  ;;  %v2187_v46 = vadd.f32 %v2186_v56, %v2168_v62  ;;  %v2154_v32 = vadd.f32 %v6493_v43, %v2135_v47  ;;  %v7608_v62 = vld [vmem:[#allocation31_spill] sm:$0xff] }
 0x4ae   : > { %v4555_v43 = vld [vmem:[#allocation2 + $0x110] sm:$0xf] }
 0x4af   : > { %2232 = vrot.lane.b32.xlu2 %v2223_v49, %s5145_s12  ;;  %v2206_v30 = vadd.f32 %v2205_v33, %v2187_v46  ;;  %2601 = vmatmul.bf16.gmra.mxu3 %v4576_v4  ;;  %v4560_v33 = vor.u32 %v4959_v21, %v4557_v19  ;;  %v2173_v17 = vadd.f32 %v6463_v15, %v2154_v32  ;;  %v4619_v46 = vld [vmem:[#allocation2 + $0x190] sm:$0xf]  ;;  %v4967_v15 = vld [vmem:[#allocation2 + $0x154] sm:$0xf]  ;;  %v7611_v19 = vld [vmem:[#allocation33_spill] sm:$0xff] }
 0x4b0   : > { %2649 = vmatpush.bf16.msrb.mxu3 %v6274_v44  ;;  %2671 = vmatpush.bf16.msra.mxu1 %v6276_v39  ;;  %v6562_v10 = vpop.f32.mrf.mxu1  ;;  %v7614_v32 = vld [vmem:[#allocation11_spill] sm:$0xff] }
 0x4b1   : > { %2910 = vmatpush.bf16.msra.mxu2 %v6274_v44  ;;  %v2225_v20 = vadd.f32 %v6484_v40, %v2206_v30  ;;  %v7606_v40 = vld [vmem:[#allocation30_spill] sm:$0xff] }
 0x4b3   : > { %2862 = vmatmul.bf16.gmra.mxu2 %v4640_v14  ;;  %2234 = vrot.lane.b32.xlu0 %v2225_v20, %s5145_s12  ;;  %v2189_v18 = vpop.f32.mrf.mxu3  ;;  %v4589_v14 = vld [vmem:[#allocation2 + $0x170] sm:$0xf0] }
 0x4b4   : > { %2830 = vmatpush.bf16.msrb.mxu1 %v5681_v50  ;;  %2650 = vmatpush.bf16.msrb.mxu3 %v6283_v53  ;;  %v2190_v42 = vadd.f32 %v2189_v18, %v2171_v13  ;;  %v7612_v13 = vld [vmem:[#allocation6_spill] sm:$0xff]  ;;  %v4592_v47 = vor.u32 %v4967_v15, %v4589_v14 }
 0x4b5   : > { %2911 = vmatpush.bf16.msra.mxu2 %v6283_v53  ;;  %v6558_v45 = vpop.f32.mrf.mxu2 }
 0x4b6   : > { %v2209_v5 = vadd.f32 %v2208_v1, %v2190_v42  ;;  %2672 = vmatmul.bf16.vlgmr.msra.gmra.mxu1 %v4560_v33  ;;  %v4963_v1 = vld [vmem:[#allocation2 + $0x12c] sm:$0xf0] }
 0x4b7   : > { %v4556_v30 = vor.u32 %v4963_v1, %v4555_v43  ;;  %v4651_v43 = vld [vmem:[#allocation2 + $0x1d0] sm:$0xf] }
 0x4b8   : > { %2831 = vmatpush.bf16.msrb.mxu1 %v5688_v3  ;;  %2651 = vmatpush.bf16.msrb.mxu3 %v6288_v52  ;;  %v2228_v49 = vadd.f32 %v6495_v48, %v2209_v5  ;;  %v6577_v56 = vpop.f32.mrf.mxu1  ;;  %v4979_v48 = vld [vmem:[#allocation2 + $0x1ac] sm:$0xf0] }
 0x4b9   : > { %2912 = vmatpush.bf16.msra.mxu2 %v6288_v52  ;;  %v4620_v4 = vor.u32 %v4979_v48, %v4619_v46  ;;  %v4587_v5 = vld [vmem:[#allocation2 + $0x150] sm:$0xf] }
 0x4ba   : > { %2236 = vrot.lane.b32.xlu1 %v2228_v49, %s5145_s12  ;;  %v4971_v49 = vld [vmem:[#allocation2 + $0x16c] sm:$0xf0] }
 0x4bb   : > { %v2191_v29 = vpop.f32.mrf.mxu3  ;;  %v4987_v1 = vld [vmem:[#allocation2 + $0x1ec] sm:$0xf0]  ;;  %v4588_v46 = vor.u32 %v4971_v49, %v4587_v5  ;;  %v7619_v5 = vld [vmem:[#allocation14_spill] sm:$0xff]  ;;  %v7620_v49 = vld [vmem:[#allocation45_spill] sm:$0xff] }
 0x4bc   : > { %2832 = vmatpush.bf16.msrb.mxu1 %v5701_v27  ;;  %2652 = vmatpush.bf16.msrb.mxu3 %v6293_v0  ;;  %v2192_v59 = vadd.f32 %v2191_v29, %v2173_v17  ;;  %v7615_v29 = vld [vmem:[#allocation61_spill] sm:$0xff]  ;;  %v7617_v48 = vld [vmem:[#allocation7_spill] sm:$0xff] }
 0x4bd   : > { %2913 = vmatpush.bf16.msra.mxu2 %v6293_v0  ;;  %v6573_v8 = vpop.f32.mrf.mxu2 }
 0x4be   : > { %v2211_v31 = vadd.f32 %v2210_v57, %v2192_v59  ;;  %v7616_v59 = vld [vmem:[#allocation42_spill] sm:$0xff] }
 0x4bf   : > { %2653 = vmatmul.bf16.vlgmr.msrb.gmra.mxu3 %v4556_v30  ;;  %v4603_v30 = vld [vmem:[#allocation2 + $0x180] sm:$0xf] }
 0x4c0   : > { %2702 = vmatpush.bf16.msra.mxu3 %v6295_v41  ;;  %2833 = vmatpush.bf16.msrb.mxu1 %v5712_v34  ;;  %v2230_v21 = vadd.f32 %v6503_v61, %v2211_v31  ;;  %v6589_v33 = vpop.f32.mrf.mxu1  ;;  %v7613_v61 = vld [vmem:[#allocation12_spill] sm:$0xff]  ;;  %v4652_v31 = vor.u32 %v4987_v1, %v4651_v43 }
 0x4c1   : > { %2963 = vmatpush.bf16.msrb.mxu2 %v6295_v41 }
 0x4c2   : > { %2238 = vrot.lane.b32.xlu2 %v2230_v21, %s5145_s12 }
 0x4c3   : > { %2914 = vmatmul.bf16.vlgmr.msra.gmra.mxu2 %v4620_v4  ;;  %v6592_v57 = vpop.f32.mrf.mxu3  ;;  %v4977_v4 = vld [vmem:[#allocation2 + $0x19c] sm:$0xf0] }
 0x4c4   : > { %2703 = vmatpush.bf16.msra.mxu3 %v6301_v6  ;;  %2834 = vmatpush.bf16.msrb.mxu1 %v7606_v40  ;;  %v4604_v14 = vor.u32 %v4977_v4, %v4603_v30  ;;  %v4565_v30 = vld [vmem:[#allocation2 + $0x138] sm:$0xf0] }
 0x4c5   : > { %2964 = vmatpush.bf16.msrb.mxu2 %v6301_v6  ;;  %v6586_v20 = vpop.f32.mrf.mxu2 }
 0x4c6   : > { %2677 = vmatmul.bf16.gmra.mxu1 %v4592_v47  ;;  %v7618_v47 = vld [vmem:[#allocation15_spill] sm:$0xff] }
 0x4c8   : > { %2704 = vmatpush.bf16.msra.mxu3 %v7607_v9  ;;  %2835 = vmatpush.bf16.msrb.mxu1 %v7608_v62  ;;  %v6601_v42 = vpop.f32.mrf.mxu1 }
 0x4c9   : > { %2965 = vmatpush.bf16.msrb.mxu2 %v7607_v9 }
 0x4cb   : > { %v6604_v17 = vpop.f32.mrf.mxu3 }
 0x4cc   : > { %2705 = vmatpush.bf16.msra.mxu3 %v7609_v24  ;;  %2836 = vmatpush.bf16.msrb.mxu1 %v7610_v12 }
 0x4cd   : > { %2966 = vmatpush.bf16.msrb.mxu2 %v7609_v24  ;;  %v6599_v18 = vpop.f32.mrf.mxu2 }
 0x4cf   : > { %2658 = vmatmul.bf16.gmra.mxu3 %v4588_v46  ;;  %v7622_v46 = vld [vmem:[#allocation8_spill] sm:$0xff] }
 0x4d0   : > { %2706 = vmatpush.bf16.msra.mxu3 %v6315_v37  ;;  %2837 = vmatpush.bf16.msrb.mxu1 %v7611_v19  ;;  %v6615_v21 = vpop.f32.mrf.mxu1 }
 0x4d1   : > { %2967 = vmatpush.bf16.msrb.mxu2 %v6315_v37 }
 0x4d3   : > { %2919 = vmatmul.bf16.gmra.mxu2 %v4652_v31  ;;  %v4960_v31 = vld [vmem:[#allocation2 + $0x11c] sm:$0xf] }
 0x4d4   : > { %2887 = vmatpush.bf16.msra.mxu1 %v7612_v13  ;;  %2707 = vmatpush.bf16.msra.mxu3 %v6322_v26 }
 0x4d5   : > { %2968 = vmatpush.bf16.msrb.mxu2 %v6322_v26  ;;  %v6612_v15 = vpop.f32.mrf.mxu2  ;;  %v7624_v26 = vld [vmem:[#allocation9_spill] sm:$0xff] }
 0x4d6   : > { %2838 = vmatmul.bf16.vlgmr.msrb.gmra.mxu1 %v4604_v14  ;;  %v4629_v14 = vld [vmem:[#allocation2 + $0x1b8] sm:$0xf0] }
 0x4d8   : > { %2888 = vmatpush.bf16.msra.mxu1 %v7613_v61  ;;  %2708 = vmatpush.bf16.msra.mxu3 %v6325_v63  ;;  %v6627_v1 = vpop.f32.mrf.mxu1 }
 0x4d9   : > { %2969 = vmatpush.bf16.msrb.mxu2 %v6325_v63  ;;  %v4635_v63 = vld [vmem:[#allocation2 + $0x1c0] sm:$0xf] }
 0x4dc   : > { %2889 = vmatpush.bf16.msra.mxu1 %v7614_v32  ;;  %2709 = vmatpush.bf16.msra.mxu3 %v7615_v29 }
 0x4dd   : > { %2970 = vmatpush.bf16.msrb.mxu2 %v7615_v29  ;;  %v6624_v43 = vpop.f32.mrf.mxu2  ;;  %v7623_v29 = vld [vmem:[#allocation17_spill] sm:$0xff] }
 0x4de   : > { %7621 = vst [vmem:[#allocation32_spill] sm:$0xff] %v6624_v43 }
 0x4e0   : > { %2868 = vmatpush.bf16.msrb.mxu3 %v7616_v59  ;;  %2890 = vmatpush.bf16.msra.mxu1 %v7617_v48  ;;  %v6640_v9 = vpop.f32.mrf.mxu1 }
 0x4e1   : > { %3129 = vmatpush.bf16.msra.mxu2 %v7616_v59  ;;  %v6618_v59 = vpop.f32.mrf.mxu3 }
 0x4e4   : > { %2869 = vmatpush.bf16.msrb.mxu3 %v5990_v58  ;;  %2891 = vmatpush.bf16.msra.mxu1 %v7618_v47 }
 0x4e5   : > { %3130 = vmatpush.bf16.msra.mxu2 %v5990_v58  ;;  %v4976_v58 = vld [vmem:[#allocation2 + $0x19c] sm:$0xf]  ;;  %v6637_v37 = vpop.f32.mrf.mxu2 }
 0x4e6   : > { %v4632_v43 = vor.u32 %v4976_v58, %v4629_v14  ;;  %7625 = vst [vmem:[#allocation33_spill] sm:$0xff] %v6637_v37  ;;  %v7627_v58 = vld [vmem:[#allocation48_spill] sm:$0xff]  ;;  %v7629_v14 = vld [vmem:[#allocation49_spill] sm:$0xff]  ;;  %v7632_v37 = vld [vmem:[#allocation10_spill] sm:$0xff] }
 0x4e8   : > { %2870 = vmatpush.bf16.msrb.mxu3 %v5997_v25  ;;  %2892 = vmatpush.bf16.msra.mxu1 %v7619_v5 }
 0x4e9   : > { %3131 = vmatpush.bf16.msra.mxu2 %v5997_v25  ;;  %v6630_v4 = vpop.f32.mrf.mxu3  ;;  %v4568_v25 = vor.u32 %v4960_v31, %v4565_v30  ;;  %v7628_v30 = vld [vmem:[#allocation18_spill] sm:$0xff] }
 0x4ea   : > { %2971 = vmatmul.bf16.vlgmr.msrb.gmra.mxu2 %v4632_v43  ;;  %v4597_v43 = vld [vmem:[#allocation2 + $0x178] sm:$0xf0] }
 0x4eb   : > { %2710 = vmatmul.bf16.vlgmr.msra.gmra.mxu3 %v4568_v25  ;;  %v7630_v25 = vld [vmem:[#allocation63_spill] sm:$0xff] }
 0x4ec   : > { %2871 = vmatpush.bf16.msrb.mxu3 %v7620_v49  ;;  %2893 = vmatpush.bf16.msra.mxu1 %v7622_v46  ;;  %v7633_v46 = vld [vmem:[#allocation21_spill] sm:$0xff] }
 0x4ed   : > { %3132 = vmatpush.bf16.msra.mxu2 %v7620_v49  ;;  %v4985_v49 = vld [vmem:[#allocation2 + $0x1dc] sm:$0xf0] }
 0x4ee   : > { %v4636_v24 = vor.u32 %v4985_v49, %v4635_v63  ;;  %v6651_v63 = vpop.f32.mrf.mxu1  ;;  %v4968_v49 = vld [vmem:[#allocation2 + $0x15c] sm:$0xf] }
 0x4f0   : > { %2872 = vmatpush.bf16.msrb.mxu3 %v6009_v36  ;;  %2894 = vmatpush.bf16.msra.mxu1 %v7623_v29  ;;  %v4613_v29 = vld [vmem:[#allocation2 + $0x1a8] sm:$0xf0] }
 0x4f1   : > { %3133 = vmatpush.bf16.msra.mxu2 %v6009_v36  ;;  %v7626_v36 = vld [vmem:[#allocation19_spill] sm:$0xff]  ;;  %v6643_v31 = vpop.f32.mrf.mxu3  ;;  %2843 = vmatmul.bf16.gmra.mxu1 %v4636_v24 }
 0x4f4   : > { %2944 = vmatpush.bf16.msrb.mxu1 %v7624_v26  ;;  %2873 = vmatpush.bf16.msrb.mxu3 %v7605_v7  ;;  %v4974_v26 = vld [vmem:[#allocation2 + $0x18c] sm:$0xf] }
 0x4f5   : > { %3134 = vmatpush.bf16.msra.mxu2 %v7605_v7  ;;  %v6654_v7 = vpop.f32.mrf.mxu2 }
 0x4f6   : > { %7631 = vst [vmem:[#allocation6_spill] sm:$0xff] %v6654_v7  ;;  %v6662_v6 = vpop.f32.mrf.mxu1 }
 0x4f8   : > { %2945 = vmatpush.bf16.msrb.mxu1 %v7626_v36  ;;  %2874 = vmatpush.bf16.msrb.mxu3 %v7627_v58  ;;  %v4600_v36 = vor.u32 %v4968_v49, %v4597_v43 }
 0x4f9   : > { %3135 = vmatpush.bf16.msra.mxu2 %v7627_v58  ;;  %v6657_v24 = vpop.f32.mrf.mxu3  ;;  %v4984_v58 = vld [vmem:[#allocation2 + $0x1dc] sm:$0xf] }
 0x4fb   : > { %2715 = vmatmul.bf16.gmra.mxu3 %v4600_v36 }
 0x4fc   : > { %2946 = vmatpush.bf16.msrb.mxu1 %v7628_v30  ;;  %2875 = vmatpush.bf16.msrb.mxu3 %v7629_v14  ;;  %v4661_v30 = vld [vmem:[#allocation2 + $0x1f8] sm:$0xf0] }
 0x4fd   : > { %3136 = vmatpush.bf16.msra.mxu2 %v7629_v14  ;;  %v4664_v14 = vor.u32 %v4984_v58, %v4661_v30  ;;  %v6665_v7 = vpop.f32.mrf.mxu2  ;;  %v7636_v58 = vld [vmem:[#allocation13_spill] sm:$0xff] }
 0x4fe   : > { %7634 = vst [vmem:[#allocation68_spill] sm:$0xff] %v6665_v7  ;;  %v6674_v36 = vpop.f32.mrf.mxu1 }
 0x4ff   : > { %2976 = vmatmul.bf16.gmra.mxu2 %v4664_v14  ;;  %v7638_v14 = vld [vmem:[#allocation67_spill] sm:$0xff] }
 0x500   : > { %2925 = vmatpush.bf16.msra.mxu3 %v7630_v25  ;;  %2947 = vmatpush.bf16.msrb.mxu1 %v7632_v37  ;;  %v7635_v37 = vld [vmem:[#allocation20_spill] sm:$0xff] }
 0x501   : > { %3186 = vmatpush.bf16.msrb.mxu2 %v7630_v25  ;;  %v4616_v25 = vor.u32 %v4974_v26, %v4613_v29  ;;  %v6669_v49 = vpop.f32.mrf.mxu3  ;;  %v4611_v26 = vld [vmem:[#allocation2 + $0x188] sm:$0xf] }
 0x502   : > { %v4978_v29 = vld [vmem:[#allocation2 + $0x1a4] sm:$0xf0] }
 0x503   : > { %2895 = vmatmul.bf16.vlgmr.msra.gmra.mxu1 %v4616_v25  ;;  %v4675_v25 = vld [vmem:[#allocation2 + $0x208] sm:$0xf]  ;;  %v4612_v7 = vor.u32 %v4978_v29, %v4611_v26 }
 0x504   : > { %2926 = vmatpush.bf16.msra.mxu3 %v6345_v55  ;;  %2948 = vmatpush.bf16.msrb.mxu1 %v7633_v46  ;;  %v7640_v46 = vld [vmem:[#allocation35_spill] sm:$0xff] }
 0x505   : > { %3187 = vmatpush.bf16.msrb.mxu2 %v6345_v55  ;;  %v6677_v30 = vpop.f32.mrf.mxu2  ;;  %v7639_v55 = vld [vmem:[#allocation34_spill] sm:$0xff] }
 0x506   : > { %7637 = vst [vmem:[#allocation69_spill] sm:$0xff] %v6677_v30  ;;  %v6687_v30 = vpop.f32.mrf.mxu1 }
 0x508   : > { %2927 = vmatpush.bf16.msra.mxu3 %v6349_v11  ;;  %2949 = vmatpush.bf16.msrb.mxu1 %v7635_v37  ;;  %v4645_v37 = vld [vmem:[#allocation2 + $0x1e8] sm:$0xf0] }
 0x509   : > { %3188 = vmatpush.bf16.msrb.mxu2 %v6349_v11  ;;  %v6681_v43 = vpop.f32.mrf.mxu3  ;;  %v4994_v11 = vld [vmem:[#allocation2 + $0x224] sm:$0xf0]  ;;  %v2233_v29 = vpop.permute.xlu2 %2232 }
 0x50b   : > { %2876 = vmatmul.bf16.vlgmr.msrb.gmra.mxu3 %v4612_v7 }
 0x50c   : > { %2928 = vmatpush.bf16.msra.mxu3 %v6353_v54  ;;  %2950 = vmatpush.bf16.msrb.mxu1 %v7636_v58  ;;  %v4982_v58 = vld [vmem:[#allocation2 + $0x1cc] sm:$0xf] }
 0x50d   : > { %3189 = vmatpush.bf16.msrb.mxu2 %v6353_v54  ;;  %v4676_v54 = vor.u32 %v4994_v11, %v4675_v25  ;;  %v7641_v11 = vld [vmem:[#allocation36_spill] sm:$0xff]  ;;  %v2330_v25 = vadd.f32 %v6592_v57, %v2233_v29  ;;  %v4643_v57 = vld [vmem:[#allocation2 + $0x1c8] sm:$0xf] }
 0x50e   : > { %v6702_v7 = vpop.f32.mrf.mxu1 }
 0x50f   : > { %3137 = vmatmul.bf16.vlgmr.msra.gmra.mxu2 %v4676_v54  ;;  %v7642_v54 = vld [vmem:[#allocation37_spill] sm:$0xff] }
 0x510   : > { %2929 = vmatpush.bf16.msra.mxu3 %v6332_v38  ;;  %2951 = vmatpush.bf16.msrb.mxu1 %v7638_v14  ;;  %v4648_v14 = vor.u32 %v4982_v58, %v4645_v37 }
 0x511   : > { %3190 = vmatpush.bf16.msrb.mxu2 %v6332_v38  ;;  %v6690_v38 = vpop.f32.mrf.mxu2  ;;  %v2443_v26 = vpop.f32.mrf.mxu3 }
 0x513   : > { %2900 = vmatmul.bf16.gmra.mxu1 %v4648_v14  ;;  %v4986_v14 = vld [vmem:[#allocation2 + $0x1e4] sm:$0xf0] }
 0x514   : > { %3110 = vmatpush.bf16.msra.mxu1 %v7639_v55  ;;  %2930 = vmatpush.bf16.msra.mxu3 %v6318_v28 }
 0x515   : > { %3191 = vmatpush.bf16.msrb.mxu2 %v6318_v28  ;;  %v2349_v28 = vadd.f32 %v6562_v10, %v2330_v25  ;;  %v4707_v25 = vld [vmem:[#allocation2 + $0x248] sm:$0xf] }
 0x517   : > { %v2368_v37 = vadd.f32 %v6515_v2, %v2349_v28  ;;  %v4644_v2 = vor.u32 %v4986_v14, %v4643_v57  ;;  %v4991_v14 = vld [vmem:[#allocation2 + $0x214] sm:$0xf] }
 0x518   : > { %3111 = vmatpush.bf16.msra.mxu1 %v7640_v46  ;;  %2931 = vmatpush.bf16.msra.mxu3 %v6299_v23 }
 0x519   : > { %3192 = vmatpush.bf16.msrb.mxu2 %v6299_v23  ;;  %v2387_v58 = vadd.f32 %v6643_v31, %v2368_v37  ;;  %v6705_v29 = vpop.f32.mrf.mxu2  ;;  %v6708_v10 = vpop.f32.mrf.mxu3  ;;  %v7644_v23 = vld [vmem:[#allocation38_spill] sm:$0xff]  ;;  %v4980_v31 = vld [vmem:[#allocation2 + $0x1b4] sm:$0xf0] }
 0x51a   : > { %7643 = vst [vmem:[#allocation34_spill] sm:$0xff] %v6705_v29 }
 0x51b   : > { %v2406_v28 = vadd.f32 %v6615_v21, %v2387_v58  ;;  %2881 = vmatmul.bf16.gmra.mxu3 %v4644_v2  ;;  %v7646_v21 = vld [vmem:[#allocation40_spill] sm:$0xff]  ;;  %v7650_v2 = vld [vmem:[#allocation22_spill] sm:$0xff] }
 0x51c   : > { %3112 = vmatpush.bf16.msra.mxu1 %v7641_v11  ;;  %2932 = vmatpush.bf16.msra.mxu3 %v6276_v39 }
 0x51d   : > { %3193 = vmatpush.bf16.msrb.mxu2 %v6276_v39  ;;  %v5002_v39 = vld [vmem:[#allocation2 + $0x264] sm:$0xf0]  ;;  %v2425_v37 = vadd.f32 %v6573_v8, %v2406_v28  ;;  %v2239_v28 = vpop.permute.xlu2 %2238 }
 0x51f   : > { %v2444_v11 = vadd.f32 %v2443_v26, %v2425_v37  ;;  %v7647_v26 = vld [vmem:[#allocation41_spill] sm:$0xff] }
 0x520   : > { %3091 = vmatpush.bf16.msrb.mxu3 %v5681_v50  ;;  %3113 = vmatpush.bf16.msra.mxu1 %v7642_v54  ;;  %v4627_v54 = vld [vmem:[#allocation2 + $0x198] sm:$0xf] }
 0x521   : > { %3352 = vmatpush.bf16.msra.mxu2 %v5681_v50  ;;  %v4708_v50 = vor.u32 %v5002_v39, %v4707_v25  ;;  %v4628_v29 = vor.u32 %v4980_v31, %v4627_v54  ;;  %v6722_v39 = vadd.f32 %v6662_v6, %v2444_v11  ;;  %v6725_v8 = vpop.f32.mrf.mxu3  ;;  %v4975_v6 = vld [vmem:[#allocation2 + $0x194] sm:$0xf]  ;;  %v2337_v31 = vadd.f32 %v6630_v4, %v2239_v28 }
 0x522   : > { %v4621_v11 = vld [vmem:[#allocation2 + $0x1b0] sm:$0xf0] }
 0x523   : > { %3142 = vmatmul.bf16.gmra.mxu2 %v4708_v50  ;;  %7645 = vst [vmem:[#allocation70_spill] sm:$0xff] %v6722_v39  ;;  %2952 = vmatmul.bf16.vlgmr.msrb.gmra.mxu1 %v4628_v29  ;;  %v7648_v50 = vld [vmem:[#allocation23_spill] sm:$0xff]  ;;  %v6738_v29 = vpop.permute.xlu0 %4044  ;;  %v4624_v37 = vor.u32 %v4975_v6, %v4621_v11 }
 0x524   : > { %3092 = vmatpush.bf16.msrb.mxu3 %v5688_v3  ;;  %3114 = vmatpush.bf16.msra.mxu1 %v7644_v23  ;;  %v6717_v23 = vpop.f32.mrf.mxu1  ;;  %v4685_v25 = vld [vmem:[#allocation2 + $0x230] sm:$0xf0]  ;;  %7649 = vst [vmem:[#allocation71_spill] sm:$0xff] %v6738_v29 }
 0x525   : > { %3353 = vmatpush.bf16.msra.mxu2 %v5688_v3  ;;  %v6719_v3 = vpop.f32.mrf.mxu2  ;;  %v4688_v39 = vor.u32 %v4991_v14, %v4685_v25  ;;  %v4983_v11 = vld [vmem:[#allocation2 + $0x1d4] sm:$0xf] }
 0x526   : > { %v4717_v28 = vld [vmem:[#allocation2 + $0x270] sm:$0xf0] }
 0x528   : > { %3093 = vmatpush.bf16.msrb.mxu3 %v5701_v27  ;;  %3115 = vmatpush.bf16.msra.mxu1 %v5912_v35 }
 0x529   : > { %3354 = vmatpush.bf16.msra.mxu2 %v5701_v27  ;;  %v2450_v57 = vpop.f32.mrf.mxu3  ;;  %v4988_v27 = vld [vmem:[#allocation2 + $0x1f4] sm:$0xf0] }
 0x52b   : > { %2933 = vmatmul.bf16.vlgmr.msra.gmra.mxu3 %v4624_v37 }
 0x52c   : > { %3094 = vmatpush.bf16.msrb.mxu3 %v5712_v34  ;;  %3116 = vmatpush.bf16.msra.mxu1 %v7646_v21  ;;  %v6733_v54 = vpop.f32.mrf.mxu1 }
 0x52d   : > { %3355 = vmatpush.bf16.msra.mxu2 %v5712_v34  ;;  %v6735_v58 = vpop.f32.mrf.mxu2  ;;  %v4659_v34 = vld [vmem:[#allocation2 + $0x1d8] sm:$0xf] }
 0x52e   : > { %v4660_v29 = vor.u32 %v4988_v27, %v4659_v34 }
 0x530   : > { %3095 = vmatpush.bf16.msrb.mxu3 %v7606_v40  ;;  %3117 = vmatpush.bf16.msra.mxu1 %v7647_v26 }
 0x531   : > { %3356 = vmatpush.bf16.msra.mxu2 %v7606_v40  ;;  %v2356_v40 = vadd.f32 %v6601_v42, %v2337_v31  ;;  %v6754_v42 = vpop.f32.mrf.mxu3 }
 0x533   : > { %3194 = vmatmul.bf16.vlgmr.msrb.gmra.mxu2 %v4688_v39  ;;  %2957 = vmatmul.bf16.gmra.mxu1 %v4660_v29  ;;  %v4999_v29 = vld [vmem:[#allocation2 + $0x254] sm:$0xf] }
 0x534   : > { %3167 = vmatpush.bf16.msrb.mxu1 %v7648_v50  ;;  %3096 = vmatpush.bf16.msrb.mxu3 %v7608_v62  ;;  %v2375_v50 = vadd.f32 %v6558_v45, %v2356_v40  ;;  %v2235_v45 = vpop.permute.xlu0 %2234 }
 0x535   : > { %3357 = vmatpush.bf16.msra.mxu2 %v7608_v62  ;;  %v6748_v62 = vpop.f32.mrf.mxu1  ;;  %v6750_v4 = vpop.f32.mrf.mxu2  ;;  %v2332_v27 = vadd.f32 %v6604_v17, %v2235_v45  ;;  %v4989_v45 = vld [vmem:[#allocation2 + $0x204] sm:$0xf] }
 0x536   : > { %v2394_v6 = vadd.f32 %v6681_v43, %v2375_v50 }
 0x537   : > { %v2351_v40 = vadd.f32 %v6577_v56, %v2332_v27  ;;  %v2237_v56 = vpop.permute.xlu1 %2236  ;;  %v4669_v27 = vld [vmem:[#allocation2 + $0x220] sm:$0xf0] }
 0x538   : > { %3168 = vmatpush.bf16.msrb.mxu1 %v7650_v2  ;;  %3097 = vmatpush.bf16.msrb.mxu3 %v7610_v12  ;;  %v2413_v34 = vadd.f32 %v6651_v63, %v2394_v6  ;;  %v4720_v6 = vor.u32 %v4999_v29, %v4717_v28  ;;  %v7655_v28 = vld [vmem:[#allocation8_spill] sm:$0xff] }
 0x539   : > { %3358 = vmatpush.bf16.msra.mxu2 %v7610_v12  ;;  %v2370_v39 = vadd.f32 %v6528_v51, %v2351_v40  ;;  %v6773_v25 = vpop.f32.mrf.mxu3 }
 0x53a   : > { %v2432_v43 = vadd.f32 %v6612_v15, %v2413_v34  ;;  %v4653_v15 = vld [vmem:[#allocation2 + $0x1f0] sm:$0xf0] }
 0x53b   : > { %v2389_v63 = vadd.f32 %v6657_v24, %v2370_v39  ;;  %v4656_v37 = vor.u32 %v4983_v11, %v4653_v15  ;;  %v5009_v15 = vld [vmem:[#allocation2 + $0x29c] sm:$0xf0] }
 0x53c   : > { %3169 = vmatpush.bf16.msrb.mxu1 %v6263_v22  ;;  %3098 = vmatpush.bf16.msrb.mxu3 %v7611_v19  ;;  %v2451_v50 = vadd.f32 %v2450_v57, %v2432_v43  ;;  %v2335_v57 = vadd.f32 %v6618_v59, %v2237_v56  ;;  %v4993_v56 = vld [vmem:[#allocation2 + $0x21c] sm:$0xf0] }
 0x53d   : > { %3359 = vmatpush.bf16.msra.mxu2 %v7611_v19  ;;  %v6768_v14 = vpop.f32.mrf.mxu1  ;;  %v6770_v17 = vpop.f32.mrf.mxu2  ;;  %v2408_v31 = vadd.f32 %v6627_v1, %v2389_v63  ;;  %2938 = vmatmul.bf16.gmra.mxu3 %v4656_v37  ;;  %v7654_v63 = vld [vmem:[#allocation54_spill] sm:$0xff]  ;;  %v4701_v37 = vld [vmem:[#allocation2 + $0x260] sm:$0xf0] }
 0x53e   : > { %v6776_v51 = vadd.f32 %v6702_v7, %v2451_v50  ;;  %v2354_v24 = vadd.f32 %v6589_v33, %v2335_v57  ;;  %v4672_v33 = vor.u32 %v4989_v45, %v4669_v27 }
 0x53f   : > { %v2427_v34 = vadd.f32 %v6586_v20, %v2408_v31  ;;  %v7656_v31 = vld [vmem:[#allocation55_spill] sm:$0xff] }
 0x540   : > { %3148 = vmatpush.bf16.msra.mxu3 %v7612_v13  ;;  %3170 = vmatpush.bf16.msrb.mxu1 %v6268_v60  ;;  %7651 = vst [vmem:[#allocation72_spill] sm:$0xff] %v6776_v51  ;;  %v2373_v7 = vadd.f32 %v6542_v16, %v2354_v24  ;;  %v4997_v24 = vld [vmem:[#allocation2 + $0x244] sm:$0xf]  ;;  %v7665_v51 = vld [vmem:[#allocation60_spill] sm:$0xff] }
 0x541   : > { %3409 = vmatpush.bf16.msrb.mxu2 %v7612_v13  ;;  %v2446_v59 = vadd.f32 %v6708_v10, %v2427_v34  ;;  %v6798_v16 = vpop.f32.mrf.mxu3  ;;  %v4667_v10 = vld [vmem:[#allocation2 + $0x200] sm:$0xf] }
 0x542   : > { %v2392_v1 = vadd.f32 %v6669_v49, %v2373_v7  ;;  %v7658_v34 = vld [vmem:[#allocation9_spill] sm:$0xff]  ;;  %v7659_v7 = vld [vmem:[#allocation56_spill] sm:$0xff] }
 0x543   : > { %3199 = vmatmul.bf16.gmra.mxu2 %v4720_v6  ;;  %v6796_v20 = vadd.f32 %v6674_v36, %v2446_v59  ;;  %3118 = vmatmul.bf16.vlgmr.msra.gmra.mxu1 %v4672_v33  ;;  %v7657_v6 = vld [vmem:[#allocation17_spill] sm:$0xff] }
 0x544   : > { %3149 = vmatpush.bf16.msra.mxu3 %v7613_v61  ;;  %3171 = vmatpush.bf16.msrb.mxu1 %v6274_v44  ;;  %v2411_v39 = vadd.f32 %v6640_v9, %v2392_v1  ;;  %v7660_v1 = vld [vmem:[#allocation19_spill] sm:$0xff]  ;;  %v7661_v33 = vld [vmem:[#allocation57_spill] sm:$0xff] }
 0x545   : > { %3410 = vmatpush.bf16.msrb.mxu2 %v7613_v61  ;;  %v6791_v40 = vpop.f32.mrf.mxu1  ;;  %v6793_v43 = vpop.f32.mrf.mxu2  ;;  %7652 = vst [vmem:[#allocation73_spill] sm:$0xff] %v6796_v20  ;;  %v4683_v20 = vld [vmem:[#allocation2 + $0x210] sm:$0xf] }
 0x546   : > { %v2430_v49 = vadd.f32 %v6599_v18, %v2411_v39  ;;  %v4731_v18 = vld [vmem:[#allocation2 + $0x280] sm:$0xf] }
 0x547   : > { %v4732_v57 = vor.u32 %v5009_v15, %v4731_v18  ;;  %v4699_v39 = vld [vmem:[#allocation2 + $0x240] sm:$0xf] }
 0x548   : > { %3150 = vmatpush.bf16.msra.mxu3 %v7614_v32  ;;  %3172 = vmatpush.bf16.msrb.mxu1 %v6283_v53  ;;  %v2449_v36 = vadd.f32 %v6725_v8, %v2430_v49  ;;  %v4668_v8 = vor.u32 %v4993_v56, %v4667_v10  ;;  %v7662_v10 = vld [vmem:[#allocation18_spill] sm:$0xff]  ;;  %v7663_v56 = vld [vmem:[#allocation59_spill] sm:$0xff]  ;;  %v5001_v18 = vld [vmem:[#allocation2 + $0x25c] sm:$0xf0] }
 0x549   : > { %3411 = vmatpush.bf16.msrb.mxu2 %v7614_v32  ;;  %v6817_v29 = vpop.f32.mrf.mxu3  ;;  %v4763_v15 = vld [vmem:[#allocation2 + $0x2c0] sm:$0xf]  ;;  %v7675_v32 = vld [vmem:[#allocation67_spill] sm:$0xff] }
 0x54a   : > { %v6814_v9 = vadd.f32 %v6687_v30, %v2449_v36  ;;  %v4704_v30 = vor.u32 %v4997_v24, %v4701_v37  ;;  %v4700_v24 = vor.u32 %v5001_v18, %v4699_v39  ;;  %v7667_v39 = vld [vmem:[#allocation21_spill] sm:$0xff] }
 0x54b   : > { %v7668_v18 = vld [vmem:[#allocation61_spill] sm:$0xff] }
 0x54c   : > { %3151 = vmatpush.bf16.msra.mxu3 %v7617_v48  ;;  %3173 = vmatpush.bf16.msrb.mxu1 %v6288_v52  ;;  %7653 = vst [vmem:[#allocation74_spill] sm:$0xff] %v6814_v9 }
 0x54d   : > { %3412 = vmatpush.bf16.msrb.mxu2 %v7617_v48  ;;  %v6809_v50 = vpop.f32.mrf.mxu1  ;;  %v6811_v11 = vpop.f32.mrf.mxu2  ;;  %3099 = vmatmul.bf16.vlgmr.msrb.gmra.mxu3 %v4668_v8  ;;  %v5017_v8 = vld [vmem:[#allocation2 + $0x2dc] sm:$0xf0] }
 0x54e   : > { %v4764_v37 = vor.u32 %v5017_v8, %v4763_v15  ;;  %v7673_v48 = vld [vmem:[#allocation13_spill] sm:$0xff] }
 0x550   : > { %3152 = vmatpush.bf16.msra.mxu3 %v7618_v47  ;;  %3174 = vmatpush.bf16.msrb.mxu1 %v6293_v0 }
 0x551   : > { %3413 = vmatpush.bf16.msrb.mxu2 %v7618_v47  ;;  %v2654_v59 = vpop.f32.mrf.mxu3 }
 0x553   : > { %3360 = vmatmul.bf16.vlgmr.msra.gmra.mxu2 %v4732_v57  ;;  %3123 = vmatmul.bf16.gmra.mxu1 %v4704_v30  ;;  %v7664_v30 = vld [vmem:[#allocation10_spill] sm:$0xff] }
 0x554   : > { %3224 = vmatpush.bf16.msra.mxu1 %v6295_v41  ;;  %3153 = vmatpush.bf16.msra.mxu3 %v7619_v5 }
 0x555   : > { %3414 = vmatpush.bf16.msrb.mxu2 %v7619_v5  ;;  %v6824_v45 = vpop.f32.mrf.mxu1  ;;  %v6826_v27 = vpop.f32.mrf.mxu2 }
 0x558   : > { %3225 = vmatpush.bf16.msra.mxu1 %v7654_v63  ;;  %3154 = vmatpush.bf16.msra.mxu3 %v7655_v28 }
 0x559   : > { %3415 = vmatpush.bf16.msrb.mxu2 %v7655_v28  ;;  %v2656_v57 = vpop.f32.mrf.mxu3 }
 0x55c   : > { %3226 = vmatpush.bf16.msra.mxu1 %v7656_v31  ;;  %3155 = vmatpush.bf16.msra.mxu3 %v7657_v6 }
 0x55d   : > { %3416 = vmatpush.bf16.msrb.mxu2 %v7657_v6  ;;  %v6834_v49 = vpop.f32.mrf.mxu1  ;;  %v6836_v36 = vpop.f32.mrf.mxu2  ;;  %3104 = vmatmul.bf16.gmra.mxu3 %v4700_v24 }
 0x560   : > { %3205 = vmatpush.bf16.msrb.mxu3 %v7658_v34  ;;  %3227 = vmatpush.bf16.msra.mxu1 %v7659_v7 }
 0x561   : > { %3466 = vmatpush.bf16.msra.mxu2 %v7658_v34  ;;  %v7666_v34 = vld [vmem:[#allocation32_spill] sm:$0xff]  ;;  %v2659_v15 = vpop.f32.mrf.mxu3 }
 0x562   : > { %v2598_v9 = vadd.f32 %v6754_v42, %v7666_v34  ;;  %v7670_v42 = vld [vmem:[#allocation42_spill] sm:$0xff] }
 0x563   : > { %3365 = vmatmul.bf16.gmra.mxu2 %v4764_v37  ;;  %v4990_v37 = vld [vmem:[#allocation2 + $0x20c] sm:$0xf] }
 0x564   : > { %3206 = vmatpush.bf16.msrb.mxu3 %v7660_v1  ;;  %3228 = vmatpush.bf16.msra.mxu1 %v7661_v33  ;;  %v2617_v8 = vadd.f32 %v6717_v23, %v2598_v9  ;;  %v7674_v23 = vld [vmem:[#allocation43_spill] sm:$0xff]  ;;  %v4677_v9 = vld [vmem:[#allocation2 + $0x228] sm:$0xf0] }
 0x565   : > { %3467 = vmatpush.bf16.msra.mxu2 %v7660_v1  ;;  %v4995_v1 = vld [vmem:[#allocation2 + $0x22c] sm:$0xf0]  ;;  %v6846_v28 = vpop.f32.mrf.mxu1 }
 0x566   : > { %v4684_v6 = vor.u32 %v4995_v1, %v4683_v20  ;;  %v7671_v20 = vld [vmem:[#allocation33_spill] sm:$0xff] }
 0x567   : > { %v2600_v34 = vadd.f32 %v6773_v25, %v7671_v20  ;;  %v7672_v1 = vld [vmem:[#allocation69_spill] sm:$0xff] }
 0x568   : > { %3207 = vmatpush.bf16.msrb.mxu3 %v7662_v10  ;;  %3229 = vmatpush.bf16.msra.mxu1 %v7663_v56  ;;  %v2636_v24 = vadd.f32 %v7672_v1, %v2617_v8  ;;  %v4680_v8 = vor.u32 %v4990_v37, %v4677_v9 }
 0x569   : > { %3468 = vmatpush.bf16.msra.mxu2 %v7662_v10  ;;  %v6848_v10 = vpop.f32.mrf.mxu2  ;;  %3175 = vmatmul.bf16.vlgmr.msrb.gmra.mxu1 %v4684_v6  ;;  %v5006_v6 = vld [vmem:[#allocation2 + $0x28c] sm:$0xf]  ;;  %v2619_v25 = vadd.f32 %v6733_v54, %v2600_v34 }
 0x56c   : > { %3208 = vmatpush.bf16.msrb.mxu3 %v7664_v30  ;;  %3230 = vmatpush.bf16.msra.mxu1 %v7665_v51 }
 0x56d   : > { %3469 = vmatpush.bf16.msra.mxu2 %v7664_v30  ;;  %v7669_v30 = vld [vmem:[#allocation20_spill] sm:$0xff]  ;;  %v6860_v5 = vpop.f32.mrf.mxu1  ;;  %3156 = vmatmul.bf16.vlgmr.msra.gmra.mxu3 %v4680_v8 }
 0x56e   : > { %v7682_v8 = vld [vmem:[#allocation36_spill] sm:$0xff] }
 0x570   : > { %3209 = vmatpush.bf16.msrb.mxu3 %v7667_v39  ;;  %3231 = vmatpush.bf16.msra.mxu1 %v7668_v18  ;;  %v5003_v18 = vld [vmem:[#allocation2 + $0x26c] sm:$0xf0] }
 0x571   : > { %3470 = vmatpush.bf16.msra.mxu2 %v7667_v39  ;;  %v6862_v47 = vpop.f32.mrf.mxu2  ;;  %v2655_v39 = vadd.f32 %v2654_v59, %v2636_v24  ;;  %v7676_v59 = vld [vmem:[#allocation44_spill] sm:$0xff]  ;;  %v4715_v24 = vld [vmem:[#allocation2 + $0x250] sm:$0xf] }
 0x572   : > { %v4716_v54 = vor.u32 %v5003_v18, %v4715_v24  ;;  %v4709_v24 = vld [vmem:[#allocation2 + $0x268] sm:$0xf0] }
 0x573   : > { %v2674_v1 = vadd.f32 %v6791_v40, %v2655_v39  ;;  %v7678_v39 = vld [vmem:[#allocation45_spill] sm:$0xff] }
 0x574   : > { %3210 = vmatpush.bf16.msrb.mxu3 %v7669_v30  ;;  %3390 = vmatpush.bf16.msrb.mxu1 %v7670_v42  ;;  %v4741_v42 = vld [vmem:[#allocation2 + $0x2a8] sm:$0xf0] }
 0x575   : > { %3471 = vmatpush.bf16.msra.mxu2 %v7669_v30  ;;  %v6867_v30 = vpop.f32.mrf.mxu3  ;;  %v4744_v20 = vor.u32 %v5006_v6, %v4741_v42  ;;  %v6877_v34 = vpop.f32.mrf.mxu1  ;;  %v2693_v37 = vadd.f32 %v6735_v58, %v2674_v1 }
 0x577   : > { %3417 = vmatmul.bf16.vlgmr.msrb.gmra.mxu2 %v4744_v20  ;;  %v7683_v20 = vld [vmem:[#allocation47_spill] sm:$0xff] }
 0x578   : > { %3211 = vmatpush.bf16.msrb.mxu3 %v7673_v48  ;;  %3391 = vmatpush.bf16.msrb.mxu1 %v7674_v23  ;;  %v7677_v23 = vld [vmem:[#allocation6_spill] sm:$0xff] }
 0x579   : > { %3472 = vmatpush.bf16.msra.mxu2 %v7673_v48  ;;  %v2603_v61 = vadd.f32 %v6798_v16, %v7677_v23  ;;  %v2638_v48 = vadd.f32 %v6690_v38, %v2619_v25  ;;  %v6879_v42 = vpop.f32.mrf.mxu2  ;;  %3180 = vmatmul.bf16.gmra.mxu1 %v4716_v54  ;;  %v7679_v23 = vld [vmem:[#allocation46_spill] sm:$0xff] }
 0x57a   : > { %v4998_v25 = vld [vmem:[#allocation2 + $0x24c] sm:$0xf] }
 0x57b   : > { %v2657_v40 = vadd.f32 %v2656_v57, %v2638_v48  ;;  %v2622_v16 = vadd.f32 %v6748_v62, %v2603_v61  ;;  %v7680_v48 = vld [vmem:[#allocation68_spill] sm:$0xff]  ;;  %v7681_v57 = vld [vmem:[#allocation34_spill] sm:$0xff] }
 0x57c   : > { %3212 = vmatpush.bf16.msrb.mxu3 %v7675_v32  ;;  %3392 = vmatpush.bf16.msrb.mxu1 %v7676_v59  ;;  %v2605_v58 = vadd.f32 %v6817_v29, %v7680_v48  ;;  %v5014_v54 = vld [vmem:[#allocation2 + $0x2cc] sm:$0xf] }
 0x57d   : > { %3473 = vmatpush.bf16.msra.mxu2 %v7675_v32  ;;  %v2711_v9 = vpop.f32.mrf.mxu3  ;;  %v2676_v18 = vadd.f32 %v6809_v50, %v2657_v40  ;;  %v2641_v6 = vadd.f32 %v7681_v57, %v2622_v16  ;;  %v6894_v62 = vpop.f32.mrf.mxu1  ;;  %v4773_v40 = vld [vmem:[#allocation2 + $0x2e8] sm:$0xf0]  ;;  %v4712_v16 = vor.u32 %v4998_v25, %v4709_v24  ;;  %v7685_v57 = vld [vmem:[#allocation48_spill] sm:$0xff] }
 0x57e   : > { %v2712_v38 = vadd.f32 %v2711_v9, %v2693_v37  ;;  %v2624_v37 = vadd.f32 %v6768_v14, %v2605_v58  ;;  %v7686_v25 = vld [vmem:[#allocation38_spill] sm:$0xff] }
 0x57f   : > { %v2660_v50 = vadd.f32 %v2659_v15, %v2641_v6  ;;  %v2695_v1 = vadd.f32 %v6750_v4, %v2676_v18  ;;  %v7684_v15 = vld [vmem:[#allocation37_spill] sm:$0xff]  ;;  %v4992_v6 = vld [vmem:[#allocation2 + $0x21c] sm:$0xf]  ;;  %3161 = vmatmul.bf16.gmra.mxu3 %v4712_v16  ;;  %v5012_v16 = vld [vmem:[#allocation2 + $0x2b4] sm:$0xf0] }
 0x580   : > { %3371 = vmatpush.bf16.msra.mxu3 %v7639_v55  ;;  %3393 = vmatpush.bf16.msrb.mxu1 %v7678_v39  ;;  %v2643_v4 = vadd.f32 %v6719_v3, %v2624_v37 }
 0x581   : > { %3632 = vmatpush.bf16.msrb.mxu2 %v7639_v55  ;;  %2721 = vrot.lane.b32.xlu0 %v2712_v38, %s5146_s13  ;;  %v6896_v61 = vpop.f32.mrf.mxu2  ;;  %v4776_v38 = vor.u32 %v5014_v54, %v4773_v40  ;;  %v2679_v48 = vadd.f32 %v6824_v45, %v2660_v50  ;;  %v7687_v50 = vld [vmem:[#allocation49_spill] sm:$0xff] }
 0x582   : > { %v2662_v45 = vadd.f32 %v6867_v30, %v2643_v4  ;;  %v4691_v30 = vld [vmem:[#allocation2 + $0x218] sm:$0xf] }
 0x584   : > { %3372 = vmatpush.bf16.msra.mxu3 %v7640_v46  ;;  %3394 = vmatpush.bf16.msrb.mxu1 %v7679_v23  ;;  %v2681_v3 = vadd.f32 %v6834_v49, %v2662_v45  ;;  %v4996_v49 = vld [vmem:[#allocation2 + $0x234] sm:$0xf0]  ;;  %v5000_v45 = vld [vmem:[#allocation2 + $0x25c] sm:$0xf] }
 0x585   : > { %3633 = vmatpush.bf16.msrb.mxu2 %v7640_v46  ;;  %v2713_v29 = vpop.f32.mrf.mxu3  ;;  %v4693_v46 = vld [vmem:[#allocation2 + $0x238] sm:$0xf0]  ;;  %v6909_v18 = vpop.f32.mrf.mxu1 }
 0x586   : > { %v2714_v9 = vadd.f32 %v2713_v29, %v2695_v1  ;;  %v4696_v14 = vor.u32 %v4992_v6, %v4693_v46  ;;  %v2698_v1 = vadd.f32 %v6770_v17, %v2679_v48  ;;  %v7688_v46 = vld [vmem:[#allocation63_spill] sm:$0xff]  ;;  %v7689_v17 = vld [vmem:[#allocation64_spill] sm:$0xff]  ;;  %v2700_v37 = vadd.f32 %v6793_v43, %v2681_v3 }
 0x587   : > { %3422 = vmatmul.bf16.gmra.mxu2 %v4776_v38  ;;  %v4692_v6 = vor.u32 %v4996_v49, %v4691_v30  ;;  %v7691_v3 = vld [vmem:[#allocation23_spill] sm:$0xff]  ;;  %v7692_v30 = vld [vmem:[#allocation66_spill] sm:$0xff] }
 0x588   : > { %3373 = vmatpush.bf16.msra.mxu3 %v7682_v8  ;;  %3395 = vmatpush.bf16.msrb.mxu1 %v7683_v20  ;;  %v7693_v49 = vld [vmem:[#allocation62_spill] sm:$0xff] }
 0x589   : > { %3634 = vmatpush.bf16.msrb.mxu2 %v7682_v8  ;;  %2723 = vrot.lane.b32.xlu1 %v2714_v9, %s5146_s13  ;;  %v6911_v58 = vpop.f32.mrf.mxu2  ;;  %v4755_v9 = vld [vmem:[#allocation2 + $0x298] sm:$0xf] }
 0x58a   : > { %3232 = vmatmul.bf16.vlgmr.msra.gmra.mxu1 %v4696_v14  ;;  %v4756_v4 = vor.u32 %v5012_v16, %v4755_v9  ;;  %v7690_v14 = vld [vmem:[#allocation65_spill] sm:$0xff]  ;;  %v4723_v9 = vld [vmem:[#allocation2 + $0x258] sm:$0xf] }
 0x58c   : > { %3374 = vmatpush.bf16.msra.mxu3 %v7684_v15  ;;  %3396 = vmatpush.bf16.msrb.mxu1 %v7685_v57 }
 0x58d   : > { %3635 = vmatpush.bf16.msrb.mxu2 %v7684_v15  ;;  %v2716_v24 = vpop.f32.mrf.mxu3  ;;  %v6923_v40 = vpop.f32.mrf.mxu1 }
 0x58e   : > { %v2717_v54 = vadd.f32 %v2716_v24, %v2698_v1  ;;  %v4725_v1 = vld [vmem:[#allocation2 + $0x278] sm:$0xf0] }
 0x58f   : > { %3213 = vmatmul.bf16.vlgmr.msrb.gmra.mxu3 %v4692_v6  ;;  %v4728_v43 = vor.u32 %v5000_v45, %v4725_v1  ;;  %v5004_v6 = vld [vmem:[#allocation2 + $0x274] sm:$0xf0] }
 0x590   : > { %3375 = vmatpush.bf16.msra.mxu3 %v7686_v25  ;;  %3397 = vmatpush.bf16.msrb.mxu1 %v7687_v50  ;;  %v5020_v45 = vld [vmem:[#allocation2 + $0x2f4] sm:$0xf0] }
 0x591   : > { %3636 = vmatpush.bf16.msrb.mxu2 %v7686_v25  ;;  %2725 = vrot.lane.b32.xlu2 %v2717_v54, %s5146_s13  ;;  %v6925_v29 = vpop.f32.mrf.mxu2 }
 0x594   : > { %3376 = vmatpush.bf16.msra.mxu3 %v5912_v35  ;;  %3447 = vmatpush.bf16.msra.mxu1 %v7688_v46 }
 0x595   : > { %3637 = vmatpush.bf16.msrb.mxu2 %v5912_v35  ;;  %v2718_v38 = vpop.f32.mrf.mxu3  ;;  %v6935_v24 = vpop.f32.mrf.mxu1 }
 0x596   : > { %v2719_v48 = vadd.f32 %v2718_v38, %v2700_v37 }
 0x597   : > { %3474 = vmatmul.bf16.vlgmr.msra.gmra.mxu2 %v4756_v4  ;;  %v4787_v4 = vld [vmem:[#allocation2 + $0x2d8] sm:$0xf] }
 0x598   : > { %3377 = vmatpush.bf16.msra.mxu3 %v7646_v21  ;;  %3448 = vmatpush.bf16.msra.mxu1 %v7689_v17 }
 0x599   : > { %3638 = vmatpush.bf16.msrb.mxu2 %v7646_v21  ;;  %2727 = vrot.lane.b32.xlu0 %v2719_v48, %s5146_s13  ;;  %v6937_v54 = vpop.f32.mrf.mxu2  ;;  %v7694_v48 = vld [vmem:[#allocation58_spill] sm:$0xff] }
 0x59a   : > { %3237 = vmatmul.bf16.gmra.mxu1 %v4728_v43  ;;  %v4724_v43 = vor.u32 %v5004_v6, %v4723_v9  ;;  %v5010_v21 = vld [vmem:[#allocation2 + $0x2a4] sm:$0xf0] }
 0x59b   : > { %v7697_v6 = vld [vmem:[#allocation26_spill] sm:$0xff] }
 0x59c   : > { %3378 = vmatpush.bf16.msra.mxu3 %v7647_v26  ;;  %3449 = vmatpush.bf16.msra.mxu1 %v7690_v14 }
 0x59d   : > { %3639 = vmatpush.bf16.msrb.mxu2 %v7647_v26  ;;  %v2877_v37 = vpop.f32.mrf.mxu3  ;;  %v6945_v16 = vpop.f32.mrf.mxu1  ;;  %v4739_v26 = vld [vmem:[#allocation2 + $0x288] sm:$0xf] }
 0x59e   : > { %v4740_v35 = vor.u32 %v5010_v21, %v4739_v26  ;;  %v2859_v21 = vadd.f32 %v6811_v11, %v6846_v28  ;;  %v5005_v26 = vld [vmem:[#allocation2 + $0x284] sm:$0xf]  ;;  %v7699_v11 = vld [vmem:[#allocation28_spill] sm:$0xff]  ;;  %v4771_v28 = vld [vmem:[#allocation2 + $0x2c8] sm:$0xf] }
 0x59f   : > { %3218 = vmatmul.bf16.gmra.mxu3 %v4724_v43  ;;  %v7698_v43 = vld [vmem:[#allocation27_spill] sm:$0xff] }
 0x5a0   : > { %3428 = vmatpush.bf16.msrb.mxu3 %v7691_v3  ;;  %3450 = vmatpush.bf16.msra.mxu1 %v7692_v30 }
 0x5a1   : > { %3689 = vmatpush.bf16.msra.mxu2 %v7691_v3  ;;  %v6947_v38 = vpop.f32.mrf.mxu2  ;;  %v4788_v3 = vor.u32 %v5020_v45, %v4787_v4  ;;  %v2878_v45 = vadd.f32 %v2877_v37, %v2859_v21  ;;  %v5018_v37 = vld [vmem:[#allocation2 + $0x2e4] sm:$0xf0]  ;;  %v2861_v21 = vadd.f32 %v6826_v27, %v6860_v5 }
 0x5a4   : > { %3429 = vmatpush.bf16.msrb.mxu3 %v7650_v2  ;;  %3451 = vmatpush.bf16.msra.mxu1 %v7693_v49 }
 0x5a5   : > { %3690 = vmatpush.bf16.msra.mxu2 %v7650_v2  ;;  %v2879_v1 = vpop.f32.mrf.mxu3  ;;  %v7695_v2 = vld [vmem:[#allocation53_spill] sm:$0xff]  ;;  %v2953_v25 = vpop.f32.mrf.mxu1 }
 0x5a7   : > { %3479 = vmatmul.bf16.gmra.mxu2 %v4788_v3 }
 0x5a8   : > { %3430 = vmatpush.bf16.msrb.mxu3 %v6263_v22  ;;  %3452 = vmatpush.bf16.msra.mxu1 %v7694_v48 }
 0x5a9   : > { %3691 = vmatpush.bf16.msra.mxu2 %v6263_v22  ;;  %v6955_v15 = vpop.f32.mrf.mxu2  ;;  %v7696_v22 = vld [vmem:[#allocation50_spill] sm:$0xff] }
 0x5aa   : > { %3398 = vmatmul.bf16.vlgmr.msrb.gmra.mxu1 %v4740_v35  ;;  %v5021_v35 = vld [vmem:[#allocation2 + $0x304] sm:$0xf] }
 0x5ac   : > { %3431 = vmatpush.bf16.msrb.mxu3 %v6268_v60  ;;  %3453 = vmatpush.bf16.msra.mxu1 %v7695_v2 }
 0x5ad   : > { %3692 = vmatpush.bf16.msra.mxu2 %v6268_v60  ;;  %v2882_v9 = vpop.f32.mrf.mxu3  ;;  %v2955_v3 = vpop.f32.mrf.mxu1  ;;  %v4797_v60 = vld [vmem:[#allocation2 + $0x320] sm:$0xf0] }
 0x5b0   : > { %3432 = vmatpush.bf16.msrb.mxu3 %v6274_v44  ;;  %3454 = vmatpush.bf16.msra.mxu1 %v7696_v22  ;;  %v2897_v22 = vadd.f32 %v6909_v18, %v2878_v45 }
 0x5b1   : > { %3693 = vmatpush.bf16.msra.mxu2 %v6274_v44  ;;  %v6965_v4 = vpop.f32.mrf.mxu2  ;;  %v4733_v44 = vld [vmem:[#allocation2 + $0x2a0] sm:$0xf0] }
 0x5b2   : > { %v4736_v8 = vor.u32 %v5005_v26, %v4733_v44  ;;  %v2880_v44 = vadd.f32 %v2879_v1, %v2861_v21  ;;  %v2916_v18 = vadd.f32 %v6862_v47, %v2897_v22  ;;  %v2864_v22 = vadd.f32 %v6836_v36, %v6877_v34  ;;  %v5013_v47 = vld [vmem:[#allocation2 + $0x2c4] sm:$0xf] }
 0x5b4   : > { %3433 = vmatpush.bf16.msrb.mxu3 %v6283_v53  ;;  %3613 = vmatpush.bf16.msrb.mxu1 %v7697_v6  ;;  %v2899_v5 = vadd.f32 %v6923_v40, %v2880_v44  ;;  %v4765_v40 = vld [vmem:[#allocation2 + $0x2e0] sm:$0xf0]  ;;  %v2883_v44 = vadd.f32 %v2882_v9, %v2864_v22 }
 0x5b5   : > { %3694 = vmatpush.bf16.msra.mxu2 %v6283_v53  ;;  %v2884_v6 = vpop.f32.mrf.mxu3  ;;  %v4800_v53 = vor.u32 %v5021_v35, %v4797_v60  ;;  %3379 = vmatmul.bf16.vlgmr.msra.gmra.mxu3 %v4736_v8  ;;  %v7700_v60 = vld [vmem:[#allocation29_spill] sm:$0xff]  ;;  %v2958_v26 = vpop.f32.mrf.mxu1 }
 0x5b7   : > { %3640 = vmatmul.bf16.vlgmr.msrb.gmra.mxu2 %v4800_v53  ;;  %v7701_v53 = vld [vmem:[#allocation30_spill] sm:$0xff] }
 0x5b8   : > { %3434 = vmatpush.bf16.msrb.mxu3 %v6288_v52  ;;  %3614 = vmatpush.bf16.msrb.mxu1 %v7698_v43  ;;  %v4772_v43 = vor.u32 %v5018_v37, %v4771_v28  ;;  %v5029_v28 = vld [vmem:[#allocation2 + $0x344] sm:$0xf] }
 0x5b9   : > { %3695 = vmatpush.bf16.msra.mxu2 %v6288_v52  ;;  %v6976_v52 = vpop.f32.mrf.mxu2  ;;  %v4829_v37 = vld [vmem:[#allocation2 + $0x360] sm:$0xf0] }
 0x5ba   : > { %3403 = vmatmul.bf16.gmra.mxu1 %v4772_v43  ;;  %v7702_v43 = vld [vmem:[#allocation31_spill] sm:$0xff] }
 0x5bc   : > { %3435 = vmatpush.bf16.msrb.mxu3 %v6293_v0  ;;  %3615 = vmatpush.bf16.msrb.mxu1 %v7699_v11 }
 0x5bd   : > { %3696 = vmatpush.bf16.msra.mxu2 %v6293_v0  ;;  %v2934_v45 = vpop.f32.mrf.mxu3  ;;  %v2960_v21 = vpop.f32.mrf.mxu1 }
 0x5be   : > { %v2935_v35 = vadd.f32 %v2934_v45, %v2916_v18  ;;  %v4832_v18 = vor.u32 %v5029_v28, %v4829_v37  ;;  %v5011_v28 = vld [vmem:[#allocation2 + $0x2ac] sm:$0xf0] }
 0x5bf   : > { %v4811_v37 = vld [vmem:[#allocation2 + $0x310] sm:$0xf] }
 0x5c0   : > { %3485 = vmatpush.bf16.msra.mxu3 %v6295_v41  ;;  %3616 = vmatpush.bf16.msrb.mxu1 %v7700_v60  ;;  %v2954_v27 = vadd.f32 %v2953_v25, %v2935_v35  ;;  %v2918_v25 = vadd.f32 %v6879_v42, %v2899_v5  ;;  %v5007_v42 = vld [vmem:[#allocation2 + $0x294] sm:$0xf]  ;;  %v2902_v5 = vadd.f32 %v6935_v24, %v2883_v44  ;;  %v5027_v44 = vld [vmem:[#allocation2 + $0x32c] sm:$0xf0] }
 0x5c1   : > { %3746 = vmatpush.bf16.msrb.mxu2 %v6295_v41  ;;  %v6989_v1 = vpop.f32.mrf.mxu2  ;;  %v4749_v35 = vld [vmem:[#allocation2 + $0x2b0] sm:$0xf0] }
 0x5c2   : > { %v2973_v8 = vadd.f32 %v6925_v29, %v2954_v27  ;;  %v4768_v29 = vor.u32 %v5013_v47, %v4765_v40  ;;  %v2866_v27 = vadd.f32 %v6848_v10, %v6894_v62  ;;  %v2921_v24 = vadd.f32 %v6896_v61, %v2902_v5  ;;  %v4747_v40 = vld [vmem:[#allocation2 + $0x290] sm:$0xf]  ;;  %v7703_v61 = vld [vmem:[#allocation12_spill] sm:$0xff]  ;;  %v4781_v5 = vld [vmem:[#allocation2 + $0x2f0] sm:$0xf0] }
 0x5c4   : > { %3486 = vmatpush.bf16.msra.mxu3 %v7654_v63  ;;  %3617 = vmatpush.bf16.msrb.mxu1 %v7701_v53  ;;  %v2885_v22 = vadd.f32 %v2884_v6, %v2866_v27 }
 0x5c5   : > { %3747 = vmatpush.bf16.msrb.mxu2 %v7654_v63  ;;  %2982 = vrot.lane.b32.xlu1 %v2973_v8, %s5147_s14  ;;  %v2936_v36 = vpop.f32.mrf.mxu3  ;;  %v4752_v8 = vor.u32 %v5007_v42, %v4749_v35  ;;  %v7705_v42 = vld [vmem:[#allocation11_spill] sm:$0xff] }
 0x5c6   : > { %v2937_v34 = vadd.f32 %v2936_v36, %v2918_v25  ;;  %3384 = vmatmul.bf16.gmra.mxu3 %v4768_v29  ;;  %v2904_v62 = vadd.f32 %v6945_v16, %v2885_v22  ;;  %v4748_v29 = vor.u32 %v5011_v28, %v4747_v40  ;;  %v5015_v35 = vld [vmem:[#allocation2 + $0x2d4] sm:$0xf]  ;;  %v4843_v40 = vld [vmem:[#allocation2 + $0x350] sm:$0xf] }
 0x5c7   : > { %3645 = vmatmul.bf16.gmra.mxu2 %v4832_v18  ;;  %v7707_v22 = vld [vmem:[#allocation7_spill] sm:$0xff] }
 0x5c8   : > { %3487 = vmatpush.bf16.msra.mxu3 %v7656_v31  ;;  %3618 = vmatpush.bf16.msrb.mxu1 %v7702_v43  ;;  %v2956_v45 = vadd.f32 %v2955_v3, %v2937_v34  ;;  %v7005_v3 = vpop.f32.mrf.mxu1  ;;  %v2923_v16 = vadd.f32 %v6911_v58, %v2904_v62  ;;  %v4784_v58 = vor.u32 %v5015_v35, %v4781_v5  ;;  %v4779_v62 = vld [vmem:[#allocation2 + $0x2d0] sm:$0xf] }
 0x5c9   : > { %3748 = vmatpush.bf16.msrb.mxu2 %v7656_v31  ;;  %v5035_v28 = vld [vmem:[#allocation2 + $0x36c] sm:$0xf0] }
 0x5ca   : > { %v2975_v9 = vadd.f32 %v6937_v54, %v2956_v45  ;;  %v7010_v54 = vpop.f32.mrf.mxu2  ;;  %3455 = vmatmul.bf16.vlgmr.msra.gmra.mxu1 %v4752_v8  ;;  %v7704_v45 = vld [vmem:[#allocation61_spill] sm:$0xff]  ;;  %v7706_v8 = vld [vmem:[#allocation42_spill] sm:$0xff] }
 0x5cc   : > { %3488 = vmatpush.bf16.msra.mxu3 %v7659_v7  ;;  %3619 = vmatpush.bf16.msrb.mxu1 %v7610_v12 }
 0x5cd   : > { %3749 = vmatpush.bf16.msrb.mxu2 %v7659_v7  ;;  %2984 = vrot.lane.b32.xlu2 %v2975_v9, %s5147_s14  ;;  %v2939_v47 = vpop.f32.mrf.mxu3 }
 0x5ce   : > { %v2940_v10 = vadd.f32 %v2939_v47, %v2921_v24 }
 0x5d0   : > { %3489 = vmatpush.bf16.msra.mxu3 %v7661_v33  ;;  %3620 = vmatpush.bf16.msrb.mxu1 %v7611_v19  ;;  %v2959_v25 = vadd.f32 %v2958_v26, %v2940_v10  ;;  %v7019_v36 = vpop.f32.mrf.mxu1  ;;  %v7709_v10 = vld [vmem:[#allocation15_spill] sm:$0xff] }
 0x5d1   : > { %3750 = vmatpush.bf16.msrb.mxu2 %v7661_v33 }
 0x5d2   : > { %v2978_v6 = vadd.f32 %v6947_v38, %v2959_v25  ;;  %v4812_v38 = vor.u32 %v5027_v44, %v4811_v37  ;;  %v7024_v18 = vpop.f32.mrf.mxu2  ;;  %v7710_v25 = vld [vmem:[#allocation14_spill] sm:$0xff] }
 0x5d4   : > { %3490 = vmatpush.bf16.msra.mxu3 %v7663_v56  ;;  %3670 = vmatpush.bf16.msra.mxu1 %v7612_v13 }
 0x5d5   : > { %3751 = vmatpush.bf16.msrb.mxu2 %v7663_v56  ;;  %2986 = vrot.lane.b32.xlu0 %v2978_v6, %s5147_s14  ;;  %v2941_v26 = vpop.f32.mrf.mxu3  ;;  %v5019_v6 = vld [vmem:[#allocation2 + $0x2ec] sm:$0xf0] }
 0x5d6   : > { %v2942_v34 = vadd.f32 %v2941_v26, %v2923_v16  ;;  %3436 = vmatmul.bf16.vlgmr.msrb.gmra.mxu3 %v4748_v29  ;;  %v4780_v16 = vor.u32 %v5019_v6, %v4779_v62  ;;  %v4844_v26 = vor.u32 %v5035_v28, %v4843_v40  ;;  %v4795_v29 = vld [vmem:[#allocation2 + $0x300] sm:$0xf]  ;;  %v5008_v6 = vld [vmem:[#allocation2 + $0x29c] sm:$0xf]  ;;  %v7716_v40 = vld [vmem:[#allocation19_spill] sm:$0xff] }
 0x5d7   : > { %3697 = vmatmul.bf16.vlgmr.msra.gmra.mxu2 %v4812_v38  ;;  %v5025_v38 = vld [vmem:[#allocation2 + $0x31c] sm:$0xf0]  ;;  %v4757_v28 = vld [vmem:[#allocation2 + $0x2b8] sm:$0xf0] }
 0x5d8   : > { %3491 = vmatpush.bf16.msra.mxu3 %v7665_v51  ;;  %3671 = vmatpush.bf16.msra.mxu1 %v7703_v61  ;;  %v2961_v9 = vadd.f32 %v2960_v21, %v2942_v34  ;;  %v7032_v24 = vpop.f32.mrf.mxu1  ;;  %v7708_v21 = vld [vmem:[#allocation43_spill] sm:$0xff]  ;;  %v7711_v34 = vld [vmem:[#allocation8_spill] sm:$0xff] }
 0x5d9   : > { %3752 = vmatpush.bf16.msrb.mxu2 %v7665_v51 }
 0x5da   : > { %v2980_v27 = vadd.f32 %v6955_v15, %v2961_v9  ;;  %3460 = vmatmul.bf16.gmra.mxu1 %v4784_v58  ;;  %v7041_v15 = vpop.f32.mrf.mxu2  ;;  %v4796_v9 = vor.u32 %v5025_v38, %v4795_v29  ;;  %v4760_v38 = vor.u32 %v5008_v6, %v4757_v28  ;;  %v7719_v6 = vld [vmem:[#allocation73_spill] sm:$0xff] }
 0x5dc   : > { %3492 = vmatpush.bf16.msra.mxu3 %v7704_v45  ;;  %3672 = vmatpush.bf16.msra.mxu1 %v7705_v42 }
 0x5dd   : > { %3753 = vmatpush.bf16.msrb.mxu2 %v7704_v45  ;;  %2988 = vrot.lane.b32.xlu1 %v2980_v27, %s5147_s14  ;;  %v7036_v47 = vpop.f32.mrf.mxu3  ;;  %v7713_v27 = vld [vmem:[#allocation74_spill] sm:$0xff] }
 0x5e0   : > { %3651 = vmatpush.bf16.msrb.mxu3 %v7706_v8  ;;  %3673 = vmatpush.bf16.msra.mxu1 %v7707_v22  ;;  %v7045_v37 = vpop.f32.mrf.mxu1 }
 0x5e1   : > { %3912 = vmatpush.bf16.msra.mxu2 %v7706_v8 }
 0x5e2   : > { %v7053_v35 = vpop.f32.mrf.mxu2 }
 0x5e4   : > { %3652 = vmatpush.bf16.msrb.mxu3 %v7708_v21  ;;  %3674 = vmatpush.bf16.msra.mxu1 %v7709_v10 }
 0x5e5   : > { %3913 = vmatpush.bf16.msra.mxu2 %v7708_v21  ;;  %v7048_v44 = vpop.f32.mrf.mxu3 }
 0x5e6   : > { %3441 = vmatmul.bf16.gmra.mxu3 %v4780_v16  ;;  %v5024_v16 = vld [vmem:[#allocation2 + $0x31c] sm:$0xf] }
 0x5e7   : > { %3702 = vmatmul.bf16.gmra.mxu2 %v4844_v26  ;;  %v4821_v26 = vld [vmem:[#allocation2 + $0x338] sm:$0xf0] }
 0x5e8   : > { %3653 = vmatpush.bf16.msrb.mxu3 %v7676_v59  ;;  %3675 = vmatpush.bf16.msra.mxu1 %v7710_v25  ;;  %v7060_v8 = vpop.f32.mrf.mxu1 }
 0x5e9   : > { %3914 = vmatpush.bf16.msra.mxu2 %v7676_v59  ;;  %v7712_v59 = vld [vmem:[#allocation17_spill] sm:$0xff] }
 0x5ea   : > { %3621 = vmatmul.bf16.vlgmr.msrb.gmra.mxu1 %v4796_v9  ;;  %v7068_v62 = vpop.f32.mrf.mxu2  ;;  %v4827_v9 = vld [vmem:[#allocation2 + $0x340] sm:$0xf] }
 0x5eb   : > { %v2726_v5 = vpop.permute.xlu2 %2725 }
 0x5ec   : > { %3654 = vmatpush.bf16.msrb.mxu3 %v7678_v39  ;;  %3676 = vmatpush.bf16.msra.mxu1 %v7711_v34  ;;  %v7058_v58 = vadd.f32 %v2726_v5, %v7713_v27  ;;  %v4824_v5 = vor.u32 %v5024_v16, %v4821_v26  ;;  %v5033_v27 = vld [vmem:[#allocation2 + $0x35c] sm:$0xf0] }
 0x5ed   : > { %3915 = vmatpush.bf16.msra.mxu2 %v7678_v39  ;;  %v7063_v21 = vpop.f32.mrf.mxu3  ;;  %v7715_v39 = vld [vmem:[#allocation9_spill] sm:$0xff]  ;;  %v4828_v51 = vor.u32 %v5033_v27, %v4827_v9  ;;  %v4789_v9 = vld [vmem:[#allocation2 + $0x2f8] sm:$0xf0] }
 0x5ee   : > { %7714 = vst [vmem:[#allocation54_spill] sm:$0xff] %v7058_v58 }
 0x5f0   : > { %3655 = vmatpush.bf16.msrb.mxu3 %v7679_v23  ;;  %3677 = vmatpush.bf16.msra.mxu1 %v7712_v59 }
 0x5f1   : > { %3916 = vmatpush.bf16.msra.mxu2 %v7679_v23  ;;  %v7072_v23 = vpop.f32.mrf.mxu1 }
 0x5f2   : > { %v7080_v58 = vpop.f32.mrf.mxu2 }
 0x5f4   : > { %3656 = vmatpush.bf16.msrb.mxu3 %v7683_v20  ;;  %3727 = vmatpush.bf16.msrb.mxu1 %v7715_v39 }
 0x5f5   : > { %3917 = vmatpush.bf16.msra.mxu2 %v7683_v20  ;;  %v7075_v29 = vpop.f32.mrf.mxu3  ;;  %v7717_v20 = vld [vmem:[#allocation18_spill] sm:$0xff] }
 0x5f6   : > { %3493 = vmatmul.bf16.vlgmr.msra.gmra.mxu3 %v4760_v38 }
 0x5f7   : > { %3754 = vmatmul.bf16.vlgmr.msrb.gmra.mxu2 %v4824_v5  ;;  %v7723_v5 = vld [vmem:[#allocation20_spill] sm:$0xff] }
 0x5f8   : > { %3657 = vmatpush.bf16.msrb.mxu3 %v7685_v57  ;;  %3728 = vmatpush.bf16.msrb.mxu1 %v7716_v40 }
 0x5f9   : > { %3918 = vmatpush.bf16.msra.mxu2 %v7685_v57  ;;  %v7718_v57 = vld [vmem:[#allocation10_spill] sm:$0xff]  ;;  %v7087_v16 = vpop.f32.mrf.mxu1 }
 0x5fa   : > { %3626 = vmatmul.bf16.gmra.mxu1 %v4828_v51  ;;  %v7093_v38 = vpop.f32.mrf.mxu2 }
 0x5fb   : > { %v2724_v45 = vpop.permute.xlu1 %2723  ;;  %7722 = vst [vmem:[#allocation56_spill] sm:$0xff] %v7093_v38 }
 0x5fc   : > { %3658 = vmatpush.bf16.msrb.mxu3 %v7687_v50  ;;  %3729 = vmatpush.bf16.msrb.mxu1 %v7717_v20  ;;  %v7085_v28 = vadd.f32 %v2724_v45, %v7719_v6  ;;  %v5016_v45 = vld [vmem:[#allocation2 + $0x2dc] sm:$0xf]  ;;  %v7724_v6 = vld [vmem:[#allocation13_spill] sm:$0xff] }
 0x5fd   : > { %3919 = vmatpush.bf16.msra.mxu2 %v7687_v50  ;;  %v3157_v26 = vpop.f32.mrf.mxu3  ;;  %v7721_v50 = vld [vmem:[#allocation21_spill] sm:$0xff]  ;;  %v4792_v51 = vor.u32 %v5016_v45, %v4789_v9  ;;  %v3120_v45 = vadd.f32 %v7005_v3, %v7036_v47  ;;  %v4803_v9 = vld [vmem:[#allocation2 + $0x308] sm:$0xf] }
 0x5fe   : > { %7720 = vst [vmem:[#allocation55_spill] sm:$0xff] %v7085_v28  ;;  %v5022_v28 = vld [vmem:[#allocation2 + $0x30c] sm:$0xf] }
 0x600   : > { %3708 = vmatpush.bf16.msra.mxu3 %v7688_v46  ;;  %3730 = vmatpush.bf16.msrb.mxu1 %v7718_v57 }
 0x601   : > { %3969 = vmatpush.bf16.msrb.mxu2 %v7688_v46  ;;  %v7097_v27 = vpop.f32.mrf.mxu1 }
 0x602   : > { %v7103_v38 = vpop.f32.mrf.mxu2 }
 0x603   : > { %7725 = vst [vmem:[#allocation57_spill] sm:$0xff] %v7103_v38 }
 0x604   : > { %3709 = vmatpush.bf16.msra.mxu3 %v7689_v17  ;;  %3731 = vmatpush.bf16.msrb.mxu1 %v7721_v50 }
 0x605   : > { %3970 = vmatpush.bf16.msrb.mxu2 %v7689_v17  ;;  %v3159_v46 = vpop.f32.mrf.mxu3  ;;  %v4805_v17 = vld [vmem:[#allocation2 + $0x328] sm:$0xf0] }
 0x606   : > { %3498 = vmatmul.bf16.gmra.mxu3 %v4792_v51  ;;  %v5026_v51 = vld [vmem:[#allocation2 + $0x324] sm:$0xf0] }
 0x607   : > { %v4804_v47 = vor.u32 %v5026_v51, %v4803_v9 }
 0x608   : > { %3710 = vmatpush.bf16.msra.mxu3 %v7690_v14  ;;  %3732 = vmatpush.bf16.msrb.mxu1 %v7723_v5  ;;  %v4808_v5 = vor.u32 %v5022_v28, %v4805_v17  ;;  %v7726_v28 = vld [vmem:[#allocation35_spill] sm:$0xff] }
 0x609   : > { %3971 = vmatpush.bf16.msrb.mxu2 %v7690_v14  ;;  %v3233_v50 = vpop.f32.mrf.mxu1 }
 0x60a   : > { %3678 = vmatmul.bf16.vlgmr.msra.gmra.mxu1 %v4808_v5  ;;  %v7116_v17 = vpop.f32.mrf.mxu2  ;;  %v5030_v5 = vld [vmem:[#allocation2 + $0x34c] sm:$0xf] }
 0x60b   : > { %7727 = vst [vmem:[#allocation59_spill] sm:$0xff] %v7116_v17 }
 0x60c   : > { %3711 = vmatpush.bf16.msra.mxu3 %v7692_v30  ;;  %3733 = vmatpush.bf16.msrb.mxu1 %v7724_v6 }
 0x60d   : > { %3972 = vmatpush.bf16.msrb.mxu2 %v7692_v30  ;;  %v3162_v14 = vpop.f32.mrf.mxu3  ;;  %v3139_v30 = vadd.f32 %v6965_v4, %v3120_v45  ;;  %v7729_v4 = vld [vmem:[#allocation36_spill] sm:$0xff]  ;;  %v4837_v45 = vld [vmem:[#allocation2 + $0x368] sm:$0xf0] }
 0x60f   : > { %v3158_v38 = vadd.f32 %v3157_v26, %v3139_v30  ;;  %v4840_v26 = vor.u32 %v5030_v5, %v4837_v45  ;;  %v7731_v30 = vld [vmem:[#allocation37_spill] sm:$0xff] }
 0x610   : > { %3712 = vmatpush.bf16.msra.mxu3 %v7693_v49  ;;  %3734 = vmatpush.bf16.msrb.mxu1 %v7675_v32 }
 0x611   : > { %3973 = vmatpush.bf16.msrb.mxu2 %v7693_v49  ;;  %v3235_v49 = vpop.f32.mrf.mxu1 }
 0x614   : > { %3713 = vmatpush.bf16.msra.mxu3 %v7694_v48  ;;  %3893 = vmatpush.bf16.msra.mxu1 %v7639_v55  ;;  %v3122_v55 = vadd.f32 %v7019_v36, %v7048_v44 }
 0x615   : > { %3974 = vmatpush.bf16.msrb.mxu2 %v7694_v48  ;;  %v3164_v3 = vpop.f32.mrf.mxu3  ;;  %v7728_v48 = vld [vmem:[#allocation50_spill] sm:$0xff] }
 0x616   : > { %v3141_v17 = vadd.f32 %v6976_v52, %v3122_v55  ;;  %3659 = vmatmul.bf16.vlgmr.msrb.gmra.mxu3 %v4804_v47  ;;  %v7733_v52 = vld [vmem:[#allocation38_spill] sm:$0xff] }
 0x618   : > { %3714 = vmatpush.bf16.msra.mxu3 %v7695_v2  ;;  %3894 = vmatpush.bf16.msra.mxu1 %v7726_v28  ;;  %v3177_v28 = vadd.f32 %v7060_v8, %v3158_v38  ;;  %v3160_v44 = vadd.f32 %v3159_v46, %v3141_v17  ;;  %v3125_v8 = vadd.f32 %v7032_v24, %v7063_v21  ;;  %v4835_v46 = vld [vmem:[#allocation2 + $0x348] sm:$0xf] }
 0x619   : > { %3975 = vmatpush.bf16.msrb.mxu2 %v7695_v2  ;;  %v7730_v2 = vld [vmem:[#allocation26_spill] sm:$0xff]  ;;  %v3238_v36 = vpop.f32.mrf.mxu1 }
 0x61a   : > { %v3196_v9 = vadd.f32 %v7024_v18, %v3177_v28  ;;  %3683 = vmatmul.bf16.gmra.mxu1 %v4840_v26  ;;  %v3179_v55 = vadd.f32 %v7072_v23, %v3160_v44  ;;  %v3144_v5 = vadd.f32 %v6989_v1, %v3125_v8  ;;  %v7734_v18 = vld [vmem:[#allocation39_spill] sm:$0xff]  ;;  %v5034_v24 = vld [vmem:[#allocation2 + $0x364] sm:$0xf0]  ;;  %v3127_v23 = vadd.f32 %v7045_v37, %v7075_v29  ;;  %v7735_v1 = vld [vmem:[#allocation40_spill] sm:$0xff] }
 0x61b   : > { %v4836_v26 = vor.u32 %v5034_v24, %v4835_v46  ;;  %v7736_v37 = vld [vmem:[#allocation41_spill] sm:$0xff]  ;;  %v5032_v29 = vld [vmem:[#allocation2 + $0x35c] sm:$0xf] }
 0x61c   : > { %3715 = vmatpush.bf16.msra.mxu3 %v7728_v48  ;;  %3895 = vmatpush.bf16.msra.mxu1 %v7729_v4  ;;  %v7129_v4 = vpop.f32.mrf.mxu2  ;;  %v3163_v17 = vadd.f32 %v3162_v14, %v3144_v5  ;;  %v3198_v45 = vadd.f32 %v7041_v15, %v3179_v55  ;;  %v3146_v14 = vadd.f32 %v7010_v54, %v3127_v23  ;;  %v7737_v54 = vld [vmem:[#allocation23_spill] sm:$0xff] }
 0x61d   : > { %3976 = vmatpush.bf16.msrb.mxu2 %v7728_v48  ;;  %v3214_v51 = vpop.f32.mrf.mxu3  ;;  %v7732_v48 = vld [vmem:[#allocation27_spill] sm:$0xff] }
 0x61e   : > { %v3215_v38 = vadd.f32 %v3214_v51, %v3196_v9  ;;  %v3182_v44 = vadd.f32 %v7087_v16, %v3163_v17  ;;  %v4853_v51 = vld [vmem:[#allocation2 + $0x378] sm:$0xf0]  ;;  %v3165_v8 = vadd.f32 %v3164_v3, %v3146_v14  ;;  %v7738_v3 = vld [vmem:[#allocation22_spill] sm:$0xff]  ;;  %v5036_v17 = vld [vmem:[#allocation2 + $0x374] sm:$0xf0] }
 0x620   : > { %3874 = vmatpush.bf16.msrb.mxu3 %v7730_v2  ;;  %3896 = vmatpush.bf16.msra.mxu1 %v7731_v30  ;;  %v3234_v47 = vadd.f32 %v3233_v50, %v3215_v38  ;;  %v4819_v2 = vld [vmem:[#allocation2 + $0x318] sm:$0xf]  ;;  %v3201_v38 = vadd.f32 %v7053_v35, %v3182_v44  ;;  %v5023_v35 = vld [vmem:[#allocation2 + $0x314] sm:$0xf] }
 0x621   : > { %v3240_v21 = vpop.f32.mrf.mxu1 }
 0x622   : > { %3243 = vrot.lane.b32.xlu2 %v3234_v47, %s5148_s16  ;;  %v4813_v47 = vld [vmem:[#allocation2 + $0x330] sm:$0xf0] }
 0x623   : > { %v4816_v24 = vor.u32 %v5023_v35, %v4813_v47  ;;  %v5039_v35 = vld [vmem:[#allocation2 + $0x394] sm:$0xf] }
 0x624   : > { %3875 = vmatpush.bf16.msrb.mxu3 %v7732_v48  ;;  %3897 = vmatpush.bf16.msra.mxu1 %v7733_v52  ;;  %v7145_v30 = vpop.f32.mrf.mxu2  ;;  %v4856_v48 = vor.u32 %v5032_v29, %v4853_v51  ;;  %v4861_v29 = vld [vmem:[#allocation2 + $0x3a0] sm:$0xf0]  ;;  %v4877_v47 = vld [vmem:[#allocation2 + $0x3b0] sm:$0xf0] }
 0x625   : > { %v3216_v28 = vpop.f32.mrf.mxu3 }
 0x626   : > { %v3217_v50 = vadd.f32 %v3216_v28, %v3198_v45  ;;  %3664 = vmatmul.bf16.gmra.mxu3 %v4836_v26  ;;  %3759 = vmatmul.bf16.gmra.mxu2 %v4856_v48  ;;  %v7740_v28 = vld [vmem:[#allocation24_spill] sm:$0xff]  ;;  %v5042_v26 = vld [vmem:[#allocation2 + $0x3a4] sm:$0xf0] }
 0x628   : > { %3876 = vmatpush.bf16.msrb.mxu3 %v7699_v11  ;;  %3898 = vmatpush.bf16.msra.mxu1 %v7734_v18  ;;  %v5028_v11 = vld [vmem:[#allocation2 + $0x334] sm:$0xf0]  ;;  %v3236_v9 = vadd.f32 %v3235_v49, %v3217_v50  ;;  %v4867_v50 = vld [vmem:[#allocation2 + $0x388] sm:$0xf] }
 0x629   : > { %v4820_v15 = vor.u32 %v5028_v11, %v4819_v2  ;;  %v5031_v2 = vld [vmem:[#allocation2 + $0x354] sm:$0xf] }
 0x62a   : > { %3245 = vrot.lane.b32.xlu0 %v3236_v9, %s5148_s16  ;;  %v4845_v11 = vld [vmem:[#allocation2 + $0x370] sm:$0xf0] }
 0x62b   : > { %3735 = vmatmul.bf16.vlgmr.msrb.gmra.mxu1 %v4820_v15  ;;  %v4848_v15 = vor.u32 %v5031_v2, %v4845_v11  ;;  %v4869_v2 = vld [vmem:[#allocation2 + $0x3a8] sm:$0xf0] }
 0x62c   : > { %3877 = vmatpush.bf16.msrb.mxu3 %v7700_v60  ;;  %3899 = vmatpush.bf16.msra.mxu1 %v7735_v1  ;;  %v7152_v60 = vpop.f32.mrf.mxu1  ;;  %v7158_v55 = vpop.f32.mrf.mxu2 }
 0x62d   : > { %v3219_v16 = vpop.f32.mrf.mxu3 }
 0x62e   : > { %v3220_v49 = vadd.f32 %v3219_v16, %v3201_v38  ;;  %v5050_v38 = vld [vmem:[#allocation2 + $0x3e4] sm:$0xf0] }
 0x630   : > { %3878 = vmatpush.bf16.msrb.mxu3 %v7701_v53  ;;  %3900 = vmatpush.bf16.msra.mxu1 %v7736_v37  ;;  %v3184_v53 = vadd.f32 %v7097_v27, %v3165_v8  ;;  %v3239_v52 = vadd.f32 %v3238_v36, %v3220_v49  ;;  %v7739_v27 = vld [vmem:[#allocation16_spill] sm:$0xff]  ;;  %v4899_v8 = vld [vmem:[#allocation2 + $0x3c8] sm:$0xf] }
 0x631   : > { %v4851_v36 = vld [vmem:[#allocation2 + $0x358] sm:$0xf]  ;;  %v4900_v48 = vor.u32 %v5050_v38, %v4899_v8  ;;  %v5051_v8 = vld [vmem:[#allocation2 + $0x3ec] sm:$0xf0] }
 0x632   : > { %3247 = vrot.lane.b32.xlu1 %v3239_v52, %s5148_s16  ;;  %v3203_v18 = vadd.f32 %v7068_v62, %v3184_v53  ;;  %v7743_v37 = vld [vmem:[#allocation52_spill] sm:$0xff]  ;;  %v4893_v52 = vld [vmem:[#allocation2 + $0x3e0] sm:$0xf0] }
 0x634   : > { %3879 = vmatpush.bf16.msrb.mxu3 %v7702_v43  ;;  %3950 = vmatpush.bf16.msrb.mxu1 %v7737_v54  ;;  %v7163_v5 = vpop.f32.mrf.mxu1  ;;  %v7173_v62 = vpop.f32.mrf.mxu2 }
 0x635   : > { %v3221_v43 = vpop.f32.mrf.mxu3 }
 0x636   : > { %v3222_v46 = vadd.f32 %v3221_v43, %v3203_v18  ;;  %3716 = vmatmul.bf16.vlgmr.msra.gmra.mxu3 %v4816_v24  ;;  %v4880_v18 = vor.u32 %v5039_v35, %v4877_v47  ;;  %v7744_v24 = vld [vmem:[#allocation60_spill] sm:$0xff]  ;;  %v4901_v35 = vld [vmem:[#allocation2 + $0x3e8] sm:$0xf0] }
 0x638   : > { %3880 = vmatpush.bf16.msrb.mxu3 %v7610_v12  ;;  %3951 = vmatpush.bf16.msrb.mxu1 %v7738_v3  ;;  %v3241_v45 = vadd.f32 %v3240_v21, %v3222_v46  ;;  %v4852_v12 = vor.u32 %v5036_v17, %v4851_v36  ;;  %v7741_v21 = vld [vmem:[#allocation25_spill] sm:$0xff] }
 0x639   : > { %v7746_v36 = vld [vmem:[#allocation61_spill] sm:$0xff] }
 0x63a   : > { %3249 = vrot.lane.b32.xlu2 %v3241_v45, %s5148_s16 }
 0x63b   : > { %3740 = vmatmul.bf16.gmra.mxu1 %v4852_v12 }
 0x63c   : > { %3881 = vmatpush.bf16.msrb.mxu3 %v7611_v19  ;;  %3952 = vmatpush.bf16.msrb.mxu1 %v7739_v27  ;;  %v7171_v23 = vpop.f32.mrf.mxu1  ;;  %v4868_v19 = vor.u32 %v5042_v26, %v4867_v50  ;;  %v7185_v14 = vpop.f32.mrf.mxu2  ;;  %v5043_v27 = vld [vmem:[#allocation2 + $0x3ac] sm:$0xf0] }
 0x63d   : > { %v7175_v1 = vpop.f32.mrf.mxu3 }
 0x63e   : > { %3920 = vmatmul.bf16.vlgmr.msra.gmra.mxu2 %v4868_v19  ;;  %v7747_v19 = vld [vmem:[#allocation20_spill] sm:$0xff] }
 0x640   : > { %3931 = vmatpush.bf16.msra.mxu3 %v7612_v13  ;;  %3953 = vmatpush.bf16.msrb.mxu1 %v7740_v28  ;;  %v7742_v13 = vld [vmem:[#allocation51_spill] sm:$0xff] }
 0x641   : > { %v5047_v28 = vld [vmem:[#allocation2 + $0x3d4] sm:$0xf] }
 0x644   : > { %3932 = vmatpush.bf16.msra.mxu3 %v7703_v61  ;;  %3954 = vmatpush.bf16.msrb.mxu1 %v7741_v21  ;;  %v7181_v44 = vpop.f32.mrf.mxu1  ;;  %v5037_v61 = vld [vmem:[#allocation2 + $0x384] sm:$0xf] }
 0x645   : > { %v7183_v9 = vpop.f32.mrf.mxu3  ;;  %v4864_v51 = vor.u32 %v5037_v61, %v4861_v29 }
 0x646   : > { %3721 = vmatmul.bf16.gmra.mxu3 %v4848_v15 }
 0x648   : > { %3933 = vmatpush.bf16.msra.mxu3 %v7705_v42  ;;  %3955 = vmatpush.bf16.msrb.mxu1 %v7742_v13  ;;  %v5038_v13 = vld [vmem:[#allocation2 + $0x38c] sm:$0xf] }
 0x649   : > { %v4872_v61 = vor.u32 %v5038_v13, %v4869_v2  ;;  %v4915_v13 = vld [vmem:[#allocation2 + $0x3d8] sm:$0xf] }
 0x64a   : > { %v5052_v2 = vld [vmem:[#allocation2 + $0x3f4] sm:$0xf0] }
 0x64b   : > { %3901 = vmatmul.bf16.vlgmr.msra.gmra.mxu1 %v4864_v51  ;;  %v4907_v51 = vld [vmem:[#allocation2 + $0x3d0] sm:$0xf] }
 0x64c   : > { %3934 = vmatpush.bf16.msra.mxu3 %v7707_v22  ;;  %3956 = vmatpush.bf16.msrb.mxu1 %v7743_v37  ;;  %v7191_v42 = vpop.f32.mrf.mxu1  ;;  %v7197_v22 = vpop.f32.mrf.mxu2 }
 0x64d   : > { %v7193_v16 = vpop.f32.mrf.mxu3 }
 0x64e   : > { %3925 = vmatmul.bf16.gmra.mxu2 %v4900_v48  ;;  %v4908_v48 = vor.u32 %v5051_v8, %v4907_v51 }
 0x650   : > { %3935 = vmatpush.bf16.msra.mxu3 %v7709_v10  ;;  %3957 = vmatpush.bf16.msrb.mxu1 %v6293_v0  ;;  %v4859_v0 = vld [vmem:[#allocation2 + $0x380] sm:$0xf] }
 0x651   : > { %v5041_v10 = vld [vmem:[#allocation2 + $0x39c] sm:$0xf0] }
 0x652   : > { %v4860_v53 = vor.u32 %v5041_v10, %v4859_v0 }
 0x654   : > { %3936 = vmatpush.bf16.msra.mxu3 %v7710_v25  ;;  %4007 = vmatpush.bf16.msra.mxu1 %v6295_v41  ;;  %v7201_v49 = vpop.f32.mrf.mxu1  ;;  %v5045_v25 = vld [vmem:[#allocation2 + $0x3c4] sm:$0xf]  ;;  %v7207_v41 = vpop.f32.mrf.mxu2 }
 0x655   : > { %v7203_v54 = vpop.f32.mrf.mxu3  ;;  %v4896_v3 = vor.u32 %v5045_v25, %v4893_v52 }
 0x656   : > { %3882 = vmatmul.bf16.vlgmr.msrb.gmra.mxu3 %v4860_v53 }
 0x658   : > { %3937 = vmatpush.bf16.msra.mxu3 %v7711_v34  ;;  %4008 = vmatpush.bf16.msra.mxu1 %v7654_v63 }
 0x65b   : > { %3906 = vmatmul.bf16.gmra.mxu1 %v4896_v3 }
 0x65c   : > { %3938 = vmatpush.bf16.msra.mxu3 %v7712_v59  ;;  %4009 = vmatpush.bf16.msra.mxu1 %v7656_v31  ;;  %v7211_v63 = vpop.f32.mrf.mxu1  ;;  %v4891_v31 = vld [vmem:[#allocation2 + $0x3c0] sm:$0xf] }
 0x65d   : > { %v3437_v34 = vpop.f32.mrf.mxu3  ;;  %v5049_v59 = vld [vmem:[#allocation2 + $0x3dc] sm:$0xf0] }
 0x65e   : > { %3977 = vmatmul.bf16.vlgmr.msrb.gmra.mxu2 %v4880_v18  ;;  %v4892_v46 = vor.u32 %v5049_v59, %v4891_v31 }
 0x660   : > { %3988 = vmatpush.bf16.msrb.mxu3 %v7715_v39  ;;  %4010 = vmatpush.bf16.msra.mxu1 %v7659_v7  ;;  %v7219_v7 = vpop.f32.mrf.mxu2 }
 0x664   : > { %3989 = vmatpush.bf16.msrb.mxu3 %v7716_v40  ;;  %4011 = vmatpush.bf16.msra.mxu1 %v7661_v33  ;;  %v7217_v39 = vpop.f32.mrf.mxu1  ;;  %v4875_v40 = vld [vmem:[#allocation2 + $0x390] sm:$0xf]  ;;  %v3381_v33 = vadd.f32 %v7175_v1, %v7080_v58  ;;  %v7748_v58 = vld [vmem:[#allocation56_spill] sm:$0xff] }
 0x665   : > { %v3439_v43 = vpop.f32.mrf.mxu3  ;;  %v3383_v1 = vadd.f32 %v7183_v9, %v7748_v58  ;;  %v4917_v58 = vld [vmem:[#allocation2 + $0x3f8] sm:$0xf0] }
 0x666   : > { %3887 = vmatmul.bf16.gmra.mxu3 %v4892_v46  ;;  %v3400_v50 = vadd.f32 %v7152_v60, %v3381_v33  ;;  %v4885_v46 = vld [vmem:[#allocation2 + $0x3b8] sm:$0xf0] }
 0x667   : > { %v3402_v60 = vadd.f32 %v7163_v5, %v3383_v1 }
 0x668   : > { %3990 = vmatpush.bf16.msrb.mxu3 %v7717_v20  ;;  %4012 = vmatpush.bf16.msra.mxu1 %v7663_v56  ;;  %v4876_v20 = vor.u32 %v5043_v27, %v4875_v40  ;;  %v7745_v56 = vld [vmem:[#allocation21_spill] sm:$0xff]  ;;  %v7229_v12 = vpop.f32.mrf.mxu2  ;;  %v3419_v21 = vadd.f32 %v7129_v4, %v3400_v50 }
 0x669   : > { %v7749_v4 = vld [vmem:[#allocation57_spill] sm:$0xff]  ;;  %v3421_v38 = vadd.f32 %v7145_v30, %v3402_v60  ;;  %v7750_v30 = vld [vmem:[#allocation59_spill] sm:$0xff]  ;;  %v4916_v60 = vor.u32 %v5052_v2, %v4915_v13 }
 0x66a   : > { %v3438_v15 = vadd.f32 %v3437_v34, %v3419_v21  ;;  %v5046_v34 = vld [vmem:[#allocation2 + $0x3cc] sm:$0xf] }
 0x66b   : > { %3958 = vmatmul.bf16.vlgmr.msrb.gmra.mxu1 %v4876_v20  ;;  %v3440_v10 = vadd.f32 %v3439_v43, %v3421_v38  ;;  %v4904_v59 = vor.u32 %v5046_v34, %v4901_v35  ;;  %v5040_v43 = vld [vmem:[#allocation2 + $0x39c] sm:$0xf] }
 0x66c   : > { %3991 = vmatpush.bf16.msrb.mxu3 %v7718_v57  ;;  %4013 = vmatpush.bf16.msra.mxu1 %v7744_v24  ;;  %v7227_v17 = vpop.f32.mrf.mxu1  ;;  %v4909_v57 = vld [vmem:[#allocation2 + $0x3f0] sm:$0xf0]  ;;  %v3457_v9 = vadd.f32 %v7191_v42, %v3438_v15 }
 0x66d   : > { %v3442_v45 = vpop.f32.mrf.mxu3  ;;  %v4912_v26 = vor.u32 %v5047_v28, %v4909_v57  ;;  %v3459_v52 = vadd.f32 %v7201_v49, %v3440_v10 }
 0x66e   : > { %v3476_v5 = vadd.f32 %v7185_v14, %v3457_v9  ;;  %v3642_v9 = vadd.f32 %v7229_v12, %v7227_v17 }
 0x66f   : > { %3982 = vmatmul.bf16.gmra.mxu2 %v4912_v26 }
 0x670   : > { %3992 = vmatpush.bf16.msrb.mxu3 %v7745_v56  ;;  %4014 = vmatpush.bf16.msra.mxu1 %v7746_v36  ;;  %v7241_v29 = vpop.f32.mrf.mxu2  ;;  %v4883_v36 = vld [vmem:[#allocation2 + $0x398] sm:$0xf] }
 0x674   : > { %3993 = vmatpush.bf16.msrb.mxu3 %v7747_v19  ;;  %v7237_v11 = vpop.f32.mrf.mxu1  ;;  %v5048_v19 = vld [vmem:[#allocation2 + $0x3dc] sm:$0xf] }
 0x675   : > { %v3444_v37 = vpop.f32.mrf.mxu3  ;;  %v3644_v10 = vadd.f32 %v7241_v29, %v7237_v11 }
 0x676   : > { %3939 = vmatmul.bf16.vlgmr.msra.gmra.mxu3 %v4872_v61 }
 0x678   : > { %3994 = vmatpush.bf16.msrb.mxu3 %v7724_v6  ;;  %v3386_v6 = vadd.f32 %v7193_v16, %v7749_v4  ;;  %v7253_v42 = vpop.f32.mrf.mxu2  ;;  %v3388_v16 = vadd.f32 %v7203_v54, %v7750_v30  ;;  %v4888_v54 = vor.u32 %v5040_v43, %v4885_v46 }
 0x67a   : > { %v3407_v49 = vadd.f32 %v7181_v44, %v3388_v16 }
 0x67b   : > { %3963 = vmatmul.bf16.gmra.mxu1 %v4908_v48 }
 0x67c   : > { %3995 = vmatpush.bf16.msrb.mxu3 %v7675_v32  ;;  %v7247_v0 = vpop.f32.mrf.mxu1  ;;  %v3405_v32 = vadd.f32 %v7171_v23, %v3386_v6  ;;  %v3478_v23 = vadd.f32 %v7197_v22, %v3459_v52 }
 0x67d   : > { %v3494_v53 = vpop.f32.mrf.mxu3  ;;  %v3647_v34 = vadd.f32 %v7253_v42, %v7247_v0 }
 0x67e   : > { %v3495_v25 = vadd.f32 %v3494_v53, %v3476_v5  ;;  %v3424_v3 = vadd.f32 %v7158_v55, %v3405_v32  ;;  %v3426_v55 = vadd.f32 %v7173_v62, %v3407_v49 }
 0x680   : > { %3504 = vrot.lane.b32.xlu0 %v3495_v25, %s5149_s17  ;;  %v3443_v47 = vadd.f32 %v3442_v45, %v3424_v3  ;;  %v3648_v40 = vpop.f32.mrf.mxu2  ;;  %v3445_v33 = vadd.f32 %v3444_v37, %v3426_v55 }
 0x682   : > { %v3462_v24 = vadd.f32 %v7211_v63, %v3443_v47  ;;  %v3464_v44 = vadd.f32 %v7217_v39, %v3445_v33  ;;  %v5044_v63 = vld [vmem:[#allocation2 + $0x3b4] sm:$0xf0] }
 0x683   : > { %v4884_v26 = vor.u32 %v5044_v63, %v4883_v36 }
 0x684   : > { %v7258_v14 = vpop.f32.mrf.mxu1  ;;  %v3481_v22 = vadd.f32 %v7207_v41, %v3462_v24  ;;  %v3483_v62 = vadd.f32 %v7219_v7, %v3464_v44  ;;  %v4920_v41 = vor.u32 %v5048_v19, %v4917_v58 }
 0x685   : > { %v3496_v18 = vpop.f32.mrf.mxu3 }
 0x686   : > { %v3497_v31 = vadd.f32 %v3496_v18, %v3478_v23  ;;  %3944 = vmatmul.bf16.gmra.mxu3 %v4904_v59 }
 0x688   : > { %3506 = vrot.lane.b32.xlu1 %v3497_v31, %s5149_s17  ;;  %v3698_v45 = vpop.f32.mrf.mxu2  ;;  %v3649_v31 = vadd.f32 %v3648_v40, %v7258_v14 }
 0x68b   : > { %4015 = vmatmul.bf16.vlgmr.msra.gmra.mxu1 %v4888_v54 }
 0x68c   : > { %v3679_v27 = vpop.f32.mrf.mxu1 }
 0x68d   : > { %v3499_v20 = vpop.f32.mrf.mxu3 }
 0x68e   : > { %v3500_v56 = vadd.f32 %v3499_v20, %v3481_v22 }
 0x690   : > { %3508 = vrot.lane.b32.xlu2 %v3500_v56, %s5149_s17  ;;  %v3700_v39 = vpop.f32.mrf.mxu2 }
 0x694   : > { %v3681_v28 = vpop.f32.mrf.mxu1 }
 0x695   : > { %v3501_v57 = vpop.f32.mrf.mxu3 }
 0x696   : > { %v3502_v50 = vadd.f32 %v3501_v57, %v3483_v62  ;;  %3996 = vmatmul.bf16.vlgmr.msrb.gmra.mxu3 %v4884_v26 }
 0x698   : > { %3510 = vrot.lane.b32.xlu0 %v3502_v50, %s5149_s17  ;;  %v3703_v61 = vpop.f32.mrf.mxu2 }
 0x69b   : > { %4020 = vmatmul.bf16.gmra.mxu1 %v4920_v41 }
 0x69c   : > { %v3684_v1 = vpop.f32.mrf.mxu1 }
 0x69d   : > { %v3660_v21 = vpop.f32.mrf.mxu3 }
 0x69e   : > { %v3661_v6 = vadd.f32 %v3660_v21, %v3642_v9 }
 0x6a0   : > { %v3705_v8 = vpop.f32.mrf.mxu2  ;;  %v3680_v48 = vadd.f32 %v3679_v27, %v3661_v6 }
 0x6a2   : > { %v3699_v32 = vadd.f32 %v3698_v45, %v3680_v48 }
 0x6a4   : > { %v3686_v15 = vpop.f32.mrf.mxu1 }
 0x6a5   : > { %v3662_v37 = vpop.f32.mrf.mxu3 }
 0x6a6   : > { %4001 = vmatmul.bf16.gmra.mxu3 %v4916_v60  ;;  %v3663_v25 = vadd.f32 %v3662_v37, %v3644_v10 }
 0x6a8   : > { %v3755_v5 = vpop.f32.mrf.mxu2  ;;  %v3682_v16 = vadd.f32 %v3681_v28, %v3663_v25 }
 0x6aa   : > { %v3701_v12 = vadd.f32 %v3700_v39, %v3682_v16 }
 0x6ac   : > { %v3736_v7 = vpop.f32.mrf.mxu1 }
 0x6ad   : > { %v3665_v51 = vpop.f32.mrf.mxu3 }
 0x6ae   : > { %v3666_v47 = vadd.f32 %v3665_v51, %v3647_v34 }
 0x6b0   : > { %v3757_v18 = vpop.f32.mrf.mxu2  ;;  %v3685_v29 = vadd.f32 %v3684_v1, %v3666_v47 }
 0x6b2   : > { %v3704_v46 = vadd.f32 %v3703_v61, %v3685_v29 }
 0x6b4   : > { %v3738_v4 = vpop.f32.mrf.mxu1 }
 0x6b5   : > { %v3667_v38 = vpop.f32.mrf.mxu3 }
 0x6b6   : > { %v3668_v24 = vadd.f32 %v3667_v38, %v3649_v31 }
 0x6b8   : > { %v3760_v42 = vpop.f32.mrf.mxu2  ;;  %v3687_v54 = vadd.f32 %v3686_v15, %v3668_v24  ;;  %v4041_v24 = vld [vmem:[%s7320_s3 + $0x18] sm:$0xff] }
 0x6ba   : > { %v3706_v20 = vadd.f32 %v3705_v8, %v3687_v54 }
 0x6bc   : > { %v3741_v53 = vpop.f32.mrf.mxu1 }
 0x6bd   : > { %v3717_v52 = vpop.f32.mrf.mxu3 }
 0x6be   : > { %v3718_v30 = vadd.f32 %v3717_v52, %v3699_v32 }
 0x6c0   : > { %v3737_v3 = vadd.f32 %v3736_v7, %v3718_v30  ;;  %v3762_v63 = vpop.f32.mrf.mxu2 }
 0x6c2   : > { %v3756_v35 = vadd.f32 %v3755_v5, %v3737_v3 }
 0x6c4   : > { %v3743_v17 = vpop.f32.mrf.mxu1  ;;  %3765 = vrot.lane.b32.xlu1 %v3756_v35, %s5150_s18 }
 0x6c5   : > { %v3719_v23 = vpop.f32.mrf.mxu3 }
 0x6c6   : > { %v3720_v11 = vadd.f32 %v3719_v23, %v3701_v12 }
 0x6c8   : > { %v3739_v49 = vadd.f32 %v3738_v4, %v3720_v11  ;;  %v3921_v57 = vpop.f32.mrf.mxu2 }
 0x6ca   : > { %v3758_v59 = vadd.f32 %v3757_v18, %v3739_v49 }
 0x6cc   : > { %v3902_v43 = vpop.f32.mrf.mxu1  ;;  %3767 = vrot.lane.b32.xlu2 %v3758_v59, %s5150_s18 }
 0x6cd   : > { %v3722_v55 = vpop.f32.mrf.mxu3 }
 0x6ce   : > { %v3723_v0 = vadd.f32 %v3722_v55, %v3704_v46 }
 0x6d0   : > { %v3742_v27 = vadd.f32 %v3741_v53, %v3723_v0  ;;  %v3923_v58 = vpop.f32.mrf.mxu2 }
 0x6d2   : > { %v3761_v33 = vadd.f32 %v3760_v42, %v3742_v27 }
 0x6d4   : > { %v3904_v22 = vpop.f32.mrf.mxu1  ;;  %3769 = vrot.lane.b32.xlu0 %v3761_v33, %s5150_s18 }
 0x6d5   : > { %v3724_v56 = vpop.f32.mrf.mxu3 }
 0x6d6   : > { %v3725_v44 = vadd.f32 %v3724_v56, %v3706_v20  ;;  %v4039_v20 = vld [vmem:[%s7320_s3 + $0x8] sm:$0xff] }
 0x6d8   : > { %v3744_v36 = vadd.f32 %v3743_v17, %v3725_v44  ;;  %v3926_v21 = vpop.f32.mrf.mxu2  ;;  %v4040_v44 = vld [vmem:[%s7320_s3 + $0x10] sm:$0xff] }
 0x6da   : > { %v3763_v45 = vadd.f32 %v3762_v63, %v3744_v36  ;;  %v2985_v36 = vpop.permute.xlu2 %2984  ;;  %v2722_v63 = vpop.permute.xlu0 %2721 }
 0x6dc   : > { %3771 = vrot.lane.b32.xlu1 %v3763_v45, %s5150_s18  ;;  %v3907_v40 = vpop.f32.mrf.mxu1  ;;  %v2983_v45 = vpop.permute.xlu1 %2982 }
 0x6dd   : > { %v3883_v14 = vpop.f32.mrf.mxu3 }
 0x6de   : > { %v3903_v37 = vadd.f32 %v3902_v43, %v3883_v14 }
 0x6e0   : > { %v3928_v2 = vpop.f32.mrf.mxu2  ;;  %v3922_v61 = vadd.f32 %v3921_v57, %v3903_v37 }
 0x6e2   : > { %v3244_v14 = vpop.permute.xlu2 %3243 }
 0x6e4   : > { %v3909_v62 = vpop.f32.mrf.mxu1 }
 0x6e5   : > { %v3885_v28 = vpop.f32.mrf.mxu3 }
 0x6e6   : > { %v3905_v9 = vadd.f32 %v3904_v22, %v3885_v28  ;;  %v2989_v28 = vpop.permute.xlu1 %2988 }
 0x6e8   : > { %v3978_v7 = vpop.f32.mrf.mxu2  ;;  %v3924_v38 = vadd.f32 %v3923_v58, %v3905_v9 }
 0x6ec   : > { %v3959_v26 = vpop.f32.mrf.mxu1 }
 0x6ed   : > { %v3888_v50 = vpop.f32.mrf.mxu3 }
 0x6ee   : > { %v3908_v32 = vadd.f32 %v3907_v40, %v3888_v50  ;;  %v2728_v40 = vpop.permute.xlu0 %2727  ;;  %v3248_v50 = vpop.permute.xlu1 %3247 }
 0x6f0   : > { %v3980_v5 = vpop.f32.mrf.mxu2  ;;  %v3927_v16 = vadd.f32 %v3926_v21, %v3908_v32 }
 0x6f4   : > { %v3961_v41 = vpop.f32.mrf.mxu1 }
 0x6f5   : > { %v3890_v19 = vpop.f32.mrf.mxu3 }
 0x6f6   : > { %v3910_v12 = vadd.f32 %v3909_v62, %v3890_v19  ;;  %v3250_v62 = vpop.permute.xlu2 %3249  ;;  %v2987_v57 = vpop.permute.xlu0 %2986 }
 0x6f8   : > { %v3983_v23 = vpop.f32.mrf.mxu2  ;;  %v3929_v29 = vadd.f32 %v3928_v2, %v3910_v12  ;;  %v7756_v12 = vld [vmem:[#allocation55_spill] sm:$0xff] }
 0x6fa   : > { %v3507_v58 = vpop.permute.xlu1 %3506 }
 0x6fc   : > { %v3964_v13 = vpop.f32.mrf.mxu1 }
 0x6fd   : > { %v3940_v1 = vpop.f32.mrf.mxu3 }
 0x6fe   : > { %v3941_v51 = vadd.f32 %v3940_v1, %v3922_v61  ;;  %v3246_v19 = vpop.permute.xlu0 %3245 }
 0x700   : > { %v3960_v4 = vadd.f32 %v3959_v26, %v3941_v51  ;;  %v3985_v42 = vpop.f32.mrf.mxu2  ;;  %v3509_v26 = vpop.permute.xlu2 %3508  ;;  %v7752_v51 = vld [vmem:[#allocation5_spill] sm:$0xff] }
 0x701   : > { %vm4066_vm0 = vcmp.lt.s32.totalorder %v7752_v51, 121 }
 0x702   : > { %v3979_v48 = vadd.f32 %v3978_v7, %v3960_v4 }
 0x704   : > { %v3966_v60 = vpop.f32.mrf.mxu1 }
 0x705   : > { %v3942_v39 = vpop.f32.mrf.mxu3 }
 0x706   : > { %v3943_v10 = vadd.f32 %v3942_v39, %v3924_v38 }
 0x708   : > { %v3962_v52 = vadd.f32 %v3961_v41, %v3943_v10  ;;  %v7751_v41 = vld [vmem:[#allocation70_spill] sm:$0xff] }
 0x709   : > { %v2729_v1 = vadd.f32 %v2722_v63, %v7751_v41 }
 0x70a   : > { %v3981_v34 = vadd.f32 %v3980_v5, %v3962_v52  ;;  %v7755_v52 = vld [vmem:[#allocation54_spill] sm:$0xff] }
 0x70b   : > { %v2990_v39 = vadd.f32 %v2983_v45, %v2729_v1 }
 0x70c   : > { %v4016_v6 = vpop.f32.mrf.mxu1 }
 0x70d   : > { %v3945_v15 = vpop.f32.mrf.mxu3  ;;  %v3251_v2 = vadd.f32 %v3244_v14, %v2990_v39 }
 0x70e   : > { %v3946_v35 = vadd.f32 %v3945_v15, %v3927_v16 }
 0x710   : > { %v3965_v18 = vadd.f32 %v3964_v13, %v3946_v35  ;;  %v3505_v13 = vpop.permute.xlu0 %3504 }
 0x711   : > { %v3512_v37 = vadd.f32 %v3505_v13, %v3251_v2 }
 0x712   : > { %v3984_v49 = vadd.f32 %v3983_v23, %v3965_v18 }
 0x714   : > { %v4018_v3 = vpop.f32.mrf.mxu1 }
 0x715   : > { %v3947_v8 = vpop.f32.mrf.mxu3 }
 0x716   : > { %v3948_v31 = vadd.f32 %v3947_v8, %v3929_v29  ;;  %v7753_v8 = vld [vmem:[#allocation71_spill] sm:$0xff] }
 0x718   : > { %v3967_v55 = vadd.f32 %v3966_v60, %v3948_v31 }
 0x71a   : > { %v3986_v54 = vadd.f32 %v3985_v42, %v3967_v55 }
 0x71c   : > { %v4021_v59 = vpop.f32.mrf.mxu1 }
 0x71d   : > { %v3997_v53 = vpop.f32.mrf.mxu3 }
 0x71e   : > { %v3998_v25 = vadd.f32 %v3997_v53, %v3979_v48  ;;  %v7754_v48 = vld [vmem:[#allocation72_spill] sm:$0xff] }
 0x71f   : > { %v2732_v10 = vadd.f32 %v2728_v40, %v7754_v48 }
 0x720   : > { %v4017_v30 = vadd.f32 %v4016_v6, %v3998_v25  ;;  %v3511_v6 = vpop.permute.xlu0 %3510 }
 0x721   : > { %v2993_v5 = vadd.f32 %v2989_v28, %v2732_v10 }
 0x722   : > { %4026 = vrot.lane.b32.xlu2 %v4017_v30, %s5151_s20  ;;  %v2992_v30 = vadd.f32 %v2987_v57, %v7755_v52 }
 0x723   : > { %v3254_v16 = vadd.f32 %v3250_v62, %v2993_v5 }
 0x724   : > { %v4023_v22 = vpop.f32.mrf.mxu1 }
 0x725   : > { %v3999_v17 = vpop.f32.mrf.mxu3 }
 0x726   : > { %v4000_v47 = vadd.f32 %v3999_v17, %v3981_v34  ;;  %v3768_v21 = vpop.permute.xlu2 %3767  ;;  %v3515_v34 = vadd.f32 %v3511_v6, %v3254_v16 }
 0x728   : > { %v4019_v11 = vadd.f32 %v4018_v3, %v4000_v47  ;;  %v3253_v3 = vadd.f32 %v3248_v50, %v2992_v30  ;;  %v2991_v47 = vadd.f32 %v2985_v36, %v7756_v12 }
 0x72a   : > { %4028 = vrot.lane.b32.xlu0 %v4019_v11, %s5151_s20  ;;  %v3514_v35 = vadd.f32 %v3509_v26, %v3253_v3 }
 0x72d   : > { %v4002_v43 = vpop.f32.mrf.mxu3 }
 0x72e   : > { %v4003_v46 = vadd.f32 %v4002_v43, %v3984_v49  ;;  %v3252_v49 = vadd.f32 %v3246_v19, %v2991_v47 }
 0x730   : > { %v4022_v0 = vadd.f32 %v4021_v59, %v4003_v46  ;;  %v3513_v46 = vadd.f32 %v3507_v58, %v3252_v49 }
 0x732   : > { %4030 = vrot.lane.b32.xlu1 %v4022_v0, %s5151_s20  ;;  %4059 = vperm.xlu0 %5095, %v4041_v24   ;;  %v3774_v0 = vadd.f32 %v3768_v21, %v3513_v46 }
 0x735   : > { %v4004_v27 = vpop.f32.mrf.mxu3 }
 0x736   : > { %v4005_v33 = vadd.f32 %v4004_v27, %v3986_v54  ;;  %v3766_v15 = vpop.permute.xlu1 %3765 }
 0x737   : > { %v3773_v60 = vadd.f32 %v3766_v15, %v3512_v37 }
 0x738   : > { %v4024_v56 = vadd.f32 %v4023_v22, %v4005_v33 }
 0x73a   : > { %4049 = vperm.xlu1 %5096, %v4039_v20   ;;  %4032 = vrot.lane.b32.xlu2 %v4024_v56, %s5151_s20 }
 0x742   : > { %4054 = vperm.xlu2 %5097, %v4040_v44  }
 0x746   : > { %v3770_v38 = vpop.permute.xlu0 %3769 }
 0x747   : > { %v3775_v23 = vadd.f32 %v3770_v38, %v3514_v35 }
 0x74e   : > { %v3772_v53 = vpop.permute.xlu1 %3771 }
 0x74f   : > { %v3776_v17 = vadd.f32 %v3772_v53, %v3515_v34 }
 0x77c   : > { %v4027_v61 = vpop.permute.xlu2 %4026 }
 0x77d   : > { %v4034_v7 = vadd.f32 %v4027_v61, %v3773_v60 }
 0x77f   : > { %v4062_v9 = vadd.f32 %v7753_v8, %v4034_v7 }
 0x781   : > { %v4067_v4 = vsel %vm4066_vm0, %v4062_v9, 0.0 }
 0x782   : > { %4071 = vst [vmem:[%s7296_s30] sm:$0xff] %v4067_v4 }
 0x794   : > { %v4033_v32 = vpop.permute.xlu2 %4032 }
 0x795   : > { %v4037_v18 = vadd.f32 %v4033_v32, %v3776_v17 }
 0x79c   : > { %v4029_v25 = vpop.permute.xlu0 %4028  ;;  %v4055_v43 = vpop.permute.xlu2 %4054 }
 0x79d   : > { %v4035_v54 = vadd.f32 %v4029_v25, %v3774_v0 }
 0x7a4   : > { %v4031_v11 = vpop.permute.xlu1 %4030  ;;  %v4060_v29 = vpop.permute.xlu0 %4059 }
 0x7a5   : > { %v4036_v31 = vadd.f32 %v4031_v11, %v3775_v23  ;;  %v4065_v59 = vadd.f32 %v4060_v29, %v4037_v18 }
 0x7a7   : > { %v4064_v24 = vadd.f32 %v4055_v43, %v4036_v31  ;;  %v4070_v55 = vsel %vm4066_vm0, %v4065_v59, 0.0 }
 0x7a8   : > { %4074 = vst [vmem:[%s7296_s30 + $0x18] sm:$0xff] %v4070_v55 }
 0x7a9   : > { %v4069_v42 = vsel %vm4066_vm0, %v4064_v24, 0.0 }
 0x7aa   : > { %4073 = vst [vmem:[%s7296_s30 + $0x10] sm:$0xff] %v4069_v42 }
 0x7ac   : > { %v4050_v27 = vpop.permute.xlu1 %4049 }
 0x7ad   : > { %v4063_v33 = vadd.f32 %v4050_v27, %v4035_v54 }
 0x7af   : > { %v4068_v22 = vsel %vm4066_vm0, %v4063_v33, 0.0 }
 0x7b0   : > { %4072 = vst [vmem:[%s7296_s30 + $0x8] sm:$0xff] %v4068_v22 }
 0x7b1 PF: > { %s15_s15 = sadd.s32 1, %s5138_s15  }
 0x7b2   : > { %p12_p7 = scmp.ge.s32.totalorder %s15_s15, 4  }
 0x7b4   :  { %14 = sbr.rel (!%p12_p7) target bundleno = 1 (0x1), region = 78 }
 0x7b9   :  { %4096 = vsyncpa [#allocation3], 1 }
 0x7ba   :  { %4098 = vsyncpa [#allocation3 + $0x1], 1 }

// kernel: net_forward.5
= control target key start
LH: loop header
LB: loop body
LE: loop exit
PB: predicated region body
PF: predicated region fallthrough
CT: control target
= control target key end

     0   :  { %s10720_s0 = inlined_call_operand.vmem [shape: f32[2,128], index: 0, kind: input, shape index: {}]   ;;  %s10721_s1 = inlined_call_operand.vmem [shape: f32[2,4096], index: 1, kind: input, shape index: {}]   ;;  %s10722_s2 = inlined_call_operand.vmem [shape: bf16[4096,128], index: 2, kind: input, shape index: {}]   ;;  %s10723_s3 = inlined_call_operand.vmem [shape: f32[1,128], index: 3, kind: input, shape index: {}]   ;;  %s10724_s4 = inlined_call_operand.vmem [shape: bf16[128,1024], index: 4, kind: input, shape index: {}]   ;;  %s10725_s5 = inlined_call_operand.hbm [shape: bf16[128,1024], index: 5, kind: input, shape index: {}]   ;;  %s10726_s6 = inlined_call_operand.vmem [shape: f32[1,1024], index: 6, kind: input, shape index: {}]   ;;  %s10727_s7 = inlined_call_operand.hbm [shape: bf16[1024,512], index: 7, kind: input, shape index: {}]   ;;  %s10728_s8 = inlined_call_operand.vmem [shape: f32[1,512], index: 8, kind: input, shape index: {}]   ;;  %s10729_s9 = inlined_call_operand.vmem [shape: f32[512,1], index: 9, kind: input, shape index: {}]   ;;  %s10730_s10 = inlined_call_operand.<no memory space> [shape: f32[1,1], index: 10, kind: input, shape index: {}]   ;;  %s10731_s11 = inlined_call_operand.vmem [shape: f32[2,1], index: 11, kind: output, shape index: {}]  }
   0x1   :  { %v16_v0 = vstv %s10730_s10 }
   0x2   :  { %17 = vst [vmem:[#allocation2] sm:$0x1] %v16_v0 }
   0x3   :  { %18 = vsyncpa [#allocation4], 0  ;;  %s34_s21 = sshll.u32 %s10725_s5, 4  ;;  %s35_s21 = int_to_ptr.hbm [resolvable:$true] %s34_s21 }
   0x4   :  { %19 = vsyncpa [#allocation6], 0  ;;  %s9064_s22 = smov [#allocation3]   ;;  %s49_s26 = sshll.u32 %s10727_s7, 4  ;;  %s50_s26 = int_to_ptr.hbm [resolvable:$true] %s49_s26 }
   0x5   :  { %s36_s23 = sshll.u32 %s9064_s22, 4  ;;  %s9065_s27 = smov 512   ;;  %s37_s23 = int_to_ptr.vmem [resolvable:$true] %s36_s23 }
   0x6   :  { %s9066_s28 = smov 32   ;;  %s9067_s10 = smov [#allocation5]  }
   0x7   :  { %42 = dma.hbm_to_vmem [thread:$0]  %s35_s21, 8192, %s37_s23, [#allocation4], %s9065_s27, %s9065_s27, %s9066_s28  }
   0x8   :  { %s51_s29 = sshll.u32 %s9067_s10, 4  ;;  %s9068_s30 = smov 256   ;;  %s52_s29 = int_to_ptr.vmem [resolvable:$true] %s51_s29 }
   0x9   :  { %s9069_s12 = smov 16  }
   0xa   :  { %57 = dma.hbm_to_vmem [thread:$0]  %s50_s26, 32768, %s52_s29, [#allocation6], %s9068_s30, %s9068_s30, %s9069_s12  }
   0xb   :  { %9060 = dma.done.wait [#allocation4], 8192  }
   0xc   :  { %9061 = vsyncadd [#allocation4], 4294959104 }
   0xd   :  { %9062 = dma.done.wait [#allocation6], 32768  }
   0xe   :  { %9063 = vsyncadd [#allocation6], 4294934528  ;;  %v8371_v1 = vld [vmem:[%s10722_s2 + $0x38] sm:$0xff]  ;;  %v8370_v5 = vld [vmem:[%s10722_s2 + $0x30] sm:$0xff]  ;;  %vm5796_vm0 = vcmask 1024  }
   0xf   :  { %v8379_v2 = vld [vmem:[%s10722_s2 + $0x78] sm:$0xff]  ;;  %2245 = vmatpush.bf16.msra.mxu0 %v8371_v1  ;;  %v8378_v6 = vld [vmem:[%s10722_s2 + $0x70] sm:$0xff]  ;;  %v8369_v9 = vld [vmem:[%s10722_s2 + $0x28] sm:$0xff] }
  0x10   :  { %v8387_v3 = vld [vmem:[%s10722_s2 + $0xb8] sm:$0xff]  ;;  %2258 = vmatpush.bf16.msra.mxu1 %v8379_v2  ;;  %v8386_v7 = vld [vmem:[%s10722_s2 + $0xb0] sm:$0xff]  ;;  %v8377_v10 = vld [vmem:[%s10722_s2 + $0x68] sm:$0xff] }
  0x11   :  { %v8395_v4 = vld [vmem:[%s10722_s2 + $0xf8] sm:$0xff]  ;;  %2271 = vmatpush.bf16.msra.mxu2 %v8387_v3  ;;  %v8394_v8 = vld [vmem:[%s10722_s2 + $0xf0] sm:$0xff]  ;;  %v8385_v11 = vld [vmem:[%s10722_s2 + $0xa8] sm:$0xff] }
  0x12   :  { %2284 = vmatpush.bf16.msra.mxu3 %v8395_v4  ;;  %v8393_v12 = vld [vmem:[%s10722_s2 + $0xe8] sm:$0xff]  ;;  %v8368_v13 = vld [vmem:[%s10722_s2 + $0x20] sm:$0xff]  ;;  %v8367_v17 = vld [vmem:[%s10722_s2 + $0x18] sm:$0xff] }
  0x13   :  { %2246 = vmatpush.bf16.msra.mxu0 %v8370_v5  ;;  %v8376_v14 = vld [vmem:[%s10722_s2 + $0x60] sm:$0xff]  ;;  %v8375_v18 = vld [vmem:[%s10722_s2 + $0x58] sm:$0xff]  ;;  %v8366_v21 = vld [vmem:[%s10722_s2 + $0x10] sm:$0xff] }
  0x14   :  { %2259 = vmatpush.bf16.msra.mxu1 %v8378_v6  ;;  %v8384_v15 = vld [vmem:[%s10722_s2 + $0xa0] sm:$0xff]  ;;  %v8383_v19 = vld [vmem:[%s10722_s2 + $0x98] sm:$0xff]  ;;  %v8374_v22 = vld [vmem:[%s10722_s2 + $0x50] sm:$0xff] }
  0x15   :  { %2272 = vmatpush.bf16.msra.mxu2 %v8386_v7  ;;  %v8392_v16 = vld [vmem:[%s10722_s2 + $0xe0] sm:$0xff]  ;;  %v8391_v20 = vld [vmem:[%s10722_s2 + $0xd8] sm:$0xff]  ;;  %v8382_v24 = vld [vmem:[%s10722_s2 + $0x90] sm:$0xff] }
  0x16   :  { %2285 = vmatpush.bf16.msra.mxu3 %v8394_v8  ;;  %v72_v23 = vld [vmem:[%s10721_s1] sm:$0xff]  ;;  %v8390_v25 = vld [vmem:[%s10722_s2 + $0xd0] sm:$0xff]  ;;  %v8365_v26 = vld [vmem:[%s10722_s2 + $0x8] sm:$0xff] }
  0x17   :  { %2247 = vmatpush.bf16.msra.mxu0 %v8369_v9  ;;  %88 = vst [vmem:[#allocation1] ss:$4 sm:$0xff] %v72_v23  ;;  %v8373_v27 = vld [vmem:[%s10722_s2 + $0x48] sm:$0xff]  ;;  %v8364_v30 = vld [vmem:[%s10722_s2] sm:$0xff]  ;;  %v74_v36 = vld [vmem:[%s10721_s1 + $0x10] sm:$0xff] }
  0x18   :  { %2260 = vmatpush.bf16.msra.mxu1 %v8377_v10  ;;  %v8381_v28 = vld [vmem:[%s10722_s2 + $0x88] sm:$0xff]  ;;  %v8372_v31 = vld [vmem:[%s10722_s2 + $0x40] sm:$0xff]  ;;  %v8403_v39 = vld [vmem:[%s10722_s2 + $0x138] sm:$0xff] }
  0x19   :  { %2273 = vmatpush.bf16.msra.mxu2 %v8385_v11  ;;  %v8389_v29 = vld [vmem:[%s10722_s2 + $0xc8] sm:$0xff]  ;;  %v8380_v32 = vld [vmem:[%s10722_s2 + $0x80] sm:$0xff]  ;;  %v8411_v40 = vld [vmem:[%s10722_s2 + $0x178] sm:$0xff] }
  0x1a   :  { %2286 = vmatpush.bf16.msra.mxu3 %v8393_v12  ;;  %v8388_v34 = vld [vmem:[%s10722_s2 + $0xc0] sm:$0xff]  ;;  %v8419_v41 = vld [vmem:[%s10722_s2 + $0x1b8] sm:$0xff]  ;;  %v73_v43 = vld [vmem:[%s10721_s1 + $0x8] sm:$0xff] }
  0x1b   :  { %2248 = vmatpush.bf16.msra.mxu0 %v8368_v13  ;;  %v8427_v42 = vld [vmem:[%s10722_s2 + $0x1f8] sm:$0xff]  ;;  %90 = vst [vmem:[#allocation1 + $0x20] ss:$4 sm:$0xff] %v73_v43  ;;  %v8402_v48 = vld [vmem:[%s10722_s2 + $0x130] sm:$0xff]  ;;  %v8401_v52 = vld [vmem:[%s10722_s2 + $0x128] sm:$0xff] }
  0x1c   :  { %2261 = vmatpush.bf16.msra.mxu1 %v8376_v14  ;;  %v8410_v49 = vld [vmem:[%s10722_s2 + $0x170] sm:$0xff]  ;;  %v8409_v53 = vld [vmem:[%s10722_s2 + $0x168] sm:$0xff]  ;;  %v8400_v56 = vld [vmem:[%s10722_s2 + $0x120] sm:$0xff] }
  0x1d   :  { %2274 = vmatpush.bf16.msra.mxu2 %v8384_v15  ;;  %v8418_v50 = vld [vmem:[%s10722_s2 + $0x1b0] sm:$0xff]  ;;  %v8417_v54 = vld [vmem:[%s10722_s2 + $0x1a8] sm:$0xff]  ;;  %v8408_v58 = vld [vmem:[%s10722_s2 + $0x160] sm:$0xff] }
  0x1e   :  { %2287 = vmatpush.bf16.msra.mxu3 %v8392_v16  ;;  %v93_v33 = vld.sshfl [vmem:[#allocation1 + $0x10] sm:$0xff pattern:$0x73625140]  ;;  %v91_v35 = vld.sshfl [vmem:[#allocation1] sm:$0xff pattern:$0x73625140] }
  0x1f   :  { %2249 = vmatpush.bf16.msra.mxu0 %v8367_v17  ;;  %v94_v37 = vld.sshfl [vmem:[#allocation1 + $0x18] sm:$0xff pattern:$0x73625140]  ;;  %v92_v38 = vld.sshfl [vmem:[#allocation1 + $0x8] sm:$0xff pattern:$0x73625140]  ;;  %v163_v44 = vpack.c.bf16 %v93_v33, %v93_v33  ;;  %v161_v45 = vpack.c.bf16 %v91_v35, %v91_v35 }
  0x20   :  { %2262 = vmatpush.bf16.msra.mxu1 %v8375_v18  ;;  %99 = vst [vmem:[#allocation1] ss:$4 sm:$0xff] %v74_v36  ;;  %v164_v46 = vpack.c.bf16 %v94_v37, %v94_v37  ;;  %v162_v47 = vpack.c.bf16 %v92_v38, %v92_v38  ;;  %v8426_v51 = vld [vmem:[%s10722_s2 + $0x1f0] sm:$0xff]  ;;  %v8425_v55 = vld [vmem:[%s10722_s2 + $0x1e8] sm:$0xff]  ;;  %v75_v60 = vld [vmem:[%s10721_s1 + $0x18] sm:$0xff] }
  0x21   :  { %2275 = vmatpush.bf16.msra.mxu2 %v8383_v19  ;;  %v8416_v63 = vld [vmem:[%s10722_s2 + $0x1a0] sm:$0xff]  ;;  %v8399_v1 = vld [vmem:[%s10722_s2 + $0x118] sm:$0xff]  ;;  %v8398_v5 = vld [vmem:[%s10722_s2 + $0x110] sm:$0xff] }
  0x22   :  { %2288 = vmatpush.bf16.msra.mxu3 %v8391_v20  ;;  %v9283_v57 = vld.sshfl [vmem:[#allocation1 + $0x30] sm:$0xff pattern:$0x73625140]  ;;  %v9288_v59 = vld.sshfl [vmem:[#allocation1 + $0x20] sm:$0xff pattern:$0x73625140] }
  0x23   :  { %2250 = vmatpush.bf16.msra.mxu0 %v8366_v21  ;;  %v9293_v61 = vld.sshfl [vmem:[#allocation1 + $0x38] sm:$0xff pattern:$0x73625140]  ;;  %v9295_v62 = vld.sshfl [vmem:[#allocation1 + $0x28] sm:$0xff pattern:$0x73625140]  ;;  %v165_v23 = vpack.c.bf16 %v9288_v59, %v9288_v59 }
  0x24   :  { %2263 = vmatpush.bf16.msra.mxu1 %v8374_v22  ;;  %v8424_v0 = vld [vmem:[%s10722_s2 + $0x1e0] sm:$0xff]  ;;  %100 = vst [vmem:[#allocation1 + $0x20] ss:$4 sm:$0xff] %v75_v60  ;;  %v8407_v2 = vld [vmem:[%s10722_s2 + $0x158] sm:$0xff]  ;;  %v8406_v6 = vld [vmem:[%s10722_s2 + $0x150] sm:$0xff]  ;;  %v167_v22 = vpack.c.bf16 %v9283_v57, %v9283_v57 }
  0x25   :  { %2276 = vmatpush.bf16.msra.mxu2 %v8382_v24  ;;  %v8415_v3 = vld [vmem:[%s10722_s2 + $0x198] sm:$0xff]  ;;  %v8414_v7 = vld [vmem:[%s10722_s2 + $0x190] sm:$0xff]  ;;  %v8397_v9 = vld [vmem:[%s10722_s2 + $0x108] sm:$0xff] }
  0x26   :  { %2289 = vmatpush.bf16.msra.mxu3 %v8390_v25  ;;  %v8423_v4 = vld [vmem:[%s10722_s2 + $0x1d8] sm:$0xff]  ;;  %v8422_v8 = vld [vmem:[%s10722_s2 + $0x1d0] sm:$0xff]  ;;  %v8405_v10 = vld [vmem:[%s10722_s2 + $0x148] sm:$0xff] }
  0x27   :  { %2251 = vmatpush.bf16.msra.mxu0 %v8365_v26  ;;  %v8413_v11 = vld [vmem:[%s10722_s2 + $0x188] sm:$0xff]  ;;  %v8396_v13 = vld [vmem:[%s10722_s2 + $0x100] sm:$0xff]  ;;  %v8435_v17 = vld [vmem:[%s10722_s2 + $0x238] sm:$0xff]  ;;  %v168_v26 = vpack.c.bf16 %v9293_v61, %v9293_v61 }
  0x28   :  { %2264 = vmatpush.bf16.msra.mxu1 %v8373_v27  ;;  %v8421_v12 = vld [vmem:[%s10722_s2 + $0x1c8] sm:$0xff]  ;;  %v8404_v14 = vld [vmem:[%s10722_s2 + $0x140] sm:$0xff]  ;;  %v8443_v18 = vld [vmem:[%s10722_s2 + $0x278] sm:$0xff]  ;;  %v166_v27 = vpack.c.bf16 %v9295_v62, %v9295_v62 }
  0x29   :  { %2277 = vmatpush.bf16.msra.mxu2 %v8381_v28  ;;  %v8412_v15 = vld [vmem:[%s10722_s2 + $0x180] sm:$0xff]  ;;  %v8451_v19 = vld [vmem:[%s10722_s2 + $0x2b8] sm:$0xff]  ;;  %v8434_v21 = vld [vmem:[%s10722_s2 + $0x230] sm:$0xff] }
  0x2a   :  { %2290 = vmatpush.bf16.msra.mxu3 %v8389_v29  ;;  %v8420_v16 = vld [vmem:[%s10722_s2 + $0x1c0] sm:$0xff]  ;;  %v8459_v20 = vld [vmem:[%s10722_s2 + $0x2f8] sm:$0xff]  ;;  %v8442_v24 = vld [vmem:[%s10722_s2 + $0x270] sm:$0xff] }
  0x2b   :  { %2252 = vmatpush.bf16.msra.mxu0 %v8364_v30  ;;  %v8450_v25 = vld [vmem:[%s10722_s2 + $0x2b0] sm:$0xff]  ;;  %v9380_v28 = vld.sshfl [vmem:[#allocation1] sm:$0xff pattern:$0x73625140]  ;;  %v8441_v35 = vld [vmem:[%s10722_s2 + $0x268] sm:$0xff] }
  0x2c   :  { %2265 = vmatpush.bf16.msra.mxu1 %v8372_v31  ;;  %v9382_v29 = vld.sshfl [vmem:[#allocation1 + $0x10] sm:$0xff pattern:$0x73625140]  ;;  %v9384_v30 = vld.sshfl [vmem:[#allocation1 + $0x8] sm:$0xff pattern:$0x73625140]  ;;  %v169_v62 = vpack.c.bf16 %v9380_v28, %v9380_v28 }
  0x2d   :  { %2278 = vmatpush.bf16.msra.mxu2 %v8380_v32  ;;  %v8458_v31 = vld [vmem:[%s10722_s2 + $0x2f0] sm:$0xff]  ;;  %v76_v32 = vld [vmem:[%s10721_s1 + $0x20] sm:$0xff]  ;;  %v9392_v33 = vld.sshfl [vmem:[#allocation1 + $0x18] sm:$0xff pattern:$0x73625140] }
  0x2e   :  { %2291 = vmatpush.bf16.msra.mxu3 %v8388_v34  ;;  %2253 = vmatmul.bf16.vlgmr.msra.gmra.mxu0 %v161_v45  ;;  %109 = vst [vmem:[#allocation1] ss:$4 sm:$0xff] %v76_v32  ;;  %v8433_v34 = vld [vmem:[%s10722_s2 + $0x228] sm:$0xff]  ;;  %v8432_v38 = vld [vmem:[%s10722_s2 + $0x220] sm:$0xff]  ;;  %v8439_v43 = vld [vmem:[%s10722_s2 + $0x258] sm:$0xff] }
  0x2f   :  { %2297 = vmatpush.bf16.msrb.mxu0 %v8403_v39  ;;  %2266 = vmatmul.bf16.vlgmr.msra.gmra.mxu1 %v162_v47  ;;  %v8449_v36 = vld [vmem:[%s10722_s2 + $0x2a8] sm:$0xff]  ;;  %v8440_v39 = vld [vmem:[%s10722_s2 + $0x260] sm:$0xff]  ;;  %v8455_v45 = vld [vmem:[%s10722_s2 + $0x2d8] sm:$0xff] }
  0x30   :  { %2310 = vmatpush.bf16.msrb.mxu1 %v8411_v40  ;;  %2279 = vmatmul.bf16.vlgmr.msra.gmra.mxu2 %v163_v44  ;;  %v8457_v37 = vld [vmem:[%s10722_s2 + $0x2e8] sm:$0xff]  ;;  %v8448_v40 = vld [vmem:[%s10722_s2 + $0x2a0] sm:$0xff]  ;;  %v8447_v44 = vld [vmem:[%s10722_s2 + $0x298] sm:$0xff] }
  0x31   :  { %2323 = vmatpush.bf16.msrb.mxu2 %v8419_v41  ;;  %2292 = vmatmul.bf16.vlgmr.msra.gmra.mxu3 %v164_v46  ;;  %v8456_v41 = vld [vmem:[%s10722_s2 + $0x2e0] sm:$0xff]  ;;  %v8430_v46 = vld [vmem:[%s10722_s2 + $0x210] sm:$0xff]  ;;  %v8475_v59 = vld [vmem:[%s10722_s2 + $0x378] sm:$0xff] }
  0x32   :  { %2336 = vmatpush.bf16.msrb.mxu3 %v8427_v42  ;;  %v8431_v42 = vld [vmem:[%s10722_s2 + $0x218] sm:$0xff]  ;;  %v8438_v47 = vld [vmem:[%s10722_s2 + $0x250] sm:$0xff]  ;;  %v8452_v57 = vld [vmem:[%s10722_s2 + $0x2c0] sm:$0xff] }
  0x33   :  { %2298 = vmatpush.bf16.msrb.mxu0 %v8402_v48  ;;  %v8446_v48 = vld [vmem:[%s10722_s2 + $0x290] sm:$0xff]  ;;  %v8483_v60 = vld [vmem:[%s10722_s2 + $0x3b8] sm:$0xff]  ;;  %v8469_v28 = vld [vmem:[%s10722_s2 + $0x348] sm:$0xff] }
  0x34   :  { %2311 = vmatpush.bf16.msrb.mxu1 %v8410_v49  ;;  %v8454_v49 = vld [vmem:[%s10722_s2 + $0x2d0] sm:$0xff]  ;;  %v8491_v61 = vld [vmem:[%s10722_s2 + $0x3f8] sm:$0xff]  ;;  %v8468_v32 = vld [vmem:[%s10722_s2 + $0x340] sm:$0xff] }
  0x35   :  { %2324 = vmatpush.bf16.msrb.mxu2 %v8418_v50  ;;  %v8429_v50 = vld [vmem:[%s10722_s2 + $0x208] sm:$0xff] }
  0x36   :  { %2337 = vmatpush.bf16.msrb.mxu3 %v8426_v51  ;;  %v8437_v51 = vld [vmem:[%s10722_s2 + $0x248] sm:$0xff] }
  0x37   :  { %2299 = vmatpush.bf16.msrb.mxu0 %v8401_v52  ;;  %v8445_v52 = vld [vmem:[%s10722_s2 + $0x288] sm:$0xff] }
  0x38   :  { %2312 = vmatpush.bf16.msrb.mxu1 %v8409_v53  ;;  %v8453_v53 = vld [vmem:[%s10722_s2 + $0x2c8] sm:$0xff] }
  0x39   :  { %2325 = vmatpush.bf16.msrb.mxu2 %v8417_v54  ;;  %v8428_v54 = vld [vmem:[%s10722_s2 + $0x200] sm:$0xff] }
  0x3a   :  { %2338 = vmatpush.bf16.msrb.mxu3 %v8425_v55  ;;  %v8436_v55 = vld [vmem:[%s10722_s2 + $0x240] sm:$0xff] }
  0x3b   :  { %2300 = vmatpush.bf16.msrb.mxu0 %v8400_v56  ;;  %v8444_v56 = vld [vmem:[%s10722_s2 + $0x280] sm:$0xff] }
  0x3c   :  { %2313 = vmatpush.bf16.msrb.mxu1 %v8408_v58  ;;  %v8467_v58 = vld [vmem:[%s10722_s2 + $0x338] sm:$0xff] }
  0x3d   :  { %2326 = vmatpush.bf16.msrb.mxu2 %v8416_v63  ;;  %v171_v63 = vpack.c.bf16 %v9382_v29, %v9382_v29  ;;  %v8477_v29 = vld [vmem:[%s10722_s2 + $0x388] sm:$0xff] }
  0x3e   :  { %2339 = vmatpush.bf16.msrb.mxu3 %v8424_v0  ;;  %v8466_v0 = vld [vmem:[%s10722_s2 + $0x330] sm:$0xff] }
  0x3f   :  { %2301 = vmatpush.bf16.msrb.mxu0 %v8399_v1  ;;  %v170_v1 = vpack.c.bf16 %v9384_v30, %v9384_v30  ;;  %v8485_v30 = vld [vmem:[%s10722_s2 + $0x3c8] sm:$0xff] }
  0x40   :  { %2314 = vmatpush.bf16.msrb.mxu1 %v8407_v2  ;;  %v172_v2 = vpack.c.bf16 %v9392_v33, %v9392_v33  ;;  %v8476_v33 = vld [vmem:[%s10722_s2 + $0x380] sm:$0xff] }
  0x41   :  { %2327 = vmatpush.bf16.msrb.mxu2 %v8415_v3  ;;  %v8474_v3 = vld [vmem:[%s10722_s2 + $0x370] sm:$0xff] }
  0x42   :  { %2340 = vmatpush.bf16.msrb.mxu3 %v8423_v4  ;;  %v8482_v4 = vld [vmem:[%s10722_s2 + $0x3b0] sm:$0xff] }
  0x43   :  { %2302 = vmatpush.bf16.msrb.mxu0 %v8398_v5  ;;  %v9495_v5 = vld.sshfl [vmem:[#allocation1 + $0x20] sm:$0xff pattern:$0x73625140] }
  0x44   :  { %2315 = vmatpush.bf16.msrb.mxu1 %v8406_v6  ;;  %v9497_v6 = vld.sshfl [vmem:[#allocation1 + $0x30] sm:$0xff pattern:$0x73625140] }
  0x45   :  { %2328 = vmatpush.bf16.msrb.mxu2 %v8414_v7  ;;  %v9499_v7 = vld.sshfl [vmem:[#allocation1 + $0x28] sm:$0xff pattern:$0x73625140] }
  0x46   :  { %2341 = vmatpush.bf16.msrb.mxu3 %v8422_v8  ;;  %v8490_v8 = vld [vmem:[%s10722_s2 + $0x3f0] sm:$0xff] }
  0x47   :  { %2303 = vmatpush.bf16.msrb.mxu0 %v8397_v9  ;;  %v77_v9 = vld [vmem:[%s10721_s1 + $0x28] sm:$0xff] }
  0x48   :  { %2316 = vmatpush.bf16.msrb.mxu1 %v8405_v10  ;;  %v9507_v10 = vld.sshfl [vmem:[#allocation1 + $0x38] sm:$0xff pattern:$0x73625140] }
  0x49   :  { %2329 = vmatpush.bf16.msrb.mxu2 %v8413_v11  ;;  %110 = vst [vmem:[#allocation1 + $0x20] ss:$4 sm:$0xff] %v77_v9  ;;  %v8465_v11 = vld [vmem:[%s10722_s2 + $0x328] sm:$0xff]  ;;  %v111_v9 = vld.sshfl [vmem:[#allocation1] sm:$0xff pattern:$0x73625140] }
  0x4a   :  { %2342 = vmatpush.bf16.msrb.mxu3 %v8421_v12  ;;  %v8473_v12 = vld [vmem:[%s10722_s2 + $0x368] sm:$0xff] }
  0x4b   :  { %2304 = vmatpush.bf16.msrb.mxu0 %v8396_v13  ;;  %v8481_v13 = vld [vmem:[%s10722_s2 + $0x3a8] sm:$0xff] }
  0x4c   :  { %2317 = vmatpush.bf16.msrb.mxu1 %v8404_v14  ;;  %v8489_v14 = vld [vmem:[%s10722_s2 + $0x3e8] sm:$0xff] }
  0x4d   :  { %2330 = vmatpush.bf16.msrb.mxu2 %v8412_v15  ;;  %v8464_v15 = vld [vmem:[%s10722_s2 + $0x320] sm:$0xff] }
  0x4e   :  { %2343 = vmatpush.bf16.msrb.mxu3 %v8420_v16  ;;  %2305 = vmatmul.bf16.vlgmr.msrb.gmra.mxu0 %v165_v23  ;;  %v8472_v16 = vld [vmem:[%s10722_s2 + $0x360] sm:$0xff]  ;;  %v8462_v23 = vld [vmem:[%s10722_s2 + $0x310] sm:$0xff] }
  0x4f   :  { %2349 = vmatpush.bf16.msra.mxu0 %v8435_v17  ;;  %2318 = vmatmul.bf16.vlgmr.msrb.gmra.mxu1 %v166_v27  ;;  %v8480_v17 = vld [vmem:[%s10722_s2 + $0x3a0] sm:$0xff]  ;;  %v8461_v27 = vld [vmem:[%s10722_s2 + $0x308] sm:$0xff] }
  0x50   :  { %2362 = vmatpush.bf16.msra.mxu1 %v8443_v18  ;;  %2331 = vmatmul.bf16.vlgmr.msrb.gmra.mxu2 %v167_v22  ;;  %v8488_v18 = vld [vmem:[%s10722_s2 + $0x3e0] sm:$0xff]  ;;  %v8487_v22 = vld [vmem:[%s10722_s2 + $0x3d8] sm:$0xff] }
  0x51   :  { %2375 = vmatpush.bf16.msra.mxu2 %v8451_v19  ;;  %2344 = vmatmul.bf16.vlgmr.msrb.gmra.mxu3 %v168_v26  ;;  %v8463_v19 = vld [vmem:[%s10722_s2 + $0x318] sm:$0xff]  ;;  %v8486_v26 = vld [vmem:[%s10722_s2 + $0x3d0] sm:$0xff] }
  0x52   :  { %2388 = vmatpush.bf16.msra.mxu3 %v8459_v20  ;;  %v8471_v20 = vld [vmem:[%s10722_s2 + $0x358] sm:$0xff] }
  0x53   :  { %2350 = vmatpush.bf16.msra.mxu0 %v8434_v21  ;;  %v8479_v21 = vld [vmem:[%s10722_s2 + $0x398] sm:$0xff] }
  0x54   :  { %2363 = vmatpush.bf16.msra.mxu1 %v8442_v24  ;;  %v8470_v24 = vld [vmem:[%s10722_s2 + $0x350] sm:$0xff] }
  0x55   :  { %2376 = vmatpush.bf16.msra.mxu2 %v8450_v25  ;;  %v8478_v25 = vld [vmem:[%s10722_s2 + $0x390] sm:$0xff] }
  0x56   :  { %2389 = vmatpush.bf16.msra.mxu3 %v8458_v31  ;;  %v8460_v31 = vld [vmem:[%s10722_s2 + $0x300] sm:$0xff] }
  0x57   :  { %2351 = vmatpush.bf16.msra.mxu0 %v8433_v34  ;;  %v8484_v34 = vld [vmem:[%s10722_s2 + $0x3c0] sm:$0xff] }
  0x58   :  { %2364 = vmatpush.bf16.msra.mxu1 %v8441_v35  ;;  %v8499_v35 = vld [vmem:[%s10722_s2 + $0x438] sm:$0xff] }
  0x59   :  { %2377 = vmatpush.bf16.msra.mxu2 %v8449_v36  ;;  %v8507_v36 = vld [vmem:[%s10722_s2 + $0x478] sm:$0xff] }
  0x5a   :  { %2390 = vmatpush.bf16.msra.mxu3 %v8457_v37  ;;  %v8515_v37 = vld [vmem:[%s10722_s2 + $0x4b8] sm:$0xff] }
  0x5b   :  { %2352 = vmatpush.bf16.msra.mxu0 %v8432_v38  ;;  %v8523_v38 = vld [vmem:[%s10722_s2 + $0x4f8] sm:$0xff] }
  0x5c   :  { %2365 = vmatpush.bf16.msra.mxu1 %v8440_v39  ;;  %v173_v39 = vpack.c.bf16 %v9495_v5, %v9495_v5  ;;  %v8508_v5 = vld [vmem:[%s10722_s2 + $0x480] sm:$0xff] }
  0x5d   :  { %2378 = vmatpush.bf16.msra.mxu2 %v8448_v40  ;;  %v175_v40 = vpack.c.bf16 %v9497_v6, %v9497_v6  ;;  %v8516_v6 = vld [vmem:[%s10722_s2 + $0x4c0] sm:$0xff] }
  0x5e   :  { %2391 = vmatpush.bf16.msra.mxu3 %v8456_v41  ;;  %v174_v41 = vpack.c.bf16 %v9499_v7, %v9499_v7  ;;  %v8531_v7 = vld [vmem:[%s10722_s2 + $0x538] sm:$0xff] }
  0x5f   :  { %2353 = vmatpush.bf16.msra.mxu0 %v8431_v42  ;;  %v176_v42 = vpack.c.bf16 %v9507_v10, %v9507_v10  ;;  %v113_v10 = vld.sshfl [vmem:[#allocation1 + $0x10] sm:$0xff pattern:$0x73625140] }
  0x60   :  { %2366 = vmatpush.bf16.msra.mxu1 %v8439_v43  ;;  %v8498_v43 = vld [vmem:[%s10722_s2 + $0x430] sm:$0xff] }
  0x61   :  { %2379 = vmatpush.bf16.msra.mxu2 %v8447_v44  ;;  %v8506_v44 = vld [vmem:[%s10722_s2 + $0x470] sm:$0xff] }
  0x62   :  { %2392 = vmatpush.bf16.msra.mxu3 %v8455_v45  ;;  %v8514_v45 = vld [vmem:[%s10722_s2 + $0x4b0] sm:$0xff] }
  0x63   :  { %2354 = vmatpush.bf16.msra.mxu0 %v8430_v46  ;;  %v8522_v46 = vld [vmem:[%s10722_s2 + $0x4f0] sm:$0xff] }
  0x64   :  { %2367 = vmatpush.bf16.msra.mxu1 %v8438_v47  ;;  %v8497_v47 = vld [vmem:[%s10722_s2 + $0x428] sm:$0xff] }
  0x65   :  { %2380 = vmatpush.bf16.msra.mxu2 %v8446_v48  ;;  %v8505_v48 = vld [vmem:[%s10722_s2 + $0x468] sm:$0xff] }
  0x66   :  { %2393 = vmatpush.bf16.msra.mxu3 %v8454_v49  ;;  %v8513_v49 = vld [vmem:[%s10722_s2 + $0x4a8] sm:$0xff] }
  0x67   :  { %2355 = vmatpush.bf16.msra.mxu0 %v8429_v50  ;;  %v8521_v50 = vld [vmem:[%s10722_s2 + $0x4e8] sm:$0xff] }
  0x68   :  { %2368 = vmatpush.bf16.msra.mxu1 %v8437_v51  ;;  %v8496_v51 = vld [vmem:[%s10722_s2 + $0x420] sm:$0xff] }
  0x69   :  { %2381 = vmatpush.bf16.msra.mxu2 %v8445_v52  ;;  %v8504_v52 = vld [vmem:[%s10722_s2 + $0x460] sm:$0xff] }
  0x6a   :  { %2394 = vmatpush.bf16.msra.mxu3 %v8453_v53  ;;  %v8512_v53 = vld [vmem:[%s10722_s2 + $0x4a0] sm:$0xff] }
  0x6b   :  { %2356 = vmatpush.bf16.msra.mxu0 %v8428_v54  ;;  %v8520_v54 = vld [vmem:[%s10722_s2 + $0x4e0] sm:$0xff] }
  0x6c   :  { %2369 = vmatpush.bf16.msra.mxu1 %v8436_v55  ;;  %v8495_v55 = vld [vmem:[%s10722_s2 + $0x418] sm:$0xff] }
  0x6d   :  { %2382 = vmatpush.bf16.msra.mxu2 %v8444_v56  ;;  %v8503_v56 = vld [vmem:[%s10722_s2 + $0x458] sm:$0xff] }
  0x6e   :  { %2395 = vmatpush.bf16.msra.mxu3 %v8452_v57  ;;  %2357 = vmatmul.bf16.vlgmr.msra.gmra.mxu0 %v169_v62  ;;  %v8511_v57 = vld [vmem:[%s10722_s2 + $0x498] sm:$0xff]  ;;  %v8518_v62 = vld [vmem:[%s10722_s2 + $0x4d0] sm:$0xff] }
  0x6f   :  { %2401 = vmatpush.bf16.msrb.mxu0 %v8467_v58  ;;  %2370 = vmatmul.bf16.vlgmr.msra.gmra.mxu1 %v170_v1  ;;  %v8519_v58 = vld [vmem:[%s10722_s2 + $0x4d8] sm:$0xff]  ;;  %v8509_v1 = vld [vmem:[%s10722_s2 + $0x488] sm:$0xff] }
  0x70   :  { %2414 = vmatpush.bf16.msrb.mxu1 %v8475_v59  ;;  %2383 = vmatmul.bf16.vlgmr.msra.gmra.mxu2 %v171_v63  ;;  %v8494_v59 = vld [vmem:[%s10722_s2 + $0x410] sm:$0xff]  ;;  %v8493_v63 = vld [vmem:[%s10722_s2 + $0x408] sm:$0xff] }
  0x71   :  { %2427 = vmatpush.bf16.msrb.mxu2 %v8483_v60  ;;  %2396 = vmatmul.bf16.vlgmr.msra.gmra.mxu3 %v172_v2  ;;  %v8502_v60 = vld [vmem:[%s10722_s2 + $0x450] sm:$0xff]  ;;  %v8517_v2 = vld [vmem:[%s10722_s2 + $0x4c8] sm:$0xff] }
  0x72   :  { %2440 = vmatpush.bf16.msrb.mxu3 %v8491_v61  ;;  %v8510_v61 = vld [vmem:[%s10722_s2 + $0x490] sm:$0xff] }
  0x73   :  { %2402 = vmatpush.bf16.msrb.mxu0 %v8466_v0  ;;  %v8501_v0 = vld [vmem:[%s10722_s2 + $0x448] sm:$0xff] }
  0x74   :  { %2415 = vmatpush.bf16.msrb.mxu1 %v8474_v3  ;;  %v8492_v3 = vld [vmem:[%s10722_s2 + $0x400] sm:$0xff] }
  0x75   :  { %2428 = vmatpush.bf16.msrb.mxu2 %v8482_v4  ;;  %v8500_v4 = vld [vmem:[%s10722_s2 + $0x440] sm:$0xff] }
  0x76   :  { %2441 = vmatpush.bf16.msrb.mxu3 %v8490_v8  ;;  %v8539_v8 = vld [vmem:[%s10722_s2 + $0x578] sm:$0xff] }
  0x77   :  { %2403 = vmatpush.bf16.msrb.mxu0 %v8465_v11  ;;  %v112_v11 = vld.sshfl [vmem:[#allocation1 + $0x8] sm:$0xff pattern:$0x73625140] }
  0x78   :  { %2416 = vmatpush.bf16.msrb.mxu1 %v8473_v12  ;;  %v114_v12 = vld.sshfl [vmem:[#allocation1 + $0x18] sm:$0xff pattern:$0x73625140] }
  0x79   :  { %2429 = vmatpush.bf16.msrb.mxu2 %v8481_v13  ;;  %v8547_v13 = vld [vmem:[%s10722_s2 + $0x5b8] sm:$0xff] }
  0x7a   :  { %2442 = vmatpush.bf16.msrb.mxu3 %v8489_v14  ;;  %v8555_v14 = vld [vmem:[%s10722_s2 + $0x5f8] sm:$0xff] }
  0x7b   :  { %2404 = vmatpush.bf16.msrb.mxu0 %v8464_v15  ;;  %v177_v15 = vpack.c.bf16 %v111_v9, %v111_v9  ;;  %v8562_v9 = vld [vmem:[%s10722_s2 + $0x630] sm:$0xff] }
  0x7c   :  { %2417 = vmatpush.bf16.msrb.mxu1 %v8472_v16  ;;  %v179_v16 = vpack.c.bf16 %v113_v10, %v113_v10  ;;  %v8570_v10 = vld [vmem:[%s10722_s2 + $0x670] sm:$0xff] }
  0x7d   :  { %2430 = vmatpush.bf16.msrb.mxu2 %v8480_v17  ;;  %v178_v17 = vpack.c.bf16 %v112_v11, %v112_v11  ;;  %v8578_v11 = vld [vmem:[%s10722_s2 + $0x6b0] sm:$0xff] }
  0x7e   :  { %2443 = vmatpush.bf16.msrb.mxu3 %v8488_v18  ;;  %v180_v18 = vpack.c.bf16 %v114_v12, %v114_v12  ;;  %v8586_v12 = vld [vmem:[%s10722_s2 + $0x6f0] sm:$0xff] }
  0x7f   :  { %2405 = vmatpush.bf16.msrb.mxu0 %v8463_v19  ;;  %v8530_v19 = vld [vmem:[%s10722_s2 + $0x530] sm:$0xff] }
  0x80   :  { %2418 = vmatpush.bf16.msrb.mxu1 %v8471_v20  ;;  %v8538_v20 = vld [vmem:[%s10722_s2 + $0x570] sm:$0xff] }
  0x81   :  { %2431 = vmatpush.bf16.msrb.mxu2 %v8479_v21  ;;  %v8546_v21 = vld [vmem:[%s10722_s2 + $0x5b0] sm:$0xff] }
  0x82   :  { %2444 = vmatpush.bf16.msrb.mxu3 %v8487_v22  ;;  %v8554_v22 = vld [vmem:[%s10722_s2 + $0x5f0] sm:$0xff] }
  0x83   :  { %2406 = vmatpush.bf16.msrb.mxu0 %v8462_v23  ;;  %v8529_v23 = vld [vmem:[%s10722_s2 + $0x528] sm:$0xff] }
  0x84   :  { %2419 = vmatpush.bf16.msrb.mxu1 %v8470_v24  ;;  %v8537_v24 = vld [vmem:[%s10722_s2 + $0x568] sm:$0xff] }
  0x85   :  { %2432 = vmatpush.bf16.msrb.mxu2 %v8478_v25  ;;  %v9010_v25 = vld [vmem:[%s10723_s3] ss:$0 sm:$0xff] }
  0x86   :  { %2445 = vmatpush.bf16.msrb.mxu3 %v8486_v26  ;;  %v8545_v26 = vld [vmem:[%s10722_s2 + $0x5a8] sm:$0xff] }
  0x87   :  { %2407 = vmatpush.bf16.msrb.mxu0 %v8461_v27  ;;  %v8553_v27 = vld [vmem:[%s10722_s2 + $0x5e8] sm:$0xff] }
  0x88   :  { %2420 = vmatpush.bf16.msrb.mxu1 %v8469_v28 }
  0x89   :  { %2433 = vmatpush.bf16.msrb.mxu2 %v8477_v29  ;;  %v8528_v29 = vld [vmem:[%s10722_s2 + $0x520] sm:$0xff] }
  0x8a   :  { %2446 = vmatpush.bf16.msrb.mxu3 %v8485_v30  ;;  %v8536_v30 = vld [vmem:[%s10722_s2 + $0x560] sm:$0xff] }
  0x8b   :  { %2408 = vmatpush.bf16.msrb.mxu0 %v8460_v31 }
  0x8c   :  { %2421 = vmatpush.bf16.msrb.mxu1 %v8468_v32 }
  0x8d   :  { %2434 = vmatpush.bf16.msrb.mxu2 %v8476_v33  ;;  %v8544_v33 = vld [vmem:[%s10722_s2 + $0x5a0] sm:$0xff] }
  0x8e   :  { %2447 = vmatpush.bf16.msrb.mxu3 %v8484_v34  ;;  %2409 = vmatmul.bf16.vlgmr.msrb.gmra.mxu0 %v173_v39  ;;  %v8552_v34 = vld [vmem:[%s10722_s2 + $0x5e0] sm:$0xff]  ;;  %v8551_v39 = vld [vmem:[%s10722_s2 + $0x5d8] sm:$0xff] }
  0x8f   :  { %2453 = vmatpush.bf16.msra.mxu0 %v8499_v35  ;;  %2422 = vmatmul.bf16.vlgmr.msrb.gmra.mxu1 %v174_v41 }
  0x90   :  { %2466 = vmatpush.bf16.msra.mxu1 %v8507_v36  ;;  %2435 = vmatmul.bf16.vlgmr.msrb.gmra.mxu2 %v175_v40  ;;  %v8527_v36 = vld [vmem:[%s10722_s2 + $0x518] sm:$0xff] }
  0x91   :  { %2479 = vmatpush.bf16.msra.mxu2 %v8515_v37  ;;  %2448 = vmatmul.bf16.vlgmr.msrb.gmra.mxu3 %v176_v42  ;;  %v8535_v37 = vld [vmem:[%s10722_s2 + $0x558] sm:$0xff] }
  0x92   :  { %2492 = vmatpush.bf16.msra.mxu3 %v8523_v38  ;;  %v8543_v38 = vld [vmem:[%s10722_s2 + $0x598] sm:$0xff] }
  0x93   :  { %2454 = vmatpush.bf16.msra.mxu0 %v8498_v43 }
  0x94   :  { %2467 = vmatpush.bf16.msra.mxu1 %v8506_v44  ;;  %v8526_v44 = vld [vmem:[%s10722_s2 + $0x510] sm:$0xff] }
  0x95   :  { %2480 = vmatpush.bf16.msra.mxu2 %v8514_v45  ;;  %v8534_v45 = vld [vmem:[%s10722_s2 + $0x550] sm:$0xff] }
  0x96   :  { %2493 = vmatpush.bf16.msra.mxu3 %v8522_v46 }
  0x97   :  { %2455 = vmatpush.bf16.msra.mxu0 %v8497_v47 }
  0x98   :  { %2468 = vmatpush.bf16.msra.mxu1 %v8505_v48  ;;  %v8542_v48 = vld [vmem:[%s10722_s2 + $0x590] sm:$0xff] }
  0x99   :  { %2481 = vmatpush.bf16.msra.mxu2 %v8513_v49  ;;  %v8550_v49 = vld [vmem:[%s10722_s2 + $0x5d0] sm:$0xff] }
  0x9a   :  { %2494 = vmatpush.bf16.msra.mxu3 %v8521_v50  ;;  %v8525_v50 = vld [vmem:[%s10722_s2 + $0x508] sm:$0xff] }
  0x9b   :  { %2456 = vmatpush.bf16.msra.mxu0 %v8496_v51  ;;  %v8533_v51 = vld [vmem:[%s10722_s2 + $0x548] sm:$0xff] }
  0x9c   :  { %2469 = vmatpush.bf16.msra.mxu1 %v8504_v52  ;;  %v78_v52 = vld [vmem:[%s10721_s1 + $0x30] sm:$0xff] }
  0x9d   :  { %2482 = vmatpush.bf16.msra.mxu2 %v8512_v53  ;;  %v8541_v53 = vld [vmem:[%s10722_s2 + $0x588] sm:$0xff]  ;;  %119 = vst [vmem:[#allocation1] ss:$4 sm:$0xff] %v78_v52 }
  0x9e   :  { %2495 = vmatpush.bf16.msra.mxu3 %v8520_v54  ;;  %v8549_v54 = vld [vmem:[%s10722_s2 + $0x5c8] sm:$0xff] }
  0x9f   :  { %2457 = vmatpush.bf16.msra.mxu0 %v8495_v55 }
  0xa0   :  { %2470 = vmatpush.bf16.msra.mxu1 %v8503_v56 }
  0xa1   :  { %2483 = vmatpush.bf16.msra.mxu2 %v8511_v57  ;;  %v8524_v57 = vld [vmem:[%s10722_s2 + $0x500] sm:$0xff] }
  0xa2   :  { %2496 = vmatpush.bf16.msra.mxu3 %v8519_v58  ;;  %v8532_v58 = vld [vmem:[%s10722_s2 + $0x540] sm:$0xff] }
  0xa3   :  { %2458 = vmatpush.bf16.msra.mxu0 %v8494_v59  ;;  %v8540_v59 = vld [vmem:[%s10722_s2 + $0x580] sm:$0xff] }
  0xa4   :  { %2471 = vmatpush.bf16.msra.mxu1 %v8502_v60  ;;  %v8548_v60 = vld [vmem:[%s10722_s2 + $0x5c0] sm:$0xff] }
  0xa5   :  { %2484 = vmatpush.bf16.msra.mxu2 %v8510_v61  ;;  %v8563_v61 = vld [vmem:[%s10722_s2 + $0x638] sm:$0xff]  ;;  %v121_v52 = vld.sshfl [vmem:[#allocation1] sm:$0xff pattern:$0x73625140] }
  0xa6   :  { %2497 = vmatpush.bf16.msra.mxu3 %v8518_v62  ;;  %v8571_v62 = vld [vmem:[%s10722_s2 + $0x678] sm:$0xff] }
  0xa7   :  { %2459 = vmatpush.bf16.msra.mxu0 %v8493_v63  ;;  %v115_v63 = vld.sshfl [vmem:[#allocation1 + $0x20] sm:$0xff pattern:$0x73625140] }
  0xa8   :  { %2472 = vmatpush.bf16.msra.mxu1 %v8501_v0  ;;  %v117_v0 = vld.sshfl [vmem:[#allocation1 + $0x30] sm:$0xff pattern:$0x73625140] }
  0xa9   :  { %2485 = vmatpush.bf16.msra.mxu2 %v8509_v1  ;;  %v116_v1 = vld.sshfl [vmem:[#allocation1 + $0x28] sm:$0xff pattern:$0x73625140] }
  0xaa   :  { %2498 = vmatpush.bf16.msra.mxu3 %v8517_v2  ;;  %v118_v2 = vld.sshfl [vmem:[#allocation1 + $0x38] sm:$0xff pattern:$0x73625140] }
  0xab   :  { %2460 = vmatpush.bf16.msra.mxu0 %v8492_v3  ;;  %v2254_v28 = vpop.f32.mrf.mxu0  ;;  %v8579_v3 = vld [vmem:[%s10722_s2 + $0x6b8] sm:$0xff] }
  0xac   :  { %2473 = vmatpush.bf16.msra.mxu1 %v8500_v4  ;;  %v2255_v31 = vadd.f32 %v9010_v25, %v2254_v28  ;;  %v2267_v32 = vpop.f32.mrf.mxu1  ;;  %v8587_v4 = vld [vmem:[%s10722_s2 + $0x6f8] sm:$0xff] }
  0xad   :  { %2486 = vmatpush.bf16.msra.mxu2 %v8508_v5  ;;  %v181_v5 = vpack.c.bf16 %v115_v63, %v115_v63  ;;  %v8559_v25 = vld [vmem:[%s10722_s2 + $0x618] sm:$0xff]  ;;  %v8602_v63 = vld [vmem:[%s10722_s2 + $0x770] sm:$0xff] }
  0xae   :  { %2499 = vmatpush.bf16.msra.mxu3 %v8516_v6  ;;  %2461 = vmatmul.bf16.vlgmr.msra.gmra.mxu0 %v177_v15  ;;  %v2268_v35 = vadd.f32 %v2267_v32, %v2255_v31  ;;  %v183_v6 = vpack.c.bf16 %v117_v0, %v117_v0  ;;  %v8577_v15 = vld [vmem:[%s10722_s2 + $0x6a8] sm:$0xff]  ;;  %v8583_v28 = vld [vmem:[%s10722_s2 + $0x6d8] sm:$0xff]  ;;  %v8610_v0 = vld [vmem:[%s10722_s2 + $0x7b0] sm:$0xff] }
  0xaf   :  { %2505 = vmatpush.bf16.msrb.mxu0 %v8531_v7  ;;  %2474 = vmatmul.bf16.vlgmr.msra.gmra.mxu1 %v178_v17  ;;  %v182_v7 = vpack.c.bf16 %v116_v1, %v116_v1  ;;  %v8618_v1 = vld [vmem:[%s10722_s2 + $0x7f0] sm:$0xff] }
  0xb0   :  { %2518 = vmatpush.bf16.msrb.mxu1 %v8539_v8  ;;  %2487 = vmatmul.bf16.vlgmr.msra.gmra.mxu2 %v179_v16  ;;  %v184_v8 = vpack.c.bf16 %v118_v2, %v118_v2  ;;  %v8585_v16 = vld [vmem:[%s10722_s2 + $0x6e8] sm:$0xff] }
  0xb1   :  { %2531 = vmatpush.bf16.msrb.mxu2 %v8547_v13  ;;  %2500 = vmatmul.bf16.vlgmr.msra.gmra.mxu3 %v180_v18  ;;  %v8561_v13 = vld [vmem:[%s10722_s2 + $0x628] sm:$0xff]  ;;  %v8560_v18 = vld [vmem:[%s10722_s2 + $0x620] sm:$0xff] }
  0xb2   :  { %2544 = vmatpush.bf16.msrb.mxu3 %v8555_v14  ;;  %v8569_v14 = vld [vmem:[%s10722_s2 + $0x668] sm:$0xff] }
  0xb3   :  { %2506 = vmatpush.bf16.msrb.mxu0 %v8530_v19  ;;  %v2280_v40 = vpop.f32.mrf.mxu2  ;;  %v2256_v43 = vpop.f32.mrf.mxu0  ;;  %v8568_v19 = vld [vmem:[%s10722_s2 + $0x660] sm:$0xff]  ;;  %v8593_v2 = vld [vmem:[%s10722_s2 + $0x728] sm:$0xff] }
  0xb4   :  { %2519 = vmatpush.bf16.msrb.mxu1 %v8538_v20  ;;  %v2281_v41 = vadd.f32 %v2280_v40, %v2268_v35  ;;  %v2293_v42 = vpop.f32.mrf.mxu3  ;;  %v2269_v47 = vpop.f32.mrf.mxu1  ;;  %v8557_v40 = vld [vmem:[%s10722_s2 + $0x608] sm:$0xff] }
  0xb5   :  { %2532 = vmatpush.bf16.msrb.mxu2 %v8546_v21  ;;  %v8581_v43 = vld [vmem:[%s10722_s2 + $0x6c8] sm:$0xff]  ;;  %v8564_v47 = vld [vmem:[%s10722_s2 + $0x640] sm:$0xff] }
  0xb6   :  { %2545 = vmatpush.bf16.msrb.mxu3 %v8554_v22  ;;  %v9754_v46 = vadd.f32 %v2293_v42, %v2281_v41  ;;  %v8576_v22 = vld [vmem:[%s10722_s2 + $0x6a0] sm:$0xff]  ;;  %v8565_v41 = vld [vmem:[%s10722_s2 + $0x648] sm:$0xff] }
  0xb7   :  { %2507 = vmatpush.bf16.msrb.mxu0 %v8529_v23  ;;  %v8584_v23 = vld [vmem:[%s10722_s2 + $0x6e0] sm:$0xff]  ;;  %v8573_v42 = vld [vmem:[%s10722_s2 + $0x688] sm:$0xff] }
  0xb8   :  { %2520 = vmatpush.bf16.msrb.mxu1 %v8537_v24 }
  0xb9   :  { %2533 = vmatpush.bf16.msrb.mxu2 %v8545_v26  ;;  %v8567_v26 = vld [vmem:[%s10722_s2 + $0x658] sm:$0xff] }
  0xba   :  { %2546 = vmatpush.bf16.msrb.mxu3 %v8553_v27  ;;  %v8575_v27 = vld [vmem:[%s10722_s2 + $0x698] sm:$0xff] }
  0xbb   :  { %2508 = vmatpush.bf16.msrb.mxu0 %v8528_v29  ;;  %v2282_v55 = vpop.f32.mrf.mxu2 }
  0xbc   :  { %2521 = vmatpush.bf16.msrb.mxu1 %v8536_v30  ;;  %v2295_v56 = vpop.f32.mrf.mxu3  ;;  %v124_v55 = vld.sshfl [vmem:[#allocation1 + $0x18] sm:$0xff pattern:$0x73625140] }
  0xbd   :  { %2534 = vmatpush.bf16.msrb.mxu2 %v8544_v33  ;;  %v8558_v33 = vld [vmem:[%s10722_s2 + $0x610] sm:$0xff]  ;;  %v8611_v56 = vld [vmem:[%s10722_s2 + $0x7b8] sm:$0xff] }
  0xbe   :  { %2547 = vmatpush.bf16.msrb.mxu3 %v8552_v34  ;;  %v8566_v34 = vld [vmem:[%s10722_s2 + $0x650] sm:$0xff] }
  0xbf   :  { %2509 = vmatpush.bf16.msrb.mxu0 %v8527_v36 }
  0xc0   :  { %2522 = vmatpush.bf16.msrb.mxu1 %v8535_v37  ;;  %v8574_v37 = vld [vmem:[%s10722_s2 + $0x690] sm:$0xff] }
  0xc1   :  { %2535 = vmatpush.bf16.msrb.mxu2 %v8543_v38  ;;  %v8582_v38 = vld [vmem:[%s10722_s2 + $0x6d0] sm:$0xff] }
  0xc2   :  { %2548 = vmatpush.bf16.msrb.mxu3 %v8551_v39  ;;  %v79_v39 = vld [vmem:[%s10721_s1 + $0x38] sm:$0xff] }
  0xc3   :  { %2510 = vmatpush.bf16.msrb.mxu0 %v8526_v44  ;;  %120 = vst [vmem:[#allocation1 + $0x20] ss:$4 sm:$0xff] %v79_v39 }
  0xc4   :  { %2523 = vmatpush.bf16.msrb.mxu1 %v8534_v45 }
  0xc5   :  { %2536 = vmatpush.bf16.msrb.mxu2 %v8542_v48  ;;  %v8572_v48 = vld [vmem:[%s10722_s2 + $0x680] sm:$0xff] }
  0xc6   :  { %2549 = vmatpush.bf16.msrb.mxu3 %v8550_v49  ;;  %v8580_v49 = vld [vmem:[%s10722_s2 + $0x6c0] sm:$0xff] }
  0xc7   :  { %2511 = vmatpush.bf16.msrb.mxu0 %v8525_v50  ;;  %v8595_v50 = vld [vmem:[%s10722_s2 + $0x738] sm:$0xff] }
  0xc8   :  { %2524 = vmatpush.bf16.msrb.mxu1 %v8533_v51  ;;  %v8603_v51 = vld [vmem:[%s10722_s2 + $0x778] sm:$0xff] }
  0xc9   :  { %2537 = vmatpush.bf16.msrb.mxu2 %v8541_v53  ;;  %v123_v53 = vld.sshfl [vmem:[#allocation1 + $0x10] sm:$0xff pattern:$0x73625140] }
  0xca   :  { %2550 = vmatpush.bf16.msrb.mxu3 %v8549_v54  ;;  %v122_v54 = vld.sshfl [vmem:[#allocation1 + $0x8] sm:$0xff pattern:$0x73625140] }
  0xcb   :  { %2512 = vmatpush.bf16.msrb.mxu0 %v8524_v57  ;;  %v2306_v17 = vpop.f32.mrf.mxu0  ;;  %v8619_v57 = vld [vmem:[%s10722_s2 + $0x7f8] sm:$0xff]  ;;  %v126_v39 = vld.sshfl [vmem:[#allocation1 + $0x28] sm:$0xff pattern:$0x73625140] }
  0xcc   :  { %2525 = vmatpush.bf16.msrb.mxu1 %v8532_v58  ;;  %v2307_v20 = vadd.f32 %v2306_v17, %v9754_v46  ;;  %v2319_v21 = vpop.f32.mrf.mxu1  ;;  %v8556_v46 = vld [vmem:[%s10722_s2 + $0x600] sm:$0xff]  ;;  %v185_v58 = vpack.c.bf16 %v121_v52, %v121_v52  ;;  %v8615_v17 = vld [vmem:[%s10722_s2 + $0x7d8] sm:$0xff] }
  0xcd   :  { %2538 = vmatpush.bf16.msrb.mxu2 %v8540_v59  ;;  %v187_v59 = vpack.c.bf16 %v123_v53, %v123_v53 }
  0xce   :  { %2551 = vmatpush.bf16.msrb.mxu3 %v8548_v60  ;;  %2513 = vmatmul.bf16.vlgmr.msrb.gmra.mxu0 %v181_v5  ;;  %v2320_v24 = vadd.f32 %v2319_v21, %v2307_v20  ;;  %v186_v60 = vpack.c.bf16 %v122_v54, %v122_v54  ;;  %v8617_v5 = vld [vmem:[%s10722_s2 + $0x7e8] sm:$0xff] }
  0xcf   :  { %2557 = vmatpush.bf16.msra.mxu0 %v8563_v61  ;;  %2526 = vmatmul.bf16.vlgmr.msrb.gmra.mxu1 %v182_v7  ;;  %v188_v61 = vpack.c.bf16 %v124_v55, %v124_v55 }
  0xd0   :  { %2570 = vmatpush.bf16.msra.mxu1 %v8571_v62  ;;  %2539 = vmatmul.bf16.vlgmr.msrb.gmra.mxu2 %v183_v6  ;;  %v8594_v62 = vld [vmem:[%s10722_s2 + $0x730] sm:$0xff] }
  0xd1   :  { %2583 = vmatpush.bf16.msra.mxu2 %v8579_v3  ;;  %2552 = vmatmul.bf16.vlgmr.msrb.gmra.mxu3 %v184_v8  ;;  %v8601_v3 = vld [vmem:[%s10722_s2 + $0x768] sm:$0xff]  ;;  %v8592_v8 = vld [vmem:[%s10722_s2 + $0x720] sm:$0xff] }
  0xd2   :  { %2596 = vmatpush.bf16.msra.mxu3 %v8587_v4  ;;  %v8609_v4 = vld [vmem:[%s10722_s2 + $0x7a8] sm:$0xff] }
  0xd3   :  { %2558 = vmatpush.bf16.msra.mxu0 %v8562_v9  ;;  %v2332_v29 = vpop.f32.mrf.mxu2  ;;  %v2308_v32 = vpop.f32.mrf.mxu0  ;;  %v8600_v9 = vld [vmem:[%s10722_s2 + $0x760] sm:$0xff] }
  0xd4   :  { %2571 = vmatpush.bf16.msra.mxu1 %v8570_v10  ;;  %v2333_v30 = vadd.f32 %v2332_v29, %v2320_v24  ;;  %v2345_v31 = vpop.f32.mrf.mxu3  ;;  %v2321_v36 = vpop.f32.mrf.mxu1  ;;  %v8598_v24 = vld [vmem:[%s10722_s2 + $0x750] sm:$0xff]  ;;  %v8597_v29 = vld [vmem:[%s10722_s2 + $0x748] sm:$0xff] }
  0xd5   :  { %2584 = vmatpush.bf16.msra.mxu2 %v8578_v11  ;;  %v8608_v11 = vld [vmem:[%s10722_s2 + $0x7a0] sm:$0xff] }
  0xd6   :  { %2597 = vmatpush.bf16.msra.mxu3 %v8586_v12  ;;  %v9856_v35 = vadd.f32 %v2345_v31, %v2333_v30  ;;  %v8616_v12 = vld [vmem:[%s10722_s2 + $0x7e0] sm:$0xff]  ;;  %v8605_v30 = vld [vmem:[%s10722_s2 + $0x788] sm:$0xff] }
  0xd7   :  { %2559 = vmatpush.bf16.msra.mxu0 %v8561_v13  ;;  %v8613_v31 = vld [vmem:[%s10722_s2 + $0x7c8] sm:$0xff]  ;;  %v8604_v36 = vld [vmem:[%s10722_s2 + $0x780] sm:$0xff] }
  0xd8   :  { %2572 = vmatpush.bf16.msra.mxu1 %v8569_v14  ;;  %v8591_v14 = vld [vmem:[%s10722_s2 + $0x718] sm:$0xff] }
  0xd9   :  { %2585 = vmatpush.bf16.msra.mxu2 %v8577_v15  ;;  %v8599_v15 = vld [vmem:[%s10722_s2 + $0x758] sm:$0xff] }
  0xda   :  { %2598 = vmatpush.bf16.msra.mxu3 %v8585_v16  ;;  %v8607_v16 = vld [vmem:[%s10722_s2 + $0x798] sm:$0xff] }
  0xdb   :  { %2560 = vmatpush.bf16.msra.mxu0 %v8560_v18  ;;  %v2334_v44 = vpop.f32.mrf.mxu2 }
  0xdc   :  { %2573 = vmatpush.bf16.msra.mxu1 %v8568_v19  ;;  %v2347_v45 = vpop.f32.mrf.mxu3 }
  0xdd   :  { %2586 = vmatpush.bf16.msra.mxu2 %v8576_v22 }
  0xde   :  { %2599 = vmatpush.bf16.msra.mxu3 %v8584_v23  ;;  %v8590_v23 = vld [vmem:[%s10722_s2 + $0x710] sm:$0xff] }
  0xdf   :  { %2561 = vmatpush.bf16.msra.mxu0 %v8559_v25 }
  0xe0   :  { %2574 = vmatpush.bf16.msra.mxu1 %v8567_v26  ;;  %v8606_v26 = vld [vmem:[%s10722_s2 + $0x790] sm:$0xff] }
  0xe1   :  { %2587 = vmatpush.bf16.msra.mxu2 %v8575_v27  ;;  %v8614_v27 = vld [vmem:[%s10722_s2 + $0x7d0] sm:$0xff] }
  0xe2   :  { %2600 = vmatpush.bf16.msra.mxu3 %v8583_v28  ;;  %v8589_v28 = vld [vmem:[%s10722_s2 + $0x708] sm:$0xff] }
  0xe3   :  { %2562 = vmatpush.bf16.msra.mxu0 %v8558_v33  ;;  %v8588_v33 = vld [vmem:[%s10722_s2 + $0x700] sm:$0xff] }
  0xe4   :  { %2575 = vmatpush.bf16.msra.mxu1 %v8566_v34 }
  0xe5   :  { %2588 = vmatpush.bf16.msra.mxu2 %v8574_v37  ;;  %v8612_v37 = vld [vmem:[%s10722_s2 + $0x7c0] sm:$0xff] }
  0xe6   :  { %2601 = vmatpush.bf16.msra.mxu3 %v8582_v38  ;;  %v125_v38 = vld.sshfl [vmem:[#allocation1 + $0x20] sm:$0xff pattern:$0x73625140] }
  0xe7   :  { %2563 = vmatpush.bf16.msra.mxu0 %v8557_v40  ;;  %v127_v40 = vld.sshfl [vmem:[#allocation1 + $0x30] sm:$0xff pattern:$0x73625140] }
  0xe8   :  { %2576 = vmatpush.bf16.msra.mxu1 %v8565_v41  ;;  %v128_v41 = vld.sshfl [vmem:[#allocation1 + $0x38] sm:$0xff pattern:$0x73625140]  ;;  %v191_v44 = vpack.c.bf16 %v127_v40, %v127_v40 }
  0xe9   :  { %2589 = vmatpush.bf16.msra.mxu2 %v8573_v42  ;;  %v189_v42 = vpack.c.bf16 %v125_v38, %v125_v38  ;;  %v192_v45 = vpack.c.bf16 %v128_v41, %v128_v41  ;;  %v6958_v41 = vld [vmem:[#allocation3 + $0x100] sm:$0xf] }
  0xea   :  { %2602 = vmatpush.bf16.msra.mxu3 %v8581_v43  ;;  %v190_v43 = vpack.c.bf16 %v126_v39, %v126_v39 }
  0xeb   :  { %2564 = vmatpush.bf16.msra.mxu0 %v8556_v46  ;;  %v2358_v6 = vpop.f32.mrf.mxu0 }
  0xec   :  { %2577 = vmatpush.bf16.msra.mxu1 %v8564_v47  ;;  %v2359_v7 = vadd.f32 %v2358_v6, %v9856_v35  ;;  %v2371_v10 = vpop.f32.mrf.mxu1  ;;  %v8596_v35 = vld [vmem:[%s10722_s2 + $0x740] sm:$0xff]  ;;  %v7056_v6 = vld [vmem:[#allocation3 + $0x1e0] sm:$0xf0] }
  0xed   :  { %2590 = vmatpush.bf16.msra.mxu2 %v8572_v48 }
  0xee   :  { %2603 = vmatpush.bf16.msra.mxu3 %v8580_v49  ;;  %2565 = vmatmul.bf16.vlgmr.msra.gmra.mxu0 %v185_v58  ;;  %v2372_v13 = vadd.f32 %v2371_v10, %v2359_v7  ;;  %v7062_v7 = vld [vmem:[#allocation3 + $0x1c8] sm:$0xf] }
  0xef   :  { %2609 = vmatpush.bf16.msrb.mxu0 %v8595_v50  ;;  %2578 = vmatmul.bf16.vlgmr.msra.gmra.mxu1 %v186_v60 }
  0xf0   :  { %2622 = vmatpush.bf16.msrb.mxu1 %v8603_v51  ;;  %2591 = vmatmul.bf16.vlgmr.msra.gmra.mxu2 %v187_v59 }
  0xf1   :  { %2635 = vmatpush.bf16.msrb.mxu2 %v8611_v56  ;;  %2604 = vmatmul.bf16.vlgmr.msra.gmra.mxu3 %v188_v61 }
  0xf2   :  { %2648 = vmatpush.bf16.msrb.mxu3 %v8619_v57 }
  0xf3   :  { %2610 = vmatpush.bf16.msrb.mxu0 %v8594_v62  ;;  %v2384_v18 = vpop.f32.mrf.mxu2  ;;  %v2360_v21 = vpop.f32.mrf.mxu0 }
  0xf4   :  { %2623 = vmatpush.bf16.msrb.mxu1 %v8602_v63  ;;  %v2385_v19 = vadd.f32 %v2384_v18, %v2372_v13  ;;  %v2397_v20 = vpop.f32.mrf.mxu3  ;;  %v2373_v25 = vpop.f32.mrf.mxu1  ;;  %v8741_v13 = vld [vmem:[#allocation3 + $0x1cc] sm:$0xf]  ;;  %v8732_v18 = vld [vmem:[#allocation3 + $0x184] sm:$0xf] }
  0xf5   :  { %2636 = vmatpush.bf16.msrb.mxu2 %v8610_v0 }
  0xf6   :  { %2649 = vmatpush.bf16.msrb.mxu3 %v8618_v1  ;;  %v2398_v22 = vadd.f32 %v2397_v20, %v2385_v19  ;;  %v7054_v1 = vld [vmem:[#allocation3 + $0x1c0] sm:$0xf]  ;;  %v7024_v19 = vld [vmem:[#allocation3 + $0x1a0] sm:$0xf0] }
  0xf7   :  { %2611 = vmatpush.bf16.msrb.mxu0 %v8593_v2  ;;  %v8744_v2 = vld [vmem:[#allocation3 + $0x1dc] sm:$0xf0]  ;;  %v7027_v21 = vor.u32 %v8732_v18, %v7024_v19  ;;  %v8692_v19 = vld [vmem:[#allocation3 + $0x44] sm:$0xf] }
  0xf8   :  { %2624 = vmatpush.bf16.msrb.mxu1 %v8601_v3  ;;  %v8740_v3 = vld [vmem:[#allocation3 + $0x1c4] sm:$0xf]  ;;  %v8696_v18 = vld [vmem:[#allocation3 + $0x5c] sm:$0xf0] }
  0xf9   :  { %2637 = vmatpush.bf16.msrb.mxu2 %v8609_v4 }
  0xfa   :  { %2650 = vmatpush.bf16.msrb.mxu3 %v8617_v5  ;;  %v7055_v5 = vor.u32 %v8744_v2, %v7054_v1 }
  0xfb   :  { %2612 = vmatpush.bf16.msrb.mxu0 %v8592_v8  ;;  %v2386_v32 = vpop.f32.mrf.mxu2  ;;  %v8745_v8 = vld [vmem:[#allocation3 + $0x1e4] sm:$0xf0] }
  0xfc   :  { %2625 = vmatpush.bf16.msrb.mxu1 %v8600_v9  ;;  %v2399_v34 = vpop.f32.mrf.mxu3  ;;  %v6998_v32 = vld [vmem:[#allocation3 + $0x148] sm:$0xf] }
  0xfd   :  { %2638 = vmatpush.bf16.msrb.mxu2 %v8608_v11  ;;  %v7059_v11 = vor.u32 %v8740_v3, %v7056_v6  ;;  %v6894_v3 = vld [vmem:[#allocation3 + $0x80] sm:$0xf] }
  0xfe   :  { %2651 = vmatpush.bf16.msrb.mxu3 %v8616_v12  ;;  %v7063_v12 = vor.u32 %v8745_v8, %v7062_v7  ;;  %v6896_v8 = vld [vmem:[#allocation3 + $0xa0] sm:$0xf0] }
  0xff   :  { %2613 = vmatpush.bf16.msrb.mxu0 %v8591_v14  ;;  %v7064_v14 = vld [vmem:[#allocation3 + $0x1e8] sm:$0xf0] }
 0x100   :  { %2626 = vmatpush.bf16.msrb.mxu1 %v8599_v15  ;;  %v7022_v15 = vld [vmem:[#allocation3 + $0x180] sm:$0xf] }
 0x101   :  { %2639 = vmatpush.bf16.msrb.mxu2 %v8607_v16  ;;  %v7067_v16 = vor.u32 %v8741_v13, %v7064_v14  ;;  %v8701_v14 = vld [vmem:[#allocation3 + $0x8c] sm:$0xf] }
 0x102   :  { %2652 = vmatpush.bf16.msrb.mxu3 %v8615_v17  ;;  %v8736_v17 = vld [vmem:[#allocation3 + $0x19c] sm:$0xf0] }
 0x103   :  { %2614 = vmatpush.bf16.msrb.mxu0 %v8590_v23  ;;  %v7023_v20 = vor.u32 %v8736_v17, %v7022_v15  ;;  %v8737_v23 = vld [vmem:[#allocation3 + $0x1a4] sm:$0xf0]  ;;  %v6904_v15 = vld [vmem:[#allocation3 + $0xa8] sm:$0xf0]  ;;  %v6862_v17 = vld [vmem:[#allocation3 + $0x40] sm:$0xf] }
 0x104   :  { %2627 = vmatpush.bf16.msrb.mxu1 %v8598_v24  ;;  %v8733_v24 = vld [vmem:[#allocation3 + $0x18c] sm:$0xf] }
 0x105   :  { %2640 = vmatpush.bf16.msrb.mxu2 %v8606_v26  ;;  %v7032_v26 = vld [vmem:[#allocation3 + $0x1a8] sm:$0xf0] }
 0x106   :  { %2653 = vmatpush.bf16.msrb.mxu3 %v8614_v27  ;;  %v6990_v27 = vld [vmem:[#allocation3 + $0x140] sm:$0xf] }
 0x107   :  { %2615 = vmatpush.bf16.msrb.mxu0 %v8589_v28  ;;  %v8728_v28 = vld [vmem:[#allocation3 + $0x15c] sm:$0xf0] }
 0x108   :  { %2628 = vmatpush.bf16.msrb.mxu1 %v8597_v29  ;;  %v7035_v29 = vor.u32 %v8733_v24, %v7032_v26  ;;  %v6991_v34 = vor.u32 %v8728_v28, %v6990_v27  ;;  %v8693_v27 = vld [vmem:[#allocation3 + $0x4c] sm:$0xf] }
 0x109   :  { %2641 = vmatpush.bf16.msrb.mxu2 %v8605_v30  ;;  %v8724_v30 = vld [vmem:[#allocation3 + $0x144] sm:$0xf]  ;;  %v6872_v28 = vld [vmem:[#allocation3 + $0x68] sm:$0xf0] }
 0x10a   :  { %2654 = vmatpush.bf16.msrb.mxu3 %v8613_v31  ;;  %v6992_v31 = vld [vmem:[#allocation3 + $0x160] sm:$0xf0] }
 0x10b   :  { %2616 = vmatpush.bf16.msrb.mxu0 %v8588_v33  ;;  %v2410_v46 = vpop.f32.mrf.mxu0  ;;  %v6995_v39 = vor.u32 %v8724_v30, %v6992_v31  ;;  %v6875_v30 = vor.u32 %v8693_v27, %v6872_v28  ;;  %v6830_v31 = vld [vmem:[#allocation3] sm:$0xf]  ;;  %v6982_v27 = vld [vmem:[#allocation3 + $0x118] sm:$0xf] }
 0x10c   :  { %2629 = vmatpush.bf16.msrb.mxu1 %v8596_v35  ;;  %v2411_v47 = vadd.f32 %v2410_v46, %v2398_v22  ;;  %v2423_v48 = vpop.f32.mrf.mxu1  ;;  %v7030_v22 = vld [vmem:[#allocation3 + $0x188] sm:$0xf]  ;;  %v8723_v28 = vld [vmem:[#allocation3 + $0x134] sm:$0xf0] }
 0x10d   :  { %2642 = vmatpush.bf16.msrb.mxu2 %v8604_v36  ;;  %v7031_v25 = vor.u32 %v8737_v23, %v7030_v22  ;;  %v8729_v35 = vld [vmem:[#allocation3 + $0x164] sm:$0xf0]  ;;  %v8725_v36 = vld [vmem:[#allocation3 + $0x14c] sm:$0xf] }
 0x10e   :  { %2655 = vmatpush.bf16.msrb.mxu3 %v8612_v37  ;;  %2617 = vmatmul.bf16.vlgmr.msrb.gmra.mxu0 %v189_v42  ;;  %v2424_v49 = vadd.f32 %v2423_v48, %v2411_v47  ;;  %v7000_v37 = vld [vmem:[#allocation3 + $0x168] sm:$0xf0]  ;;  %v6999_v40 = vor.u32 %v8729_v35, %v6998_v32  ;;  %v8720_v42 = vld [vmem:[#allocation3 + $0x11c] sm:$0xf0]  ;;  %v6966_v46 = vld [vmem:[#allocation3 + $0x108] sm:$0xf] }
 0x10f   :  { %2630 = vmatmul.bf16.vlgmr.msrb.gmra.mxu1 %v190_v43  ;;  %3112 = vmatpush.bf16.msra.mxu0 %v7055_v5  ;;  %v8716_v43 = vld [vmem:[#allocation3 + $0x104] sm:$0xf]  ;;  %v8721_v47 = vld [vmem:[#allocation3 + $0x124] sm:$0xf0]  ;;  %v8717_v48 = vld [vmem:[#allocation3 + $0x10c] sm:$0xf] }
 0x110   :  { %2643 = vmatmul.bf16.vlgmr.msrb.gmra.mxu2 %v191_v44  ;;  %3125 = vmatpush.bf16.msra.mxu1 %v7059_v11  ;;  %v7003_v44 = vor.u32 %v8725_v36, %v7000_v37  ;;  %v8700_v5 = vld [vmem:[#allocation3 + $0x84] sm:$0xf]  ;;  %v8705_v11 = vld [vmem:[#allocation3 + $0xa4] sm:$0xf0]  ;;  %v8688_v32 = vld [vmem:[#allocation3 + $0x1c] sm:$0xf0] }
 0x111   :  { %2656 = vmatmul.bf16.vlgmr.msrb.gmra.mxu3 %v192_v45  ;;  %3138 = vmatpush.bf16.msra.mxu2 %v7063_v12  ;;  %v6960_v45 = vld [vmem:[#allocation3 + $0x120] sm:$0xf0]  ;;  %v6899_v12 = vor.u32 %v8700_v5, %v6896_v8  ;;  %v6870_v22 = vld [vmem:[#allocation3 + $0x48] sm:$0xf]  ;;  %v6831_v35 = vor.u32 %v8688_v32, %v6830_v31  ;;  %v6984_v31 = vld [vmem:[#allocation3 + $0x138] sm:$0xf0] }
 0x112   :  { %3151 = vmatpush.bf16.msra.mxu3 %v7067_v16  ;;  %v6907_v16 = vor.u32 %v8701_v14, %v6904_v15  ;;  %v8697_v23 = vld [vmem:[#allocation3 + $0x64] sm:$0xf0]  ;;  %v6832_v36 = vld [vmem:[#allocation3 + $0x20] sm:$0xf0]  ;;  %v7014_v14 = vld [vmem:[#allocation3 + $0x158] sm:$0xf] }
 0x113   :  { %v2436_v50 = vpop.f32.mrf.mxu2  ;;  %v2412_v53 = vpop.f32.mrf.mxu0  ;;  %3113 = vmatpush.bf16.msra.mxu0 %v7023_v20  ;;  %v6863_v20 = vor.u32 %v8696_v18, %v6862_v17  ;;  %v6871_v26 = vor.u32 %v8697_v23, %v6870_v22  ;;  %v6838_v37 = vld [vmem:[#allocation3 + $0x8] sm:$0xf]  ;;  %v8731_v15 = vld [vmem:[#allocation3 + $0x174] sm:$0xf0]  ;;  %v8727_v17 = vld [vmem:[#allocation3 + $0x15c] sm:$0xf] }
 0x114   :  { %v2437_v51 = vadd.f32 %v2436_v50, %v2424_v49  ;;  %v2449_v52 = vpop.f32.mrf.mxu3  ;;  %v2425_v55 = vpop.f32.mrf.mxu1  ;;  %3126 = vmatpush.bf16.msra.mxu1 %v7027_v21  ;;  %v6968_v49 = vld [vmem:[#allocation3 + $0x128] sm:$0xf0]  ;;  %v6959_v50 = vor.u32 %v8720_v42, %v6958_v41  ;;  %v6864_v21 = vld [vmem:[#allocation3 + $0x60] sm:$0xf0]  ;;  %v7016_v18 = vld [vmem:[#allocation3 + $0x178] sm:$0xf0] }
 0x115   :  { %3139 = vmatpush.bf16.msra.mxu2 %v7031_v25  ;;  %v6971_v53 = vor.u32 %v8717_v48, %v6968_v49  ;;  %v8712_v55 = vld [vmem:[#allocation3 + $0xdc] sm:$0xf0]  ;;  %v6867_v25 = vor.u32 %v8692_v19, %v6864_v21  ;;  %v8685_v42 = vld [vmem:[#allocation3 + $0xc] sm:$0xf]  ;;  %v7072_v48 = vld [vmem:[#allocation3 + $0x1f0] sm:$0xf0] }
 0x116   :  { %v2450_v54 = vadd.f32 %v2449_v52, %v2437_v51  ;;  %3152 = vmatpush.bf16.msra.mxu3 %v7035_v29  ;;  %v6963_v51 = vor.u32 %v8716_v43, %v6960_v45  ;;  %v6967_v52 = vor.u32 %v8721_v47, %v6966_v46  ;;  %v6840_v43 = vld [vmem:[#allocation3 + $0x28] sm:$0xf0]  ;;  %v8746_v46 = vld [vmem:[#allocation3 + $0x1ec] sm:$0xf0]  ;;  %v8742_v47 = vld [vmem:[#allocation3 + $0x1d4] sm:$0xf] }
 0x117   :  { %3114 = vmatpush.bf16.msra.mxu0 %v6991_v34  ;;  %v6843_v45 = vor.u32 %v8685_v42, %v6840_v43  ;;  %v6974_v21 = vld [vmem:[#allocation3 + $0x110] sm:$0xf]  ;;  %v8718_v23 = vld [vmem:[#allocation3 + $0x114] sm:$0xf]  ;;  %v8715_v42 = vld [vmem:[#allocation3 + $0xf4] sm:$0xf0] }
 0x118   :  { %3127 = vmatpush.bf16.msra.mxu1 %v6995_v39  ;;  %v8722_v22 = vld [vmem:[#allocation3 + $0x12c] sm:$0xf0] }
 0x119   :  { %3140 = vmatpush.bf16.msra.mxu2 %v6999_v40  ;;  %v6975_v32 = vor.u32 %v8722_v22, %v6974_v21  ;;  %v6848_v21 = vld [vmem:[#allocation3 + $0x30] sm:$0xf0]  ;;  %v6854_v22 = vld [vmem:[#allocation3 + $0x18] sm:$0xf] }
 0x11a   :  { %3153 = vmatpush.bf16.msra.mxu3 %v7003_v44  ;;  %v7070_v44 = vld [vmem:[#allocation3 + $0x1d0] sm:$0xf] }
 0x11b   :  { %v2438_v56 = vpop.f32.mrf.mxu2  ;;  %3115 = vmatpush.bf16.msra.mxu0 %v6959_v50  ;;  %v7071_v49 = vor.u32 %v8746_v46, %v7070_v44  ;;  %v7075_v50 = vor.u32 %v8742_v47, %v7072_v48  ;;  %v6952_v46 = vld [vmem:[#allocation3 + $0xf8] sm:$0xf0]  ;;  %v6910_v48 = vld [vmem:[#allocation3 + $0x90] sm:$0xf] }
 0x11c   :  { %v2451_v57 = vpop.f32.mrf.mxu3  ;;  %3128 = vmatpush.bf16.msra.mxu1 %v6963_v51  ;;  %v8708_v56 = vld [vmem:[#allocation3 + $0xc4] sm:$0xf]  ;;  %v7078_v51 = vld [vmem:[#allocation3 + $0x1d8] sm:$0xf] }
 0x11d   :  { %3141 = vmatpush.bf16.msra.mxu2 %v6967_v52  ;;  %v8747_v52 = vld [vmem:[#allocation3 + $0x1f4] sm:$0xf0] }
 0x11e   :  { %3154 = vmatpush.bf16.msra.mxu3 %v6971_v53  ;;  %v8743_v53 = vld [vmem:[#allocation3 + $0x1dc] sm:$0xf] }
 0x12b   :  { %v2462_v58 = vpop.f32.mrf.mxu0 }
 0x12c   :  { %v2463_v59 = vadd.f32 %v2462_v58, %v2450_v54  ;;  %v2475_v60 = vpop.f32.mrf.mxu1  ;;  %v6926_v54 = vld [vmem:[#allocation3 + $0xc0] sm:$0xf]  ;;  %v6928_v58 = vld [vmem:[#allocation3 + $0xe0] sm:$0xf0] }
 0x12d   :  { %v6927_v57 = vor.u32 %v8712_v55, %v6926_v54  ;;  %v7079_v54 = vor.u32 %v8747_v52, %v7078_v51  ;;  %v7080_v55 = vld [vmem:[#allocation3 + $0x1f8] sm:$0xf0] }
 0x12e   :  { %v2476_v61 = vadd.f32 %v2475_v60, %v2463_v59  ;;  %v6934_v59 = vld [vmem:[#allocation3 + $0xc8] sm:$0xf] }
 0x12f   :  { %v8713_v60 = vld [vmem:[#allocation3 + $0xe4] sm:$0xf0]  ;;  %3116 = vmatpush.bf16.msra.mxu0 %v6927_v57  ;;  %v8738_v57 = vld [vmem:[#allocation3 + $0x1ac] sm:$0xf0] }
 0x133   :  { %v2488_v62 = vpop.f32.mrf.mxu2  ;;  %v2464_v4 = vpop.f32.mrf.mxu0 }
 0x134   :  { %v2489_v63 = vadd.f32 %v2488_v62, %v2476_v61  ;;  %v2501_v0 = vpop.f32.mrf.mxu3  ;;  %v2477_v10 = vpop.f32.mrf.mxu1  ;;  %v6931_v61 = vor.u32 %v8708_v56, %v6928_v58  ;;  %v6935_v62 = vor.u32 %v8713_v60, %v6934_v59  ;;  %v8704_v4 = vld [vmem:[#allocation3 + $0x9c] sm:$0xf0]  ;;  %v7038_v56 = vld [vmem:[#allocation3 + $0x190] sm:$0xf]  ;;  %v7083_v58 = vor.u32 %v8743_v53, %v7080_v55  ;;  %v8734_v60 = vld [vmem:[#allocation3 + $0x194] sm:$0xf] }
 0x135   :  { %v6895_v7 = vor.u32 %v8704_v4, %v6894_v3  ;;  %v6902_v10 = vld [vmem:[#allocation3 + $0x88] sm:$0xf]  ;;  %v7039_v59 = vor.u32 %v8738_v57, %v7038_v56  ;;  %v8735_v3 = vld [vmem:[#allocation3 + $0x19c] sm:$0xf]  ;;  %v6912_v53 = vld [vmem:[#allocation3 + $0xb0] sm:$0xf0] }
 0x136   :  { %v9988_v9 = vadd.f32 %v2501_v0, %v2489_v63  ;;  %v8709_v63 = vld [vmem:[#allocation3 + $0xcc] sm:$0xf]  ;;  %3129 = vmatpush.bf16.msra.mxu1 %v6931_v61  ;;  %3142 = vmatpush.bf16.msra.mxu2 %v6935_v62  ;;  %v6903_v13 = vor.u32 %v8705_v11, %v6902_v10  ;;  %v7040_v61 = vld [vmem:[#allocation3 + $0x1b0] sm:$0xf0]  ;;  %v7046_v62 = vld [vmem:[#allocation3 + $0x198] sm:$0xf] }
 0x137   :  { %v6936_v0 = vld [vmem:[#allocation3 + $0xe8] sm:$0xf0]  ;;  %3117 = vmatpush.bf16.msra.mxu0 %v6895_v7  ;;  %v7048_v4 = vld [vmem:[#allocation3 + $0x1b8] sm:$0xf0]  ;;  %v7006_v10 = vld [vmem:[#allocation3 + $0x150] sm:$0xf] }
 0x138   :  { %v6939_v1 = vor.u32 %v8709_v63, %v6936_v0  ;;  %v7043_v0 = vor.u32 %v8734_v60, %v7040_v61  ;;  %v7051_v8 = vor.u32 %v8735_v3, %v7048_v4  ;;  %v8730_v11 = vld [vmem:[#allocation3 + $0x16c] sm:$0xf0]  ;;  %v8707_v55 = vld [vmem:[#allocation3 + $0xb4] sm:$0xf0]  ;;  %v6920_v60 = vld [vmem:[#allocation3 + $0xb8] sm:$0xf0] }
 0x139   :  { %v6880_v3 = vld [vmem:[#allocation3 + $0x70] sm:$0xf0]  ;;  %v6886_v4 = vld [vmem:[#allocation3 + $0x58] sm:$0xf] }
 0x13a   :  { %3155 = vmatpush.bf16.msra.mxu3 %v6939_v1  ;;  %3130 = vmatpush.bf16.msra.mxu1 %v6899_v12  ;;  %v8739_v1 = vld [vmem:[#allocation3 + $0x1b4] sm:$0xf0]  ;;  %v8726_v12 = vld [vmem:[#allocation3 + $0x154] sm:$0xf] }
 0x13b   :  { %v2490_v33 = vpop.f32.mrf.mxu2  ;;  %3143 = vmatpush.bf16.msra.mxu2 %v6903_v13  ;;  %3118 = vmatpush.bf16.msra.mxu0 %v6863_v20  ;;  %v7047_v7 = vor.u32 %v8739_v1, %v7046_v62  ;;  %v7008_v13 = vld [vmem:[#allocation3 + $0x170] sm:$0xf0]  ;;  %v7015_v20 = vor.u32 %v8731_v15, %v7014_v14  ;;  %v6878_v62 = vld [vmem:[#allocation3 + $0x50] sm:$0xf] }
 0x13c   :  { %v2503_v38 = vpop.f32.mrf.mxu3  ;;  %v8684_v33 = vld [vmem:[#allocation3 + $0x4] sm:$0xf]  ;;  %v7011_v19 = vor.u32 %v8726_v12, %v7008_v13 }
 0x13d   :  { %v8689_v38 = vld [vmem:[#allocation3 + $0x24] sm:$0xf0]  ;;  %v6835_v40 = vor.u32 %v8684_v33, %v6832_v36  ;;  %v6942_v36 = vld [vmem:[#allocation3 + $0xd0] sm:$0xf] }
 0x13e   :  { %3156 = vmatpush.bf16.msra.mxu3 %v6907_v16  ;;  %3131 = vmatpush.bf16.msra.mxu1 %v6867_v25  ;;  %v6839_v41 = vor.u32 %v8689_v38, %v6838_v37  ;;  %v7007_v16 = vor.u32 %v8730_v11, %v7006_v10  ;;  %v7019_v25 = vor.u32 %v8727_v17, %v7016_v18  ;;  %v8714_v37 = vld [vmem:[#allocation3 + $0xec] sm:$0xf0]  ;;  %v8710_v38 = vld [vmem:[#allocation3 + $0xd4] sm:$0xf]  ;;  %v8695_v10 = vld [vmem:[#allocation3 + $0x5c] sm:$0xf] }
 0x13f   :  { %3144 = vmatpush.bf16.msra.mxu2 %v6871_v26  ;;  %3119 = vmatpush.bf16.msra.mxu0 %v6831_v35  ;;  %v6976_v26 = vld [vmem:[#allocation3 + $0x130] sm:$0xf0]  ;;  %v6888_v11 = vld [vmem:[#allocation3 + $0x78] sm:$0xf0]  ;;  %v8690_v17 = vld [vmem:[#allocation3 + $0x2c] sm:$0xf0] }
 0x140   :  { %v6979_v33 = vor.u32 %v8718_v23, %v6976_v26  ;;  %v6891_v13 = vor.u32 %v8695_v10, %v6888_v11  ;;  %v8686_v18 = vld [vmem:[#allocation3 + $0x14] sm:$0xf]  ;;  %v8691_v23 = vld [vmem:[#allocation3 + $0x34] sm:$0xf0] }
 0x141   :  { %v6851_v26 = vor.u32 %v8686_v18, %v6848_v21  ;;  %v7246_v10 = vld [vmem:[%s10724_s4 + $0x140] sm:$0xf]  ;;  %v8661_v18 = vld [vmem:[%s10724_s4 + $0x14c] sm:$0xf] }
 0x142   :  { %3157 = vmatpush.bf16.msra.mxu3 %v6875_v30  ;;  %3132 = vmatpush.bf16.msra.mxu1 %v6835_v40  ;;  %v8719_v30 = vld [vmem:[#allocation3 + $0x11c] sm:$0xf]  ;;  %v6944_v40 = vld [vmem:[#allocation3 + $0xf0] sm:$0xf0] }
 0x143   :  { %3145 = vmatpush.bf16.msra.mxu2 %v6839_v41  ;;  %3164 = vmatpush.bf16.msrb.mxu0 %v7071_v49  ;;  %v6987_v35 = vor.u32 %v8719_v30, %v6984_v31  ;;  %v6950_v41 = vld [vmem:[#allocation3 + $0xd8] sm:$0xf]  ;;  %v6947_v43 = vor.u32 %v8710_v38, %v6944_v40  ;;  %v8706_v49 = vld [vmem:[#allocation3 + $0xac] sm:$0xf0]  ;;  %v6856_v30 = vld [vmem:[#allocation3 + $0x38] sm:$0xf0] }
 0x144   :  { %v6951_v44 = vor.u32 %v8715_v42, %v6950_v41  ;;  %v6911_v52 = vor.u32 %v8706_v49, %v6910_v48  ;;  %v7312_v48 = vld [vmem:[%s10724_s4 + $0x1e0] sm:$0xf0]  ;;  %v7318_v49 = vld [vmem:[%s10724_s4 + $0x1c8] sm:$0xf]  ;;  %v8664_v11 = vld [vmem:[%s10724_s4 + $0x15c] sm:$0xf0] }
 0x146   :  { %3158 = vmatpush.bf16.msra.mxu3 %v6843_v45  ;;  %3177 = vmatpush.bf16.msrb.mxu1 %v7075_v50  ;;  %v8711_v45 = vld [vmem:[#allocation3 + $0xdc] sm:$0xf]  ;;  %v8702_v50 = vld [vmem:[#allocation3 + $0x94] sm:$0xf] }
 0x147   :  { %3190 = vmatpush.bf16.msrb.mxu2 %v7079_v54  ;;  %3165 = vmatpush.bf16.msrb.mxu0 %v7039_v59  ;;  %v6955_v47 = vor.u32 %v8711_v45, %v6952_v46  ;;  %v6918_v54 = vld [vmem:[#allocation3 + $0x98] sm:$0xf]  ;;  %v6915_v57 = vor.u32 %v8702_v50, %v6912_v53  ;;  %v8703_v59 = vld [vmem:[#allocation3 + $0x9c] sm:$0xf]  ;;  %v7320_v53 = vld [vmem:[%s10724_s4 + $0x1e8] sm:$0xf0] }
 0x148   :  { %v6923_v61 = vor.u32 %v8703_v59, %v6920_v60 }
 0x14a   :  { %3203 = vmatpush.bf16.msrb.mxu3 %v7083_v58  ;;  %3178 = vmatpush.bf16.msrb.mxu1 %v7043_v0  ;;  %v6919_v58 = vor.u32 %v8707_v55, %v6918_v54  ;;  %v8694_v0 = vld [vmem:[#allocation3 + $0x54] sm:$0xf] }
 0x14b   :  { %v9990_v2 = vpop.f32.mrf.mxu0  ;;  %3191 = vmatpush.bf16.msrb.mxu2 %v7047_v7  ;;  %3166 = vmatpush.bf16.msrb.mxu0 %v7007_v16  ;;  %v6883_v7 = vor.u32 %v8694_v0, %v6880_v3  ;;  %v6846_v16 = vld [vmem:[#allocation3 + $0x10] sm:$0xf]  ;;  %v8673_v0 = vld [vmem:[%s10724_s4 + $0x1a4] sm:$0xf0]  ;;  %v7288_v3 = vld [vmem:[%s10724_s4 + $0x1a8] sm:$0xf0] }
 0x14c   :  { %v9992_v6 = vpop.f32.mrf.mxu1  ;;  %v2515_v14 = vadd.f32 %v9990_v2, %v9988_v9 }
 0x14e   :  { %3204 = vmatpush.bf16.msrb.mxu3 %v7051_v8  ;;  %3179 = vmatpush.bf16.msrb.mxu1 %v7011_v19  ;;  %v2528_v9 = vadd.f32 %v9992_v6, %v2515_v14  ;;  %v8660_v14 = vld [vmem:[%s10724_s4 + $0x144] sm:$0xf] }
 0x14f   :  { %3192 = vmatpush.bf16.msrb.mxu2 %v7015_v20  ;;  %3167 = vmatpush.bf16.msrb.mxu0 %v6975_v32  ;;  %v6847_v20 = vor.u32 %v8690_v17, %v6846_v16  ;;  %v7254_v16 = vld [vmem:[%s10724_s4 + $0x148] sm:$0xf] }
 0x150   :  { %v8665_v17 = vld [vmem:[%s10724_s4 + $0x164] sm:$0xf0] }
 0x152   :  { %3205 = vmatpush.bf16.msrb.mxu3 %v7019_v25  ;;  %3180 = vmatpush.bf16.msrb.mxu1 %v6979_v33 }
 0x153   :  { %v9994_v24 = vpop.f32.mrf.mxu2  ;;  %v2516_v34 = vpop.f32.mrf.mxu0 }
 0x154   :  { %v9996_v29 = vpop.f32.mrf.mxu3  ;;  %v2529_v39 = vpop.f32.mrf.mxu1  ;;  %v6983_v34 = vor.u32 %v8723_v28, %v6982_v27  ;;  %v6855_v27 = vor.u32 %v8691_v23, %v6854_v22  ;;  %v8687_v28 = vld [vmem:[#allocation3 + $0x1c] sm:$0xf]  ;;  %v2541_v2 = vadd.f32 %v9994_v24, %v2528_v9  ;;  %v7310_v24 = vld [vmem:[%s10724_s4 + $0x1c0] sm:$0xf]  ;;  %v8653_v9 = vld [vmem:[%s10724_s4 + $0x10c] sm:$0xf] }
 0x155   :  { %v6943_v39 = vor.u32 %v8714_v37, %v6942_v36  ;;  %v6859_v31 = vor.u32 %v8687_v28, %v6856_v30  ;;  %v7214_v22 = vld [vmem:[%s10724_s4 + $0x100] sm:$0xf]  ;;  %v7216_v28 = vld [vmem:[%s10724_s4 + $0x120] sm:$0xf0]  ;;  %v7222_v30 = vld [vmem:[%s10724_s4 + $0x108] sm:$0xf] }
 0x156   :  { %3193 = vmatpush.bf16.msrb.mxu2 %v6983_v34  ;;  %3206 = vmatpush.bf16.msrb.mxu3 %v6987_v35  ;;  %v2554_v34 = vadd.f32 %v9996_v29, %v2541_v2  ;;  %v8680_v29 = vld [vmem:[%s10724_s4 + $0x1dc] sm:$0xf0]  ;;  %v7224_v2 = vld [vmem:[%s10724_s4 + $0x128] sm:$0xf0] }
 0x157   :  { %3168 = vmatpush.bf16.msrb.mxu0 %v6943_v39  ;;  %3181 = vmatpush.bf16.msrb.mxu1 %v6947_v43  ;;  %v7311_v55 = vor.u32 %v8680_v29, %v7310_v24  ;;  %v8656_v23 = vld [vmem:[%s10724_s4 + $0x11c] sm:$0xf0] }
 0x15a   :  { %3194 = vmatpush.bf16.msrb.mxu2 %v6951_v44  ;;  %3207 = vmatpush.bf16.msrb.mxu3 %v6955_v47  ;;  %v8676_v47 = vld [vmem:[%s10724_s4 + $0x1c4] sm:$0xf] }
 0x15b   :  { %v2542_v63 = vpop.f32.mrf.mxu2  ;;  %3169 = vmatpush.bf16.msrb.mxu0 %v6911_v52  ;;  %3182 = vmatpush.bf16.msrb.mxu1 %v6915_v57  ;;  %v8677_v52 = vld [vmem:[%s10724_s4 + $0x1cc] sm:$0xf]  ;;  %v7278_v57 = vld [vmem:[%s10724_s4 + $0x180] sm:$0xf] }
 0x15c   :  { %v2555_v5 = vpop.f32.mrf.mxu3  ;;  %v8698_v63 = vld [vmem:[#allocation3 + $0x6c] sm:$0xf0]  ;;  %v7323_v60 = vor.u32 %v8677_v52, %v7320_v53  ;;  %v7160_v52 = vld [vmem:[%s10724_s4 + $0xa8] sm:$0xf0] }
 0x15d   :  { %v6879_v1 = vor.u32 %v8698_v63, %v6878_v62  ;;  %v8699_v5 = vld [vmem:[#allocation3 + $0x74] sm:$0xf0]  ;;  %v7286_v63 = vld [vmem:[%s10724_s4 + $0x188] sm:$0xf] }
 0x15e   :  { %3195 = vmatpush.bf16.msrb.mxu2 %v6919_v58  ;;  %3208 = vmatpush.bf16.msrb.mxu3 %v6923_v61  ;;  %v6887_v8 = vor.u32 %v8699_v5, %v6886_v4  ;;  %v8672_v58 = vld [vmem:[%s10724_s4 + $0x19c] sm:$0xf0]  ;;  %v8668_v61 = vld [vmem:[%s10724_s4 + $0x184] sm:$0xf] }
 0x15f   :  { %3170 = vmatpush.bf16.msrb.mxu0 %v6879_v1  ;;  %3183 = vmatpush.bf16.msrb.mxu1 %v6883_v7  ;;  %v7280_v62 = vld [vmem:[%s10724_s4 + $0x1a0] sm:$0xf0]  ;;  %v8669_v1 = vld [vmem:[%s10724_s4 + $0x18c] sm:$0xf]  ;;  %v7279_v7 = vor.u32 %v8672_v58, %v7278_v57  ;;  %v8632_v57 = vld [vmem:[%s10724_s4 + $0x5c] sm:$0xf0] }
 0x162   :  { %3196 = vmatpush.bf16.msrb.mxu2 %v6887_v8  ;;  %3209 = vmatpush.bf16.msrb.mxu3 %v6891_v13  ;;  %v7283_v8 = vor.u32 %v8668_v61, %v7280_v62  ;;  %v7291_v13 = vor.u32 %v8669_v1, %v7288_v3  ;;  %v7126_v61 = vld [vmem:[%s10724_s4 + $0x48] sm:$0xf]  ;;  %v7086_v1 = vld [vmem:[%s10724_s4] sm:$0xf] }
 0x163   :  { %3171 = vmatpush.bf16.msrb.mxu0 %v6847_v20  ;;  %3184 = vmatpush.bf16.msrb.mxu1 %v6851_v26  ;;  %v7247_v20 = vor.u32 %v8664_v11, %v7246_v10  ;;  %v8633_v62 = vld [vmem:[%s10724_s4 + $0x64] sm:$0xf0] }
 0x164   :  { %v7127_v10 = vor.u32 %v8633_v62, %v7126_v61  ;;  %v8655_v61 = vld [vmem:[%s10724_s4 + $0x11c] sm:$0xf] }
 0x165   :  { %v7240_v62 = vld [vmem:[%s10724_s4 + $0x138] sm:$0xf0] }
 0x166   :  { %3197 = vmatpush.bf16.msrb.mxu2 %v6855_v27  ;;  %3210 = vmatpush.bf16.msrb.mxu3 %v6859_v31  ;;  %v8652_v27 = vld [vmem:[%s10724_s4 + $0x104] sm:$0xf]  ;;  %v8657_v31 = vld [vmem:[%s10724_s4 + $0x124] sm:$0xf0] }
 0x16b   :  { %v2566_v51 = vpop.f32.mrf.mxu0 }
 0x16c   :  { %v2579_v56 = vpop.f32.mrf.mxu1  ;;  %v2567_v35 = vadd.f32 %v2566_v51, %v2554_v34  ;;  %v8681_v51 = vld [vmem:[%s10724_s4 + $0x1e4] sm:$0xf0]  ;;  %v7182_v34 = vld [vmem:[%s10724_s4 + $0xc0] sm:$0xf] }
 0x16d   :  { %v7319_v59 = vor.u32 %v8681_v51, %v7318_v49  ;;  %v7158_v49 = vld [vmem:[%s10724_s4 + $0x88] sm:$0xf]  ;;  %v8637_v51 = vld [vmem:[%s10724_s4 + $0x8c] sm:$0xf] }
 0x16e   :  { %v2580_v36 = vadd.f32 %v2579_v56, %v2567_v35  ;;  %v7315_v56 = vor.u32 %v8676_v47, %v7312_v48  ;;  %v8648_v35 = vld [vmem:[%s10724_s4 + $0xdc] sm:$0xf0]  ;;  %v8636_v47 = vld [vmem:[%s10724_s4 + $0x84] sm:$0xf] }
 0x16f   :  { %v7152_v48 = vld [vmem:[%s10724_s4 + $0xa0] sm:$0xf0] }
 0x173   :  { %v2592_v12 = vpop.f32.mrf.mxu2  ;;  %v2568_v19 = vpop.f32.mrf.mxu0 }
 0x174   :  { %v2605_v15 = vpop.f32.mrf.mxu3  ;;  %v2581_v25 = vpop.f32.mrf.mxu1  ;;  %v2593_v37 = vadd.f32 %v2592_v12, %v2580_v36  ;;  %v7287_v12 = vor.u32 %v8673_v0, %v7286_v63  ;;  %v7256_v19 = vld [vmem:[%s10724_s4 + $0x168] sm:$0xf0]  ;;  %v7223_v36 = vor.u32 %v8657_v31, %v7222_v30  ;;  %v2661_v30 = vld [vmem:[%s10720_s0] sm:$0x3] }
 0x175   :  { %v7255_v25 = vor.u32 %v8665_v17, %v7254_v16  ;;  %v7259_v26 = vor.u32 %v8661_v18, %v7256_v19  ;;  %v8629_v63 = vld [vmem:[%s10724_s4 + $0x4c] sm:$0xf]  ;;  %v7326_v16 = vld [vmem:[%s10724_s4 + $0x1d0] sm:$0xf]  ;;  %v8678_v18 = vld [vmem:[%s10724_s4 + $0x1d4] sm:$0xf] }
 0x176   :  { %v2606_v38 = vadd.f32 %v2605_v15, %v2593_v37  ;;  %v7248_v15 = vld [vmem:[%s10724_s4 + $0x160] sm:$0xf0]  ;;  %v7227_v37 = vor.u32 %v8653_v9, %v7224_v2  ;;  %v7128_v0 = vld [vmem:[%s10724_s4 + $0x68] sm:$0xf0]  ;;  %v8682_v17 = vld [vmem:[%s10724_s4 + $0x1ec] sm:$0xf0] }
 0x177   :  { %v7251_v21 = vor.u32 %v8660_v14, %v7248_v15  ;;  %v7131_v11 = vor.u32 %v8629_v63, %v7128_v0  ;;  %v8621_v14 = vld [vmem:[%s10724_s4 + $0xc] sm:$0xf]  ;;  %v7328_v19 = vld [vmem:[%s10724_s4 + $0x1f0] sm:$0xf0]  ;;  %v7327_v31 = vor.u32 %v8682_v17, %v7326_v16  ;;  %v7294_v2 = vld [vmem:[%s10724_s4 + $0x190] sm:$0xf] }
 0x178   :  { %v7096_v15 = vld [vmem:[%s10724_s4 + $0x28] sm:$0xf0]  ;;  %v7331_v9 = vor.u32 %v8678_v18, %v7328_v19  ;;  %v7166_v16 = vld [vmem:[%s10724_s4 + $0x90] sm:$0xf] }
 0x179   :  { %v8642_v17 = vld [vmem:[%s10724_s4 + $0xac] sm:$0xf0] }
 0x17b   :  { %v2594_v32 = vpop.f32.mrf.mxu2 }
 0x17c   :  { %v2607_v33 = vpop.f32.mrf.mxu3  ;;  %v7215_v32 = vor.u32 %v8656_v23, %v7214_v22  ;;  %v8683_v23 = vld [vmem:[%s10724_s4 + $0x1f4] sm:$0xf0] }
 0x17d   :  { %v7219_v33 = vor.u32 %v8652_v27, %v7216_v28  ;;  %v7099_v28 = vor.u32 %v8621_v14, %v7096_v15 }
 0x18b   :  { %v2618_v39 = vpop.f32.mrf.mxu0 }
 0x18c   :  { %v2631_v40 = vpop.f32.mrf.mxu1  ;;  %v2619_v41 = vadd.f32 %v2618_v39, %v2606_v38  ;;  %v8644_v38 = vld [vmem:[%s10724_s4 + $0xc4] sm:$0xf] }
 0x18d   :  { %v7184_v39 = vld [vmem:[%s10724_s4 + $0xe0] sm:$0xf0] }
 0x18e   :  { %v2632_v42 = vadd.f32 %v2631_v40, %v2619_v41  ;;  %v7190_v40 = vld [vmem:[%s10724_s4 + $0xc8] sm:$0xf] }
 0x18f   :  { %v8649_v41 = vld [vmem:[%s10724_s4 + $0xe4] sm:$0xf0] }
 0x190   :  { %v7191_v24 = vor.u32 %v8649_v41, %v7190_v40  ;;  %v8671_v40 = vld [vmem:[%s10724_s4 + $0x19c] sm:$0xf] }
 0x191   :  { %v7304_v41 = vld [vmem:[%s10724_s4 + $0x1b8] sm:$0xf0] }
 0x193   :  { %v2644_v43 = vpop.f32.mrf.mxu2  ;;  %v2620_v45 = vpop.f32.mrf.mxu0 }
 0x194   :  { %v2657_v6 = vpop.f32.mrf.mxu3  ;;  %v2645_v44 = vadd.f32 %v2644_v43, %v2632_v42  ;;  %v2633_v46 = vpop.f32.mrf.mxu1  ;;  %v8645_v42 = vld [vmem:[%s10724_s4 + $0xcc] sm:$0xf]  ;;  %v7150_v45 = vld [vmem:[%s10724_s4 + $0x80] sm:$0xf] }
 0x195   :  { %v7192_v43 = vld [vmem:[%s10724_s4 + $0xe8] sm:$0xf0]  ;;  %v8640_v46 = vld [vmem:[%s10724_s4 + $0x9c] sm:$0xf0] }
 0x196   :  { %v2658_v50 = vadd.f32 %v2657_v6, %v2645_v44  ;;  %v7183_v6 = vor.u32 %v8648_v35, %v7182_v34  ;;  %v7187_v44 = vor.u32 %v8644_v38, %v7184_v39  ;;  %v7195_v29 = vor.u32 %v8645_v42, %v7192_v43  ;;  %v8670_v35 = vld [vmem:[%s10724_s4 + $0x194] sm:$0xf]  ;;  %v8675_v39 = vld [vmem:[%s10724_s4 + $0x1b4] sm:$0xf0] }
 0x197   :  { %v7151_v53 = vor.u32 %v8640_v46, %v7150_v45  ;;  %v10247_v38 = vpack.c.bf16 %v2661_v30, %v2661_v30  ;;  %v7307_v46 = vor.u32 %v8671_v40, %v7304_v41  ;;  %v7134_v30 = vld [vmem:[%s10724_s4 + $0x50] sm:$0xf] }
 0x198   :  { %v10027_v54 = vpack.c.bf16 %v2658_v50, %v2658_v50  ;;  %v8641_v50 = vld [vmem:[%s10724_s4 + $0xa4] sm:$0xf0]  ;;  %v7102_v41 = vld [vmem:[%s10724_s4 + $0x10] sm:$0xf] }
 0x199   :  { %v7159_v58 = vor.u32 %v8641_v50, %v7158_v49  ;;  %v8663_v49 = vld [vmem:[%s10724_s4 + $0x15c] sm:$0xf] }
 0x19a   :  { %3120 = vmatmul.bf16.vlgmr.msra.gmra.mxu0 %v10027_v54  ;;  %3133 = vmatmul.bf16.vlgmr.msra.gmra.mxu1 %v10027_v54  ;;  %v7272_v50 = vld [vmem:[%s10724_s4 + $0x178] sm:$0xf0] }
 0x19b   :  { %3146 = vmatmul.bf16.vlgmr.msra.gmra.mxu2 %v10027_v54  ;;  %3159 = vmatmul.bf16.vlgmr.msra.gmra.mxu3 %v10027_v54  ;;  %v2646_v4 = vpop.f32.mrf.mxu2 }
 0x19c   :  { %v2659_v5 = vpop.f32.mrf.mxu3  ;;  %3536 = vmatpush.bf16.msra.mxu0 %v7311_v55  ;;  %3549 = vmatpush.bf16.msra.mxu1 %v7315_v56  ;;  %v7155_v55 = vor.u32 %v8636_v47, %v7152_v48  ;;  %v7118_v56 = vld [vmem:[%s10724_s4 + $0x40] sm:$0xf]  ;;  %v7270_v47 = vld [vmem:[%s10724_s4 + $0x158] sm:$0xf] }
 0x19d   :  { %3562 = vmatpush.bf16.msra.mxu2 %v7319_v59  ;;  %3575 = vmatpush.bf16.msra.mxu3 %v7323_v60  ;;  %v7163_v59 = vor.u32 %v8637_v51, %v7160_v52  ;;  %v7120_v60 = vld [vmem:[%s10724_s4 + $0x60] sm:$0xf0]  ;;  %v7119_v3 = vor.u32 %v8632_v57, %v7118_v56  ;;  %v8624_v5 = vld [vmem:[%s10724_s4 + $0x1c] sm:$0xf0]  ;;  %v8667_v48 = vld [vmem:[%s10724_s4 + $0x174] sm:$0xf0]  ;;  %v7275_v57 = vor.u32 %v8663_v49, %v7272_v50 }
 0x19e   :  { %v7271_v56 = vor.u32 %v8667_v48, %v7270_v47  ;;  %v7112_v47 = vld [vmem:[%s10724_s4 + $0x38] sm:$0xf0]  ;;  %v7454_v48 = vld [vmem:[#allocation5 + $0xe0] sm:$0xf] }
 0x19f   :  { %v8778_v49 = vld [vmem:[#allocation5 + $0xec] sm:$0xf0]  ;;  %v7582_v50 = vld [vmem:[#allocation5 + $0x1e0] sm:$0xf] }
 0x1a0   :  { %3537 = vmatpush.bf16.msra.mxu0 %v7279_v7  ;;  %3550 = vmatpush.bf16.msra.mxu1 %v7283_v8  ;;  %v8620_v7 = vld [vmem:[%s10724_s4 + $0x4] sm:$0xf] }
 0x1a1   :  { %3563 = vmatpush.bf16.msra.mxu2 %v7287_v12  ;;  %3576 = vmatpush.bf16.msra.mxu3 %v7291_v13  ;;  %v7088_v8 = vld [vmem:[%s10724_s4 + $0x20] sm:$0xf0]  ;;  %v7094_v12 = vld [vmem:[%s10724_s4 + $0x8] sm:$0xf] }
 0x1a2   :  { %v8625_v13 = vld [vmem:[%s10724_s4 + $0x24] sm:$0xf0]  ;;  %v7091_v22 = vor.u32 %v8620_v7, %v7088_v8  ;;  %v8646_v7 = vld [vmem:[%s10724_s4 + $0xd4] sm:$0xf] }
 0x1a3   :  { %v7095_v27 = vor.u32 %v8625_v13, %v7094_v12  ;;  %v7200_v8 = vld [vmem:[%s10724_s4 + $0xf0] sm:$0xf0]  ;;  %v8647_v12 = vld [vmem:[%s10724_s4 + $0xdc] sm:$0xf] }
 0x1a4   :  { %3538 = vmatpush.bf16.msra.mxu0 %v7247_v20  ;;  %3551 = vmatpush.bf16.msra.mxu1 %v7251_v21  ;;  %v7334_v20 = vld [vmem:[%s10724_s4 + $0x1d8] sm:$0xf]  ;;  %v7087_v21 = vor.u32 %v8624_v5, %v7086_v1  ;;  %v7198_v1 = vld [vmem:[%s10724_s4 + $0xd0] sm:$0xf]  ;;  %v7243_v5 = vor.u32 %v8655_v61, %v7240_v62  ;;  %v7208_v13 = vld [vmem:[%s10724_s4 + $0xf8] sm:$0xf0]  ;;  %v7203_v15 = vor.u32 %v8646_v7, %v7200_v8 }
 0x1a5   :  { %3564 = vmatpush.bf16.msra.mxu2 %v7255_v25  ;;  %3577 = vmatpush.bf16.msra.mxu3 %v7259_v26  ;;  %v8679_v25 = vld [vmem:[%s10724_s4 + $0x1dc] sm:$0xf]  ;;  %v7211_v19 = vor.u32 %v8647_v12, %v7208_v13  ;;  %v7838_v61 = vld [vmem:[#allocation5 + $0x3e0] sm:$0xf] }
 0x1a6   :  { %v7336_v26 = vld [vmem:[%s10724_s4 + $0x1f8] sm:$0xf0]  ;;  %v7694_v7 = vld [vmem:[#allocation5 + $0x2c0] sm:$0xf] }
 0x1a7   :  { %v7339_v34 = vor.u32 %v8679_v25, %v7336_v26  ;;  %v8639_v25 = vld [vmem:[%s10724_s4 + $0x9c] sm:$0xf]  ;;  %v7822_v12 = vld [vmem:[#allocation5 + $0x3c0] sm:$0xf] }
 0x1a8   :  { %3539 = vmatpush.bf16.msra.mxu0 %v7215_v32  ;;  %3552 = vmatpush.bf16.msra.mxu1 %v7219_v33  ;;  %v8674_v32 = vld [vmem:[%s10724_s4 + $0x1ac] sm:$0xf0]  ;;  %v7335_v33 = vor.u32 %v8683_v23, %v7334_v20  ;;  %v8638_v20 = vld [vmem:[%s10724_s4 + $0x94] sm:$0xf]  ;;  %v8643_v23 = vld [vmem:[%s10724_s4 + $0xb4] sm:$0xf0] }
 0x1a9   :  { %3565 = vmatpush.bf16.msra.mxu2 %v7223_v36  ;;  %3578 = vmatpush.bf16.msra.mxu3 %v7227_v37  ;;  %v7296_v36 = vld [vmem:[%s10724_s4 + $0x1b0] sm:$0xf0]  ;;  %v7302_v37 = vld [vmem:[%s10724_s4 + $0x198] sm:$0xf]  ;;  %v7295_v42 = vor.u32 %v8674_v32, %v7294_v2  ;;  %v7176_v26 = vld [vmem:[%s10724_s4 + $0xb8] sm:$0xf0] }
 0x1aa   :  { %3172 = vmatmul.bf16.vlgmr.msrb.gmra.mxu0 %v10027_v54  ;;  %3185 = vmatmul.bf16.vlgmr.msrb.gmra.mxu1 %v10027_v54  ;;  %v7299_v43 = vor.u32 %v8670_v35, %v7296_v36  ;;  %v7303_v45 = vor.u32 %v8675_v39, %v7302_v37  ;;  %v7179_v2 = vor.u32 %v8639_v25, %v7176_v26  ;;  %v8630_v32 = vld [vmem:[%s10724_s4 + $0x54] sm:$0xf]  ;;  %v8635_v35 = vld [vmem:[%s10724_s4 + $0x74] sm:$0xf0]  ;;  %v8631_v36 = vld [vmem:[%s10724_s4 + $0x5c] sm:$0xf] }
 0x1ab   :  { %3198 = vmatmul.bf16.vlgmr.msrb.gmra.mxu2 %v10027_v54  ;;  %3211 = vmatmul.bf16.vlgmr.msrb.gmra.mxu3 %v10027_v54  ;;  %v8628_v54 = vld [vmem:[%s10724_s4 + $0x44] sm:$0xf]  ;;  %v7144_v37 = vld [vmem:[%s10724_s4 + $0x78] sm:$0xf0]  ;;  %v7806_v25 = vld [vmem:[#allocation5 + $0x3a0] sm:$0xf] }
 0x1ac   :  { %3540 = vmatpush.bf16.msra.mxu0 %v7183_v6  ;;  %3553 = vmatpush.bf16.msra.mxu1 %v7187_v44  ;;  %v7123_v4 = vor.u32 %v8628_v54, %v7120_v60  ;;  %v7262_v6 = vld [vmem:[%s10724_s4 + $0x150] sm:$0xf]  ;;  %v7238_v54 = vld [vmem:[%s10724_s4 + $0x118] sm:$0xf] }
 0x1ad   :  { %3566 = vmatpush.bf16.msra.mxu2 %v7191_v24  ;;  %3579 = vmatpush.bf16.msra.mxu3 %v7195_v29  ;;  %v8666_v44 = vld [vmem:[%s10724_s4 + $0x16c] sm:$0xf0]  ;;  %v8662_v24 = vld [vmem:[%s10724_s4 + $0x154] sm:$0xf]  ;;  %v8659_v60 = vld [vmem:[%s10724_s4 + $0x134] sm:$0xf0] }
 0x1ae   :  { %v7264_v29 = vld [vmem:[%s10724_s4 + $0x170] sm:$0xf0]  ;;  %v7263_v51 = vor.u32 %v8666_v44, %v7262_v6  ;;  %v7147_v44 = vor.u32 %v8631_v36, %v7144_v37  ;;  %v8874_v62 = vld [vmem:[#allocation5 + $0x3ec] sm:$0xf0] }
 0x1af   :  { %v7267_v52 = vor.u32 %v8662_v24, %v7264_v29  ;;  %v8627_v24 = vld [vmem:[%s10724_s4 + $0x34] sm:$0xf0]  ;;  %v8623_v29 = vld [vmem:[%s10724_s4 + $0x1c] sm:$0xf] }
 0x1b0   :  { %3541 = vmatpush.bf16.msra.mxu0 %v7151_v53  ;;  %3554 = vmatpush.bf16.msra.mxu1 %v7155_v55  ;;  %v7230_v53 = vld [vmem:[%s10724_s4 + $0x110] sm:$0xf]  ;;  %v8870_v13 = vld [vmem:[#allocation5 + $0x3cc] sm:$0xf0] }
 0x1b1   :  { %3567 = vmatpush.bf16.msra.mxu2 %v7159_v58  ;;  %3580 = vmatpush.bf16.msra.mxu3 %v7163_v59  ;;  %v8658_v55 = vld [vmem:[%s10724_s4 + $0x12c] sm:$0xf0]  ;;  %v8654_v58 = vld [vmem:[%s10724_s4 + $0x114] sm:$0xf]  ;;  %v8866_v26 = vld [vmem:[#allocation5 + $0x3ac] sm:$0xf0] }
 0x1b2   :  { %v7232_v59 = vld [vmem:[%s10724_s4 + $0x130] sm:$0xf0]  ;;  %v7231_v63 = vor.u32 %v8658_v55, %v7230_v53 }
 0x1b3   :  { %v7235_v0 = vor.u32 %v8654_v58, %v7232_v59  ;;  %v7710_v58 = vld [vmem:[#allocation5 + $0x2e0] sm:$0xf]  ;;  %v7455_v59 = vor.u32 %v8778_v49, %v7454_v48  ;;  %v8826_v49 = vld [vmem:[#allocation5 + $0x26c] sm:$0xf0] }
 0x1b4   :  { %3542 = vmatpush.bf16.msra.mxu0 %v7119_v3  ;;  %3555 = vmatpush.bf16.msra.mxu1 %v7123_v4  ;;  %v8650_v3 = vld [vmem:[%s10724_s4 + $0xec] sm:$0xf0]  ;;  %v7239_v4 = vor.u32 %v8659_v60, %v7238_v54  ;;  %v8842_v60 = vld [vmem:[#allocation5 + $0x2ec] sm:$0xf0] }
 0x1b5   :  { %3568 = vmatpush.bf16.msra.mxu2 %v7127_v10  ;;  %3581 = vmatpush.bf16.msra.mxu3 %v7131_v11  ;;  %v7206_v10 = vld [vmem:[%s10724_s4 + $0xd8] sm:$0xf]  ;;  %v7199_v14 = vor.u32 %v8650_v3, %v7198_v1  ;;  %v7711_v3 = vor.u32 %v8842_v60, %v7710_v58 }
 0x1b6   :  { %v8651_v11 = vld [vmem:[%s10724_s4 + $0xf4] sm:$0xf0] }
 0x1b7   :  { %v7207_v18 = vor.u32 %v8651_v11, %v7206_v10  ;;  %v8806_v1 = vld [vmem:[#allocation5 + $0x1cc] sm:$0xf0] }
 0x1b8   :  { %3543 = vmatpush.bf16.msra.mxu0 %v7087_v21  ;;  %3556 = vmatpush.bf16.msra.mxu1 %v7091_v22  ;;  %v7168_v21 = vld [vmem:[%s10724_s4 + $0xb0] sm:$0xf0]  ;;  %v7174_v22 = vld [vmem:[%s10724_s4 + $0x98] sm:$0xf] }
 0x1b9   :  { %3569 = vmatpush.bf16.msra.mxu2 %v7095_v27  ;;  %3582 = vmatpush.bf16.msra.mxu3 %v7099_v28  ;;  %v7167_v27 = vor.u32 %v8642_v17, %v7166_v16  ;;  %v7171_v28 = vor.u32 %v8638_v20, %v7168_v21  ;;  %v8838_v11 = vld [vmem:[#allocation5 + $0x2cc] sm:$0xf0]  ;;  %v7678_v20 = vld [vmem:[#allocation5 + $0x2a0] sm:$0xf] }
 0x1ba   :  { %v8802_v16 = vld [vmem:[#allocation5 + $0x1ac] sm:$0xf0]  ;;  %v7695_v17 = vor.u32 %v8838_v11, %v7694_v7  ;;  %v7966_v11 = vld [vmem:[#allocation5 + $0x4e0] sm:$0xf] }
 0x1bb   :  { %3544 = vmatmul.bf16.vlgmr.msra.gmra.mxu0 %v10247_v38  ;;  %3557 = vmatmul.bf16.vlgmr.msra.gmra.mxu1 %v10247_v38  ;;  %v8822_v60 = vld [vmem:[#allocation5 + $0x24c] sm:$0xf0] }
 0x1bc   :  { %3588 = vmatpush.bf16.msrb.mxu0 %v7327_v31  ;;  %3601 = vmatpush.bf16.msrb.mxu1 %v7331_v9  ;;  %v8634_v31 = vld [vmem:[%s10724_s4 + $0x6c] sm:$0xf0]  ;;  %v7175_v9 = vor.u32 %v8643_v23, %v7174_v22  ;;  %v8834_v23 = vld [vmem:[#allocation5 + $0x2ac] sm:$0xf0] }
 0x1bd   :  { %3614 = vmatpush.bf16.msrb.mxu2 %v7335_v33  ;;  %3627 = vmatpush.bf16.msrb.mxu3 %v7339_v34  ;;  %v7136_v33 = vld [vmem:[%s10724_s4 + $0x70] sm:$0xf0]  ;;  %v7142_v34 = vld [vmem:[%s10724_s4 + $0x58] sm:$0xf]  ;;  %v7135_v39 = vor.u32 %v8634_v31, %v7134_v30  ;;  %v7679_v31 = vor.u32 %v8834_v23, %v7678_v20  ;;  %v7742_v20 = vld [vmem:[#allocation5 + $0x320] sm:$0xf] }
 0x1be   :  { %3570 = vmatmul.bf16.vlgmr.msra.gmra.mxu2 %v10247_v38  ;;  %3583 = vmatmul.bf16.vlgmr.msra.gmra.mxu3 %v10247_v38  ;;  %v7139_v40 = vor.u32 %v8630_v32, %v7136_v33  ;;  %v7143_v6 = vor.u32 %v8635_v35, %v7142_v34  ;;  %v8798_v30 = vld [vmem:[#allocation5 + $0x18c] sm:$0xf0]  ;;  %v7390_v32 = vld [vmem:[#allocation5 + $0x60] sm:$0xf] }
 0x1bf   :  { %v8762_v33 = vld [vmem:[#allocation5 + $0x6c] sm:$0xf0]  ;;  %v7518_v34 = vld [vmem:[#allocation5 + $0x160] sm:$0xf] }
 0x1c0   :  { %3589 = vmatpush.bf16.msrb.mxu0 %v7295_v42  ;;  %3602 = vmatpush.bf16.msrb.mxu1 %v7299_v43  ;;  %v8626_v42 = vld [vmem:[%s10724_s4 + $0x2c] sm:$0xf0]  ;;  %v8622_v43 = vld [vmem:[%s10724_s4 + $0x14] sm:$0xf]  ;;  %v8794_v35 = vld [vmem:[#allocation5 + $0x16c] sm:$0xf0]  ;;  %v7391_v36 = vor.u32 %v8762_v33, %v7390_v32 }
 0x1c1   :  { %3615 = vmatpush.bf16.msrb.mxu2 %v7303_v45  ;;  %3628 = vmatpush.bf16.msrb.mxu3 %v7307_v46  ;;  %v7104_v45 = vld [vmem:[%s10724_s4 + $0x30] sm:$0xf0]  ;;  %v7110_v46 = vld [vmem:[%s10724_s4 + $0x18] sm:$0xf]  ;;  %v7519_v37 = vor.u32 %v8794_v35, %v7518_v34  ;;  %v7950_v23 = vld [vmem:[#allocation5 + $0x4c0] sm:$0xf] }
 0x1c2   :  { %v7107_v53 = vor.u32 %v8622_v43, %v7104_v45  ;;  %v7111_v55 = vor.u32 %v8627_v24, %v7110_v46  ;;  %v8862_v43 = vld [vmem:[#allocation5 + $0x38c] sm:$0xf0]  ;;  %v7502_v24 = vld [vmem:[#allocation5 + $0x140] sm:$0xf] }
 0x1c3   :  { %v8782_v7 = vld [vmem:[#allocation5 + $0x10c] sm:$0xf0]  ;;  %v8222_v33 = vld [vmem:[#allocation5 + $0x6e0] sm:$0xf] }
 0x1c4   :  { %3590 = vmatpush.bf16.msrb.mxu0 %v7263_v51  ;;  %3603 = vmatpush.bf16.msrb.mxu1 %v7267_v52  ;;  %v8810_v51 = vld [vmem:[#allocation5 + $0x1ec] sm:$0xf0]  ;;  %v7103_v52 = vor.u32 %v8626_v42, %v7102_v41  ;;  %v7790_v41 = vld [vmem:[#allocation5 + $0x380] sm:$0xf] }
 0x1c5   :  { %3616 = vmatpush.bf16.msrb.mxu2 %v7271_v56  ;;  %3629 = vmatpush.bf16.msrb.mxu3 %v7275_v57  ;;  %v7115_v56 = vor.u32 %v8623_v29, %v7112_v47  ;;  %v7438_v57 = vld [vmem:[#allocation5 + $0xc0] sm:$0xf]  ;;  %v7583_v54 = vor.u32 %v8810_v51, %v7582_v50  ;;  %v7791_v45 = vor.u32 %v8862_v43, %v7790_v41  ;;  %v8790_v29 = vld [vmem:[#allocation5 + $0x14c] sm:$0xf0] }
 0x1c6   :  { %v7646_v47 = vld [vmem:[#allocation5 + $0x260] sm:$0xf]  ;;  %v7503_v48 = vor.u32 %v8790_v29, %v7502_v24  ;;  %v8858_v51 = vld [vmem:[#allocation5 + $0x36c] sm:$0xf0] }
 0x1c7   :  { %v7774_v50 = vld [vmem:[#allocation5 + $0x360] sm:$0xf]  ;;  %v8846_v32 = vld [vmem:[#allocation5 + $0x30c] sm:$0xf0] }
 0x1c8   :  { %3591 = vmatpush.bf16.msrb.mxu0 %v7231_v63  ;;  %3604 = vmatpush.bf16.msrb.mxu1 %v7235_v0  ;;  %v8774_v63 = vld [vmem:[#allocation5 + $0xcc] sm:$0xf0]  ;;  %v7566_v0 = vld [vmem:[#allocation5 + $0x1c0] sm:$0xf] }
 0x1c9   :  { %3617 = vmatpush.bf16.msrb.mxu2 %v7239_v4  ;;  %3630 = vmatpush.bf16.msrb.mxu3 %v7243_v5  ;;  %v7839_v4 = vor.u32 %v8874_v62, %v7838_v61  ;;  %v7422_v5 = vld [vmem:[#allocation5 + $0xa0] sm:$0xf]  ;;  %v7439_v8 = vor.u32 %v8774_v63, %v7438_v57  ;;  %v7567_v10 = vor.u32 %v8806_v1, %v7566_v0  ;;  %v8854_v0 = vld [vmem:[#allocation5 + $0x34c] sm:$0xf0] }
 0x1ca   :  { %v7486_v57 = vld [vmem:[#allocation5 + $0x120] sm:$0xf]  ;;  %v8970_v35 = vld [vmem:[#allocation5 + $0x6ec] sm:$0xf0] }
 0x1cb   :  { %v7758_v63 = vld [vmem:[#allocation5 + $0x340] sm:$0xf]  ;;  %v8966_v24 = vld [vmem:[#allocation5 + $0x6cc] sm:$0xf0] }
 0x1cc   :  { %3592 = vmatpush.bf16.msrb.mxu0 %v7199_v14  ;;  %3605 = vmatpush.bf16.msrb.mxu1 %v7203_v15  ;;  %v8770_v14 = vld [vmem:[#allocation5 + $0xac] sm:$0xf0]  ;;  %v7550_v15 = vld [vmem:[#allocation5 + $0x1a0] sm:$0xf] }
 0x1cd   :  { %3618 = vmatpush.bf16.msrb.mxu2 %v7207_v18  ;;  %3631 = vmatpush.bf16.msrb.mxu3 %v7211_v19  ;;  %v7823_v18 = vor.u32 %v8870_v13, %v7822_v12  ;;  %v7406_v19 = vld [vmem:[#allocation5 + $0x80] sm:$0xf]  ;;  %v7423_v21 = vor.u32 %v8770_v14, %v7422_v5  ;;  %v7551_v22 = vor.u32 %v8802_v16, %v7550_v15  ;;  %v8906_v12 = vld [vmem:[#allocation5 + $0x4ec] sm:$0xf0] }
 0x1ce   :  { %v7342_v1 = vld [vmem:[#allocation5] sm:$0xf]  ;;  %v7967_v14 = vor.u32 %v8906_v12, %v7966_v11  ;;  %v8938_v15 = vld [vmem:[#allocation5 + $0x5ec] sm:$0xf0] }
 0x1cf   :  { %v7470_v5 = vld [vmem:[#allocation5 + $0x100] sm:$0xf] }
 0x1d0   :  { %3593 = vmatpush.bf16.msrb.mxu0 %v7167_v27  ;;  %3606 = vmatpush.bf16.msrb.mxu1 %v7171_v28  ;;  %v8766_v27 = vld [vmem:[#allocation5 + $0x8c] sm:$0xf0]  ;;  %v7534_v28 = vld [vmem:[#allocation5 + $0x180] sm:$0xf] }
 0x1d1   :  { %3619 = vmatpush.bf16.msrb.mxu2 %v7175_v9  ;;  %3632 = vmatpush.bf16.msrb.mxu3 %v7179_v2  ;;  %v7407_v9 = vor.u32 %v8766_v27, %v7406_v19  ;;  %v7535_v2 = vor.u32 %v8798_v30, %v7534_v28  ;;  %v8094_v13 = vld [vmem:[#allocation5 + $0x5e0] sm:$0xf]  ;;  %v8934_v28 = vld [vmem:[#allocation5 + $0x5cc] sm:$0xf0] }
 0x1d2   :  { %v7614_v16 = vld [vmem:[#allocation5 + $0x220] sm:$0xf] }
 0x1d3   :  { %v7598_v30 = vld [vmem:[#allocation5 + $0x200] sm:$0xf] }
 0x1d4   :  { %3594 = vmatpush.bf16.msrb.mxu0 %v7135_v39  ;;  %3607 = vmatpush.bf16.msrb.mxu1 %v7139_v40  ;;  %v7662_v39 = vld [vmem:[#allocation5 + $0x280] sm:$0xf]  ;;  %v8830_v40 = vld [vmem:[#allocation5 + $0x28c] sm:$0xf0] }
 0x1d5   :  { %3620 = vmatpush.bf16.msrb.mxu2 %v7143_v6  ;;  %3633 = vmatpush.bf16.msrb.mxu3 %v7147_v44  ;;  %v7663_v42 = vor.u32 %v8830_v40, %v7662_v39  ;;  %v7374_v6 = vld [vmem:[#allocation5 + $0x40] sm:$0xf]  ;;  %v8758_v44 = vld [vmem:[#allocation5 + $0x4c] sm:$0xf0]  ;;  %v8223_v39 = vor.u32 %v8970_v35, %v8222_v33 }
 0x1d6   :  { %v7375_v46 = vor.u32 %v8758_v44, %v7374_v6  ;;  %v7934_v41 = vld [vmem:[#allocation5 + $0x4a0] sm:$0xf]  ;;  %v8930_v44 = vld [vmem:[#allocation5 + $0x5ac] sm:$0xf0] }
 0x1d7   :  { %v8062_v43 = vld [vmem:[#allocation5 + $0x5a0] sm:$0xf]  ;;  %v8950_v35 = vld [vmem:[#allocation5 + $0x64c] sm:$0xf0] }
 0x1d8   :  { %3595 = vmatpush.bf16.msrb.mxu0 %v7103_v52  ;;  %3608 = vmatpush.bf16.msrb.mxu1 %v7107_v53  ;;  %v7647_v52 = vor.u32 %v8826_v49, %v7646_v47  ;;  %v7775_v53 = vor.u32 %v8858_v51, %v7774_v50  ;;  %v8334_v29 = vld [vmem:[#allocation5 + $0x7c0] sm:$0xf]  ;;  %v8894_v50 = vld [vmem:[#allocation5 + $0x48c] sm:$0xf0] }
 0x1d9   :  { %3621 = vmatpush.bf16.msrb.mxu2 %v7111_v55  ;;  %3634 = vmatpush.bf16.msrb.mxu3 %v7115_v56  ;;  %v7358_v55 = vld [vmem:[#allocation5 + $0x20] sm:$0xf]  ;;  %v8754_v56 = vld [vmem:[#allocation5 + $0x2c] sm:$0xf0] }
 0x1da   :  { %v7359_v58 = vor.u32 %v8754_v56, %v7358_v55  ;;  %v7918_v49 = vld [vmem:[#allocation5 + $0x480] sm:$0xf]  ;;  %v8926_v55 = vld [vmem:[#allocation5 + $0x58c] sm:$0xf0] }
 0x1db   :  { %3596 = vmatmul.bf16.vlgmr.msrb.gmra.mxu0 %v10247_v38  ;;  %3609 = vmatmul.bf16.vlgmr.msrb.gmra.mxu1 %v10247_v38  ;;  %v8190_v56 = vld [vmem:[#allocation5 + $0x6a0] sm:$0xf] }
 0x1dc   :  { %5228 = vmatpush.bf16.msra.mxu0 %v7455_v59  ;;  %5241 = vmatpush.bf16.msra.mxu1 %v7583_v54  ;;  %v8786_v59 = vld [vmem:[#allocation5 + $0x12c] sm:$0xf0]  ;;  %v7630_v54 = vld [vmem:[#allocation5 + $0x240] sm:$0xf] }
 0x1dd   :  { %3622 = vmatmul.bf16.vlgmr.msrb.gmra.mxu2 %v10247_v38  ;;  %3635 = vmatmul.bf16.vlgmr.msrb.gmra.mxu3 %v10247_v38  ;;  %v7807_v38 = vor.u32 %v8866_v26, %v7806_v25  ;;  %v7487_v61 = vor.u32 %v8786_v59, %v7486_v57  ;;  %v7631_v62 = vor.u32 %v8822_v60, %v7630_v54  ;;  %v8902_v25 = vld [vmem:[#allocation5 + $0x4cc] sm:$0xf0]  ;;  %v8078_v26 = vld [vmem:[#allocation5 + $0x5c0] sm:$0xf] }
 0x1de   :  { %5254 = vmatpush.bf16.msra.mxu2 %v7711_v3  ;;  %5267 = vmatpush.bf16.msra.mxu3 %v7839_v4  ;;  %v7759_v3 = vor.u32 %v8854_v0, %v7758_v63  ;;  %v8750_v4 = vld [vmem:[#allocation5 + $0xc] sm:$0xf0]  ;;  %v7951_v27 = vor.u32 %v8902_v25, %v7950_v23  ;;  %v8318_v59 = vld [vmem:[#allocation5 + $0x7a0] sm:$0xf] }
 0x1df   :  { %v8994_v54 = vld [vmem:[#allocation5 + $0x7ac] sm:$0xf0]  ;;  %v8030_v0 = vld [vmem:[#allocation5 + $0x560] sm:$0xf] }
 0x1e0   :  { %5229 = vmatpush.bf16.msra.mxu0 %v7439_v8  ;;  %5242 = vmatpush.bf16.msra.mxu1 %v7567_v10  ;;  %v7343_v8 = vor.u32 %v8750_v4, %v7342_v1  ;;  %v7471_v10 = vor.u32 %v8782_v7, %v7470_v5  ;;  %v8890_v63 = vld [vmem:[#allocation5 + $0x46c] sm:$0xf0]  ;;  %v8174_v5 = vld [vmem:[#allocation5 + $0x680] sm:$0xf] }
 0x1e1   :  { %v8958_v7 = vld [vmem:[#allocation5 + $0x68c] sm:$0xf0]  ;;  %v8286_v25 = vld [vmem:[#allocation5 + $0x760] sm:$0xf] }
 0x1e2   :  { %5255 = vmatpush.bf16.msra.mxu2 %v7695_v17  ;;  %5268 = vmatpush.bf16.msra.mxu3 %v7823_v18  ;;  %v8818_v17 = vld [vmem:[#allocation5 + $0x22c] sm:$0xf0]  ;;  %v8095_v18 = vor.u32 %v8938_v15, %v8094_v13  ;;  %v8175_v12 = vor.u32 %v8958_v7, %v8174_v5  ;;  %v7886_v15 = vld [vmem:[#allocation5 + $0x440] sm:$0xf] }
 0x1e3   :  { %v7615_v19 = vor.u32 %v8818_v17, %v7614_v16  ;;  %v8990_v13 = vld [vmem:[#allocation5 + $0x78c] sm:$0xf0]  ;;  %v8014_v17 = vld [vmem:[#allocation5 + $0x540] sm:$0xf] }
 0x1e4   :  { %5230 = vmatpush.bf16.msra.mxu0 %v7423_v21  ;;  %5243 = vmatpush.bf16.msra.mxu1 %v7551_v22  ;;  %v8850_v21 = vld [vmem:[#allocation5 + $0x32c] sm:$0xf0] }
 0x1e5   :  { %v7743_v22 = vor.u32 %v8850_v21, %v7742_v20  ;;  %v8886_v16 = vld [vmem:[#allocation5 + $0x44c] sm:$0xf0]  ;;  %v8158_v21 = vld [vmem:[#allocation5 + $0x660] sm:$0xf] }
 0x1e6   :  { %5256 = vmatpush.bf16.msra.mxu2 %v7679_v31  ;;  %5269 = vmatpush.bf16.msra.mxu3 %v7807_v38  ;;  %v8814_v31 = vld [vmem:[#allocation5 + $0x20c] sm:$0xf0]  ;;  %v8079_v38 = vor.u32 %v8934_v28, %v8078_v26  ;;  %v7870_v28 = vld [vmem:[#allocation5 + $0x420] sm:$0xf] }
 0x1e7   :  { %v8986_v26 = vld [vmem:[#allocation5 + $0x76c] sm:$0xf0] }
 0x1e8   :  { %5231 = vmatpush.bf16.msra.mxu0 %v7407_v9  ;;  %5244 = vmatpush.bf16.msra.mxu1 %v7535_v2  ;;  %v7599_v9 = vor.u32 %v8814_v31, %v7598_v30  ;;  %v7726_v2 = vld [vmem:[#allocation5 + $0x300] sm:$0xf]  ;;  %v8882_v30 = vld [vmem:[#allocation5 + $0x42c] sm:$0xf0] }
 0x1e9   :  { %v7727_v34 = vor.u32 %v8846_v32, %v7726_v2  ;;  %v7871_v31 = vor.u32 %v8882_v30, %v7870_v28  ;;  %v8772_v30 = vld [vmem:[#allocation5 + $0xc4] sm:$0xf] }
 0x1ea   :  { %5257 = vmatpush.bf16.msra.mxu2 %v7663_v42  ;;  %5270 = vmatpush.bf16.msra.mxu3 %v7791_v45  ;;  %v8898_v42 = vld [vmem:[#allocation5 + $0x4ac] sm:$0xf0]  ;;  %v8063_v45 = vor.u32 %v8930_v44, %v8062_v43  ;;  %v7854_v43 = vld [vmem:[#allocation5 + $0x400] sm:$0xf] }
 0x1eb   :  { %v7935_v6 = vor.u32 %v8898_v42, %v7934_v41  ;;  %v8982_v41 = vld [vmem:[#allocation5 + $0x74c] sm:$0xf0]  ;;  %v7982_v44 = vld [vmem:[#allocation5 + $0x500] sm:$0xf] }
 0x1ec   :  { %5232 = vmatpush.bf16.msra.mxu0 %v7391_v36  ;;  %5245 = vmatpush.bf16.msra.mxu1 %v7519_v37  ;;  %v8350_v36 = vld [vmem:[#allocation5 + $0x7e0] sm:$0xf]  ;;  %v9002_v37 = vld [vmem:[#allocation5 + $0x7ec] sm:$0xf0] }
 0x1ed   :  { %v8351_v40 = vor.u32 %v9002_v37, %v8350_v36  ;;  %v8270_v36 = vld [vmem:[#allocation5 + $0x740] sm:$0xf] }
 0x1ee   :  { %5258 = vmatpush.bf16.msra.mxu2 %v7647_v52  ;;  %5271 = vmatpush.bf16.msra.mxu3 %v7775_v53  ;;  %v7919_v52 = vor.u32 %v8894_v50, %v7918_v49  ;;  %v8046_v53 = vld [vmem:[#allocation5 + $0x580] sm:$0xf]  ;;  %v8271_v42 = vor.u32 %v8982_v41, %v8270_v36  ;;  %v8978_v50 = vld [vmem:[#allocation5 + $0x72c] sm:$0xf0]  ;;  %v8840_v41 = vld [vmem:[#allocation5 + $0x2e4] sm:$0xf] }
 0x1ef   :  { %v8047_v57 = vor.u32 %v8926_v55, %v8046_v53  ;;  %v8254_v49 = vld [vmem:[#allocation5 + $0x720] sm:$0xf] }
 0x1f0   :  { %5233 = vmatpush.bf16.msra.mxu0 %v7375_v46  ;;  %5246 = vmatpush.bf16.msra.mxu1 %v7503_v48  ;;  %v8206_v46 = vld [vmem:[#allocation5 + $0x6c0] sm:$0xf]  ;;  %v8998_v48 = vld [vmem:[#allocation5 + $0x7cc] sm:$0xf0] }
 0x1f1   :  { %v8207_v47 = vor.u32 %v8966_v24, %v8206_v46  ;;  %v8335_v51 = vor.u32 %v8998_v48, %v8334_v29  ;;  %v8910_v46 = vld [vmem:[#allocation5 + $0x50c] sm:$0xf0]  ;;  %v8126_v29 = vld [vmem:[#allocation5 + $0x620] sm:$0xf] }
 0x1f2   :  { %5259 = vmatpush.bf16.msra.mxu2 %v7631_v62  ;;  %5272 = vmatpush.bf16.msra.mxu3 %v7759_v3  ;;  %v7902_v62 = vld [vmem:[#allocation5 + $0x460] sm:$0xf]  ;;  %v8922_v3 = vld [vmem:[#allocation5 + $0x56c] sm:$0xf0]  ;;  %v7983_v24 = vor.u32 %v8910_v46, %v7982_v44  ;;  %v7840_v46 = vld [vmem:[#allocation5 + $0x3f0] sm:$0xf0] }
 0x1f3   :  { %v7903_v1 = vor.u32 %v8890_v63, %v7902_v62  ;;  %v8031_v4 = vor.u32 %v8922_v3, %v8030_v0  ;;  %v8110_v55 = vld [vmem:[#allocation5 + $0x600] sm:$0xf]  ;;  %v10429_v3 = vld [vmem:[%s10726_s6] sm:$0xff] }
 0x1f4   :  { %5234 = vmatpush.bf16.msra.mxu0 %v7359_v58  ;;  %5247 = vmatpush.bf16.msra.mxu1 %v7487_v61  ;;  %v8962_v58 = vld [vmem:[#allocation5 + $0x6ac] sm:$0xf0]  ;;  %v8319_v61 = vor.u32 %v8994_v54, %v8318_v59  ;;  %v8238_v54 = vld [vmem:[#allocation5 + $0x700] sm:$0xf]  ;;  %v3642_v7 = vperm.slane %v10429_v3, 0 }
 0x1f5   :  { %v8191_v60 = vor.u32 %v8962_v58, %v8190_v56  ;;  %v8942_v56 = vld [vmem:[#allocation5 + $0x60c] sm:$0xf0] }
 0x1f6   :  { %5260 = vmatpush.bf16.msra.mxu2 %v7615_v19  ;;  %5273 = vmatpush.bf16.msra.mxu3 %v7743_v22  ;;  %v8918_v19 = vld [vmem:[#allocation5 + $0x54c] sm:$0xf0]  ;;  %v8111_v59 = vor.u32 %v8942_v56, %v8110_v55 }
 0x1f7   :  { %v8015_v20 = vor.u32 %v8918_v19, %v8014_v17  ;;  %v8954_v22 = vld [vmem:[#allocation5 + $0x66c] sm:$0xf0]  ;;  %v7456_v19 = vld [vmem:[#allocation5 + $0xf0] sm:$0xf0] }
 0x1f8   :  { %5235 = vmatpush.bf16.msra.mxu0 %v7343_v8  ;;  %5248 = vmatpush.bf16.msra.mxu1 %v7471_v10  ;;  %v8302_v8 = vld [vmem:[#allocation5 + $0x780] sm:$0xf]  ;;  %v8159_v23 = vor.u32 %v8954_v22, %v8158_v21  ;;  %v7584_v21 = vld [vmem:[#allocation5 + $0x1f0] sm:$0xf0] }
 0x1fa   :  { %5261 = vmatpush.bf16.msra.mxu2 %v7599_v9  ;;  %5274 = vmatpush.bf16.msra.mxu3 %v7727_v34  ;;  %v8914_v9 = vld [vmem:[#allocation5 + $0x52c] sm:$0xf0]  ;;  %v8142_v34 = vld [vmem:[#allocation5 + $0x640] sm:$0xf] }
 0x1fc   :  { %5280 = vmatpush.bf16.msrb.mxu0 %v7967_v14  ;;  %5293 = vmatpush.bf16.msrb.mxu1 %v8095_v18  ;;  %v8303_v14 = vor.u32 %v8990_v13, %v8302_v8  ;;  %v7887_v18 = vor.u32 %v8886_v16, %v7886_v15  ;;  %v3643_v8 = vperm.slane %v10429_v3, 1  ;;  %v8776_v16 = vld [vmem:[#allocation5 + $0xe4] sm:$0xf] }
 0x1fe   :  { %5306 = vmatpush.bf16.msrb.mxu2 %v8223_v39  ;;  %5319 = vmatpush.bf16.msrb.mxu3 %v8351_v40  ;;  %v8143_v40 = vor.u32 %v8950_v35, %v8142_v34  ;;  %v7568_v34 = vld [vmem:[#allocation5 + $0x1d0] sm:$0xf0] }
 0x200   :  { %5281 = vmatpush.bf16.msrb.mxu0 %v7951_v27  ;;  %5294 = vmatpush.bf16.msrb.mxu1 %v8079_v38  ;;  %v8287_v27 = vor.u32 %v8986_v26, %v8286_v25  ;;  %v7998_v38 = vld [vmem:[#allocation5 + $0x520] sm:$0xf]  ;;  %v3644_v25 = vperm.slane %v10429_v3, 2  ;;  %v3645_v26 = vperm.slane %v10429_v3, 3 }
 0x201   :  { %v7999_v33 = vor.u32 %v8914_v9, %v7998_v38 }
 0x202   :  { %5307 = vmatpush.bf16.msrb.mxu2 %v8207_v47  ;;  %5320 = vmatpush.bf16.msrb.mxu3 %v8335_v51  ;;  %v8946_v47 = vld [vmem:[#allocation5 + $0x62c] sm:$0xf0]  ;;  %v8255_v51 = vor.u32 %v8978_v50, %v8254_v49 }
 0x203   :  { %v8127_v48 = vor.u32 %v8946_v47, %v8126_v29  ;;  %v8800_v29 = vld [vmem:[#allocation5 + $0x1a4] sm:$0xf] }
 0x204   :  { %5282 = vmatpush.bf16.msrb.mxu0 %v7935_v6  ;;  %5295 = vmatpush.bf16.msrb.mxu1 %v8063_v45  ;;  %v8878_v6 = vld [vmem:[#allocation5 + $0x40c] sm:$0xf0] }
 0x205   :  { %v7855_v45 = vor.u32 %v8878_v6, %v7854_v43  ;;  %v8872_v43 = vld [vmem:[#allocation5 + $0x3e4] sm:$0xf] }
 0x206   :  { %5308 = vmatpush.bf16.msrb.mxu2 %v8191_v60  ;;  %5321 = vmatpush.bf16.msrb.mxu3 %v8319_v61  ;;  %v8974_v60 = vld [vmem:[#allocation5 + $0x70c] sm:$0xf0]  ;;  %v7843_v50 = vor.u32 %v8872_v43, %v7840_v46  ;;  %v8784_v46 = vld [vmem:[#allocation5 + $0x124] sm:$0xf] }
 0x207   :  { %v8239_v61 = vor.u32 %v8974_v60, %v8238_v54  ;;  %v8868_v54 = vld [vmem:[#allocation5 + $0x3c4] sm:$0xf]  ;;  %v7824_v60 = vld [vmem:[#allocation5 + $0x3d0] sm:$0xf0] }
 0x208   :  { %5283 = vmatpush.bf16.msrb.mxu0 %v7919_v52  ;;  %5296 = vmatpush.bf16.msrb.mxu1 %v8047_v57 }
 0x20a   :  { %5309 = vmatpush.bf16.msrb.mxu2 %v8175_v12  ;;  %5322 = vmatpush.bf16.msrb.mxu3 %v8303_v14 }
 0x20c   :  { %5284 = vmatpush.bf16.msrb.mxu0 %v7903_v1  ;;  %5297 = vmatpush.bf16.msrb.mxu1 %v8031_v4 }
 0x20e   :  { %5310 = vmatpush.bf16.msrb.mxu2 %v8159_v23  ;;  %5323 = vmatpush.bf16.msrb.mxu3 %v8287_v27  ;;  %v7459_v27 = vor.u32 %v8776_v16, %v7456_v19  ;;  %v8760_v19 = vld [vmem:[#allocation5 + $0x64] sm:$0xf] }
 0x210   :  { %5285 = vmatpush.bf16.msrb.mxu0 %v7887_v18  ;;  %5298 = vmatpush.bf16.msrb.mxu1 %v8015_v20  ;;  %v8808_v20 = vld [vmem:[#allocation5 + $0x1e4] sm:$0xf] }
 0x211   :  { %v7587_v28 = vor.u32 %v8808_v20, %v7584_v21  ;;  %v7392_v20 = vld [vmem:[#allocation5 + $0x70] sm:$0xf0]  ;;  %v8792_v21 = vld [vmem:[#allocation5 + $0x164] sm:$0xf] }
 0x212   :  { %5311 = vmatpush.bf16.msrb.mxu2 %v8143_v40  ;;  %5324 = vmatpush.bf16.msrb.mxu3 %v8271_v42  ;;  %v7712_v42 = vld [vmem:[#allocation5 + $0x2f0] sm:$0xf0] }
 0x213   :  { %v7715_v49 = vor.u32 %v8840_v41, %v7712_v42  ;;  %v8856_v41 = vld [vmem:[#allocation5 + $0x364] sm:$0xf] }
 0x214   :  { %5286 = vmatpush.bf16.msrb.mxu0 %v7871_v31  ;;  %5299 = vmatpush.bf16.msrb.mxu1 %v7999_v33  ;;  %v7440_v31 = vld [vmem:[#allocation5 + $0xd0] sm:$0xf0]  ;;  %v8804_v33 = vld [vmem:[#allocation5 + $0x1c4] sm:$0xf] }
 0x215   :  { %v7443_v40 = vor.u32 %v8772_v30, %v7440_v31  ;;  %v8860_v31 = vld [vmem:[#allocation5 + $0x384] sm:$0xf] }
 0x216   :  { %5312 = vmatpush.bf16.msrb.mxu2 %v8127_v48  ;;  %5325 = vmatpush.bf16.msrb.mxu3 %v8255_v51 }
 0x217   :  { %v10410_v10 = vpop.f32.mrf.mxu0  ;;  %v10412_v11 = vpop.f32.mrf.mxu1 }
 0x218   :  { %5287 = vmatpush.bf16.msrb.mxu0 %v7855_v45  ;;  %5300 = vmatpush.bf16.msrb.mxu1 %v7983_v24  ;;  %v7571_v45 = vor.u32 %v8804_v33, %v7568_v34  ;;  %v8768_v24 = vld [vmem:[#allocation5 + $0xa4] sm:$0xf]  ;;  %v7376_v33 = vld [vmem:[#allocation5 + $0x50] sm:$0xf0] }
 0x219   :  { %v8788_v34 = vld [vmem:[#allocation5 + $0x144] sm:$0xf] }
 0x21a   :  { %5313 = vmatpush.bf16.msrb.mxu2 %v8111_v59  ;;  %5326 = vmatpush.bf16.msrb.mxu3 %v8239_v61  ;;  %v8764_v61 = vld [vmem:[#allocation5 + $0x84] sm:$0xf] }
 0x21e   :  { %v10414_v2 = vpop.f32.mrf.mxu2  ;;  %v10416_v32 = vpop.f32.mrf.mxu3 }
 0x21f   :  { %v3123_v37 = vpop.f32.mrf.mxu0  ;;  %v3136_v39 = vpop.f32.mrf.mxu1 }
 0x226   :  { %v3149_v52 = vpop.f32.mrf.mxu2  ;;  %v3162_v53 = vpop.f32.mrf.mxu3 }
 0x227   :  { %v10418_v57 = vpop.f32.mrf.mxu0  ;;  %v10420_v58 = vpop.f32.mrf.mxu1  ;;  %v8836_v52 = vld [vmem:[#allocation5 + $0x2c4] sm:$0xf]  ;;  %v7696_v53 = vld [vmem:[#allocation5 + $0x2d0] sm:$0xf0] }
 0x22e   :  { %v10422_v62 = vpop.f32.mrf.mxu2  ;;  %v10424_v63 = vpop.f32.mrf.mxu3 }
 0x22f   :  { %v3175_v0 = vpop.f32.mrf.mxu0  ;;  %v3188_v1 = vpop.f32.mrf.mxu1 }
 0x236   :  { %v3201_v4 = vpop.f32.mrf.mxu2  ;;  %v3214_v5 = vpop.f32.mrf.mxu3 }
 0x237   :  { %v7408_v4 = vld [vmem:[#allocation5 + $0x90] sm:$0xf0]  ;;  %v8796_v5 = vld [vmem:[#allocation5 + $0x184] sm:$0xf] }
 0x238   :  { %v3545_v12 = vpop.f32.mrf.mxu0  ;;  %v3558_v13 = vpop.f32.mrf.mxu1 }
 0x239   :  { %v3546_v14 = vadd.f32 %v3545_v12, %v10410_v10  ;;  %v3559_v15 = vadd.f32 %v3558_v13, %v10412_v11  ;;  %v7827_v12 = vor.u32 %v8868_v54, %v7824_v60  ;;  %v8832_v13 = vld [vmem:[#allocation5 + $0x2a4] sm:$0xf] }
 0x23b   :  { %v3658_v17 = vadd.f32 %v3642_v7, %v3546_v14  ;;  %v3659_v18 = vadd.f32 %v3643_v8, %v3559_v15  ;;  %v7536_v7 = vld [vmem:[#allocation5 + $0x190] sm:$0xf0]  ;;  %v7699_v8 = vor.u32 %v8836_v52, %v7696_v53  ;;  %v7411_v15 = vor.u32 %v8764_v61, %v7408_v4  ;;  %v8852_v53 = vld [vmem:[#allocation5 + $0x344] sm:$0xf] }
 0x23c   :  { %v7680_v14 = vld [vmem:[#allocation5 + $0x2b0] sm:$0xf0]  ;;  %v7539_v16 = vor.u32 %v8796_v5, %v7536_v7  ;;  %v3648_v4 = vperm.slane %v10429_v3, 6  ;;  %v8780_v5 = vld [vmem:[#allocation5 + $0x104] sm:$0xf] }
 0x23d   :  { %v3666_v22 = vmax.f32 %v3658_v17, 0.0  ;;  %v3667_v23 = vmax.f32 %v3659_v18, 0.0  ;;  %v8864_v17 = vld [vmem:[#allocation5 + $0x3a4] sm:$0xf]  ;;  %v7808_v18 = vld [vmem:[#allocation5 + $0x3b0] sm:$0xf0] }
 0x23e   :  { %v7632_v52 = vld [vmem:[#allocation5 + $0x250] sm:$0xf0] }
 0x23f   :  { %v10437_v38 = vpack.c.bf16 %v3666_v22, %v3666_v22  ;;  %v10439_v10 = vpack.c.bf16 %v3667_v23, %v3667_v23  ;;  %v7520_v22 = vld [vmem:[#allocation5 + $0x170] sm:$0xf0]  ;;  %v7683_v23 = vor.u32 %v8832_v13, %v7680_v14  ;;  %v8904_v13 = vld [vmem:[#allocation5 + $0x4e4] sm:$0xf] }
 0x240   :  { %v3547_v37 = vpop.f32.mrf.mxu0  ;;  %v3560_v39 = vpop.f32.mrf.mxu1  ;;  %v7523_v30 = vor.u32 %v8792_v21, %v7520_v22  ;;  %v7760_v61 = vld [vmem:[#allocation5 + $0x350] sm:$0xf0]  ;;  %v8848_v21 = vld [vmem:[#allocation5 + $0x324] sm:$0xf] }
 0x241   :  { %v3571_v11 = vpop.f32.mrf.mxu2  ;;  %v3584_v9 = vpop.f32.mrf.mxu3  ;;  %5236 = vmatmul.bf16.vlgmr.msra.gmra.mxu0 %v10437_v38  ;;  %5249 = vmatmul.bf16.vlgmr.msra.gmra.mxu1 %v10439_v10  ;;  %v8824_v39 = vld [vmem:[#allocation5 + $0x264] sm:$0xf]  ;;  %v7472_v7 = vld [vmem:[#allocation5 + $0x110] sm:$0xf0] }
 0x242   :  { %v3572_v35 = vadd.f32 %v3571_v11, %v10414_v2  ;;  %v3585_v36 = vadd.f32 %v3584_v9, %v10416_v32  ;;  %5332 = vmatpush.bf16.msra.mxu0 %v7459_v27  ;;  %5345 = vmatpush.bf16.msra.mxu1 %v7587_v28  ;;  %v7424_v2 = vld [vmem:[#allocation5 + $0xb0] sm:$0xf0]  ;;  %v7395_v28 = vor.u32 %v8760_v19, %v7392_v20  ;;  %v8756_v9 = vld [vmem:[#allocation5 + $0x44] sm:$0xf] }
 0x243   :  { %v7552_v32 = vld [vmem:[#allocation5 + $0x1b0] sm:$0xf0]  ;;  %v7427_v51 = vor.u32 %v8768_v24, %v7424_v2  ;;  %v7379_v42 = vor.u32 %v8756_v9, %v7376_v33  ;;  %v3646_v2 = vperm.slane %v10429_v3, 4 }
 0x244   :  { %v3660_v6 = vadd.f32 %v3644_v25, %v3572_v35  ;;  %v3661_v44 = vadd.f32 %v3645_v26, %v3585_v36  ;;  %v7555_v59 = vor.u32 %v8800_v29, %v7552_v32  ;;  %v7811_v25 = vor.u32 %v8864_v17, %v7808_v18  ;;  %v8828_v26 = vld [vmem:[#allocation5 + $0x284] sm:$0xf]  ;;  %v7664_v27 = vld [vmem:[#allocation5 + $0x290] sm:$0xf0] }
 0x245   :  { %v7792_v11 = vld [vmem:[#allocation5 + $0x390] sm:$0xf0]  ;;  %v7667_v36 = vor.u32 %v8828_v26, %v7664_v27  ;;  %v3647_v29 = vperm.slane %v10429_v3, 5  ;;  %v8816_v17 = vld [vmem:[#allocation5 + $0x224] sm:$0xf]  ;;  %v7475_v26 = vor.u32 %v8780_v5, %v7472_v7 }
 0x246   :  { %v3668_v47 = vmax.f32 %v3660_v6, 0.0  ;;  %v3669_v48 = vmax.f32 %v3661_v44, 0.0  ;;  %5333 = vmatpush.bf16.msra.mxu0 %v7443_v40  ;;  %5346 = vmatpush.bf16.msra.mxu1 %v7571_v45  ;;  %v7504_v35 = vld [vmem:[#allocation5 + $0x150] sm:$0xf0]  ;;  %v7795_v37 = vor.u32 %v8860_v31, %v7792_v11  ;;  %v8752_v44 = vld [vmem:[#allocation5 + $0x24] sm:$0xf] }
 0x247   :  { %v7648_v40 = vld [vmem:[#allocation5 + $0x270] sm:$0xf0]  ;;  %v7507_v43 = vor.u32 %v8788_v34, %v7504_v35  ;;  %v8900_v34 = vld [vmem:[#allocation5 + $0x4c4] sm:$0xf] }
 0x248   :  { %v10445_v55 = vpack.c.bf16 %v3668_v47, %v3668_v47  ;;  %v10447_v56 = vpack.c.bf16 %v3669_v48, %v3669_v48  ;;  %v7776_v6 = vld [vmem:[#allocation5 + $0x370] sm:$0xf0]  ;;  %v7651_v48 = vor.u32 %v8824_v39, %v7648_v40 }
 0x249   :  { %v3573_v0 = vpop.f32.mrf.mxu2  ;;  %v3586_v1 = vpop.f32.mrf.mxu3  ;;  %v7360_v45 = vld [vmem:[#allocation5 + $0x30] sm:$0xf0] }
 0x24a   :  { %5262 = vmatmul.bf16.vlgmr.msra.gmra.mxu2 %v10445_v55  ;;  %5275 = vmatmul.bf16.vlgmr.msra.gmra.mxu3 %v10447_v56  ;;  %v7488_v24 = vld [vmem:[#allocation5 + $0x130] sm:$0xf0]  ;;  %v8748_v0 = vld [vmem:[#allocation5 + $0x4] sm:$0xf] }
 0x24b   :  { %5358 = vmatpush.bf16.msra.mxu2 %v7715_v49  ;;  %5371 = vmatpush.bf16.msra.mxu3 %v7843_v50  ;;  %v7779_v49 = vor.u32 %v8856_v41, %v7776_v6  ;;  %v7363_v50 = vor.u32 %v8752_v44, %v7360_v45  ;;  %v7491_v60 = vor.u32 %v8784_v46, %v7488_v24  ;;  %v7344_v1 = vld [vmem:[#allocation5 + $0x10] sm:$0xf0]  ;;  %v8932_v41 = vld [vmem:[#allocation5 + $0x5c4] sm:$0xf] }
 0x24c   :  { %5334 = vmatpush.bf16.msra.mxu0 %v7427_v51  ;;  %5347 = vmatpush.bf16.msra.mxu1 %v7555_v59  ;;  %v8820_v51 = vld [vmem:[#allocation5 + $0x244] sm:$0xf]  ;;  %v7968_v14 = vld [vmem:[#allocation5 + $0x4f0] sm:$0xf0] }
 0x24d   :  { %v7616_v18 = vld [vmem:[#allocation5 + $0x230] sm:$0xf0]  ;;  %v7971_v27 = vor.u32 %v8904_v13, %v7968_v14  ;;  %v8844_v44 = vld [vmem:[#allocation5 + $0x304] sm:$0xf] }
 0x24e   :  { %v7744_v22 = vld [vmem:[#allocation5 + $0x330] sm:$0xf0]  ;;  %v7619_v33 = vor.u32 %v8816_v17, %v7616_v18  ;;  %v8996_v14 = vld [vmem:[#allocation5 + $0x7c4] sm:$0xf] }
 0x24f   :  { %5359 = vmatpush.bf16.msra.mxu2 %v7699_v8  ;;  %5372 = vmatpush.bf16.msra.mxu3 %v7827_v12  ;;  %v7952_v35 = vld [vmem:[#allocation5 + $0x4d0] sm:$0xf0]  ;;  %v7747_v40 = vor.u32 %v8848_v21, %v7744_v22 }
 0x250   :  { %5335 = vmatpush.bf16.msra.mxu0 %v7411_v15  ;;  %5348 = vmatpush.bf16.msra.mxu1 %v7539_v16  ;;  %v8936_v15 = vld [vmem:[#allocation5 + $0x5e4] sm:$0xf]  ;;  %v7763_v16 = vor.u32 %v8852_v53, %v7760_v61  ;;  %v7600_v6 = vld [vmem:[#allocation5 + $0x210] sm:$0xf0] }
 0x251   :  { %v7728_v45 = vld [vmem:[#allocation5 + $0x310] sm:$0xf0] }
 0x252   :  { %v8064_v53 = vld [vmem:[#allocation5 + $0x5b0] sm:$0xf0] }
 0x253   :  { %5360 = vmatpush.bf16.msra.mxu2 %v7683_v23  ;;  %5373 = vmatpush.bf16.msra.mxu3 %v7811_v25  ;;  %v3649_v23 = vperm.slane %v10429_v3, 7  ;;  %v7347_v25 = vor.u32 %v8748_v0, %v7344_v1  ;;  %v8208_v5 = vld [vmem:[#allocation5 + $0x6d0] sm:$0xf0] }
 0x254   :  { %5336 = vmatpush.bf16.msra.mxu0 %v7395_v28  ;;  %5349 = vmatpush.bf16.msra.mxu1 %v7523_v30  ;;  %v8048_v17 = vld [vmem:[#allocation5 + $0x590] sm:$0xf0] }
 0x255   :  { %v8192_v21 = vld [vmem:[#allocation5 + $0x6b0] sm:$0xf0] }
 0x257   :  { %5361 = vmatpush.bf16.msra.mxu2 %v7667_v36  ;;  %5374 = vmatpush.bf16.msra.mxu3 %v7795_v37 }
 0x258   :  { %v3597_v32 = vpop.f32.mrf.mxu0  ;;  %v3610_v47 = vpop.f32.mrf.mxu1  ;;  %5337 = vmatpush.bf16.msra.mxu0 %v7379_v42  ;;  %5350 = vmatpush.bf16.msra.mxu1 %v7507_v43  ;;  %v8080_v42 = vld [vmem:[#allocation5 + $0x5d0] sm:$0xf0]  ;;  %v8812_v43 = vld [vmem:[#allocation5 + $0x204] sm:$0xf] }
 0x259   :  { %v3598_v59 = vadd.f32 %v3597_v32, %v10418_v57  ;;  %v3611_v54 = vadd.f32 %v3610_v47, %v10420_v58  ;;  %v7635_v57 = vor.u32 %v8820_v51, %v7632_v52  ;;  %v8096_v58 = vld [vmem:[#allocation5 + $0x5f0] sm:$0xf0]  ;;  %v8083_v32 = vor.u32 %v8932_v41, %v8080_v42  ;;  %v8928_v52 = vld [vmem:[#allocation5 + $0x5a4] sm:$0xf] }
 0x25a   :  { %v8099_v9 = vor.u32 %v8936_v15, %v8096_v58  ;;  %v8352_v47 = vld [vmem:[#allocation5 + $0x7f0] sm:$0xf0]  ;;  %v8067_v13 = vor.u32 %v8928_v52, %v8064_v53  ;;  %v8924_v58 = vld [vmem:[#allocation5 + $0x584] sm:$0xf] }
 0x25b   :  { %v3662_v8 = vadd.f32 %v3646_v2, %v3598_v59  ;;  %v3663_v12 = vadd.f32 %v3647_v29, %v3611_v54  ;;  %5362 = vmatpush.bf16.msra.mxu2 %v7651_v48  ;;  %5375 = vmatpush.bf16.msra.mxu3 %v7779_v49  ;;  %v9000_v2 = vld [vmem:[#allocation5 + $0x7e4] sm:$0xf]  ;;  %v7955_v29 = vor.u32 %v8900_v34, %v7952_v35  ;;  %v7936_v49 = vld [vmem:[#allocation5 + $0x4b0] sm:$0xf0] }
 0x25c   :  { %5338 = vmatpush.bf16.msra.mxu0 %v7363_v50  ;;  %5351 = vmatpush.bf16.msra.mxu1 %v7491_v60  ;;  %v8896_v48 = vld [vmem:[#allocation5 + $0x4a4] sm:$0xf]  ;;  %v7603_v59 = vor.u32 %v8812_v43, %v7600_v6  ;;  %v7731_v54 = vor.u32 %v8844_v44, %v7728_v45  ;;  %v8355_v1 = vor.u32 %v9000_v2, %v8352_v47  ;;  %v8336_v15 = vld [vmem:[#allocation5 + $0x7d0] sm:$0xf0] }
 0x25d   :  { %v3670_v19 = vmax.f32 %v3662_v8, 0.0  ;;  %v3671_v20 = vmax.f32 %v3663_v12, 0.0  ;;  %v7939_v12 = vor.u32 %v8896_v48, %v7936_v49  ;;  %v8956_v35 = vld [vmem:[#allocation5 + $0x684] sm:$0xf]  ;;  %v7888_v42 = vld [vmem:[#allocation5 + $0x450] sm:$0xf0] }
 0x25e   :  { %v8884_v41 = vld [vmem:[#allocation5 + $0x444] sm:$0xf]  ;;  %v8016_v6 = vld [vmem:[#allocation5 + $0x550] sm:$0xf0] }
 0x25f   :  { %v10457_v28 = vpack.c.bf16 %v3670_v19, %v3670_v19  ;;  %v10459_v30 = vpack.c.bf16 %v3671_v20, %v3671_v20  ;;  %5363 = vmatpush.bf16.msra.mxu2 %v7635_v57  ;;  %5376 = vmatpush.bf16.msra.mxu3 %v7763_v16  ;;  %v8892_v57 = vld [vmem:[#allocation5 + $0x484] sm:$0xf]  ;;  %v7920_v16 = vld [vmem:[#allocation5 + $0x490] sm:$0xf0]  ;;  %v8339_v19 = vor.u32 %v8996_v14, %v8336_v15  ;;  %v7590_v14 = vld [vmem:[#allocation5 + $0x1e8] sm:$0xf] }
 0x260   :  { %v3623_v31 = vpop.f32.mrf.mxu2  ;;  %v3636_v11 = vpop.f32.mrf.mxu3  ;;  %5339 = vmatpush.bf16.msra.mxu0 %v7347_v25  ;;  %5352 = vmatpush.bf16.msra.mxu1 %v7475_v26  ;;  %v8960_v20 = vld [vmem:[#allocation5 + $0x6a4] sm:$0xf]  ;;  %v7923_v22 = vor.u32 %v8892_v57, %v7920_v16  ;;  %v8320_v26 = vld [vmem:[#allocation5 + $0x7b0] sm:$0xf0]  ;;  %v8811_v15 = vld [vmem:[#allocation5 + $0x1f4] sm:$0xf0] }
 0x261   :  { %v3624_v36 = vadd.f32 %v3623_v31, %v10422_v62  ;;  %v3637_v37 = vadd.f32 %v3636_v11, %v10424_v63  ;;  %v3599_v3 = vpop.f32.mrf.mxu0  ;;  %v3612_v39 = vpop.f32.mrf.mxu1  ;;  %5288 = vmatmul.bf16.vlgmr.msrb.gmra.mxu0 %v10457_v28  ;;  %5301 = vmatmul.bf16.vlgmr.msrb.gmra.mxu1 %v10459_v30  ;;  %v8968_v62 = vld [vmem:[#allocation5 + $0x6e4] sm:$0xf]  ;;  %v8224_v63 = vld [vmem:[#allocation5 + $0x6f0] sm:$0xf0] }
 0x262   :  { %v8227_v0 = vor.u32 %v8968_v62, %v8224_v63  ;;  %v8992_v25 = vld [vmem:[#allocation5 + $0x7a4] sm:$0xf]  ;;  %v7904_v31 = vld [vmem:[#allocation5 + $0x470] sm:$0xf0]  ;;  %v7891_v62 = vor.u32 %v8884_v41, %v7888_v42  ;;  %v7846_v41 = vld [vmem:[#allocation5 + $0x3e8] sm:$0xf] }
 0x263   :  { %v3664_v46 = vadd.f32 %v3648_v4, %v3624_v36  ;;  %v3665_v24 = vadd.f32 %v3649_v23, %v3637_v37  ;;  %5364 = vmatpush.bf16.msra.mxu2 %v7619_v33  ;;  %5377 = vmatpush.bf16.msra.mxu3 %v7747_v40  ;;  %v8964_v4 = vld [vmem:[#allocation5 + $0x6c4] sm:$0xf]  ;;  %v8051_v23 = vor.u32 %v8924_v58, %v8048_v17  ;;  %v8176_v36 = vld [vmem:[#allocation5 + $0x690] sm:$0xf0]  ;;  %v8875_v42 = vld [vmem:[#allocation5 + $0x3f4] sm:$0xf0] }
 0x264   :  { %5384 = vmatpush.bf16.msrb.mxu0 %v7971_v27  ;;  %5397 = vmatpush.bf16.msrb.mxu1 %v8099_v9  ;;  %v8211_v18 = vor.u32 %v8964_v4, %v8208_v5  ;;  %v8888_v27 = vld [vmem:[#allocation5 + $0x464] sm:$0xf]  ;;  %v8032_v9 = vld [vmem:[#allocation5 + $0x570] sm:$0xf0]  ;;  %v8195_v33 = vor.u32 %v8960_v20, %v8192_v21  ;;  %v8323_v34 = vor.u32 %v8992_v25, %v8320_v26  ;;  %v7446_v25 = vld [vmem:[#allocation5 + $0xc8] sm:$0xf] }
 0x265   :  { %v3672_v50 = vmax.f32 %v3664_v46, 0.0  ;;  %v3673_v51 = vmax.f32 %v3665_v24, 0.0  ;;  %v8920_v11 = vld [vmem:[#allocation5 + $0x564] sm:$0xf]  ;;  %v7907_v37 = vor.u32 %v8888_v27, %v7904_v31  ;;  %v8304_v40 = vld [vmem:[#allocation5 + $0x790] sm:$0xf0]  ;;  %v8179_v44 = vor.u32 %v8956_v35, %v8176_v36 }
 0x266   :  { %v8035_v3 = vor.u32 %v8920_v11, %v8032_v9  ;;  %v8988_v39 = vld [vmem:[#allocation5 + $0x784] sm:$0xf]  ;;  %v8160_v24 = vld [vmem:[#allocation5 + $0x670] sm:$0xf0]  ;;  %v8775_v26 = vld [vmem:[#allocation5 + $0xd4] sm:$0xf0] }
 0x267   :  { %v10465_v60 = vpack.c.bf16 %v3672_v50, %v3672_v50  ;;  %v10467_v61 = vpack.c.bf16 %v3673_v51, %v3673_v51  ;;  %5365 = vmatpush.bf16.msra.mxu2 %v7603_v59  ;;  %5378 = vmatpush.bf16.msra.mxu3 %v7731_v54  ;;  %v8916_v43 = vld [vmem:[#allocation5 + $0x544] sm:$0xf]  ;;  %v8307_v45 = vor.u32 %v8988_v39, %v8304_v40  ;;  %v7872_v47 = vld [vmem:[#allocation5 + $0x430] sm:$0xf0]  ;;  %v7574_v27 = vld [vmem:[#allocation5 + $0x1c8] sm:$0xf] }
 0x268   :  { %v3625_v7 = vpop.f32.mrf.mxu2  ;;  %v3638_v8 = vpop.f32.mrf.mxu3  ;;  %5385 = vmatpush.bf16.msrb.mxu0 %v7955_v29  ;;  %5398 = vmatpush.bf16.msrb.mxu1 %v8083_v32  ;;  %v8952_v46 = vld [vmem:[#allocation5 + $0x664] sm:$0xf]  ;;  %v8019_v63 = vor.u32 %v8916_v43, %v8016_v6  ;;  %v8288_v29 = vld [vmem:[#allocation5 + $0x770] sm:$0xf0]  ;;  %v8807_v31 = vld [vmem:[#allocation5 + $0x1d4] sm:$0xf0]  ;;  %v7447_v39 = vor.u32 %v8775_v26, %v7446_v25 }
 0x269   :  { %5314 = vmatmul.bf16.vlgmr.msrb.gmra.mxu2 %v10465_v60  ;;  %5327 = vmatmul.bf16.vlgmr.msrb.gmra.mxu3 %v10467_v61  ;;  %v8984_v2 = vld [vmem:[#allocation5 + $0x764] sm:$0xf]  ;;  %v8000_v49 = vld [vmem:[#allocation5 + $0x530] sm:$0xf0]  ;;  %v8163_v50 = vor.u32 %v8952_v46, %v8160_v24  ;;  %v7575_v40 = vor.u32 %v8807_v31, %v7574_v27  ;;  %v7430_v43 = vld [vmem:[#allocation5 + $0xa8] sm:$0xf] }
 0x26a   :  { %v8880_v32 = vld [vmem:[#allocation5 + $0x424] sm:$0xf]  ;;  %v8291_v51 = vor.u32 %v8984_v2, %v8288_v29  ;;  %v8144_v53 = vld [vmem:[#allocation5 + $0x650] sm:$0xf0]  ;;  %v8771_v6 = vld [vmem:[#allocation5 + $0xb4] sm:$0xf0] }
 0x26b   :  { %5410 = vmatpush.bf16.msrb.mxu2 %v8227_v0  ;;  %5423 = vmatpush.bf16.msrb.mxu3 %v8355_v1  ;;  %v8912_v48 = vld [vmem:[#allocation5 + $0x524] sm:$0xf]  ;;  %v7875_v54 = vor.u32 %v8880_v32, %v7872_v47  ;;  %v8272_v1 = vld [vmem:[#allocation5 + $0x750] sm:$0xf0]  ;;  %v7702_v2 = vld [vmem:[#allocation5 + $0x2c8] sm:$0xf]  ;;  %v7431_v32 = vor.u32 %v8771_v6, %v7430_v43 }
 0x26c   :  { %5386 = vmatpush.bf16.msrb.mxu0 %v7939_v12  ;;  %5399 = vmatpush.bf16.msrb.mxu1 %v8067_v13  ;;  %v8948_v52 = vld [vmem:[#allocation5 + $0x644] sm:$0xf]  ;;  %v8003_v0 = vor.u32 %v8912_v48, %v8000_v49  ;;  %v7856_v5 = vld [vmem:[#allocation5 + $0x410] sm:$0xf0]  ;;  %v7462_v12 = vld [vmem:[#allocation5 + $0xe8] sm:$0xf] }
 0x26d   :  { %v8980_v59 = vld [vmem:[#allocation5 + $0x744] sm:$0xf]  ;;  %v7984_v8 = vld [vmem:[#allocation5 + $0x510] sm:$0xf0]  ;;  %v8779_v13 = vld [vmem:[#allocation5 + $0xf4] sm:$0xf0]  ;;  %v8147_v57 = vor.u32 %v8948_v52, %v8144_v53 }
 0x26e   :  { %v8876_v4 = vld [vmem:[#allocation5 + $0x404] sm:$0xf]  ;;  %v8275_v16 = vor.u32 %v8980_v59, %v8272_v1  ;;  %v8256_v21 = vld [vmem:[#allocation5 + $0x730] sm:$0xf0]  ;;  %v8839_v29 = vld [vmem:[#allocation5 + $0x2d4] sm:$0xf0] }
 0x26f   :  { %5411 = vmatpush.bf16.msrb.mxu2 %v8211_v18  ;;  %5424 = vmatpush.bf16.msrb.mxu3 %v8339_v19  ;;  %v8908_v7 = vld [vmem:[#allocation5 + $0x504] sm:$0xf]  ;;  %v7859_v17 = vor.u32 %v8876_v4, %v7856_v5  ;;  %v8128_v19 = vld [vmem:[#allocation5 + $0x630] sm:$0xf0]  ;;  %v7830_v48 = vld [vmem:[#allocation5 + $0x3c8] sm:$0xf]  ;;  %v7703_v59 = vor.u32 %v8839_v29, %v7702_v2 }
 0x270   :  { %5387 = vmatpush.bf16.msrb.mxu0 %v7923_v22  ;;  %5400 = vmatpush.bf16.msrb.mxu1 %v8051_v23  ;;  %v8944_v58 = vld [vmem:[#allocation5 + $0x624] sm:$0xf]  ;;  %v7987_v18 = vor.u32 %v8908_v7, %v7984_v8  ;;  %v7463_v22 = vor.u32 %v8779_v13, %v7462_v12  ;;  %v7591_v23 = vor.u32 %v8811_v15, %v7590_v14  ;;  %v8240_v36 = vld [vmem:[#allocation5 + $0x710] sm:$0xf0]  ;;  %v8871_v49 = vld [vmem:[#allocation5 + $0x3d4] sm:$0xf0] }
 0x271   :  { %5340 = vmatmul.bf16.vlgmr.msra.gmra.mxu0 %v10437_v38  ;;  %5353 = vmatmul.bf16.vlgmr.msra.gmra.mxu1 %v10439_v10  ;;  %v8976_v20 = vld [vmem:[#allocation5 + $0x724] sm:$0xf]  ;;  %v8131_v11 = vor.u32 %v8944_v58, %v8128_v19  ;;  %v7542_v52 = vld [vmem:[#allocation5 + $0x188] sm:$0xf]  ;;  %v8799_v53 = vld [vmem:[#allocation5 + $0x194] sm:$0xf0] }
 0x272   :  { %v8259_v9 = vor.u32 %v8976_v20, %v8256_v21  ;;  %v8972_v35 = vld [vmem:[#allocation5 + $0x704] sm:$0xf]  ;;  %v8835_v1 = vld [vmem:[#allocation5 + $0x2b4] sm:$0xf0]  ;;  %v7543_v5 = vor.u32 %v8799_v53, %v7542_v52  ;;  %v7814_v7 = vld [vmem:[#allocation5 + $0x3a8] sm:$0xf] }
 0x273   :  { %5412 = vmatpush.bf16.msrb.mxu2 %v8195_v33  ;;  %5425 = vmatpush.bf16.msrb.mxu3 %v8323_v34  ;;  %v8940_v33 = vld [vmem:[#allocation5 + $0x604] sm:$0xf]  ;;  %v8112_v34 = vld [vmem:[#allocation5 + $0x610] sm:$0xf0]  ;;  %v8243_v24 = vor.u32 %v8972_v35, %v8240_v36  ;;  %v8867_v8 = vld [vmem:[#allocation5 + $0x3b4] sm:$0xf0] }
 0x274   :  { %5388 = vmatpush.bf16.msrb.mxu0 %v7907_v37  ;;  %5401 = vmatpush.bf16.msrb.mxu1 %v8035_v3  ;;  %v7718_v37 = vld [vmem:[#allocation5 + $0x2e8] sm:$0xf]  ;;  %v8843_v3 = vld [vmem:[#allocation5 + $0x2f4] sm:$0xf0]  ;;  %v8115_v46 = vor.u32 %v8940_v33, %v8112_v34 }
 0x275   :  { %v7398_v12 = vld [vmem:[#allocation5 + $0x68] sm:$0xf]  ;;  %v8763_v13 = vld [vmem:[#allocation5 + $0x74] sm:$0xf0] }
 0x276   :  { %v7526_v14 = vld [vmem:[#allocation5 + $0x168] sm:$0xf]  ;;  %v8795_v15 = vld [vmem:[#allocation5 + $0x174] sm:$0xf0] }
 0x277   :  { %5413 = vmatpush.bf16.msrb.mxu2 %v8179_v44  ;;  %5426 = vmatpush.bf16.msrb.mxu3 %v8307_v45  ;;  %v7558_v44 = vld [vmem:[#allocation5 + $0x1a8] sm:$0xf]  ;;  %v8803_v45 = vld [vmem:[#allocation5 + $0x1b4] sm:$0xf0]  ;;  %v7527_v19 = vor.u32 %v8795_v15, %v7526_v14 }
 0x278   :  { %5389 = vmatpush.bf16.msrb.mxu0 %v7891_v62  ;;  %5402 = vmatpush.bf16.msrb.mxu1 %v8019_v63  ;;  %v7719_v62 = vor.u32 %v8843_v3, %v7718_v37  ;;  %v7847_v63 = vor.u32 %v8875_v42, %v7846_v41  ;;  %v7559_v47 = vor.u32 %v8803_v45, %v7558_v44  ;;  %v7670_v58 = vld [vmem:[#allocation5 + $0x288] sm:$0xf]  ;;  %v8863_v21 = vld [vmem:[#allocation5 + $0x394] sm:$0xf0] }
 0x279   :  { %5366 = vmatmul.bf16.vlgmr.msra.gmra.mxu2 %v10445_v55  ;;  %5379 = vmatmul.bf16.vlgmr.msra.gmra.mxu3 %v10447_v56  ;;  %v7798_v20 = vld [vmem:[#allocation5 + $0x388] sm:$0xf]  ;;  %v8791_v26 = vld [vmem:[#allocation5 + $0x154] sm:$0xf0] }
 0x27a   :  { %v7510_v25 = vld [vmem:[#allocation5 + $0x148] sm:$0xf]  ;;  %v7799_v31 = vor.u32 %v8863_v21, %v7798_v20  ;;  %v8859_v36 = vld [vmem:[#allocation5 + $0x374] sm:$0xf0] }
 0x27b   :  { %5414 = vmatpush.bf16.msrb.mxu2 %v8163_v50  ;;  %5427 = vmatpush.bf16.msrb.mxu3 %v8291_v51  ;;  %v7414_v50 = vld [vmem:[#allocation5 + $0x88] sm:$0xf]  ;;  %v8767_v51 = vld [vmem:[#allocation5 + $0x94] sm:$0xf0]  ;;  %v7511_v34 = vor.u32 %v8791_v26, %v7510_v25 }
 0x27c   :  { %5390 = vmatpush.bf16.msrb.mxu0 %v7875_v54  ;;  %5403 = vmatpush.bf16.msrb.mxu1 %v8003_v0  ;;  %v7831_v54 = vor.u32 %v8871_v49, %v7830_v48  ;;  %v7686_v0 = vld [vmem:[#allocation5 + $0x2a8] sm:$0xf]  ;;  %v7415_v4 = vor.u32 %v8767_v51, %v7414_v50  ;;  %v8755_v3 = vld [vmem:[#allocation5 + $0x34] sm:$0xf0] }
 0x27d   :  { %v7782_v35 = vld [vmem:[#allocation5 + $0x368] sm:$0xf]  ;;  %v8823_v6 = vld [vmem:[#allocation5 + $0x254] sm:$0xf0] }
 0x27e   :  { %v7366_v37 = vld [vmem:[#allocation5 + $0x28] sm:$0xf]  ;;  %v7783_v42 = vor.u32 %v8859_v36, %v7782_v35  ;;  %v8783_v29 = vld [vmem:[#allocation5 + $0x114] sm:$0xf0] }
 0x27f   :  { %5415 = vmatpush.bf16.msrb.mxu2 %v8147_v57  ;;  %5428 = vmatpush.bf16.msrb.mxu3 %v8275_v16  ;;  %v7687_v57 = vor.u32 %v8835_v1, %v7686_v0  ;;  %v7815_v16 = vor.u32 %v8867_v8, %v7814_v7  ;;  %v7638_v43 = vld [vmem:[#allocation5 + $0x248] sm:$0xf]  ;;  %v7367_v45 = vor.u32 %v8755_v3, %v7366_v37  ;;  %v8939_v49 = vld [vmem:[#allocation5 + $0x5f4] sm:$0xf0] }
 0x280   :  { %5391 = vmatpush.bf16.msrb.mxu0 %v7859_v17  ;;  %5404 = vmatpush.bf16.msrb.mxu1 %v7987_v18  ;;  %v8831_v17 = vld [vmem:[#allocation5 + $0x294] sm:$0xf0]  ;;  %v7399_v18 = vor.u32 %v8763_v13, %v7398_v12  ;;  %v7766_v44 = vld [vmem:[#allocation5 + $0x348] sm:$0xf]  ;;  %v7639_v50 = vor.u32 %v8823_v6, %v7638_v43 }
 0x281   :  { %v7671_v27 = vor.u32 %v8831_v17, %v7670_v58  ;;  %v7478_v2 = vld [vmem:[#allocation5 + $0x108] sm:$0xf]  ;;  %v8851_v1 = vld [vmem:[#allocation5 + $0x334] sm:$0xf0] }
 0x282   :  { %v8102_v48 = vld [vmem:[#allocation5 + $0x5e8] sm:$0xf]  ;;  %v8903_v8 = vld [vmem:[#allocation5 + $0x4d4] sm:$0xf0] }
 0x283   :  { %5416 = vmatpush.bf16.msrb.mxu2 %v8131_v11  ;;  %5429 = vmatpush.bf16.msrb.mxu3 %v8259_v9  ;;  %v7654_v11 = vld [vmem:[#allocation5 + $0x268] sm:$0xf]  ;;  %v8827_v9 = vld [vmem:[#allocation5 + $0x274] sm:$0xf0] }
 0x284   :  { %5436 = vmatpush.bf16.msra.mxu0 %v7463_v22  ;;  %5449 = vmatpush.bf16.msra.mxu1 %v7591_v23  ;;  %v7382_v22 = vld [vmem:[#allocation5 + $0x48] sm:$0xf]  ;;  %v8759_v23 = vld [vmem:[#allocation5 + $0x54] sm:$0xf0]  ;;  %v7655_v41 = vor.u32 %v8827_v9, %v7654_v11 }
 0x285   :  { %5392 = vmatmul.bf16.vlgmr.msrb.gmra.mxu0 %v10457_v28  ;;  %5405 = vmatmul.bf16.vlgmr.msrb.gmra.mxu1 %v10459_v30  ;;  %v7383_v33 = vor.u32 %v8759_v23, %v7382_v22  ;;  %v7622_v52 = vld [vmem:[#allocation5 + $0x228] sm:$0xf]  ;;  %v8935_v13 = vld [vmem:[#allocation5 + $0x5d4] sm:$0xf0] }
 0x286   :  { %v7750_v0 = vld [vmem:[#allocation5 + $0x328] sm:$0xf]  ;;  %v8847_v17 = vld [vmem:[#allocation5 + $0x314] sm:$0xf0] }
 0x287   :  { %5417 = vmatpush.bf16.msrb.mxu2 %v8115_v46  ;;  %5430 = vmatpush.bf16.msrb.mxu3 %v8243_v24  ;;  %v8855_v24 = vld [vmem:[#allocation5 + $0x354] sm:$0xf0]  ;;  %v7958_v7 = vld [vmem:[#allocation5 + $0x4c8] sm:$0xf]  ;;  %v7751_v15 = vor.u32 %v8851_v1, %v7750_v0 }
 0x288   :  { %5437 = vmatpush.bf16.msra.mxu0 %v7447_v39  ;;  %5450 = vmatpush.bf16.msra.mxu1 %v7575_v40  ;;  %v7494_v39 = vld [vmem:[#allocation5 + $0x128] sm:$0xf]  ;;  %v8787_v40 = vld [vmem:[#allocation5 + $0x134] sm:$0xf0]  ;;  %v7767_v51 = vor.u32 %v8855_v24, %v7766_v44  ;;  %v7959_v20 = vor.u32 %v8903_v8, %v7958_v7 }
 0x289   :  { %v7495_v46 = vor.u32 %v8787_v40, %v7494_v39  ;;  %v8086_v12 = vld [vmem:[#allocation5 + $0x5c8] sm:$0xf]  ;;  %v9003_v23 = vld [vmem:[#allocation5 + $0x7f4] sm:$0xf0] }
 0x28a   :  { %5418 = vmatmul.bf16.vlgmr.msrb.gmra.mxu2 %v10465_v60  ;;  %5431 = vmatmul.bf16.vlgmr.msrb.gmra.mxu3 %v10467_v61  ;;  %v7734_v58 = vld [vmem:[#allocation5 + $0x308] sm:$0xf]  ;;  %v8087_v21 = vor.u32 %v8935_v13, %v8086_v12  ;;  %v8899_v26 = vld [vmem:[#allocation5 + $0x4b4] sm:$0xf0] }
 0x28b   :  { %5462 = vmatpush.bf16.msra.mxu2 %v7719_v62  ;;  %5475 = vmatpush.bf16.msra.mxu3 %v7847_v63  ;;  %v7350_v62 = vld [vmem:[#allocation5 + $0x8] sm:$0xf]  ;;  %v8751_v63 = vld [vmem:[#allocation5 + $0x14] sm:$0xf0]  ;;  %v7735_v9 = vor.u32 %v8847_v17, %v7734_v58 }
 0x28c   :  { %5438 = vmatpush.bf16.msra.mxu0 %v7431_v32  ;;  %5451 = vmatpush.bf16.msra.mxu1 %v7559_v47  ;;  %v7974_v32 = vld [vmem:[#allocation5 + $0x4e8] sm:$0xf]  ;;  %v8907_v47 = vld [vmem:[#allocation5 + $0x4f4] sm:$0xf0]  ;;  %v7351_v53 = vor.u32 %v8751_v63, %v7350_v62 }
 0x28d   :  { %v8358_v22 = vld [vmem:[#allocation5 + $0x7e8] sm:$0xf]  ;;  %v8967_v36 = vld [vmem:[#allocation5 + $0x6d4] sm:$0xf0] }
 0x28e   :  { %v7942_v25 = vld [vmem:[#allocation5 + $0x4a8] sm:$0xf]  ;;  %v8999_v40 = vld [vmem:[#allocation5 + $0x7d4] sm:$0xf0] }
 0x28f   :  { %5463 = vmatpush.bf16.msra.mxu2 %v7703_v59  ;;  %5476 = vmatpush.bf16.msra.mxu3 %v7831_v54  ;;  %v7479_v59 = vor.u32 %v8783_v29, %v7478_v2  ;;  %v8819_v54 = vld [vmem:[#allocation5 + $0x234] sm:$0xf0]  ;;  %v8214_v35 = vld [vmem:[#allocation5 + $0x6c8] sm:$0xf]  ;;  %v7943_v37 = vor.u32 %v8899_v26, %v7942_v25 }
 0x290   :  { %5439 = vmatpush.bf16.msra.mxu0 %v7415_v4  ;;  %5452 = vmatpush.bf16.msra.mxu1 %v7543_v5  ;;  %v7975_v4 = vor.u32 %v8907_v47, %v7974_v32  ;;  %v8103_v5 = vor.u32 %v8939_v49, %v8102_v48  ;;  %v7623_v14 = vor.u32 %v8819_v54, %v7622_v52  ;;  %v8342_v39 = vld [vmem:[#allocation5 + $0x7c8] sm:$0xf]  ;;  %v8927_v6 = vld [vmem:[#allocation5 + $0x594] sm:$0xf0] }
 0x291   :  { %v8054_v43 = vld [vmem:[#allocation5 + $0x588] sm:$0xf]  ;;  %v8215_v44 = vor.u32 %v8967_v36, %v8214_v35  ;;  %v8963_v24 = vld [vmem:[#allocation5 + $0x6b4] sm:$0xf0] }
 0x292   :  { %v8055_v63 = vor.u32 %v8927_v6, %v8054_v43  ;;  %v8326_v2 = vld [vmem:[#allocation5 + $0x7a8] sm:$0xf]  ;;  %v8995_v29 = vld [vmem:[#allocation5 + $0x7b4] sm:$0xf0] }
 0x293   :  { %5464 = vmatpush.bf16.msra.mxu2 %v7687_v57  ;;  %5477 = vmatpush.bf16.msra.mxu3 %v7815_v16  ;;  %v7606_v57 = vld [vmem:[#allocation5 + $0x208] sm:$0xf]  ;;  %v8815_v16 = vld [vmem:[#allocation5 + $0x214] sm:$0xf0] }
 0x294   :  { %5440 = vmatpush.bf16.msra.mxu0 %v7399_v18  ;;  %5453 = vmatpush.bf16.msra.mxu1 %v7527_v19  ;;  %v8230_v18 = vld [vmem:[#allocation5 + $0x6e8] sm:$0xf]  ;;  %v8971_v19 = vld [vmem:[#allocation5 + $0x6f4] sm:$0xf0]  ;;  %v7607_v11 = vor.u32 %v8815_v16, %v7606_v57 }
 0x295   :  { %v7910_v32 = vld [vmem:[#allocation5 + $0x468] sm:$0xf]  ;;  %v8891_v47 = vld [vmem:[#allocation5 + $0x474] sm:$0xf0] }
 0x296   :  { %v8038_v48 = vld [vmem:[#allocation5 + $0x568] sm:$0xf]  ;;  %v8923_v49 = vld [vmem:[#allocation5 + $0x574] sm:$0xf0] }
 0x297   :  { %5465 = vmatpush.bf16.msra.mxu2 %v7671_v27  ;;  %5478 = vmatpush.bf16.msra.mxu3 %v7799_v31  ;;  %v8070_v27 = vld [vmem:[#allocation5 + $0x5a8] sm:$0xf]  ;;  %v8931_v31 = vld [vmem:[#allocation5 + $0x5b4] sm:$0xf0]  ;;  %v8039_v54 = vor.u32 %v8923_v49, %v8038_v48 }
 0x298   :  { %5441 = vmatpush.bf16.msra.mxu0 %v7383_v33  ;;  %5454 = vmatpush.bf16.msra.mxu1 %v7511_v34  ;;  %v8231_v33 = vor.u32 %v8971_v19, %v8230_v18  ;;  %v8359_v34 = vor.u32 %v9003_v23, %v8358_v22  ;;  %v8071_v3 = vor.u32 %v8931_v31, %v8070_v27  ;;  %v8182_v52 = vld [vmem:[#allocation5 + $0x688] sm:$0xf]  ;;  %v8991_v1 = vld [vmem:[#allocation5 + $0x794] sm:$0xf0] }
 0x299   :  { %v8310_v0 = vld [vmem:[#allocation5 + $0x788] sm:$0xf]  ;;  %v8919_v8 = vld [vmem:[#allocation5 + $0x554] sm:$0xf0] }
 0x29a   :  { %v8022_v7 = vld [vmem:[#allocation5 + $0x548] sm:$0xf]  ;;  %v8311_v13 = vor.u32 %v8991_v1, %v8310_v0  ;;  %v8987_v17 = vld [vmem:[#allocation5 + $0x774] sm:$0xf0]  ;;  %v8873_v0 = vld [vmem:[#allocation5 + $0x3ec] sm:$0xf] }
 0x29b   :  { %5466 = vmatpush.bf16.msra.mxu2 %v7655_v41  ;;  %5479 = vmatpush.bf16.msra.mxu3 %v7783_v42  ;;  %v7926_v41 = vld [vmem:[#allocation5 + $0x488] sm:$0xf]  ;;  %v8895_v42 = vld [vmem:[#allocation5 + $0x494] sm:$0xf0]  ;;  %v8023_v16 = vor.u32 %v8919_v8, %v8022_v7  ;;  %v8769_v7 = vld [vmem:[#allocation5 + $0xac] sm:$0xf] }
 0x29c   :  { %5442 = vmatpush.bf16.msra.mxu0 %v7367_v45  ;;  %5455 = vmatpush.bf16.msra.mxu1 %v7495_v46  ;;  %v8343_v45 = vor.u32 %v8999_v40, %v8342_v39  ;;  %v8198_v46 = vld [vmem:[#allocation5 + $0x6a8] sm:$0xf]  ;;  %v7927_v62 = vor.u32 %v8895_v42, %v7926_v41  ;;  %v8883_v19 = vld [vmem:[#allocation5 + $0x434] sm:$0xf0]  ;;  %v8809_v39 = vld [vmem:[#allocation5 + $0x1ec] sm:$0xf] }
 0x29d   :  { %v8294_v58 = vld [vmem:[#allocation5 + $0x768] sm:$0xf]  ;;  %v8951_v26 = vld [vmem:[#allocation5 + $0x654] sm:$0xf0]  ;;  %v7592_v40 = vld [vmem:[#allocation5 + $0x1f8] sm:$0xf0] }
 0x29e   :  { %v7878_v18 = vld [vmem:[#allocation5 + $0x428] sm:$0xf]  ;;  %v8295_v23 = vor.u32 %v8987_v17, %v8294_v58  ;;  %v8911_v36 = vld [vmem:[#allocation5 + $0x514] sm:$0xf0] }
 0x29f   :  { %5467 = vmatpush.bf16.msra.mxu2 %v7639_v50  ;;  %5480 = vmatpush.bf16.msra.mxu3 %v7767_v51  ;;  %v8199_v50 = vor.u32 %v8963_v24, %v8198_v46  ;;  %v8327_v51 = vor.u32 %v8995_v29, %v8326_v2  ;;  %v8150_v25 = vld [vmem:[#allocation5 + $0x648] sm:$0xf]  ;;  %v7879_v31 = vor.u32 %v8883_v19, %v7878_v18  ;;  %v8979_v24 = vld [vmem:[#allocation5 + $0x734] sm:$0xf0]  ;;  %v8773_v2 = vld [vmem:[#allocation5 + $0xcc] sm:$0xf] }
 0x2a0   :  { %5443 = vmatpush.bf16.msra.mxu0 %v7351_v53  ;;  %5456 = vmatpush.bf16.msra.mxu1 %v7479_v59  ;;  %v8959_v53 = vld [vmem:[#allocation5 + $0x694] sm:$0xf0]  ;;  %v7911_v59 = vor.u32 %v8891_v47, %v7910_v32  ;;  %v8278_v27 = vld [vmem:[#allocation5 + $0x748] sm:$0xf]  ;;  %v8151_v41 = vor.u32 %v8951_v26, %v8150_v25  ;;  %v7448_v29 = vld [vmem:[#allocation5 + $0xd8] sm:$0xf0] }
 0x2a1   :  { %v8183_v12 = vor.u32 %v8959_v53, %v8182_v52  ;;  %v7990_v35 = vld [vmem:[#allocation5 + $0x508] sm:$0xf]  ;;  %v8805_v32 = vld [vmem:[#allocation5 + $0x1cc] sm:$0xf]  ;;  %v7576_v47 = vld [vmem:[#allocation5 + $0x1d8] sm:$0xf0]  ;;  %v7451_v1 = vor.u32 %v8773_v2, %v7448_v29 }
 0x2a2   :  { %v8134_v43 = vld [vmem:[#allocation5 + $0x628] sm:$0xf]  ;;  %v8975_v53 = vld [vmem:[#allocation5 + $0x714] sm:$0xf0]  ;;  %v8837_v18 = vld [vmem:[#allocation5 + $0x2cc] sm:$0xf] }
 0x2a3   :  { %5468 = vmatpush.bf16.msra.mxu2 %v7623_v14  ;;  %5481 = vmatpush.bf16.msra.mxu3 %v7751_v15  ;;  %v8166_v14 = vld [vmem:[#allocation5 + $0x668] sm:$0xf]  ;;  %v8955_v15 = vld [vmem:[#allocation5 + $0x674] sm:$0xf0]  ;;  %v7704_v19 = vld [vmem:[#allocation5 + $0x2d8] sm:$0xf0] }
 0x2a4   :  { %5488 = vmatpush.bf16.msrb.mxu0 %v7975_v4  ;;  %5501 = vmatpush.bf16.msrb.mxu1 %v8103_v5  ;;  %v7894_v4 = vld [vmem:[#allocation5 + $0x448] sm:$0xf]  ;;  %v8887_v5 = vld [vmem:[#allocation5 + $0x454] sm:$0xf0]  ;;  %v8167_v22 = vor.u32 %v8955_v15, %v8166_v14  ;;  %v7560_v14 = vld [vmem:[#allocation5 + $0x1b8] sm:$0xf0] }
 0x2a5   :  { %5444 = vmatmul.bf16.vlgmr.msra.gmra.mxu0 %v10437_v38  ;;  %5457 = vmatmul.bf16.vlgmr.msra.gmra.mxu1 %v10439_v10  ;;  %v7895_v57 = vor.u32 %v8887_v5, %v7894_v4  ;;  %v8262_v46 = vld [vmem:[#allocation5 + $0x728] sm:$0xf]  ;;  %v7579_v4 = vor.u32 %v8805_v32, %v7576_v47  ;;  %v7848_v5 = vld [vmem:[#allocation5 + $0x3f8] sm:$0xf0]  ;;  %v10486_v8 = vld [vmem:[%s10728_s8] sm:$0xf] }
 0x2a6   :  { %v8118_v48 = vld [vmem:[#allocation5 + $0x608] sm:$0xf]  ;;  %v7851_v58 = vor.u32 %v8873_v0, %v7848_v5  ;;  %v3940_v17 = vperm.slane %v10486_v8, 0  ;;  %v8765_v25 = vld [vmem:[#allocation5 + $0x8c] sm:$0xf] }
 0x2a7   :  { %5469 = vmatpush.bf16.msra.mxu2 %v7607_v11  ;;  %5482 = vmatpush.bf16.msra.mxu3 %v7735_v9  ;;  %v8983_v9 = vld [vmem:[#allocation5 + $0x754] sm:$0xf0]  ;;  %v8246_v52 = vld [vmem:[#allocation5 + $0x708] sm:$0xf]  ;;  %v7416_v26 = vld [vmem:[#allocation5 + $0x98] sm:$0xf0] }
 0x2a8   :  { %5489 = vmatpush.bf16.msrb.mxu0 %v7959_v20  ;;  %5502 = vmatpush.bf16.msrb.mxu1 %v8087_v21  ;;  %v8006_v20 = vld [vmem:[#allocation5 + $0x528] sm:$0xf]  ;;  %v8915_v21 = vld [vmem:[#allocation5 + $0x534] sm:$0xf0]  ;;  %v8279_v42 = vor.u32 %v8983_v9, %v8278_v27  ;;  %v8797_v27 = vld [vmem:[#allocation5 + $0x18c] sm:$0xf] }
 0x2a9   :  { %v8007_v11 = vor.u32 %v8915_v21, %v8006_v20  ;;  %v8861_v32 = vld [vmem:[#allocation5 + $0x38c] sm:$0xf]  ;;  %v7800_v47 = vld [vmem:[#allocation5 + $0x398] sm:$0xf0] }
 0x2aa   :  { %5470 = vmatmul.bf16.vlgmr.msra.gmra.mxu2 %v10445_v55  ;;  %5483 = vmatmul.bf16.vlgmr.msra.gmra.mxu3 %v10447_v56  ;;  %v8825_v0 = vld [vmem:[#allocation5 + $0x26c] sm:$0xf] }
 0x2ab   :  { %5514 = vmatpush.bf16.msrb.mxu2 %v8231_v33  ;;  %5527 = vmatpush.bf16.msrb.mxu3 %v8359_v34  ;;  %v7862_v33 = vld [vmem:[#allocation5 + $0x408] sm:$0xf]  ;;  %v8879_v34 = vld [vmem:[#allocation5 + $0x414] sm:$0xf0] }
 0x2ac   :  { %5490 = vmatpush.bf16.msrb.mxu0 %v7943_v37  ;;  %5503 = vmatpush.bf16.msrb.mxu1 %v8071_v3  ;;  %v8777_v37 = vld [vmem:[#allocation5 + $0xec] sm:$0xf]  ;;  %v7464_v3 = vld [vmem:[#allocation5 + $0xf8] sm:$0xf0]  ;;  %v7863_v6 = vor.u32 %v8879_v34, %v7862_v33  ;;  %v7707_v33 = vor.u32 %v8837_v18, %v7704_v19 }
 0x2ad   :  { %v7640_v18 = vld [vmem:[#allocation5 + $0x258] sm:$0xf0]  ;;  %v8853_v19 = vld [vmem:[#allocation5 + $0x34c] sm:$0xf] }
 0x2af   :  { %5515 = vmatpush.bf16.msrb.mxu2 %v8215_v44  ;;  %5528 = vmatpush.bf16.msrb.mxu3 %v8343_v45  ;;  %v7991_v44 = vor.u32 %v8911_v36, %v7990_v35  ;;  %v8947_v45 = vld [vmem:[#allocation5 + $0x634] sm:$0xf0]  ;;  %v8833_v35 = vld [vmem:[#allocation5 + $0x2ac] sm:$0xf]  ;;  %v7688_v36 = vld [vmem:[#allocation5 + $0x2b8] sm:$0xf0] }
 0x2b0   :  { %5491 = vmatpush.bf16.msrb.mxu0 %v7927_v62  ;;  %5504 = vmatpush.bf16.msrb.mxu1 %v8055_v63  ;;  %v7467_v62 = vor.u32 %v8777_v37, %v7464_v3  ;;  %v7595_v63 = vor.u32 %v8809_v39, %v7592_v40  ;;  %v8135_v49 = vor.u32 %v8947_v45, %v8134_v43  ;;  %v8865_v40 = vld [vmem:[#allocation5 + $0x3ac] sm:$0xf]  ;;  %v7400_v43 = vld [vmem:[#allocation5 + $0x78] sm:$0xf0] }
 0x2b1   :  { %v7419_v3 = vor.u32 %v8765_v25, %v7416_v26  ;;  %v7768_v25 = vld [vmem:[#allocation5 + $0x358] sm:$0xf0]  ;;  %v8749_v26 = vld [vmem:[#allocation5 + $0xc] sm:$0xf] }
 0x2b3   :  { %5516 = vmatpush.bf16.msrb.mxu2 %v8199_v50  ;;  %5529 = vmatpush.bf16.msrb.mxu3 %v8327_v51  ;;  %v8263_v50 = vor.u32 %v8979_v24, %v8262_v46  ;;  %v8943_v51 = vld [vmem:[#allocation5 + $0x614] sm:$0xf0]  ;;  %v7691_v46 = vor.u32 %v8833_v35, %v7688_v36  ;;  %v8104_v35 = vld [vmem:[#allocation5 + $0x5f8] sm:$0xf0] }
 0x2b4   :  { %5492 = vmatpush.bf16.msrb.mxu0 %v7911_v59  ;;  %5505 = vmatpush.bf16.msrb.mxu1 %v8039_v54  ;;  %v8841_v59 = vld [vmem:[#allocation5 + $0x2ec] sm:$0xf]  ;;  %v7720_v54 = vld [vmem:[#allocation5 + $0x2f8] sm:$0xf0]  ;;  %v8119_v15 = vor.u32 %v8943_v51, %v8118_v48 }
 0x2b5   :  { %v8757_v48 = vld [vmem:[#allocation5 + $0x4c] sm:$0xf]  ;;  %v7512_v51 = vld [vmem:[#allocation5 + $0x158] sm:$0xf0] }
 0x2b7   :  { %5517 = vmatpush.bf16.msrb.mxu2 %v8183_v12  ;;  %5530 = vmatpush.bf16.msrb.mxu3 %v8311_v13  ;;  %v7432_v12 = vld [vmem:[#allocation5 + $0xb8] sm:$0xf0]  ;;  %v8801_v13 = vld [vmem:[#allocation5 + $0x1ac] sm:$0xf] }
 0x2b8   :  { %5493 = vmatpush.bf16.msrb.mxu0 %v7895_v57  ;;  %5506 = vmatpush.bf16.msrb.mxu1 %v8023_v16  ;;  %v8247_v57 = vor.u32 %v8975_v53, %v8246_v52  ;;  %v7723_v16 = vor.u32 %v8841_v59, %v7720_v54  ;;  %v7435_v20 = vor.u32 %v8769_v7, %v7432_v12  ;;  %v8857_v7 = vld [vmem:[#allocation5 + $0x36c] sm:$0xf]  ;;  %v7784_v12 = vld [vmem:[#allocation5 + $0x378] sm:$0xf0] }
 0x2b9   :  { %v7563_v21 = vor.u32 %v8801_v13, %v7560_v14  ;;  %v7803_v54 = vor.u32 %v8861_v32, %v7800_v47  ;;  %v8753_v13 = vld [vmem:[#allocation5 + $0x2c] sm:$0xf]  ;;  %v7368_v14 = vld [vmem:[#allocation5 + $0x38] sm:$0xf0] }
 0x2ba   :  { %v8813_v32 = vld [vmem:[#allocation5 + $0x20c] sm:$0xf]  ;;  %v7608_v47 = vld [vmem:[#allocation5 + $0x218] sm:$0xf0] }
 0x2bb   :  { %5518 = vmatpush.bf16.msrb.mxu2 %v8167_v22  ;;  %5531 = vmatpush.bf16.msrb.mxu3 %v8295_v23  ;;  %v8869_v22 = vld [vmem:[#allocation5 + $0x3cc] sm:$0xf]  ;;  %v7832_v23 = vld [vmem:[#allocation5 + $0x3d8] sm:$0xf0] }
 0x2bc   :  { %5494 = vmatpush.bf16.msrb.mxu0 %v7879_v31  ;;  %5507 = vmatpush.bf16.msrb.mxu1 %v8007_v11  ;;  %v7544_v31 = vld [vmem:[#allocation5 + $0x198] sm:$0xf0]  ;;  %v7835_v34 = vor.u32 %v8869_v22, %v7832_v23  ;;  %v7371_v22 = vor.u32 %v8753_v13, %v7368_v14  ;;  %v7611_v13 = vor.u32 %v8813_v32, %v7608_v47 }
 0x2bd   :  { %v7547_v39 = vor.u32 %v8797_v27, %v7544_v31  ;;  %v7352_v27 = vld [vmem:[#allocation5 + $0x18] sm:$0xf0]  ;;  %v8781_v31 = vld [vmem:[#allocation5 + $0x10c] sm:$0xf] }
 0x2be   :  { %v5237_v11 = vpop.f32.mrf.mxu0  ;;  %v5250_v9 = vpop.f32.mrf.mxu1  ;;  %v8024_v32 = vld [vmem:[#allocation5 + $0x558] sm:$0xf0] }
 0x2bf   :  { %5519 = vmatpush.bf16.msrb.mxu2 %v8151_v41  ;;  %5532 = vmatpush.bf16.msrb.mxu3 %v8279_v42  ;;  %v5238_v37 = vadd.f32 %v5237_v11, %v3940_v17  ;;  %v7816_v41 = vld [vmem:[#allocation5 + $0x3b8] sm:$0xf0]  ;;  %v8761_v42 = vld [vmem:[#allocation5 + $0x6c] sm:$0xf] }
 0x2c0   :  { %5495 = vmatpush.bf16.msrb.mxu0 %v7863_v6  ;;  %5508 = vmatpush.bf16.msrb.mxu1 %v7991_v44  ;;  %v8793_v6 = vld [vmem:[#allocation5 + $0x16c] sm:$0xf]  ;;  %v7528_v44 = vld [vmem:[#allocation5 + $0x178] sm:$0xf0]  ;;  %v7819_v24 = vor.u32 %v8865_v40, %v7816_v41  ;;  %v7403_v2 = vor.u32 %v8761_v42, %v7400_v43 }
 0x2c1   :  { %v10493_v45 = vadd.f32 %v5250_v9, %v5238_v37  ;;  %v7531_v29 = vor.u32 %v8793_v6, %v7528_v44  ;;  %v8821_v17 = vld [vmem:[#allocation5 + $0x24c] sm:$0xf]  ;;  %v7480_v11 = vld [vmem:[#allocation5 + $0x118] sm:$0xf0]  ;;  %v7771_v37 = vor.u32 %v8853_v19, %v7768_v25 }
 0x2c2   :  { %v8905_v9 = vld [vmem:[#allocation5 + $0x4ec] sm:$0xf]  ;;  %v7643_v36 = vor.u32 %v8821_v17, %v7640_v18  ;;  %v7483_v40 = vor.u32 %v8781_v31, %v7480_v11  ;;  %v7624_v41 = vld [vmem:[#allocation5 + $0x238] sm:$0xf0] }
 0x2c3   :  { %5520 = vmatpush.bf16.msrb.mxu2 %v8135_v49  ;;  %5533 = vmatpush.bf16.msrb.mxu3 %v8263_v50  ;;  %v7384_v49 = vld [vmem:[#allocation5 + $0x58] sm:$0xf0]  ;;  %v8789_v50 = vld [vmem:[#allocation5 + $0x14c] sm:$0xf] }
 0x2c4   :  { %5540 = vmatpush.bf16.msra.mxu0 %v7467_v62  ;;  %5553 = vmatpush.bf16.msra.mxu1 %v7595_v63  ;;  %v8829_v62 = vld [vmem:[#allocation5 + $0x28c] sm:$0xf]  ;;  %v7672_v63 = vld [vmem:[#allocation5 + $0x298] sm:$0xf0]  ;;  %v7515_v5 = vor.u32 %v8789_v50, %v7512_v51 }
 0x2c5   :  { %5496 = vmatmul.bf16.vlgmr.msrb.gmra.mxu0 %v10457_v28  ;;  %5509 = vmatmul.bf16.vlgmr.msrb.gmra.mxu1 %v10459_v30  ;;  %v7675_v59 = vor.u32 %v8829_v62, %v7672_v63  ;;  %v8849_v42 = vld [vmem:[#allocation5 + $0x32c] sm:$0xf]  ;;  %v7752_v43 = vld [vmem:[#allocation5 + $0x338] sm:$0xf0] }
 0x2c6   :  { %v5239_v52 = vpop.f32.mrf.mxu0  ;;  %v5252_v53 = vpop.f32.mrf.mxu1  ;;  %v8933_v62 = vld [vmem:[#allocation5 + $0x5cc] sm:$0xf]  ;;  %v8088_v63 = vld [vmem:[#allocation5 + $0x5d8] sm:$0xf0] }
 0x2c7   :  { %5521 = vmatpush.bf16.msrb.mxu2 %v8119_v15  ;;  %5534 = vmatpush.bf16.msrb.mxu3 %v8247_v57  ;;  %v8785_v15 = vld [vmem:[#allocation5 + $0x12c] sm:$0xf]  ;;  %v7496_v57 = vld [vmem:[#allocation5 + $0x138] sm:$0xf0] }
 0x2c8   :  { %5541 = vmatpush.bf16.msra.mxu0 %v7451_v1  ;;  %5554 = vmatpush.bf16.msra.mxu1 %v7579_v4  ;;  %v7656_v1 = vld [vmem:[#allocation5 + $0x278] sm:$0xf0]  ;;  %v7387_v4 = vor.u32 %v8757_v48, %v7384_v49  ;;  %v7499_v23 = vor.u32 %v8785_v15, %v7496_v57  ;;  %v8845_v48 = vld [vmem:[#allocation5 + $0x30c] sm:$0xf] }
 0x2c9   :  { %v7736_v51 = vld [vmem:[#allocation5 + $0x318] sm:$0xf0]  ;;  %v8969_v52 = vld [vmem:[#allocation5 + $0x6ec] sm:$0xf] }
 0x2ca   :  { %5522 = vmatmul.bf16.vlgmr.msrb.gmra.mxu2 %v10465_v60  ;;  %5535 = vmatmul.bf16.vlgmr.msrb.gmra.mxu3 %v10467_v61  ;;  %v8232_v53 = vld [vmem:[#allocation5 + $0x6f8] sm:$0xf0]  ;;  %v7739_v14 = vor.u32 %v8845_v48, %v7736_v51  ;;  %v8997_v19 = vld [vmem:[#allocation5 + $0x7cc] sm:$0xf] }
 0x2cb   :  { %5566 = vmatpush.bf16.msra.mxu2 %v7723_v16  ;;  %5579 = vmatpush.bf16.msra.mxu3 %v7851_v58  ;;  %v7659_v16 = vor.u32 %v8825_v0, %v7656_v1  ;;  %v7787_v58 = vor.u32 %v8857_v7, %v7784_v12  ;;  %v9001_v0 = vld [vmem:[#allocation5 + $0x7ec] sm:$0xf]  ;;  %v8360_v1 = vld [vmem:[#allocation5 + $0x7f8] sm:$0xf0]  ;;  %v8235_v15 = vor.u32 %v8969_v52, %v8232_v53 }
 0x2cc   :  { %5542 = vmatpush.bf16.msra.mxu0 %v7435_v20  ;;  %5555 = vmatpush.bf16.msra.mxu1 %v7563_v21  ;;  %v8929_v7 = vld [vmem:[#allocation5 + $0x5ac] sm:$0xf]  ;;  %v8072_v12 = vld [vmem:[#allocation5 + $0x5b8] sm:$0xf0]  ;;  %v8363_v57 = vor.u32 %v9001_v0, %v8360_v1 }
 0x2cd   :  { %v10495_v20 = vpop.f32.mrf.mxu2  ;;  %v10497_v21 = vpop.f32.mrf.mxu3  ;;  %v8075_v18 = vor.u32 %v8929_v7, %v8072_v12  ;;  %v7928_v25 = vld [vmem:[#allocation5 + $0x498] sm:$0xf0]  ;;  %v8881_v0 = vld [vmem:[#allocation5 + $0x42c] sm:$0xf] }
 0x2ce   :  { %v8168_v51 = vld [vmem:[#allocation5 + $0x678] sm:$0xf0] }
 0x2cf   :  { %5567 = vmatpush.bf16.msra.mxu2 %v7707_v33  ;;  %5580 = vmatpush.bf16.msra.mxu3 %v7835_v34  ;;  %v7976_v33 = vld [vmem:[#allocation5 + $0x4f8] sm:$0xf0]  ;;  %v8937_v34 = vld [vmem:[#allocation5 + $0x5ec] sm:$0xf] }
 0x2d0   :  { %5543 = vmatpush.bf16.msra.mxu0 %v7419_v3  ;;  %5556 = vmatpush.bf16.msra.mxu1 %v7547_v39  ;;  %v8817_v3 = vld [vmem:[#allocation5 + $0x22c] sm:$0xf]  ;;  %v7355_v39 = vor.u32 %v8749_v26, %v7352_v27  ;;  %v7979_v6 = vor.u32 %v8905_v9, %v7976_v33  ;;  %v8107_v44 = vor.u32 %v8937_v34, %v8104_v35  ;;  %v8056_v27 = vld [vmem:[#allocation5 + $0x598] sm:$0xf0] }
 0x2d1   :  { %v8925_v26 = vld [vmem:[#allocation5 + $0x58c] sm:$0xf]  ;;  %v8200_v33 = vld [vmem:[#allocation5 + $0x6b8] sm:$0xf0] }
 0x2d2   :  { %v8961_v9 = vld [vmem:[#allocation5 + $0x6ac] sm:$0xf]  ;;  %v8059_v35 = vor.u32 %v8925_v26, %v8056_v27  ;;  %v7880_v1 = vld [vmem:[#allocation5 + $0x438] sm:$0xf0] }
 0x2d3   :  { %5568 = vmatpush.bf16.msra.mxu2 %v7691_v46  ;;  %5581 = vmatpush.bf16.msra.mxu3 %v7819_v24  ;;  %v8901_v46 = vld [vmem:[#allocation5 + $0x4cc] sm:$0xf]  ;;  %v7960_v24 = vld [vmem:[#allocation5 + $0x4d8] sm:$0xf0] }
 0x2d4   :  { %5544 = vmatpush.bf16.msra.mxu0 %v7403_v2  ;;  %5557 = vmatpush.bf16.msra.mxu1 %v7531_v29  ;;  %v7627_v2 = vor.u32 %v8817_v3, %v7624_v41  ;;  %v7755_v29 = vor.u32 %v8849_v42, %v7752_v43  ;;  %v8889_v3 = vld [vmem:[#allocation5 + $0x46c] sm:$0xf]  ;;  %v8040_v41 = vld [vmem:[#allocation5 + $0x578] sm:$0xf0]  ;;  %v8203_v42 = vor.u32 %v8961_v9, %v8200_v33 }
 0x2d5   :  { %v5265_v49 = vpop.f32.mrf.mxu2  ;;  %v5278_v50 = vpop.f32.mrf.mxu3  ;;  %v8945_v9 = vld [vmem:[#allocation5 + $0x62c] sm:$0xf] }
 0x2d6   :  { %v8953_v50 = vld [vmem:[#allocation5 + $0x66c] sm:$0xf] }
 0x2d7   :  { %5569 = vmatpush.bf16.msra.mxu2 %v7675_v59  ;;  %5582 = vmatpush.bf16.msra.mxu3 %v7803_v54  ;;  %v7963_v59 = vor.u32 %v8901_v46, %v7960_v24  ;;  %v8091_v54 = vor.u32 %v8933_v62, %v8088_v63  ;;  %v8989_v62 = vld [vmem:[#allocation5 + $0x78c] sm:$0xf]  ;;  %v8312_v63 = vld [vmem:[#allocation5 + $0x798] sm:$0xf0]  ;;  %v8171_v7 = vor.u32 %v8953_v50, %v8168_v51 }
 0x2d8   :  { %5545 = vmatpush.bf16.msra.mxu0 %v7387_v4  ;;  %5558 = vmatpush.bf16.msra.mxu1 %v7515_v5  ;;  %v8897_v4 = vld [vmem:[#allocation5 + $0x4ac] sm:$0xf]  ;;  %v7944_v5 = vld [vmem:[#allocation5 + $0x4b8] sm:$0xf0]  ;;  %v8315_v49 = vor.u32 %v8989_v62, %v8312_v63  ;;  %v3941_v62 = vperm.slane %v10486_v8, 1 }
 0x2d9   :  { %v7947_v17 = vor.u32 %v8897_v4, %v7944_v5  ;;  %v8913_v4 = vld [vmem:[#allocation5 + $0x52c] sm:$0xf]  ;;  %v8008_v5 = vld [vmem:[#allocation5 + $0x538] sm:$0xf0] }
 0x2da   :  { %v5662_v63 = vld [vmem:[%s10729_s9 + $0x70] sm:$0xff]  ;;  %v5660_v50 = vld [vmem:[%s10729_s9 + $0x60] sm:$0xff] }
 0x2db   :  { %5570 = vmatpush.bf16.msra.mxu2 %v7659_v16  ;;  %5583 = vmatpush.bf16.msra.mxu3 %v7787_v58  ;;  %v8965_v16 = vld [vmem:[#allocation5 + $0x6cc] sm:$0xf]  ;;  %v8216_v58 = vld [vmem:[#allocation5 + $0x6d8] sm:$0xf0] }
 0x2dc   :  { %5546 = vmatpush.bf16.msra.mxu0 %v7371_v22  ;;  %5559 = vmatpush.bf16.msra.mxu1 %v7499_v23  ;;  %v8344_v22 = vld [vmem:[#allocation5 + $0x7d8] sm:$0xf0]  ;;  %v8893_v23 = vld [vmem:[#allocation5 + $0x48c] sm:$0xf]  ;;  %v8219_v31 = vor.u32 %v8965_v16, %v8216_v58  ;;  %v7883_v16 = vor.u32 %v8881_v0, %v7880_v1  ;;  %v8011_v58 = vor.u32 %v8913_v4, %v8008_v5 }
 0x2dd   :  { %v8347_v11 = vor.u32 %v8997_v19, %v8344_v22  ;;  %v7931_v34 = vor.u32 %v8893_v23, %v7928_v25  ;;  %v8877_v19 = vld [vmem:[#allocation5 + $0x40c] sm:$0xf]  ;;  %v7864_v22 = vld [vmem:[#allocation5 + $0x418] sm:$0xf0]  ;;  %v5264_v4 = vadd.f32 %v10495_v20, %v10493_v45 }
 0x2de   :  { %v8909_v23 = vld [vmem:[#allocation5 + $0x50c] sm:$0xf]  ;;  %v7992_v25 = vld [vmem:[#allocation5 + $0x518] sm:$0xf0]  ;;  %v7867_v33 = vor.u32 %v8877_v19, %v7864_v22 }
 0x2df   :  { %5571 = vmatpush.bf16.msra.mxu2 %v7643_v36  ;;  %5584 = vmatpush.bf16.msra.mxu3 %v7771_v37  ;;  %v8993_v36 = vld [vmem:[#allocation5 + $0x7ac] sm:$0xf]  ;;  %v8328_v37 = vld [vmem:[#allocation5 + $0x7b8] sm:$0xf0] }
 0x2e0   :  { %5547 = vmatpush.bf16.msra.mxu0 %v7355_v39  ;;  %5560 = vmatpush.bf16.msra.mxu1 %v7483_v40  ;;  %v7912_v39 = vld [vmem:[#allocation5 + $0x478] sm:$0xf0]  ;;  %v8921_v40 = vld [vmem:[#allocation5 + $0x56c] sm:$0xf]  ;;  %v8331_v43 = vor.u32 %v8993_v36, %v8328_v37 }
 0x2e1   :  { %v7915_v46 = vor.u32 %v8889_v3, %v7912_v39  ;;  %v8043_v24 = vor.u32 %v8921_v40, %v8040_v41  ;;  %v8977_v36 = vld [vmem:[#allocation5 + $0x72c] sm:$0xf]  ;;  %v8264_v37 = vld [vmem:[#allocation5 + $0x738] sm:$0xf0] }
 0x2e2   :  { %v5663_v3 = vld [vmem:[%s10729_s9 + $0x78] sm:$0xff]  ;;  %v8267_v41 = vor.u32 %v8977_v36, %v8264_v37  ;;  %v5674_v0 = vld [vmem:[%s10729_s9 + $0xd0] sm:$0xff]  ;;  %v5672_v45 = vld [vmem:[%s10729_s9 + $0xc0] sm:$0xff] }
 0x2e3   :  { %5572 = vmatpush.bf16.msra.mxu2 %v7627_v2  ;;  %5585 = vmatpush.bf16.msra.mxu3 %v7755_v29  ;;  %v8885_v2 = vld [vmem:[#allocation5 + $0x44c] sm:$0xf]  ;;  %v7896_v29 = vld [vmem:[#allocation5 + $0x458] sm:$0xf0] }
 0x2e4   :  { %5592 = vmatpush.bf16.msrb.mxu0 %v7979_v6  ;;  %5605 = vmatpush.bf16.msrb.mxu1 %v8107_v44  ;;  %v8957_v6 = vld [vmem:[#allocation5 + $0x68c] sm:$0xf]  ;;  %v8184_v44 = vld [vmem:[#allocation5 + $0x698] sm:$0xf0]  ;;  %v7899_v52 = vor.u32 %v8885_v2, %v7896_v29 }
 0x2e5   :  { %5548 = vmatmul.bf16.vlgmr.msra.gmra.mxu0 %v10437_v38  ;;  %5561 = vmatmul.bf16.vlgmr.msra.gmra.mxu1 %v10439_v10  ;;  %v10501_v38 = vpop.f32.mrf.mxu0  ;;  %v10503_v10 = vpop.f32.mrf.mxu1  ;;  %v8187_v48 = vor.u32 %v8957_v6, %v8184_v44  ;;  %v5679_v39 = vld [vmem:[%s10729_s9 + $0xf8] sm:$0xff]  ;;  %v8120_v44 = vld [vmem:[#allocation5 + $0x618] sm:$0xf0]  ;;  %v5678_v2 = vld [vmem:[%s10729_s9 + $0xf0] sm:$0xff] }
 0x2e6   :  { %v8941_v6 = vld [vmem:[#allocation5 + $0x60c] sm:$0xf] }
 0x2e7   :  { %5573 = vmatpush.bf16.msra.mxu2 %v7611_v13  ;;  %5586 = vmatpush.bf16.msra.mxu3 %v7739_v14  ;;  %v8949_v13 = vld [vmem:[#allocation5 + $0x64c] sm:$0xf]  ;;  %v8152_v14 = vld [vmem:[#allocation5 + $0x658] sm:$0xf0] }
 0x2e8   :  { %5593 = vmatpush.bf16.msrb.mxu0 %v7963_v59  ;;  %5606 = vmatpush.bf16.msrb.mxu1 %v8091_v54  ;;  %v8985_v59 = vld [vmem:[#allocation5 + $0x76c] sm:$0xf]  ;;  %v8296_v54 = vld [vmem:[#allocation5 + $0x778] sm:$0xf0] }
 0x2e9   :  { %v8299_v12 = vor.u32 %v8985_v59, %v8296_v54  ;;  %v5658_v54 = vld [vmem:[%s10729_s9 + $0x50] sm:$0xff]  ;;  %v5651_v36 = vld [vmem:[%s10729_s9 + $0x18] sm:$0xff] }
 0x2ea   :  { %5574 = vmatmul.bf16.vlgmr.msra.gmra.mxu2 %v10445_v55  ;;  %5587 = vmatmul.bf16.vlgmr.msra.gmra.mxu3 %v10447_v56  ;;  %v8917_v55 = vld [vmem:[#allocation5 + $0x54c] sm:$0xf] }
 0x2eb   :  { %5618 = vmatpush.bf16.msrb.mxu2 %v8235_v15  ;;  %5631 = vmatpush.bf16.msrb.mxu3 %v8363_v57  ;;  %v8027_v53 = vor.u32 %v8917_v55, %v8024_v32  ;;  %v5661_v32 = vld [vmem:[%s10729_s9 + $0x68] sm:$0xff]  ;;  %v5654_v19 = vld [vmem:[%s10729_s9 + $0x30] sm:$0xff]  ;;  %v5695_v37 = vld [vmem:[%s10729_s9 + $0x178] sm:$0xff] }
 0x2ec   :  { %5594 = vmatpush.bf16.msrb.mxu0 %v7947_v17  ;;  %5607 = vmatpush.bf16.msrb.mxu1 %v8075_v18  ;;  %v10507_v15 = vpop.f32.mrf.mxu2  ;;  %v10509_v57 = vpop.f32.mrf.mxu3  ;;  %v8981_v17 = vld [vmem:[#allocation5 + $0x74c] sm:$0xf]  ;;  %v8280_v18 = vld [vmem:[#allocation5 + $0x758] sm:$0xf0] }
 0x2ed   :  { %v5291_v56 = vpop.f32.mrf.mxu0  ;;  %v5304_v47 = vpop.f32.mrf.mxu1 }
 0x2ee   :  { %v5677_v56 = vld [vmem:[%s10729_s9 + $0xe8] sm:$0xff]  ;;  %v8123_v47 = vor.u32 %v8941_v6, %v8120_v44 }
 0x2ef   :  { %5619 = vmatpush.bf16.msrb.mxu2 %v8219_v31  ;;  %5632 = vmatpush.bf16.msrb.mxu3 %v8347_v11  ;;  %v8155_v31 = vor.u32 %v8949_v13, %v8152_v14  ;;  %v8283_v11 = vor.u32 %v8981_v17, %v8280_v18  ;;  %v5671_v17 = vld [vmem:[%s10729_s9 + $0xb8] sm:$0xff]  ;;  %v5665_v6 = vld [vmem:[%s10729_s9 + $0x88] sm:$0xff] }
 0x2f0   :  { %5595 = vmatpush.bf16.msrb.mxu0 %v7931_v34  ;;  %5608 = vmatpush.bf16.msrb.mxu1 %v8059_v35  ;;  %v7995_v34 = vor.u32 %v8909_v23, %v7992_v25  ;;  %v8136_v35 = vld [vmem:[#allocation5 + $0x638] sm:$0xf0] }
 0x2f1   :  { %v8139_v40 = vor.u32 %v8945_v9, %v8136_v35  ;;  %v5693_v44 = vld [vmem:[%s10729_s9 + $0x168] sm:$0xff] }
 0x2f3   :  { %5620 = vmatpush.bf16.msrb.mxu2 %v8203_v42  ;;  %5633 = vmatpush.bf16.msrb.mxu3 %v8331_v43 }
 0x2f4   :  { %5596 = vmatpush.bf16.msrb.mxu0 %v7915_v46  ;;  %5609 = vmatpush.bf16.msrb.mxu1 %v8043_v24  ;;  %v5317_v42 = vpop.f32.mrf.mxu2  ;;  %v5330_v43 = vpop.f32.mrf.mxu3  ;;  %v8973_v46 = vld [vmem:[#allocation5 + $0x70c] sm:$0xf]  ;;  %v8248_v24 = vld [vmem:[#allocation5 + $0x718] sm:$0xf0] }
 0x2f5   :  { %v5341_v26 = vpop.f32.mrf.mxu0  ;;  %v5354_v27 = vpop.f32.mrf.mxu1  ;;  %v5649_v43 = vld [vmem:[%s10729_s9 + $0x8] sm:$0xff] }
 0x2f7   :  { %5621 = vmatpush.bf16.msrb.mxu2 %v8187_v48  ;;  %5634 = vmatpush.bf16.msrb.mxu3 %v8315_v49  ;;  %v8251_v48 = vor.u32 %v8973_v46, %v8248_v24  ;;  %v5342_v49 = vadd.f32 %v5341_v26, %v3941_v62  ;;  %v5653_v26 = vld [vmem:[%s10729_s9 + $0x28] sm:$0xff]  ;;  %v5692_v46 = vld [vmem:[%s10729_s9 + $0x160] sm:$0xff] }
 0x2f8   :  { %5597 = vmatpush.bf16.msrb.mxu0 %v7899_v52  ;;  %5610 = vmatpush.bf16.msrb.mxu1 %v8027_v53  ;;  %v5659_v52 = vld [vmem:[%s10729_s9 + $0x58] sm:$0xff]  ;;  %v5648_v24 = vld [vmem:[%s10729_s9] sm:$0xff] }
 0x2f9   :  { %v5675_v53 = vld [vmem:[%s10729_s9 + $0xd8] sm:$0xff]  ;;  %v5355_v59 = vadd.f32 %v5354_v27, %v5342_v49  ;;  %v5664_v62 = vld [vmem:[%s10729_s9 + $0x80] sm:$0xff] }
 0x2fa   :  { %v5688_v49 = vld [vmem:[%s10729_s9 + $0x140] sm:$0xff] }
 0x2fb   :  { %5622 = vmatpush.bf16.msrb.mxu2 %v8171_v7  ;;  %5635 = vmatpush.bf16.msrb.mxu3 %v8299_v12  ;;  %v5656_v12 = vld [vmem:[%s10729_s9 + $0x40] sm:$0xff] }
 0x2fc   :  { %5598 = vmatpush.bf16.msrb.mxu0 %v7883_v16  ;;  %5611 = vmatpush.bf16.msrb.mxu1 %v8011_v58  ;;  %v5380_v51 = vpop.f32.mrf.mxu3  ;;  %v5277_v16 = vadd.f32 %v10497_v21, %v5264_v4  ;;  %v5655_v58 = vld [vmem:[%s10729_s9 + $0x38] sm:$0xff]  ;;  %v5670_v21 = vld [vmem:[%s10729_s9 + $0xb0] sm:$0xff]  ;;  %v5681_v4 = vld [vmem:[%s10729_s9 + $0x108] sm:$0xff] }
 0x2fd   :  { %v5343_v29 = vpop.f32.mrf.mxu0  ;;  %v5356_v55 = vpop.f32.mrf.mxu1 }
 0x2fe   :  { %v5290_v18 = vadd.f32 %v10501_v38, %v5277_v16  ;;  %v5669_v38 = vld [vmem:[%s10729_s9 + $0xa8] sm:$0xff]  ;;  %v5691_v55 = vld [vmem:[%s10729_s9 + $0x158] sm:$0xff] }
 0x2ff   :  { %5623 = vmatpush.bf16.msrb.mxu2 %v8155_v31  ;;  %5636 = vmatpush.bf16.msrb.mxu3 %v8283_v11  ;;  %v5652_v31 = vld [vmem:[%s10729_s9 + $0x20] sm:$0xff] }
 0x300   :  { %5599 = vmatpush.bf16.msrb.mxu0 %v7867_v33  ;;  %5612 = vmatpush.bf16.msrb.mxu1 %v7995_v34  ;;  %v5303_v27 = vadd.f32 %v10503_v10, %v5290_v18  ;;  %v5668_v11 = vld [vmem:[%s10729_s9 + $0xa0] sm:$0xff]  ;;  %v5667_v10 = vld [vmem:[%s10729_s9 + $0x98] sm:$0xff] }
 0x302   :  { %v5316_v33 = vadd.f32 %v10507_v15, %v5303_v27  ;;  %v5694_v15 = vld [vmem:[%s10729_s9 + $0x170] sm:$0xff] }
 0x303   :  { %5624 = vmatpush.bf16.msrb.mxu2 %v8139_v40  ;;  %5637 = vmatpush.bf16.msrb.mxu3 %v8267_v41  ;;  %v5666_v40 = vld [vmem:[%s10729_s9 + $0x90] sm:$0xff] }
 0x304   :  { %5716 = vmatpush.msra.mxu0 %v5663_v3  ;;  %5736 = vmatpush.msra.mxu1 %v5679_v39  ;;  %v5382_v14 = vpop.f32.mrf.mxu3  ;;  %v5650_v39 = vld [vmem:[%s10729_s9 + $0x10] sm:$0xff]  ;;  %v5329_v42 = vadd.f32 %v10509_v57, %v5316_v33 }
 0x305   :  { %5600 = vmatmul.bf16.vlgmr.msrb.gmra.mxu0 %v10457_v28  ;;  %5613 = vmatmul.bf16.vlgmr.msrb.gmra.mxu1 %v10459_v30  ;;  %v5676_v28 = vld [vmem:[%s10729_s9 + $0xe0] sm:$0xff]  ;;  %v5367_v30 = vpop.f32.mrf.mxu2  ;;  %v5393_v5 = vpop.f32.mrf.mxu0 }
 0x306   :  { %5717 = vmatpush.msra.mxu0 %v5662_v63  ;;  %5737 = vmatpush.msra.mxu1 %v5678_v2  ;;  %v5368_v1 = vadd.f32 %v5367_v30, %v5355_v59  ;;  %v5406_v7 = vpop.f32.mrf.mxu1  ;;  %v5644_v63 = vmax.f32 %v5329_v42, 0.0  ;;  %v5685_v30 = vld [vmem:[%s10729_s9 + $0x128] sm:$0xff]  ;;  %v5683_v59 = vld [vmem:[%s10729_s9 + $0x118] sm:$0xff] }
 0x307   :  { %5625 = vmatpush.bf16.msrb.mxu2 %v8123_v47  ;;  %5638 = vmatpush.bf16.msrb.mxu3 %v8251_v48 }
 0x308   :  { %5718 = vmatpush.msra.mxu0 %v5661_v32  ;;  %5738 = vmatpush.msra.mxu1 %v5677_v56  ;;  %v5381_v20 = vadd.f32 %v5380_v51, %v5368_v1  ;;  %v5690_v32 = vld [vmem:[%s10729_s9 + $0x150] sm:$0xff]  ;;  %v5689_v56 = vld [vmem:[%s10729_s9 + $0x148] sm:$0xff]  ;;  %v5684_v51 = vld [vmem:[%s10729_s9 + $0x120] sm:$0xff] }
 0x309   :  { %v5682_v1 = vld [vmem:[%s10729_s9 + $0x110] sm:$0xff] }
 0x30a   :  { %5719 = vmatpush.msra.mxu0 %v5660_v50  ;;  %5739 = vmatpush.msra.mxu1 %v5676_v28  ;;  %v5394_v22 = vadd.f32 %v5393_v5, %v5381_v20  ;;  %v5687_v50 = vld [vmem:[%s10729_s9 + $0x138] sm:$0xff]  ;;  %v5686_v28 = vld [vmem:[%s10729_s9 + $0x130] sm:$0xff]  ;;  %v5680_v5 = vld [vmem:[%s10729_s9 + $0x100] sm:$0xff] }
 0x30b   :  { %5626 = vmatmul.bf16.vlgmr.msrb.gmra.mxu2 %v10465_v60  ;;  %5639 = vmatmul.bf16.vlgmr.msrb.gmra.mxu3 %v10467_v61  ;;  %v5657_v60 = vld [vmem:[%s10729_s9 + $0x48] sm:$0xff] }
 0x30c   :  { %5720 = vmatpush.msra.mxu0 %v5659_v52  ;;  %5740 = vmatpush.msra.mxu1 %v5675_v53  ;;  %v5673_v61 = vld [vmem:[%s10729_s9 + $0xc8] sm:$0xff]  ;;  %v5407_v9 = vadd.f32 %v5406_v7, %v5394_v22  ;;  %v3942_v7 = vperm.slane %v10486_v8, 2 }
 0x30d   :  { %v5369_v13 = vpop.f32.mrf.mxu2  ;;  %v5395_v23 = vpop.f32.mrf.mxu0  ;;  %5756 = vmatpush.msra.mxu2 %v5695_v37 }
 0x30e   :  { %5721 = vmatpush.msra.mxu0 %v5658_v54  ;;  %5741 = vmatpush.msra.mxu1 %v5674_v0  ;;  %v5408_v25 = vpop.f32.mrf.mxu1  ;;  %v5432_v35 = vpop.f32.mrf.mxu3  ;;  %v5711_v23 = vld [vmem:[%s10729_s9 + $0x1f8] sm:$0xff] }
 0x30f   :  { %5757 = vmatpush.msra.mxu2 %v5694_v15  ;;  %v5710_v25 = vld [vmem:[%s10729_s9 + $0x1f0] sm:$0xff]  ;;  %5776 = vmatpush.msra.mxu3 %v5711_v23  ;;  %v5703_v15 = vld [vmem:[%s10729_s9 + $0x1b8] sm:$0xff] }
 0x310   :  { %5722 = vmatpush.msra.mxu0 %v5657_v60  ;;  %5742 = vmatpush.msra.mxu1 %v5673_v61 }
 0x311   :  { %5758 = vmatpush.msra.mxu2 %v5693_v44  ;;  %5777 = vmatpush.msra.mxu3 %v5710_v25 }
 0x312   :  { %5723 = vmatpush.msra.mxu0 %v5656_v12  ;;  %5743 = vmatpush.msra.mxu1 %v5672_v45 }
 0x313   :  { %5759 = vmatpush.msra.mxu2 %v5692_v46 }
 0x314   :  { %5724 = vmatpush.msra.mxu0 %v5655_v58  ;;  %5744 = vmatpush.msra.mxu1 %v5671_v17 }
 0x315   :  { %v5419_v34 = vpop.f32.mrf.mxu2  ;;  %5760 = vmatpush.msra.mxu2 %v5691_v55 }
 0x316   :  { %5725 = vmatpush.msra.mxu0 %v5654_v19  ;;  %5745 = vmatpush.msra.mxu1 %v5670_v21  ;;  %v5420_v3 = vadd.f32 %v5419_v34, %v5407_v9  ;;  %v5434_v29 = vpop.f32.mrf.mxu3  ;;  %v5707_v9 = vld [vmem:[%s10729_s9 + $0x1d8] sm:$0xff] }
 0x317   :  { %5761 = vmatpush.msra.mxu2 %v5690_v32  ;;  %v3943_v29 = vperm.slane %v10486_v8, 3 }
 0x318   :  { %5726 = vmatpush.msra.mxu0 %v5653_v26  ;;  %5746 = vmatpush.msra.mxu1 %v5669_v38  ;;  %v5433_v41 = vadd.f32 %v5432_v35, %v5420_v3  ;;  %v5706_v35 = vld [vmem:[%s10729_s9 + $0x1d0] sm:$0xff]  ;;  %v5704_v3 = vld [vmem:[%s10729_s9 + $0x1c0] sm:$0xff] }
 0x319   :  { %5762 = vmatpush.msra.mxu2 %v5689_v56 }
 0x31a   :  { %5727 = vmatpush.msra.mxu0 %v5652_v31  ;;  %5747 = vmatpush.msra.mxu1 %v5668_v11  ;;  %v5645_v57 = vmax.f32 %v5433_v41, 0.0  ;;  %v5709_v31 = vld [vmem:[%s10729_s9 + $0x1e8] sm:$0xff]  ;;  %v5708_v11 = vld [vmem:[%s10729_s9 + $0x1e0] sm:$0xff] }
 0x31b   :  { %5763 = vmatpush.msra.mxu2 %v5688_v49  ;;  %5778 = vmatpush.msra.mxu3 %v5709_v31  ;;  %v5700_v41 = vld [vmem:[%s10729_s9 + $0x1a0] sm:$0xff] }
 0x31c   :  { %5728 = vmatpush.msra.mxu0 %v5651_v36  ;;  %5748 = vmatpush.msra.mxu1 %v5667_v10  ;;  %v5705_v36 = vld [vmem:[%s10729_s9 + $0x1c8] sm:$0xff] }
 0x31d   :  { %v5421_v2 = vpop.f32.mrf.mxu2  ;;  %5764 = vmatpush.msra.mxu2 %v5687_v50  ;;  %5779 = vmatpush.msra.mxu3 %v5708_v11 }
 0x31e   :  { %5729 = vmatpush.msra.mxu0 %v5650_v39  ;;  %5749 = vmatpush.msra.mxu1 %v5666_v40  ;;  %v5702_v39 = vld [vmem:[%s10729_s9 + $0x1b0] sm:$0xff]  ;;  %v5701_v40 = vld [vmem:[%s10729_s9 + $0x1a8] sm:$0xff] }
 0x31f   :  { %5765 = vmatpush.msra.mxu2 %v5686_v28  ;;  %5780 = vmatpush.msra.mxu3 %v5707_v9 }
 0x320   :  { %5730 = vmatpush.msra.mxu0 %v5649_v43  ;;  %5750 = vmatpush.msra.mxu1 %v5665_v6  ;;  %v5699_v6 = vld [vmem:[%s10729_s9 + $0x198] sm:$0xff] }
 0x321   :  { %5766 = vmatpush.msra.mxu2 %v5685_v30  ;;  %5781 = vmatpush.msra.mxu3 %v5706_v35 }
 0x322   :  { %5731 = vmatpush.msra.mxu0 %v5648_v24  ;;  %5751 = vmatpush.msra.mxu1 %v5664_v62  ;;  %v5445_v47 = vpop.f32.mrf.mxu0  ;;  %v5458_v48 = vpop.f32.mrf.mxu1  ;;  %v5697_v24 = vld [vmem:[%s10729_s9 + $0x188] sm:$0xff]  ;;  %v5696_v62 = vld [vmem:[%s10729_s9 + $0x180] sm:$0xff] }
 0x323   :  { %5732 = vmatmul.f32.vlgmr.msra.gmra.mxu0 %v5644_v63  ;;  %5752 = vmatmul.f32.vlgmr.msra.gmra.mxu1 %v5645_v57  ;;  %v5446_v12 = vadd.f32 %v5445_v47, %v3942_v7  ;;  %v5698_v57 = vld [vmem:[%s10729_s9 + $0x190] sm:$0xff] }
 0x324   :  { %5767 = vmatpush.msra.mxu2 %v5684_v51  ;;  %5782 = vmatpush.msra.mxu3 %v5705_v36 }
 0x325   :  { %v5459_v45 = vadd.f32 %v5458_v48, %v5446_v12 }
 0x326   :  { %5768 = vmatpush.msra.mxu2 %v5683_v59  ;;  %5783 = vmatpush.msra.mxu3 %v5704_v3 }
 0x328   :  { %5769 = vmatpush.msra.mxu2 %v5682_v1  ;;  %5784 = vmatpush.msra.mxu3 %v5703_v15 }
 0x32a   :  { %v5447_v52 = vpop.f32.mrf.mxu0  ;;  %v5460_v53 = vpop.f32.mrf.mxu1  ;;  %5770 = vmatpush.msra.mxu2 %v5681_v4  ;;  %5785 = vmatpush.msra.mxu3 %v5702_v39 }
 0x32c   :  { %5771 = vmatpush.msra.mxu2 %v5680_v5  ;;  %5786 = vmatpush.msra.mxu3 %v5701_v40  ;;  %v9011_v5 = vld [vmem:[#allocation2] ss:$0 sm:$0xff] }
 0x32d   :  { %v5471_v54 = vpop.f32.mrf.mxu2  ;;  %v5484_v0 = vpop.f32.mrf.mxu3 }
 0x32e   :  { %v5472_v14 = vadd.f32 %v5471_v54, %v5459_v45  ;;  %5787 = vmatpush.msra.mxu3 %v5700_v41 }
 0x330   :  { %v5485_v16 = vadd.f32 %v5484_v0, %v5472_v14  ;;  %5788 = vmatpush.msra.mxu3 %v5699_v6 }
 0x332   :  { %5789 = vmatpush.msra.mxu3 %v5698_v57 }
 0x334   :  { %5790 = vmatpush.msra.mxu3 %v5697_v24 }
 0x335   :  { %v5473_v60 = vpop.f32.mrf.mxu2  ;;  %v5486_v61 = vpop.f32.mrf.mxu3 }
 0x336   :  { %5791 = vmatpush.msra.mxu3 %v5696_v62 }
 0x342   :  { %v5497_v20 = vpop.f32.mrf.mxu0  ;;  %v5510_v13 = vpop.f32.mrf.mxu1 }
 0x343   :  { %v5498_v58 = vadd.f32 %v5497_v20, %v5485_v16 }
 0x345   :  { %v5511_v19 = vadd.f32 %v5510_v13, %v5498_v58 }
 0x34a   :  { %v5499_v17 = vpop.f32.mrf.mxu0  ;;  %v5512_v18 = vpop.f32.mrf.mxu1 }
 0x34d   :  { %v5523_v21 = vpop.f32.mrf.mxu2  ;;  %v5536_v22 = vpop.f32.mrf.mxu3 }
 0x34e   :  { %v5524_v26 = vadd.f32 %v5523_v21, %v5511_v19 }
 0x350   :  { %v5537_v38 = vadd.f32 %v5536_v22, %v5524_v26 }
 0x352   :  { %v5646_v27 = vmax.f32 %v5537_v38, 0.0 }
 0x354   :  { %5772 = vmatmul.f32.vlgmr.msra.gmra.mxu2 %v5646_v27 }
 0x355   :  { %v5525_v33 = vpop.f32.mrf.mxu2  ;;  %v5538_v34 = vpop.f32.mrf.mxu3 }
 0x362   :  { %v5549_v10 = vpop.f32.mrf.mxu0  ;;  %v5562_v37 = vpop.f32.mrf.mxu1 }
 0x363   :  { %v5550_v55 = vadd.f32 %v5549_v10, %v3943_v29 }
 0x365   :  { %v5563_v32 = vadd.f32 %v5562_v37, %v5550_v55 }
 0x36a   :  { %v5551_v42 = vpop.f32.mrf.mxu0  ;;  %v5564_v43 = vpop.f32.mrf.mxu1 }
 0x36d   :  { %v5575_v44 = vpop.f32.mrf.mxu2  ;;  %v5588_v46 = vpop.f32.mrf.mxu3 }
 0x36e   :  { %v5576_v48 = vadd.f32 %v5575_v44, %v5563_v32 }
 0x370   :  { %v5589_v49 = vadd.f32 %v5588_v46, %v5576_v48 }
 0x375   :  { %v5577_v63 = vpop.f32.mrf.mxu2  ;;  %v5590_v2 = vpop.f32.mrf.mxu3 }
 0x382   :  { %v5601_v56 = vpop.f32.mrf.mxu0  ;;  %v5614_v47 = vpop.f32.mrf.mxu1 }
 0x383   :  { %v5602_v50 = vadd.f32 %v5601_v56, %v5589_v49 }
 0x385   :  { %v5615_v51 = vadd.f32 %v5614_v47, %v5602_v50 }
 0x38a   :  { %v5603_v28 = vpop.f32.mrf.mxu0  ;;  %v5616_v30 = vpop.f32.mrf.mxu1 }
 0x38e   :  { %v5627_v52 = vpop.f32.mrf.mxu2  ;;  %v5640_v53 = vpop.f32.mrf.mxu3 }
 0x38f   :  { %v5628_v59 = vadd.f32 %v5627_v52, %v5615_v51 }
 0x391   :  { %v5641_v54 = vadd.f32 %v5640_v53, %v5628_v59 }
 0x393   :  { %v5647_v0 = vmax.f32 %v5641_v54, 0.0 }
 0x395   :  { %5792 = vmatmul.f32.vlgmr.msra.gmra.mxu3 %v5647_v0 }
 0x396   :  { %v5629_v1 = vpop.f32.mrf.mxu2  ;;  %v5642_v4 = vpop.f32.mrf.mxu3 }
 0x3a0   :  { %v5733_v8 = vpop.f32.mrf.mxu0  ;;  %v5753_v60 = vpop.f32.mrf.mxu1 }
 0x3a1   :  { %v5734_v7 = vadd.f32 %v9011_v5, %v5733_v8 }
 0x3a3   :  { %v5754_v12 = vadd.f32 %v5753_v60, %v5734_v7 }
 0x3d7   :  { %v5773_v61 = vpop.f32.mrf.mxu2 }
 0x3d8   :  { %v5774_v45 = vadd.f32 %v5773_v61, %v5754_v12 }
 0x418   :  { %v5793_v20 = vpop.f32.mrf.mxu3 }
 0x419   :  { %v5794_v13 = vadd.f32 %v5793_v20, %v5774_v45 }
 0x41b   :  { %5797 = vst.msk [vmem:[%s10731_s11] sm:$0x3] %vm5796_vm0, %v5794_v13 }
 0x41c   :  { %5802 = vsyncpa [#allocation4], 1 }
 0x41d   :  { %5803 = vsyncpa [#allocation6], 1 }

</bundles_post_ra>
